<compile_context>
chip_gen: v5e
topology: v5e:2x2
jax: 0.10.0
libtpu: 0.0.40
codegen_flags: <defaults>
</compile_context>

<pallas_src>
import functools

import jax
import jax.numpy as jnp
import numpy as np
from jax import lax
from jax.experimental import pallas as pl
from jax.experimental.pallas import tpu as pltpu

LN_EPS = 1e-6
_INV_SQRT2 = 0.7071067811865475
_LANE = 128
_SUBLANE = 8


# --------------------------------------------------------------------------
# In-kernel math helpers
# --------------------------------------------------------------------------
def _gelu(x, approximate=False):
    if approximate:
        # tanh approximation -> transcendental rides the EUP slot.
        return jax.nn.gelu(x, approximate=True)
    # PyTorch F.gelu default = exact erf formulation.
    return 0.5 * x * (1.0 + lax.erf(x * _INV_SQRT2))


def _layernorm_gelu(h, ln_w, ln_b, approx_gelu):
    """channels_last LayerNorm (biased var, eps inside rsqrt) + GELU, in f32."""
    inv_d = 1.0 / h.shape[-1]
    u = jnp.sum(h, axis=-1, keepdims=True) * inv_d
    e2 = jnp.sum(h * h, axis=-1, keepdims=True) * inv_d
    var = jnp.maximum(e2 - u * u, 0.0)          # one-pass variance
    hn = (h - u) * lax.rsqrt(var + LN_EPS)
    hn = ln_w * hn + ln_b
    return _gelu(hn, approx_gelu)


# --------------------------------------------------------------------------
# Kernels
# --------------------------------------------------------------------------
def _fclayer_kernel(x_ref, w_ref, b_ref, lnw_ref, lnb_ref, o_ref, *, approx_gelu):
    """Whole contraction dim resident: one MXU matmul + fused LN/GELU epilogue."""
    h = jnp.dot(x_ref[...], w_ref[...], preferred_element_type=jnp.float32)
    h = h + b_ref[...]
    y = _layernorm_gelu(h, lnw_ref[...], lnb_ref[...], approx_gelu)
    o_ref[...] = y.astype(o_ref.dtype)


def _fclayer_kernel_ktiled(x_ref, w_ref, b_ref, lnw_ref, lnb_ref, o_ref, acc_ref,
                           *, approx_gelu):
    """K-streamed variant: accumulate (tm, Dout) in f32 VMEM, epilogue on last k."""
    k = pl.program_id(1)

    @pl.when(k == 0)
    def _():
        acc_ref[...] = jnp.zeros_like(acc_ref)

    acc_ref[...] += jnp.dot(x_ref[...], w_ref[...],
                            preferred_element_type=jnp.float32)

    @pl.when(k == pl.num_programs(1) - 1)
    def _():
        h = acc_ref[...] + b_ref[...]
        y = _layernorm_gelu(h, lnw_ref[...], lnb_ref[...], approx_gelu)
        o_ref[...] = y.astype(o_ref.dtype)


# --------------------------------------------------------------------------
# Generation-aware tiling policy
# --------------------------------------------------------------------------
def _tpu_vmem_and_cores():
    """(vmem_capacity_bytes, num_tensorcores) with conservative fallbacks."""
    vmem = 64 << 20          # conservative default (v7x per-TC VMEM)
    cores = 1                # v5e / v6e have one TensorCore
    try:
        info = pltpu.get_tpu_info()
        vmem = int(getattr(info, "vmem_capacity_bytes", vmem))
        for attr in ("num_cores", "num_tensorcores", "core_count", "tensor_cores"):
            c = getattr(info, attr, None)
            if c:
                cores = int(c)
                break
    except Exception:
        pass
    return vmem, cores


def _round_up(v, m):
    return -(-v // m) * m


def _pick_row_tile(n_rows, row_cap, cores):
    """Largest sublane-aligned row tile <= row_cap; on multi-TC chips make sure
    there are at least `cores` parallel grid steps."""
    row_cap = max(_SUBLANE, min(int(row_cap), 4096))
    row_cap = (row_cap // _SUBLANE) * _SUBLANE
    padded = _round_up(n_rows, _SUBLANE)
    if padded <= row_cap:
        if cores >= 2 and padded >= 2 * _SUBLANE:
            return _round_up(_round_up(padded, cores) // cores, _SUBLANE)
        return padded                      # single-TC: biggest tile that fits
    return row_cap


# --------------------------------------------------------------------------
# pallas_call wrapper
# --------------------------------------------------------------------------
@functools.partial(jax.jit,
                   static_argnames=("row_tile", "k_tile", "vmem_limit", "approx_gelu"))
def _fclayer_2d(x, w, b, ln_w, ln_b, *, row_tile, k_tile, vmem_limit, approx_gelu):
    n, d_in = x.shape
    d_out = w.shape[1]
    assert n % row_tile == 0

    flops = 2 * n * d_in * d_out + 12 * n * d_out
    transcendentals = n * d_out
    bytes_accessed = 4 * (n * d_in + n * d_out + d_in * d_out + 4 * d_out)
    cost = pl.CostEstimate(flops=flops, transcendentals=transcendentals,
                           bytes_accessed=bytes_accessed)

    if k_tile is None:
        kernel = functools.partial(_fclayer_kernel, approx_gelu=approx_gelu)
        grid = (n // row_tile,)
        in_specs = [
            pl.BlockSpec((row_tile, d_in), lambda i: (i, 0)),   # x tile
            pl.BlockSpec((d_in, d_out), lambda i: (0, 0)),      # W (resident)
            pl.BlockSpec((1, d_out), lambda i: (0, 0)),         # bias
            pl.BlockSpec((1, d_out), lambda i: (0, 0)),         # LN weight
            pl.BlockSpec((1, d_out), lambda i: (0, 0)),         # LN bias
        ]
        out_specs = pl.BlockSpec((row_tile, d_out), lambda i: (i, 0))
        scratch = ()
        semantics = ("parallel",)
    else:
        assert d_in % k_tile == 0
        kernel = functools.partial(_fclayer_kernel_ktiled, approx_gelu=approx_gelu)
        grid = (n // row_tile, d_in // k_tile)                  # K last, "arbitrary"
        in_specs = [
            pl.BlockSpec((row_tile, k_tile), lambda i, k: (i, k)),   # x tile
            pl.BlockSpec((k_tile, d_out), lambda i, k: (k, 0)),      # W stream
            pl.BlockSpec((1, d_out), lambda i, k: (0, 0)),
            pl.BlockSpec((1, d_out), lambda i, k: (0, 0)),
            pl.BlockSpec((1, d_out), lambda i, k: (0, 0)),
        ]
        out_specs = pl.BlockSpec((row_tile, d_out), lambda i, k: (i, 0))
        scratch = (pltpu.VMEM((row_tile, d_out), jnp.float32),)
        semantics = ("parallel", "arbitrary")

    return pl.pallas_call(
        kernel,
        out_shape=jax.ShapeDtypeStruct((n, d_out), x.dtype),
        grid_spec=pltpu.PrefetchScalarGridSpec(
            num_scalar_prefetch=0,
            grid=grid,
            in_specs=in_specs,
            out_specs=out_specs,
            scratch_shapes=scratch),
        compiler_params=pltpu.CompilerParams(
            dimension_semantics=semantics,
            vmem_limit_bytes=vmem_limit),
        cost_estimate=cost,
    )(x, w, b, ln_w, ln_b)


def fclayer_forward(x, w, b, ln_w, ln_b, *, approx_gelu=False, force_k_tile=None):
    """FCLayer forward: gelu(LayerNorm(x @ w + b)).  x has shape (..., in_feature);
    w is the nn.Linear weight already transposed to (in_feature, out_feature)."""
    d_in = x.shape[-1]
    d_out = w.shape[1]
    lead = x.shape[:-1]
    n_rows = int(np.prod(lead)) if lead else 1
    x2 = x.reshape(n_rows, d_in)
    b2 = b.reshape(1, d_out).astype(jnp.float32)
    lnw2 = ln_w.reshape(1, d_out).astype(jnp.float32)
    lnb2 = ln_b.reshape(1, d_out).astype(jnp.float32)

    itemsize = 4                                   # f32 path
    vmem, cores = _tpu_vmem_and_cores()
    budget = int(vmem * 0.45)                      # leave headroom for compiler scratch

    # --- decide whether W stays resident or is streamed along K ---------------
    if force_k_tile is not None:
        k_tile = int(force_k_tile)
    else:
        k_tile = None
        if 2 * d_in * d_out * itemsize > budget // 3:     # resident W too large
            k_tile = 256 if 8 * 256 * d_out * itemsize < budget // 4 else _LANE

    d_in_pad = d_in
    if k_tile is not None:
        d_in_pad = _round_up(d_in, k_tile)
        if d_in_pad != d_in:                       # zero-pad contraction dim
            x2 = jnp.pad(x2, ((0, 0), (0, d_in_pad - d_in)))
            w = jnp.pad(w, ((0, d_in_pad - d_in), (0, 0)))

    # --- VMEM-driven row tile --------------------------------------------------
    d_in_res = k_tile if k_tile is not None else d_in_pad
    fixed = 2 * d_in_res * d_out * itemsize + 6 * d_out * itemsize   # W bufs + params
    per_row = 2 * (d_in_res + d_out) * itemsize + (4 * d_out if k_tile else 0)
    row_cap = max(_SUBLANE, (budget - fixed) // max(per_row, 1))
    row_tile = _pick_row_tile(n_rows, row_cap, cores)

    n_pad = _round_up(n_rows, row_tile)
    if n_pad != n_rows:                            # zero rows, sliced off below
        x2 = jnp.pad(x2, ((0, n_pad - n_rows), (0, 0)))

    footprint = fixed + row_tile * per_row
    vmem_limit = int(min(0.9 * vmem, max(footprint + (8 << 20), 32 << 20)))

    out2 = _fclayer_2d(x2, w, b2, lnw2, lnb2,
                       row_tile=row_tile, k_tile=k_tile,
                       vmem_limit=vmem_limit, approx_gelu=approx_gelu)
    if n_pad != n_rows:
        out2 = out2[:n_rows]
    return out2.reshape(*lead, d_out)


# --------------------------------------------------------------------------
# Pure-JAX reference (matches PyTorch FCLayer numerics)
# --------------------------------------------------------------------------
def reference_forward(x, w, b, ln_w, ln_b):
    h = x @ w + b
    u = jnp.mean(h, axis=-1, keepdims=True)
    s = jnp.mean((h - u) ** 2, axis=-1, keepdims=True)
    hn = (h - u) * lax.rsqrt(s + LN_EPS)
    hn = ln_w * hn + ln_b
    return 0.5 * hn * (1.0 + lax.erf(hn * _INV_SQRT2))


if __name__ == "__main__":
    key = jax.random.PRNGKey(0)
    k1, k2 = jax.random.split(key)

    # --- Case 1: small FCLayer, weight fully resident -------------------------
    in_feature, out_feature = 32, 128       # lane-dense feature width
    batch, seq = 4, 128                     # 512 rows
    kx, kw, kb = jax.random.split(k1, 3)
    x = jax.random.normal(kx, (batch, seq, in_feature), dtype=jnp.float32)
    bound = 1.0 / np.sqrt(in_feature)       # PyTorch nn.Linear init range
    w = jax.random.uniform(kw, (in_feature, out_feature), jnp.float32, -bound, bound)
    b = jax.random.uniform(kb, (out_feature,), jnp.float32, -bound, bound)
    ln_w = jnp.ones((out_feature,), jnp.float32)   # LayerNorm init: ones / zeros
    ln_b = jnp.zeros((out_feature,), jnp.float32)

    out = jax.block_until_ready(fclayer_forward(x, w, b, ln_w, ln_b))
    ref = reference_forward(x, w, b, ln_w, ln_b)
    np.testing.assert_allclose(np.asarray(out), np.asarray(ref), rtol=2e-5, atol=2e-5)

    # --- Case 2: larger contraction dim, exercises the K-streaming path -------
    d_in2, d_out2 = 512, 256
    kx2, kw2, kb2 = jax.random.split(k2, 3)
    x2 = jax.random.normal(kx2, (2, 128, d_in2), dtype=jnp.float32)
    bound2 = 1.0 / np.sqrt(d_in2)
    w2 = jax.random.uniform(kw2, (d_in2, d_out2), jnp.float32, -bound2, bound2)
    b2 = jax.random.uniform(kb2, (d_out2,), jnp.float32, -bound2, bound2)
    lw2 = jnp.ones((d_out2,), jnp.float32)
    lb2 = jnp.zeros((d_out2,), jnp.float32)

    y2 = jax.block_until_ready(
        fclayer_forward(x2, w2, b2, lw2, lb2, force_k_tile=128))
    r2 = reference_forward(x2, w2, b2, lw2, lb2)
    np.testing.assert_allclose(np.asarray(y2), np.asarray(r2), rtol=2e-5, atol=2e-5)

    print("KERNEL_OK")
</pallas_src>

<mosaic_0001>
module attributes {stable_mosaic.version = 11 : i64} {
  func.func @_fclayer_kernel(%arg0: i32, %arg1: memref<512x32xf32, #tpu.memory_space<vmem>>, %arg2: memref<32x128xf32, #tpu.memory_space<vmem>>, %arg3: memref<1x128xf32, #tpu.memory_space<vmem>>, %arg4: memref<1x128xf32, #tpu.memory_space<vmem>>, %arg5: memref<1x128xf32, #tpu.memory_space<vmem>>, %arg6: memref<512x128xf32, #tpu.memory_space<vmem>>) attributes {dimension_semantics = [#tpu.dimension_semantics<parallel>], iteration_bounds = array<i64: 1>, scalar_prefetch = 0 : i64, scratch_operands = 0 : i64, tpu.core_type = #tpu.core_type<tc>, window_params = [{transform_indices = @transform_0, window_bounds = array<i64: 512, 32>}, {pipeline_mode = #tpu.pipeline_mode<synchronous>, transform_indices = @transform_1, window_bounds = array<i64: 32, 128>}, {pipeline_mode = #tpu.pipeline_mode<synchronous>, transform_indices = @transform_2, window_bounds = array<i64: 1, 128>}, {pipeline_mode = #tpu.pipeline_mode<synchronous>, transform_indices = @transform_3, window_bounds = array<i64: 1, 128>}, {pipeline_mode = #tpu.pipeline_mode<synchronous>, transform_indices = @transform_4, window_bounds = array<i64: 1, 128>}, {transform_indices = @transform_5, window_bounds = array<i64: 512, 128>}]} {
    %c0 = arith.constant 0 : index
    %c0_0 = arith.constant 0 : index
    %0 = vector.load %arg1[%c0, %c0_0] : memref<512x32xf32, #tpu.memory_space<vmem>>, vector<512x32xf32>
    %c0_1 = arith.constant 0 : index
    %c0_2 = arith.constant 0 : index
    %1 = vector.load %arg2[%c0_1, %c0_2] : memref<32x128xf32, #tpu.memory_space<vmem>>, vector<32x128xf32>
    %cst = arith.constant dense<0.000000e+00> : vector<512x128xf32>
    %2 = tpu.matmul %0, %1, %cst {dimension_numbers = #tpu.dot_dimension_numbers<[1], [0], [0], [1], [0, 0, 1, 1], [], []>} : vector<512x32xf32>, vector<32x128xf32>, vector<512x128xf32> -> vector<512x128xf32>
    %c0_3 = arith.constant 0 : index
    %c0_4 = arith.constant 0 : index
    %3 = vector.load %arg3[%c0_3, %c0_4] : memref<1x128xf32, #tpu.memory_space<vmem>>, vector<1x128xf32>
    %4 = vector.broadcast %3 : vector<1x128xf32> to vector<512x128xf32>
    %5 = arith.addf %2, %4 : vector<512x128xf32>
    %c0_5 = arith.constant 0 : index
    %c0_6 = arith.constant 0 : index
    %6 = vector.load %arg4[%c0_5, %c0_6] : memref<1x128xf32, #tpu.memory_space<vmem>>, vector<1x128xf32>
    %c0_7 = arith.constant 0 : index
    %c0_8 = arith.constant 0 : index
    %7 = vector.load %arg5[%c0_7, %c0_8] : memref<1x128xf32, #tpu.memory_space<vmem>>, vector<1x128xf32>
    %cst_9 = arith.constant dense<0.000000e+00> : vector<512xf32>
    %8 = vector.multi_reduction <add>, %5, %cst_9 [1] : vector<512x128xf32> to vector<512xf32>
    %9 = vector.shape_cast %8 : vector<512xf32> to vector<512x1xf32>
    %cst_10 = arith.constant 7.812500e-03 : f32
    %10 = vector.broadcast %cst_10 : f32 to vector<512x1xf32>
    %11 = arith.mulf %9, %10 : vector<512x1xf32>
    %12 = arith.mulf %5, %5 : vector<512x128xf32>
    %cst_11 = arith.constant dense<0.000000e+00> : vector<512xf32>
    %13 = vector.multi_reduction <add>, %12, %cst_11 [1] : vector<512x128xf32> to vector<512xf32>
    %14 = vector.shape_cast %13 : vector<512xf32> to vector<512x1xf32>
    %cst_12 = arith.constant 7.812500e-03 : f32
    %15 = vector.broadcast %cst_12 : f32 to vector<512x1xf32>
    %16 = arith.mulf %14, %15 : vector<512x1xf32>
    %17 = arith.mulf %11, %11 : vector<512x1xf32>
    %18 = arith.subf %16, %17 : vector<512x1xf32>
    %cst_13 = arith.constant 0.000000e+00 : f32
    %19 = vector.broadcast %cst_13 : f32 to vector<512x1xf32>
    %20 = arith.maximumf %18, %19 : vector<512x1xf32>
    %21 = vector.broadcast %11 : vector<512x1xf32> to vector<512x128xf32>
    %22 = arith.subf %5, %21 : vector<512x128xf32>
    %cst_14 = arith.constant 9.99999997E-7 : f32
    %23 = vector.broadcast %cst_14 : f32 to vector<512x1xf32>
    %24 = arith.addf %20, %23 : vector<512x1xf32>
    %25 = math.rsqrt %24 : vector<512x1xf32>
    %26 = vector.broadcast %25 : vector<512x1xf32> to vector<512x128xf32>
    %27 = arith.mulf %22, %26 : vector<512x128xf32>
    %28 = vector.broadcast %6 : vector<1x128xf32> to vector<512x128xf32>
    %29 = arith.mulf %28, %27 : vector<512x128xf32>
    %30 = vector.broadcast %7 : vector<1x128xf32> to vector<512x128xf32>
    %31 = arith.addf %29, %30 : vector<512x128xf32>
    %cst_15 = arith.constant 5.000000e-01 : f32
    %32 = vector.broadcast %cst_15 : f32 to vector<512x128xf32>
    %33 = arith.mulf %32, %31 : vector<512x128xf32>
    %cst_16 = arith.constant 0.707106769 : f32
    %34 = vector.broadcast %cst_16 : f32 to vector<512x128xf32>
    %35 = arith.mulf %31, %34 : vector<512x128xf32>
    %36 = math.erf %35 : vector<512x128xf32>
    %cst_17 = arith.constant 1.000000e+00 : f32
    %37 = vector.broadcast %cst_17 : f32 to vector<512x128xf32>
    %38 = arith.addf %37, %36 : vector<512x128xf32>
    %39 = arith.mulf %33, %38 : vector<512x128xf32>
    %c0_18 = arith.constant 0 : index
    %c0_19 = arith.constant 0 : index
    %40 = vector.load %arg6[%c0_18, %c0_19] : memref<512x128xf32, #tpu.memory_space<vmem>>, vector<512x128xf32>
    tpu.vector_store %arg6[%c0_18, %c0_19], %39 {strides = array<i32>} : memref<512x128xf32, #tpu.memory_space<vmem>>, vector<512x128xf32>,
    return
  }
  func.func @transform_0(%arg0: i32) -> (i32, i32) {
    %c0_i32 = arith.constant 0 : i32
    %c0_i32_0 = arith.constant 0 : i32
    return %arg0, %c0_i32 : i32, i32
  }
  func.func @transform_1(%arg0: i32) -> (i32, i32) {
    %c0_i32 = arith.constant 0 : i32
    %c0_i32_0 = arith.constant 0 : i32
    %c0_i32_1 = arith.constant 0 : i32
    return %c0_i32, %c0_i32_0 : i32, i32
  }
  func.func @transform_2(%arg0: i32) -> (i32, i32) {
    %c0_i32 = arith.constant 0 : i32
    %c0_i32_0 = arith.constant 0 : i32
    %c0_i32_1 = arith.constant 0 : i32
    return %c0_i32, %c0_i32_0 : i32, i32
  }
  func.func @transform_3(%arg0: i32) -> (i32, i32) {
    %c0_i32 = arith.constant 0 : i32
    %c0_i32_0 = arith.constant 0 : i32
    %c0_i32_1 = arith.constant 0 : i32
    return %c0_i32, %c0_i32_0 : i32, i32
  }
  func.func @transform_4(%arg0: i32) -> (i32, i32) {
    %c0_i32 = arith.constant 0 : i32
    %c0_i32_0 = arith.constant 0 : i32
    %c0_i32_1 = arith.constant 0 : i32
    return %c0_i32, %c0_i32_0 : i32, i32
  }
  func.func @transform_5(%arg0: i32) -> (i32, i32) {
    %c0_i32 = arith.constant 0 : i32
    %c0_i32_0 = arith.constant 0 : i32
    return %arg0, %c0_i32 : i32, i32
  }
}

</mosaic_0001>

<bundles_post_ra>
// kernel: _fclayer_2d.1
= control target key start
LH: loop header
LB: loop body
LE: loop exit
PB: predicated region body
PF: predicated region fallthrough
CT: control target
= control target key end

     0   :  { %vm93_vm0 = vcmask 261120   ;;  %s9825_s0 = inlined_call_operand.vmem [shape: f32[512,32], index: 0, kind: input, shape index: {}]   ;;  %s9826_s1 = inlined_call_operand.vmem [shape: f32[32,128], index: 1, kind: input, shape index: {}]   ;;  %s9827_s2 = inlined_call_operand.vmem [shape: f32[1,128], index: 2, kind: input, shape index: {}]   ;;  %s9828_s3 = inlined_call_operand.vmem [shape: f32[1,128], index: 3, kind: input, shape index: {}]   ;;  %s9829_s4 = inlined_call_operand.vmem [shape: f32[1,128], index: 4, kind: input, shape index: {}]   ;;  %s9830_s5 = inlined_call_operand.hbm [shape: f32[512,128], index: 5, kind: output, shape index: {}]  }
   0x1   :  { %v88_v0 = vld [vmem:[%s9826_s1 + $0x18] sm:$0xff]  ;;  %v87_v1 = vld [vmem:[%s9826_s1 + $0x10] sm:$0xff]  ;;  %v86_v2 = vld [vmem:[%s9826_s1 + $0x8] sm:$0xff] }
   0x2   :  { %298 = vmatpush.msra.mxu0 %v88_v0  ;;  %5129 = vmatpush.msra.mxu1 %v88_v0  ;;  %v85_v3 = vld [vmem:[%s9826_s1] sm:$0xff] }
   0x3   :  { %5131 = vmatpush.msra.mxu3 %v88_v0  ;;  %5130 = vmatpush.msra.mxu2 %v88_v0  ;;  %v21_v4 = vld [vmem:[%s9825_s0] sm:$0xff] }
   0x4   :  { %299 = vmatpush.msra.mxu0 %v87_v1  ;;  %5132 = vmatpush.msra.mxu1 %v87_v1  ;;  %v37_v5 = vld [vmem:[%s9825_s0 + $0x80] sm:$0xff] }
   0x5   :  { %5134 = vmatpush.msra.mxu3 %v87_v1  ;;  %5133 = vmatpush.msra.mxu2 %v87_v1  ;;  %v69_v6 = vld [vmem:[%s9825_s0 + $0x180] sm:$0xff] }
   0x6   :  { %300 = vmatpush.msra.mxu0 %v86_v2  ;;  %5135 = vmatpush.msra.mxu1 %v86_v2  ;;  %v53_v7 = vld [vmem:[%s9825_s0 + $0x100] sm:$0xff] }
   0x7   :  { %5137 = vmatpush.msra.mxu3 %v86_v2  ;;  %5136 = vmatpush.msra.mxu2 %v86_v2 }
   0x8   :  { %301 = vmatpush.msra.mxu0 %v85_v3  ;;  %5138 = vmatpush.msra.mxu1 %v85_v3 }
   0x9   :  { %5001 = vmatmul.msk.f32.vlgmr.msra.gmra.mxu0 %vm93_vm0, %v21_v4  ;;  %5017 = vmatmul.msk.f32.vlgmr.msra.gmra.mxu1 %vm93_vm0, %v37_v5 }
   0xa   :  { %10 = vsyncpa [#allocation3], 0  ;;  %5140 = vmatpush.msra.mxu3 %v85_v3  ;;  %5139 = vmatpush.msra.mxu2 %v85_v3  ;;  %v22_v8 = vld [vmem:[%s9825_s0 + $0x8] sm:$0xff]  ;;  %v23_v12 = vld [vmem:[%s9825_s0 + $0x10] sm:$0xff]  ;;  %s4989_s9 = sshll.u32 %s9830_s5, 4  ;;  %s5446_s10 = smov 128   ;;  %s4990_s9 = int_to_ptr.hbm [resolvable:$true] %s4989_s9 }
   0xb   :  { %5049 = vmatmul.msk.f32.vlgmr.msra.gmra.mxu3 %vm93_vm0, %v69_v6  ;;  %5033 = vmatmul.msk.f32.vlgmr.msra.gmra.mxu2 %vm93_vm0, %v53_v7  ;;  %v38_v9 = vld [vmem:[%s9825_s0 + $0x88] sm:$0xff]  ;;  %v39_v13 = vld [vmem:[%s9825_s0 + $0x90] sm:$0xff]  ;;  %v40_v16 = vld [vmem:[%s9825_s0 + $0x98] sm:$0xff] }
   0xc   :  { %v70_v10 = vld [vmem:[%s9825_s0 + $0x188] sm:$0xff]  ;;  %v71_v14 = vld [vmem:[%s9825_s0 + $0x190] sm:$0xff]  ;;  %v24_v17 = vld [vmem:[%s9825_s0 + $0x18] sm:$0xff] }
   0xd   :  { %v54_v11 = vld [vmem:[%s9825_s0 + $0x108] sm:$0xff]  ;;  %v55_v15 = vld [vmem:[%s9825_s0 + $0x110] sm:$0xff]  ;;  %v56_v18 = vld [vmem:[%s9825_s0 + $0x118] sm:$0xff] }
   0xe   :  { %v72_v19 = vld [vmem:[%s9825_s0 + $0x198] sm:$0xff]  ;;  %v25_v20 = vld [vmem:[%s9825_s0 + $0x20] sm:$0xff]  ;;  %v42_v24 = vld [vmem:[%s9825_s0 + $0xa8] sm:$0xff] }
   0xf   :  { %v41_v21 = vld [vmem:[%s9825_s0 + $0xa0] sm:$0xff]  ;;  %v26_v25 = vld [vmem:[%s9825_s0 + $0x28] sm:$0xff]  ;;  %v27_v28 = vld [vmem:[%s9825_s0 + $0x30] sm:$0xff] }
  0x10   :  { %v57_v22 = vld [vmem:[%s9825_s0 + $0x120] sm:$0xff]  ;;  %v58_v26 = vld [vmem:[%s9825_s0 + $0x128] sm:$0xff]  ;;  %v43_v29 = vld [vmem:[%s9825_s0 + $0xb0] sm:$0xff] }
  0x11   :  { %5002 = vmatmul.msk.f32.gmra.mxu0 %vm93_vm0, %v22_v8  ;;  %5018 = vmatmul.msk.f32.gmra.mxu1 %vm93_vm0, %v38_v9  ;;  %v73_v23 = vld [vmem:[%s9825_s0 + $0x1a0] sm:$0xff]  ;;  %v74_v27 = vld [vmem:[%s9825_s0 + $0x1a8] sm:$0xff]  ;;  %v75_v30 = vld [vmem:[%s9825_s0 + $0x1b0] sm:$0xff] }
  0x12   :  { %v59_v31 = vld [vmem:[%s9825_s0 + $0x130] sm:$0xff]  ;;  %v44_v32 = vld [vmem:[%s9825_s0 + $0xb8] sm:$0xff]  ;;  %v45_v36 = vld [vmem:[%s9825_s0 + $0xc0] sm:$0xff] }
  0x13   :  { %5050 = vmatmul.msk.f32.gmra.mxu3 %vm93_vm0, %v70_v10  ;;  %5034 = vmatmul.msk.f32.gmra.mxu2 %vm93_vm0, %v54_v11  ;;  %v28_v33 = vld [vmem:[%s9825_s0 + $0x38] sm:$0xff]  ;;  %v61_v37 = vld [vmem:[%s9825_s0 + $0x140] sm:$0xff]  ;;  %v30_v40 = vld [vmem:[%s9825_s0 + $0x48] sm:$0xff] }
  0x14   :  { %v60_v34 = vld [vmem:[%s9825_s0 + $0x138] sm:$0xff]  ;;  %v29_v38 = vld [vmem:[%s9825_s0 + $0x40] sm:$0xff]  ;;  %v46_v41 = vld [vmem:[%s9825_s0 + $0xc8] sm:$0xff] }
  0x15   :  { %v76_v35 = vld [vmem:[%s9825_s0 + $0x1b8] sm:$0xff]  ;;  %v77_v39 = vld [vmem:[%s9825_s0 + $0x1c0] sm:$0xff]  ;;  %v78_v42 = vld [vmem:[%s9825_s0 + $0x1c8] sm:$0xff] }
  0x16   :  { %v5649_v43 = vld [vmem:[%s9827_s2] ss:$0 sm:$0xff]  ;;  %v62_v44 = vld [vmem:[%s9825_s0 + $0x148] sm:$0xff]  ;;  %v47_v50 = vld [vmem:[%s9825_s0 + $0xd0] sm:$0xff] }
  0x17   :  { %v31_v51 = vld [vmem:[%s9825_s0 + $0x50] sm:$0xff]  ;;  %v48_v2 = vld [vmem:[%s9825_s0 + $0xd8] sm:$0xff] }
  0x18   :  { %v63_v58 = vld [vmem:[%s9825_s0 + $0x150] sm:$0xff]  ;;  %v32_v8 = vld [vmem:[%s9825_s0 + $0x58] sm:$0xff] }
  0x19   :  { %5003 = vmatmul.msk.f32.gmra.mxu0 %vm93_vm0, %v23_v12  ;;  %5019 = vmatmul.msk.f32.gmra.mxu1 %vm93_vm0, %v39_v13  ;;  %v79_v59 = vld [vmem:[%s9825_s0 + $0x1d0] sm:$0xff]  ;;  %v64_v9 = vld [vmem:[%s9825_s0 + $0x158] sm:$0xff] }
  0x1a   :  { %v80_v10 = vld [vmem:[%s9825_s0 + $0x1d8] sm:$0xff] }
  0x1b   :  { %5051 = vmatmul.msk.f32.gmra.mxu3 %vm93_vm0, %v71_v14  ;;  %5035 = vmatmul.msk.f32.gmra.mxu2 %vm93_vm0, %v55_v15 }
  0x21   :  { %5020 = vmatmul.msk.f32.gmra.mxu1 %vm93_vm0, %v40_v16  ;;  %5004 = vmatmul.msk.f32.gmra.mxu0 %vm93_vm0, %v24_v17 }
  0x23   :  { %5036 = vmatmul.msk.f32.gmra.mxu2 %vm93_vm0, %v56_v18  ;;  %5052 = vmatmul.msk.f32.gmra.mxu3 %vm93_vm0, %v72_v19  ;;  %v33_v19 = vld [vmem:[%s9825_s0 + $0x60] sm:$0xff] }
  0x29   :  { %5005 = vmatmul.msk.f32.gmra.mxu0 %vm93_vm0, %v25_v20  ;;  %5021 = vmatmul.msk.f32.gmra.mxu1 %vm93_vm0, %v41_v21  ;;  %v49_v20 = vld [vmem:[%s9825_s0 + $0xe0] sm:$0xff] }
  0x2b   :  { %5037 = vmatmul.msk.f32.gmra.mxu2 %vm93_vm0, %v57_v22  ;;  %5053 = vmatmul.msk.f32.gmra.mxu3 %vm93_vm0, %v73_v23 }
  0x31   :  { %5022 = vmatmul.msk.f32.gmra.mxu1 %vm93_vm0, %v42_v24  ;;  %5006 = vmatmul.msk.f32.gmra.mxu0 %vm93_vm0, %v26_v25  ;;  %v81_v24 = vld [vmem:[%s9825_s0 + $0x1e0] sm:$0xff] }
  0x33   :  { %5038 = vmatmul.msk.f32.gmra.mxu2 %vm93_vm0, %v58_v26  ;;  %5054 = vmatmul.msk.f32.gmra.mxu3 %vm93_vm0, %v74_v27  ;;  %v65_v26 = vld [vmem:[%s9825_s0 + $0x160] sm:$0xff] }
  0x39   :  { %5007 = vmatmul.msk.f32.gmra.mxu0 %vm93_vm0, %v27_v28  ;;  %5023 = vmatmul.msk.f32.gmra.mxu1 %vm93_vm0, %v43_v29  ;;  %v50_v29 = vld [vmem:[%s9825_s0 + $0xe8] sm:$0xff] }
  0x3b   :  { %5055 = vmatmul.msk.f32.gmra.mxu3 %vm93_vm0, %v75_v30  ;;  %5039 = vmatmul.msk.f32.gmra.mxu2 %vm93_vm0, %v59_v31  ;;  %v34_v30 = vld [vmem:[%s9825_s0 + $0x68] sm:$0xff] }
  0x41   :  { %5024 = vmatmul.msk.f32.gmra.mxu1 %vm93_vm0, %v44_v32  ;;  %5008 = vmatmul.msk.f32.gmra.mxu0 %vm93_vm0, %v28_v33 }
  0x43   :  { %5040 = vmatmul.msk.f32.gmra.mxu2 %vm93_vm0, %v60_v34  ;;  %5056 = vmatmul.msk.f32.gmra.mxu3 %vm93_vm0, %v76_v35  ;;  %v66_v35 = vld [vmem:[%s9825_s0 + $0x168] sm:$0xff] }
  0x49   :  { %5025 = vmatmul.msk.f32.gmra.mxu1 %vm93_vm0, %v45_v36  ;;  %5009 = vmatmul.msk.f32.gmra.mxu0 %vm93_vm0, %v29_v38  ;;  %v82_v36 = vld [vmem:[%s9825_s0 + $0x1e8] sm:$0xff] }
  0x4b   :  { %5041 = vmatmul.msk.f32.gmra.mxu2 %vm93_vm0, %v61_v37  ;;  %5057 = vmatmul.msk.f32.gmra.mxu3 %vm93_vm0, %v77_v39 }
  0x51   :  { %5010 = vmatmul.msk.f32.gmra.mxu0 %vm93_vm0, %v30_v40  ;;  %5026 = vmatmul.msk.f32.gmra.mxu1 %vm93_vm0, %v46_v41 }
  0x53   :  { %5058 = vmatmul.msk.f32.gmra.mxu3 %vm93_vm0, %v78_v42  ;;  %5042 = vmatmul.msk.f32.gmra.mxu2 %vm93_vm0, %v62_v44  ;;  %v51_v44 = vld [vmem:[%s9825_s0 + $0xf0] sm:$0xff] }
  0x59   :  { %5027 = vmatmul.msk.f32.gmra.mxu1 %vm93_vm0, %v47_v50  ;;  %5011 = vmatmul.msk.f32.gmra.mxu0 %vm93_vm0, %v31_v51  ;;  %v67_v50 = vld [vmem:[%s9825_s0 + $0x170] sm:$0xff] }
  0x5b   :  { %5043 = vmatmul.msk.f32.gmra.mxu2 %vm93_vm0, %v63_v58  ;;  %5059 = vmatmul.msk.f32.gmra.mxu3 %vm93_vm0, %v79_v59 }
  0x61   :  { %5028 = vmatmul.msk.f32.gmra.mxu1 %vm93_vm0, %v48_v2  ;;  %5012 = vmatmul.msk.f32.gmra.mxu0 %vm93_vm0, %v32_v8 }
  0x63   :  { %5044 = vmatmul.msk.f32.gmra.mxu2 %vm93_vm0, %v64_v9  ;;  %5060 = vmatmul.msk.f32.gmra.mxu3 %vm93_vm0, %v80_v10  ;;  %v84_v9 = vld [vmem:[%s9825_s0 + $0x1f8] sm:$0xff] }
  0x69   :  { %5013 = vmatmul.msk.f32.gmra.mxu0 %vm93_vm0, %v33_v19  ;;  %5029 = vmatmul.msk.f32.gmra.mxu1 %vm93_vm0, %v49_v20 }
  0x6b   :  { %5061 = vmatmul.msk.f32.gmra.mxu3 %vm93_vm0, %v81_v24  ;;  %5045 = vmatmul.msk.f32.gmra.mxu2 %vm93_vm0, %v65_v26 }
  0x71   :  { %5030 = vmatmul.msk.f32.gmra.mxu1 %vm93_vm0, %v50_v29  ;;  %5014 = vmatmul.msk.f32.gmra.mxu0 %vm93_vm0, %v34_v30 }
  0x73   :  { %5046 = vmatmul.msk.f32.gmra.mxu2 %vm93_vm0, %v66_v35  ;;  %5062 = vmatmul.msk.f32.gmra.mxu3 %vm93_vm0, %v82_v36 }
  0x79   :  { %5031 = vmatmul.msk.f32.gmra.mxu1 %vm93_vm0, %v51_v44 }
  0x7b   :  { %5047 = vmatmul.msk.f32.gmra.mxu2 %vm93_vm0, %v67_v50 }
  0x86   :  { %v303_v45 = vpop.f32.mrf.mxu0  ;;  %v351_v46 = vpop.f32.mrf.mxu1 }
  0x87   :  { %v5656_v47 = vadd.f32 %v5649_v43, %v303_v45  ;;  %v5659_v48 = vadd.f32 %v5649_v43, %v351_v46 }
  0x89   :  { %529 = vadd.xlane.f32.xlu1 %v5659_v48  ;;  %497 = vadd.xlane.f32.xlu0 %v5656_v47  ;;  %v705_v49 = vmul.f32 %v5659_v48, %v5659_v48  ;;  %v689_v56 = vmul.f32 %v5656_v47, %v5656_v47 }
  0x8b   :  { %785 = vadd.xlane.f32.xlu2 %v705_v49  ;;  %v35_v49 = vld [vmem:[%s9825_s0 + $0x70] sm:$0xff] }
  0x8c   :  { %5015 = vmatmul.msk.f32.gmra.mxu0 %vm93_vm0, %v35_v49 }
  0x8e   :  { %v447_v52 = vpop.f32.mrf.mxu3  ;;  %v399_v53 = vpop.f32.mrf.mxu2 }
  0x8f   :  { %v5674_v54 = vadd.f32 %v5649_v43, %v447_v52  ;;  %v5677_v55 = vadd.f32 %v5649_v43, %v399_v53  ;;  %v306_v57 = vpop.f32.mrf.mxu0  ;;  %v354_v60 = vpop.f32.mrf.mxu1  ;;  %v83_v53 = vld [vmem:[%s9825_s0 + $0x1f0] sm:$0xff] }
  0x90   :  { %v5692_v61 = vadd.f32 %v5649_v43, %v306_v57  ;;  %v5698_v0 = vadd.f32 %v5649_v43, %v354_v60  ;;  %5063 = vmatmul.msk.f32.gmra.mxu3 %vm93_vm0, %v83_v53 }
  0x91   :  { %9918 = vst [vmem:[#allocation5_spill] sm:$0xff] %v5674_v54  ;;  %593 = vadd.xlane.f32.xlu0 %v5674_v54  ;;  %753 = vadd.xlane.f32.xlu1 %v689_v56  ;;  %v721_v5 = vmul.f32 %v5677_v55, %v5677_v55 }
  0x92   :  { %v690_v6 = vmul.f32 %v5692_v61, %v5692_v61  ;;  %v706_v15 = vmul.f32 %v5698_v0, %v5698_v0 }
  0x93   :  { %561 = vadd.xlane.f32.xlu2 %v5677_v55 }
  0x96   :  { %v450_v62 = vpop.f32.mrf.mxu3  ;;  %v402_v4 = vpop.f32.mrf.mxu2 }
  0x97   :  { %v5695_v63 = vadd.f32 %v5649_v43, %v450_v62  ;;  %v309_v1 = vpop.f32.mrf.mxu0  ;;  %v5716_v7 = vadd.f32 %v5649_v43, %v402_v4  ;;  %v357_v13 = vpop.f32.mrf.mxu1 }
  0x98   :  { %v5708_v3 = vadd.f32 %v5649_v43, %v309_v1  ;;  %v5738_v17 = vadd.f32 %v5649_v43, %v357_v13  ;;  %5064 = vmatmul.msk.f32.gmra.mxu3 %vm93_vm0, %v84_v9 }
  0x99   :  { %9919 = vst [vmem:[#allocation6_spill] sm:$0xff] %v5695_v63  ;;  %499 = vadd.xlane.f32.xlu0 %v5692_v61  ;;  %595 = vadd.xlane.f32.xlu1 %v5695_v63  ;;  %v722_v12 = vmul.f32 %v5716_v7, %v5716_v7 }
  0x9a   :  { %v707_v21 = vmul.f32 %v5738_v17, %v5738_v17  ;;  %v691_v34 = vmul.f32 %v5708_v3, %v5708_v3 }
  0x9b   :  { %531 = vadd.xlane.f32.xlu2 %v5698_v0 }
  0x9e   :  { %v453_v11 = vpop.f32.mrf.mxu3  ;;  %v405_v16 = vpop.f32.mrf.mxu2 }
  0x9f   :  { %v5733_v14 = vadd.f32 %v5649_v43, %v453_v11  ;;  %v5742_v18 = vadd.f32 %v5649_v43, %v405_v16  ;;  %v360_v23 = vpop.f32.mrf.mxu1  ;;  %v312_v28 = vpop.f32.mrf.mxu0 }
  0xa0   :  { %v5762_v25 = vadd.f32 %v5649_v43, %v360_v23  ;;  %v5781_v32 = vadd.f32 %v5649_v43, %v312_v28 }
  0xa1   :  { %817 = vadd.xlane.f32.xlu0 %v721_v5  ;;  %501 = vadd.xlane.f32.xlu1 %v5708_v3  ;;  %9920 = vst [vmem:[#allocation7_spill] sm:$0xff] %v5733_v14  ;;  %v723_v22 = vmul.f32 %v5742_v18, %v5742_v18  ;;  %v36_v5 = vld [vmem:[%s9825_s0 + $0x78] sm:$0xff] }
  0xa2   :  { %v708_v27 = vmul.f32 %v5762_v25, %v5762_v25  ;;  %v692_v46 = vmul.f32 %v5781_v32, %v5781_v32  ;;  %5016 = vmatmul.msk.f32.gmra.mxu0 %vm93_vm0, %v36_v5 }
  0xa3   :  { %755 = vadd.xlane.f32.xlu2 %v690_v6  ;;  %v52_v6 = vld [vmem:[%s9825_s0 + $0xf8] sm:$0xff] }
  0xa4   :  { %5032 = vmatmul.msk.f32.gmra.mxu1 %vm93_vm0, %v52_v6 }
  0xa6   :  { %v408_v31 = vpop.f32.mrf.mxu2  ;;  %v456_v37 = vpop.f32.mrf.mxu3 }
  0xa7   :  { %v5784_v33 = vadd.f32 %v5649_v43, %v408_v31  ;;  %v315_v38 = vpop.f32.mrf.mxu0  ;;  %v5799_v39 = vadd.f32 %v5649_v43, %v456_v37  ;;  %v363_v40 = vpop.f32.mrf.mxu1 }
  0xa8   :  { %v5802_v41 = vadd.f32 %v5649_v43, %v315_v38  ;;  %v5807_v42 = vadd.f32 %v5649_v43, %v363_v40 }
  0xa9   :  { %787 = vadd.xlane.f32.xlu0 %v706_v15  ;;  %819 = vadd.xlane.f32.xlu1 %v722_v12  ;;  %9921 = vst [vmem:[#allocation8_spill] sm:$0xff] %v5799_v39  ;;  %v68_v12 = vld [vmem:[%s9825_s0 + $0x178] sm:$0xff] }
  0xaa   :  { %v709_v45 = vmul.f32 %v5807_v42, %v5807_v42  ;;  %v693_v59 = vmul.f32 %v5802_v41, %v5802_v41  ;;  %5048 = vmatmul.msk.f32.gmra.mxu2 %vm93_vm0, %v68_v12 }
  0xab   :  { %597 = vadd.xlane.f32.xlu2 %v5733_v14 }
  0xae   :  { %v411_v51 = vpop.f32.mrf.mxu2  ;;  %v459_v52 = vpop.f32.mrf.mxu3 }
  0xaf   :  { %v5832_v56 = vadd.f32 %v5649_v43, %v411_v51  ;;  %v5835_v57 = vadd.f32 %v5649_v43, %v459_v52  ;;  %v366_v58 = vpop.f32.mrf.mxu1  ;;  %v318_v62 = vpop.f32.mrf.mxu0 }
  0xb0   :  { %v5842_v60 = vadd.f32 %v5649_v43, %v366_v58  ;;  %v5847_v2 = vadd.f32 %v5649_v43, %v318_v62 }
  0xb1   :  { %563 = vadd.xlane.f32.xlu0 %v5716_v7  ;;  %789 = vadd.xlane.f32.xlu1 %v707_v21  ;;  %9922 = vst [vmem:[#allocation9_spill] sm:$0xff] %v5835_v57 }
  0xb2   :  { %v710_v1 = vmul.f32 %v5842_v60, %v5842_v60  ;;  %v694_v11 = vmul.f32 %v5847_v2, %v5847_v2 }
  0xb3   :  { %821 = vadd.xlane.f32.xlu2 %v723_v22 }
  0xb6   :  { %v414_v4 = vpop.f32.mrf.mxu2  ;;  %v462_v8 = vpop.f32.mrf.mxu3 }
  0xb7   :  { %v5863_v10 = vadd.f32 %v5649_v43, %v414_v4  ;;  %v5872_v13 = vadd.f32 %v5649_v43, %v462_v8  ;;  %v369_v15 = vpop.f32.mrf.mxu1  ;;  %v321_v16 = vpop.f32.mrf.mxu0 }
  0xb8   :  { %v5878_v19 = vadd.f32 %v5649_v43, %v369_v15  ;;  %v5881_v20 = vadd.f32 %v5649_v43, %v321_v16 }
  0xb9   :  { %533 = vadd.xlane.f32.xlu0 %v5738_v17  ;;  %565 = vadd.xlane.f32.xlu1 %v5742_v18  ;;  %9923 = vst [vmem:[#allocation10_spill] sm:$0xff] %v5863_v10 }
  0xba   :  { %9924 = vst [vmem:[#allocation11_spill] sm:$0xff] %v5872_v13  ;;  %v711_v21 = vmul.f32 %v5878_v19, %v5878_v19  ;;  %v695_v28 = vmul.f32 %v5881_v20, %v5881_v20 }
  0xbb   :  { %791 = vadd.xlane.f32.xlu2 %v708_v27 }
  0xbe   :  { %v465_v22 = vpop.f32.mrf.mxu3  ;;  %v417_v23 = vpop.f32.mrf.mxu2 }
  0xbf   :  { %v5888_v24 = vadd.f32 %v5649_v43, %v465_v22  ;;  %v372_v26 = vpop.f32.mrf.mxu1  ;;  %v5891_v27 = vadd.f32 %v5649_v43, %v417_v23  ;;  %v324_v30 = vpop.f32.mrf.mxu0 }
  0xc0   :  { %v5897_v29 = vadd.f32 %v5649_v43, %v372_v26  ;;  %v5903_v36 = vadd.f32 %v5649_v43, %v324_v30 }
  0xc1   :  { %757 = vadd.xlane.f32.xlu0 %v691_v34  ;;  %503 = vadd.xlane.f32.xlu1 %v5781_v32  ;;  %9925 = vst [vmem:[#allocation12_spill] sm:$0xff] %v5888_v24 }
  0xc2   :  { %9926 = vst [vmem:[#allocation13_spill] sm:$0xff] %v5891_v27  ;;  %v712_v37 = vmul.f32 %v5897_v29, %v5897_v29 }
  0xc3   :  { %567 = vadd.xlane.f32.xlu2 %v5784_v33 }
  0xc6   :  { %v420_v49 = vpop.f32.mrf.mxu2  ;;  %v468_v50 = vpop.f32.mrf.mxu3 }
  0xc7   :  { %v5918_v62 = vadd.f32 %v5649_v43, %v420_v49  ;;  %v375_v6 = vpop.f32.mrf.mxu1 }
  0xc8   :  { %v5928_v12 = vadd.f32 %v5649_v43, %v375_v6 }
  0xc9   :  { %599 = vadd.xlane.f32.xlu0 %v5799_v39  ;;  %535 = vadd.xlane.f32.xlu1 %v5762_v25  ;;  %9928 = vst [vmem:[#allocation15_spill] sm:$0xff] %v5918_v62 }
  0xca   :  { %9930 = vst [vmem:[#allocation17_spill] sm:$0xff] %v5928_v12  ;;  %v713_v22 = vmul.f32 %v5928_v12, %v5928_v12 }
  0xcb   :  { %505 = vadd.xlane.f32.xlu2 %v5802_v41 }
  0xd1   :  { %793 = vadd.xlane.f32.xlu0 %v709_v45  ;;  %759 = vadd.xlane.f32.xlu1 %v692_v46 }
  0xd3   :  { %537 = vadd.xlane.f32.xlu2 %v5807_v42 }
  0xd9   :  { %569 = vadd.xlane.f32.xlu0 %v5832_v56  ;;  %601 = vadd.xlane.f32.xlu1 %v5835_v57 }
  0xdb   :  { %761 = vadd.xlane.f32.xlu2 %v693_v59 }
  0xe1   :  { %539 = vadd.xlane.f32.xlu0 %v5842_v60  ;;  %795 = vadd.xlane.f32.xlu1 %v710_v1  ;;  %v5921_v1 = vadd.f32 %v5649_v43, %v468_v50 }
  0xe3   :  { %507 = vadd.xlane.f32.xlu2 %v5847_v2  ;;  %9929 = vst [vmem:[#allocation16_spill] sm:$0xff] %v5921_v1 }
  0xe9   :  { %763 = vadd.xlane.f32.xlu0 %v694_v11  ;;  %571 = vadd.xlane.f32.xlu1 %v5863_v10  ;;  %v696_v11 = vmul.f32 %v5903_v36, %v5903_v36 }
  0xeb   :  { %603 = vadd.xlane.f32.xlu2 %v5872_v13 }
  0xf1   :  { %509 = vadd.xlane.f32.xlu0 %v5881_v20  ;;  %541 = vadd.xlane.f32.xlu1 %v5878_v19 }
  0xf3   :  { %797 = vadd.xlane.f32.xlu2 %v711_v21  ;;  %v327_v21 = vpop.f32.mrf.mxu0 }
  0xf9   :  { %605 = vadd.xlane.f32.xlu0 %v5888_v24  ;;  %765 = vadd.xlane.f32.xlu1 %v695_v28 }
  0xfb   :  { %573 = vadd.xlane.f32.xlu2 %v5891_v27 }
  0xfc   :  { %v530_v31 = vpop.xlane.xlu1 %529  ;;  %v498_v34 = vpop.xlane.xlu0 %497 }
  0xfd   :  { %v5900_v35 = vmul.f32 0.0078125, %v530_v31  ;;  %v5909_v45 = vmul.f32 0.0078125, %v498_v34  ;;  %v5938_v31 = vadd.f32 %v5649_v43, %v327_v21 }
  0xfe   :  { %v786_v38 = vpop.xlane.xlu2 %785 }
  0xff   :  { %v961_v40 = vmul.f32 %v5900_v35, %v5900_v35  ;;  %v897_v44 = vmul.f32 0.0078125, %v786_v38  ;;  %v945_v58 = vmul.f32 %v5909_v45, %v5909_v45  ;;  %9932 = vst [vmem:[#allocation19_spill] sm:$0xff] %v5938_v31 }
 0x101   :  { %799 = vadd.xlane.f32.xlu0 %v712_v37  ;;  %511 = vadd.xlane.f32.xlu1 %v5903_v36  ;;  %v1025_v46 = vsub.f32 %v897_v44, %v961_v40  ;;  %v423_v37 = vpop.f32.mrf.mxu2 }
 0x103   :  { %543 = vadd.xlane.f32.xlu2 %v5897_v29  ;;  %v1089_v51 = vmax.f32 %v1025_v46, 0.0 }
 0x104   :  { %v5913_v52 = vpop.xlane.xlu0 %593  ;;  %v754_v53 = vpop.xlane.xlu1 %753 }
 0x105   :  { %9927 = vst [vmem:[#allocation14_spill] sm:$0xff] %v5913_v52  ;;  %v881_v59 = vmul.f32 0.0078125, %v754_v53  ;;  %v1217_v4 = vadd.f32 1e-06, %v1089_v51  ;;  %v5948_v51 = vadd.f32 %v5649_v43, %v423_v37  ;;  %v471_v53 = vpop.f32.mrf.mxu3 }
 0x106   :  { %v562_v5 = vpop.xlane.xlu2 %561  ;;  %v5955_v21 = vadd.f32 %v5649_v43, %v471_v53 }
 0x107   :  { %v1009_v8 = vsub.f32 %v881_v59, %v945_v58  ;;  %5147 = vrsqrt.f32 %v1217_v4  ;;  %v5941_v44 = vmul.f32 0.0078125, %v562_v5  ;;  %9933 = vst [vmem:[#allocation20_spill] sm:$0xff] %v5948_v51  ;;  %v697_v58 = vmul.f32 %v5938_v31, %v5938_v31 }
 0x108   :  { %vm1431_vm2 = vweird.f32 %v1217_v4  ;;  %9934 = vst [vmem:[#allocation21_spill] sm:$0xff] %v5955_v21 }
 0x109   :  { %v1073_v9 = vmax.f32 %v1009_v8, 0.0  ;;  %575 = vadd.xlane.f32.xlu0 %v5918_v62  ;;  %607 = vadd.xlane.f32.xlu1 %v5921_v1  ;;  %v977_v5 = vmul.f32 %v5941_v44, %v5941_v44 }
 0x10b   :  { %v5930_v15 = vadd.f32 1e-06, %v1073_v9  ;;  %767 = vadd.xlane.f32.xlu2 %v696_v11 }
 0x10c   :  { %v500_v16 = vpop.xlane.xlu0 %499  ;;  %v5935_v26 = vpop.xlane.xlu1 %595 }
 0x10d   :  { %5149 = vrsqrt.f32 %v5930_v15  ;;  %v5148_v23 = vpop.eup %5147  ;;  %9931 = vst [vmem:[#allocation18_spill] sm:$0xff] %v5935_v26  ;;  %v5945_v49 = vmul.f32 0.0078125, %v500_v16  ;;  %vm1271_vm5 = vweird.f32 %v5930_v15 }
 0x10e   :  { %v532_v28 = vpop.xlane.xlu2 %531  ;;  %v1426_v30 = vmul.f32 %v5148_v23, %v1217_v4  ;;  %vm1432_vm1 = vweird.f32 %v5148_v23 }
 0x10f   :  { %vm1433_vm3 = vmor %vm1431_vm2, %vm1432_vm1  ;;  %v946_v37 = vmul.f32 %v5945_v49, %v5945_v49 }
 0x110   :  { %v1427_v34 = vmul.f32 %v5148_v23, %v1426_v30  ;;  %v5962_v30 = vld [vmem:[%s9828_s3] ss:$0 sm:$0xff] }
 0x111   :  { %545 = vadd.xlane.f32.xlu0 %v5928_v12  ;;  %801 = vadd.xlane.f32.xlu1 %v713_v22  ;;  %v1153_v22 = vsub.f32 %v5659_v48, %v5900_v35  ;;  %v5972_v48 = vld [vmem:[%s9829_s4] ss:$0 sm:$0xff] }
 0x112   :  { %v1428_v40 = vmul.f32 0.5, %v1427_v34 }
 0x113   :  { %v5150_v38 = vpop.eup %5149  ;;  %513 = vadd.xlane.f32.xlu2 %v5938_v31 }
 0x114   :  { %v1266_v46 = vmul.f32 %v5150_v38, %v5930_v15  ;;  %v818_v50 = vpop.xlane.xlu0 %817  ;;  %v1429_v59 = vsub.f32 1.5, %v1428_v40  ;;  %v5966_v40 = vpop.xlane.xlu1 %501  ;;  %vm1272_vm4 = vweird.f32 %v5150_v38 }
 0x115   :  { %v913_v6 = vmul.f32 0.0078125, %v818_v50  ;;  %vm1273_vm6 = vmor %vm1271_vm5, %vm1272_vm4 }
 0x116   :  { %v1267_v8 = vmul.f32 %v5150_v38, %v1266_v46  ;;  %v756_v9 = vpop.xlane.xlu2 %755  ;;  %v1430_v11 = vmul.f32 %v5148_v23, %v1429_v59  ;;  %v378_v46 = vpop.f32.mrf.mxu1 }
 0x117   :  { %v1041_v16 = vsub.f32 %v913_v6, %v977_v5  ;;  %v882_v4 = vmul.f32 0.0078125, %v756_v9  ;;  %v330_v6 = vpop.f32.mrf.mxu0  ;;  %v5976_v9 = vmul.f32 0.0078125, %v532_v28 }
 0x118   :  { %v1268_v34 = vmul.f32 0.5, %v1267_v8  ;;  %v1434_v50 = vsel %vm1433_vm3, %v5148_v23, %v1430_v11  ;;  %v1137_v8 = vsub.f32 %v5656_v47, %v5909_v45  ;;  %v5990_v28 = vadd.f32 %v5649_v43, %v330_v6 }
 0x119   :  { %v1105_v53 = vmax.f32 %v1041_v16, 0.0  ;;  %769 = vadd.xlane.f32.xlu0 %v697_v58  ;;  %577 = vadd.xlane.f32.xlu1 %v5948_v51  ;;  %v1921_v35 = vmul.f32 %v1434_v50, %v1153_v22  ;;  %v1010_v5 = vsub.f32 %v882_v4, %v946_v37  ;;  %v5982_v58 = vadd.f32 %v5649_v43, %v378_v46 }
 0x11a   :  { %v1269_v59 = vsub.f32 1.5, %v1268_v34  ;;  %v962_v47 = vmul.f32 %v5976_v9, %v5976_v9  ;;  %9936 = vst [vmem:[#allocation23_spill] sm:$0xff] %v5990_v28 }
 0x11b   :  { %v5978_v23 = vadd.f32 1e-06, %v1105_v53  ;;  %609 = vadd.xlane.f32.xlu2 %v5955_v21  ;;  %9935 = vst [vmem:[#allocation22_spill] sm:$0xff] %v5982_v58  ;;  %v1988_v11 = vmul.f32 %v5962_v30, %v1921_v35  ;;  %v1074_v22 = vmax.f32 %v1010_v5, 0.0  ;;  %v714_v53 = vmul.f32 %v5982_v58, %v5982_v58 }
 0x11c   :  { %v1270_v16 = vmul.f32 %v5150_v38, %v1269_v59  ;;  %v788_v34 = vpop.xlane.xlu0 %787  ;;  %v820_v6 = vpop.xlane.xlu1 %819 }
 0x11d   :  { %5151 = vrsqrt.f32 %v5978_v23  ;;  %v898_v45 = vmul.f32 0.0078125, %v788_v34  ;;  %v5993_v37 = vadd.f32 %v5972_v48, %v1988_v11  ;;  %v5995_v46 = vadd.f32 1e-06, %v1074_v22 }
 0x11e   :  { %v1274_v4 = vsel %vm1273_vm6, %v5150_v38, %v1270_v16  ;;  %v1169_v22 = vsub.f32 %v5677_v55, %v5941_v44  ;;  %vm1591_vm7 = vweird.f32 %v5978_v23  ;;  %v914_v55 = vmul.f32 0.0078125, %v820_v6  ;;  %v381_v21 = vpop.f32.mrf.mxu1 }
 0x11f   :  { %v1905_v50 = vmul.f32 %v1274_v4, %v1137_v8  ;;  %v1026_v15 = vsub.f32 %v898_v45, %v962_v47  ;;  %v6000_v35 = vmul.f32 0.70710677, %v5993_v37  ;;  %5153 = vrsqrt.f32 %v5995_v46  ;;  %v474_v8 = vpop.f32.mrf.mxu3 }
 0x120   :  { %v6028_v44 = vadd.f32 %v5649_v43, %v474_v8  ;;  %vm1281_vm8 = vweird.f32 %v5995_v46  ;;  %v6047_v63 = vadd.f32 %v5649_v43, %v381_v21 }
 0x121   :  { %v1972_v59 = vmul.f32 %v5962_v30, %v1905_v50  ;;  %v1090_v5 = vmax.f32 %v1026_v15, 0.0  ;;  %515 = vadd.xlane.f32.xlu0 %v5990_v28  ;;  %547 = vadd.xlane.f32.xlu1 %v5982_v58  ;;  %v2871_v38 = vmul.f32 %v6000_v35, %v6000_v35  ;;  %v426_v15 = vpop.f32.mrf.mxu2 }
 0x122   :  { %9937 = vst [vmem:[#allocation24_spill] sm:$0xff] %v6028_v44  ;;  %v6039_v6 = vadd.f32 %v5649_v43, %v426_v15 }
 0x123   :  { %v5152_v11 = vpop.eup %5151  ;;  %v6009_v16 = vadd.f32 %v5972_v48, %v1972_v59  ;;  %v6015_v47 = vadd.f32 1e-06, %v1090_v5  ;;  %803 = vadd.xlane.f32.xlu2 %v714_v53  ;;  %v6017_v45 = vmin.f32 %v2871_v38, 16.0  ;;  %v698_v59 = vmul.f32 %v5990_v28, %v5990_v28 }
 0x124   :  { %v1586_v4 = vmul.f32 %v5152_v11, %v5978_v23  ;;  %v564_v50 = vpop.xlane.xlu0 %563  ;;  %9938 = vst [vmem:[#allocation25_spill] sm:$0xff] %v6039_v6  ;;  %vm1592_vm9 = vweird.f32 %v5152_v11 }
 0x125   :  { %v6024_v26 = vmul.f32 0.70710677, %v6009_v16  ;;  %5155 = vrsqrt.f32 %v6015_v47  ;;  %v5154_v53 = vpop.eup %5153  ;;  %v2873_v5 = vmul.f32 2.1237322e-06, %v6017_v45  ;;  %v2884_v38 = vmul.f32 3.8918573e-05, %v6017_v45  ;;  %vm1593_vm11 = vmor %vm1591_vm7, %vm1592_vm9 }
 0x126   :  { %v1587_v34 = vmul.f32 %v5152_v11, %v1586_v4  ;;  %v6032_v52 = vmul.f32 0.0078125, %v564_v50  ;;  %v1276_v14 = vmul.f32 %v5154_v53, %v5995_v46  ;;  %vm1282_vm10 = vweird.f32 %v5154_v53 }
 0x127   :  { %v2231_v13 = vmul.f32 %v6024_v26, %v6024_v26  ;;  %v2874_v8 = vadd.f32 0.00028619796, %v2873_v5  ;;  %v2885_v1 = vadd.f32 0.001143296, %v2884_v38  ;;  %vm1283_vm13 = vmor %vm1281_vm8, %vm1282_vm10  ;;  %vm1441_vm14 = vweird.f32 %v6015_v47 }
 0x128   :  { %v1588_v57 = vmul.f32 0.5, %v1587_v34  ;;  %v978_v24 = vmul.f32 %v6032_v52, %v6032_v52  ;;  %v1277_v50 = vmul.f32 %v5154_v53, %v1276_v14 }
 0x129   :  { %v6043_v4 = vmin.f32 %v2231_v13, 16.0  ;;  %611 = vadd.xlane.f32.xlu0 %v6028_v44  ;;  %771 = vadd.xlane.f32.xlu1 %v698_v59  ;;  %v2875_v39 = vmul.f32 %v2874_v8, %v6017_v45  ;;  %v2886_v15 = vmul.f32 %v2885_v1, %v6017_v45 }
 0x12a   :  { %v1589_v5 = vsub.f32 1.5, %v1588_v57  ;;  %v1278_v54 = vmul.f32 0.5, %v1277_v50  ;;  %v1042_v14 = vsub.f32 %v914_v55, %v978_v24 }
 0x12b   :  { %v6051_v34 = vpop.eup %5155  ;;  %v2233_v38 = vmul.f32 2.1237322e-06, %v6043_v4  ;;  %v2244_v13 = vmul.f32 3.8918573e-05, %v6043_v4  ;;  %579 = vadd.xlane.f32.xlu2 %v6039_v6  ;;  %v2876_v59 = vadd.f32 0.0036580483, %v2875_v39 }
 0x12c   :  { %v2887_v44 = vadd.f32 0.014752088, %v2886_v15  ;;  %v1590_v43 = vmul.f32 %v5152_v11, %v1589_v5  ;;  %v1436_v21 = vmul.f32 %v6051_v34, %v6015_v47  ;;  %v1279_v57 = vsub.f32 1.5, %v1278_v54 }
 0x12d   :  { %v2234_v8 = vadd.f32 0.00028619796, %v2233_v38  ;;  %v2245_v1 = vadd.f32 0.001143296, %v2244_v13  ;;  %vm1442_vm12 = vweird.f32 %v6051_v34  ;;  %v2877_v50 = vmul.f32 %v2876_v59, %v6017_v45 }
 0x12e   :  { %v2888_v24 = vmul.f32 %v2887_v44, %v6017_v45  ;;  %v1594_v55 = vsel %vm1593_vm11, %v5152_v11, %v1590_v43  ;;  %v1437_v39 = vmul.f32 %v6051_v34, %v1436_v21  ;;  %v1280_v13 = vmul.f32 %v5154_v53, %v1279_v57  ;;  %vm1443_vm15 = vmor %vm1441_vm14, %vm1442_vm12 }
 0x12f   :  { %v2235_v15 = vmul.f32 %v2234_v8, %v6043_v4  ;;  %v2246_v5 = vmul.f32 %v2245_v1, %v6043_v4  ;;  %v1937_v38 = vmul.f32 %v1594_v55, %v1169_v22  ;;  %v2878_v28 = vadd.f32 0.05243302, %v2877_v50 }
 0x130   :  { %v2889_v6 = vadd.f32 0.112945676, %v2888_v24  ;;  %v1438_v54 = vmul.f32 0.5, %v1437_v39  ;;  %v1106_v23 = vmax.f32 %v1042_v14, 0.0  ;;  %v1284_v44 = vsel %vm1283_vm13, %v5154_v53, %v1280_v13 }
 0x131   :  { %v2236_v59 = vadd.f32 0.0036580483, %v2235_v15  ;;  %v2247_v58 = vadd.f32 0.014752088, %v2246_v5  ;;  %v2004_v11 = vmul.f32 %v5962_v30, %v1937_v38  ;;  %v2879_v43 = vmul.f32 %v2878_v28, %v6017_v45 }
 0x132   :  { %v2890_v21 = vmul.f32 %v2889_v6, %v6017_v45  ;;  %v9939_v22 = vsub.f32 %v5692_v61, %v5945_v49  ;;  %v1439_v1 = vsub.f32 1.5, %v1438_v54  ;;  %v6081_v50 = vadd.f32 1e-06, %v1106_v23 }
 0x133   :  { %v2237_v57 = vmul.f32 %v2236_v59, %v6043_v4  ;;  %v2248_v46 = vmul.f32 %v2247_v58, %v6043_v4  ;;  %v6079_v14 = vadd.f32 %v5972_v48, %v2004_v11  ;;  %549 = vadd.xlane.f32.xlu2 %v6047_v63  ;;  %v2880_v53 = vadd.f32 0.18741608, %v2879_v43 }
 0x134   :  { %v1906_v8 = vmul.f32 %v1284_v44, %v9939_v22  ;;  %v2891_v28 = vadd.f32 0.4994258, %v2890_v21  ;;  %v1440_v24 = vmul.f32 %v6051_v34, %v1439_v1  ;;  %5157 = vrsqrt.f32 %v6081_v50 }
 0x135   :  { %v2238_v61 = vadd.f32 0.05243302, %v2237_v57  ;;  %v2249_v49 = vadd.f32 0.112945676, %v2248_v46  ;;  %v2881_v58 = vmul.f32 %v2880_v53, %v6017_v45  ;;  %v6091_v39 = vmul.f32 0.70710677, %v6079_v14 }
 0x136   :  { %v1973_v6 = vmul.f32 %v5962_v30, %v1906_v8  ;;  %v2892_v55 = vmul.f32 %v2891_v28, %v6017_v45  ;;  %v1154_v47 = vsub.f32 %v5698_v0, %v5976_v9  ;;  %v1444_v13 = vsel %vm1443_vm15, %v6051_v34, %v1440_v24 }
 0x137   :  { %v2239_v5 = vmul.f32 %v2238_v61, %v6043_v4  ;;  %v2250_v38 = vmul.f32 %v2249_v49, %v6043_v4  ;;  %v3511_v45 = vmul.f32 %v6091_v39, %v6091_v39  ;;  %v2882_v43 = vadd.f32 1.1283791, %v2881_v58 }
 0x138   :  { %v6094_v15 = vadd.f32 %v5972_v48, %v1973_v6  ;;  %v6103_v54 = vadd.f32 1.0, %v2892_v55  ;;  %v1922_v44 = vmul.f32 %v1444_v13, %v1154_v47  ;;  %v6128_v24 = vmul.f32 0.5, %v5993_v37 }
 0x139   :  { %v2240_v23 = vadd.f32 0.18741608, %v2239_v5  ;;  %v2251_v59 = vadd.f32 0.4994258, %v2250_v38  ;;  %v6116_v22 = vmin.f32 %v3511_v45, 16.0  ;;  %v6132_v61 = vmul.f32 0.0078125, %v5966_v40 }
 0x13a   :  { %v6108_v11 = vmul.f32 0.70710677, %v6094_v15  ;;  %5159 = vrcp.f32 %v6103_v54  ;;  %v6111_v21 = vpop.eup %5157  ;;  %v2903_v0 = vand.u32 2147483647, %v6103_v54  ;;  %v2905_v8 = vand.u32 2147483648, %v6103_v54 }
 0x13b   :  { %v2241_v9 = vmul.f32 %v2240_v23, %v6043_v4  ;;  %v2252_v34 = vmul.f32 %v2251_v59, %v6043_v4  ;;  %v1989_v57 = vmul.f32 %v5962_v30, %v1922_v44  ;;  %v1596_v46 = vmul.f32 %v6111_v21, %v6081_v50 }
 0x13c   :  { %v2271_v1 = vmul.f32 %v6108_v11, %v6108_v11  ;;  %v3513_v6 = vmul.f32 2.1237322e-06, %v6116_v22  ;;  %v3524_v4 = vmul.f32 3.8918573e-05, %v6116_v22  ;;  %v2883_v58 = vmul.f32 %v2882_v43, %v6000_v35 }
 0x13d   :  { %v2242_v53 = vadd.f32 1.1283791, %v2241_v9  ;;  %v6124_v28 = vadd.f32 1.0, %v2252_v34  ;;  %v6139_v55 = vadd.f32 %v5972_v48, %v1989_v57  ;;  %v1597_v5 = vmul.f32 %v6111_v21, %v1596_v46 }
 0x13e   :  { %v6134_v49 = vmin.f32 %v2271_v1, 16.0  ;;  %vm2899_vm0 = vweird.f32 %v6103_v54  ;;  %v2906_v37 = vor.u32 1.1754944e-38, %v2905_v8  ;;  %v3514_v47 = vadd.f32 0.00028619796, %v3513_v6 }
 0x13f   :  { %5161 = vrcp.f32 %v6124_v28  ;;  %v3525_v13 = vadd.f32 0.001143296, %v3524_v4  ;;  %vm6144_vm1 = vcmp.eq.f32.partialorder %v2903_v0, 8.507059e+37  ;;  %v6149_v35 = vmul.f32 %v2242_v53, %v6024_v26 }
 0x140   :  { %v5160_v38 = vpop.eup %5159  ;;  %v2265_v23 = vand.u32 2147483648, %v6124_v28  ;;  %v2273_v59 = vmul.f32 2.1237322e-06, %v6134_v49  ;;  %v2263_v44 = vand.u32 2147483647, %v6124_v28  ;;  %v3515_v43 = vmul.f32 %v3514_v47, %v6116_v22 }
 0x141   :  { %v2895_v40 = vmul.f32 %v5160_v38, %v6103_v54  ;;  %v3526_v9 = vmul.f32 %v3525_v13, %v6116_v22  ;;  %v2284_v34 = vmul.f32 3.8918573e-05, %v6134_v49  ;;  %v6158_v1 = vmul.f32 0.70710677, %v6139_v55 }
 0x142   :  { %v2274_v0 = vadd.f32 0.00028619796, %v2273_v59  ;;  %v1598_v57 = vmul.f32 0.5, %v1597_v5  ;;  %vm2900_vm2 = vweird.f32 %v5160_v38  ;;  %vm2259_vm3 = vweird.f32 %v6124_v28 }
 0x143   :  { %v2896_v8 = vsub.f32 1.0, %v2895_v40  ;;  %v3516_v26 = vadd.f32 0.0036580483, %v3515_v43  ;;  %v3527_v46 = vadd.f32 0.014752088, %v3526_v9  ;;  %v2266_v51 = vor.u32 1.1754944e-38, %v2265_v23  ;;  %vm2901_vm5 = vmor %vm2899_vm0, %vm2900_vm2 }
 0x144   :  { %v2285_v53 = vadd.f32 0.001143296, %v2284_v34  ;;  %v2275_v47 = vmul.f32 %v2274_v0, %v6134_v49  ;;  %v2911_v13 = vmul.f32 %v6158_v1, %v6158_v1  ;;  %vm6165_vm4 = vcmp.eq.f32.partialorder %v2263_v44, 8.507059e+37 }
 0x145   :  { %v5162_v6 = vpop.eup %5161  ;;  %v2897_v4 = vmul.f32 %v5160_v38, %v2896_v8  ;;  %v3517_v5 = vmul.f32 %v3516_v26, %v6116_v22  ;;  %v3528_v43 = vmul.f32 %v3527_v46, %v6116_v22  ;;  %v1599_v9 = vsub.f32 1.5, %v1598_v57 }
 0x146   :  { %v2255_v40 = vmul.f32 %v5162_v6, %v6124_v28  ;;  %v2276_v62 = vadd.f32 0.0036580483, %v2275_v47  ;;  %v2286_v23 = vmul.f32 %v2285_v53, %v6134_v49  ;;  %v6172_v8 = vmin.f32 %v2911_v13, 16.0 }
 0x147   :  { %v2898_v34 = vadd.f32 %v5160_v38, %v2897_v4  ;;  %vm2260_vm6 = vweird.f32 %v5162_v6  ;;  %v3518_v44 = vadd.f32 0.05243302, %v3517_v5  ;;  %v3529_v27 = vadd.f32 0.112945676, %v3528_v43 }
 0x148   :  { %v2256_v0 = vsub.f32 1.0, %v2255_v40  ;;  %v2277_v26 = vmul.f32 %v2276_v62, %v6134_v49  ;;  %v2287_v12 = vadd.f32 0.014752088, %v2286_v23  ;;  %v2913_v57 = vmul.f32 2.1237322e-06, %v6172_v8  ;;  %v6185_v23 = vpop.xlane.xlu2 %597  ;;  %vm2261_vm7 = vmor %vm2259_vm3, %vm2260_vm6 }
 0x149   :  { %v2902_v31 = vsel %vm2901_vm5, %v5160_v38, %v2898_v34  ;;  %v3519_v4 = vmul.f32 %v3518_v44, %v6116_v22  ;;  %v3530_v47 = vmul.f32 %v3529_v27, %v6116_v22  ;;  %v2924_v62 = vmul.f32 3.8918573e-05, %v6172_v8 }
 0x14a   :  { %v2907_v46 = vsel %vm6144_vm1, %v2906_v37, %v2902_v31  ;;  %v2257_v53 = vmul.f32 %v5162_v6, %v2256_v0  ;;  %v2278_v13 = vadd.f32 0.05243302, %v2277_v26  ;;  %v2288_v40 = vmul.f32 %v2287_v12, %v6134_v49  ;;  %v790_v0 = vpop.xlane.xlu1 %789 }
 0x14b   :  { %v2908_v54 = vmul.f32 %v2907_v46, %v2883_v58  ;;  %v2914_v5 = vadd.f32 0.00028619796, %v2913_v57  ;;  %v3520_v38 = vadd.f32 0.18741608, %v3519_v4  ;;  %v3531_v34 = vadd.f32 0.4994258, %v3530_v47 }
 0x14c   :  { %v2258_v43 = vadd.f32 %v5162_v6, %v2257_v53  ;;  %v2279_v31 = vmul.f32 %v2278_v13, %v6134_v49  ;;  %v2289_v27 = vadd.f32 0.112945676, %v2288_v40  ;;  %v2925_v45 = vadd.f32 0.001143296, %v2924_v62 }
 0x14d   :  { %v5081_v10 = vclamps-f32 %v2908_v54, 1.0  ;;  %v2915_v58 = vmul.f32 %v2914_v5, %v6172_v8  ;;  %v3532_v12 = vmul.f32 %v3531_v34, %v6116_v22  ;;  %vm1602_vm8 = vweird.f32 %v6111_v21  ;;  %v534_v34 = vpop.xlane.xlu0 %533 }
 0x14e   :  { %v2262_v37 = vsel %vm2261_vm7, %v5162_v6, %v2258_v43  ;;  %v2290_v57 = vmul.f32 %v2289_v27, %v6134_v49  ;;  %v1600_v28 = vmul.f32 %v6111_v21, %v1599_v9  ;;  %v3521_v53 = vmul.f32 %v3520_v38, %v6116_v22 }
 0x14f   :  { %v4807_v44 = vadd.f32 1.0, %v5081_v10  ;;  %v2267_v26 = vsel %vm6165_vm4, %v2266_v51, %v2262_v37  ;;  %v6200_v4 = vadd.f32 1.0, %v3532_v12  ;;  %v2916_v6 = vadd.f32 0.0036580483, %v2915_v58 }
 0x150   :  { %v2268_v46 = vmul.f32 %v2267_v26, %v6149_v35  ;;  %v2280_v54 = vadd.f32 0.18741608, %v2279_v31  ;;  %v2291_v13 = vadd.f32 0.4994258, %v2290_v57  ;;  %v2926_v10 = vmul.f32 %v2925_v45, %v6172_v8  ;;  %v822_v27 = vpop.xlane.xlu2 %821 }
 0x151   :  { %v4871_v47 = vmul.f32 %v4807_v44, %v6128_v24  ;;  %5163 = vrcp.f32 %v6200_v4  ;;  %vm1601_vm9 = vweird.f32 %v6081_v50  ;;  %v2103_v51 = vmul.f32 0.5, %v6009_v16 }
 0x152   :  { %v5065_v40 = vclamps-f32 %v2268_v46, 1.0  ;;  %v2292_v35 = vmul.f32 %v2291_v13, %v6134_v49  ;;  %v1170_v22 = vsub.f32 %v5716_v7, %v6032_v52  ;;  %vm1603_vm10 = vmor %vm1601_vm9, %vm1602_vm8  ;;  %v2917_v59 = vmul.f32 %v2916_v6, %v6172_v8  ;;  %v566_v57 = vpop.xlane.xlu1 %565 }
 0x153   :  { %4935 = vst [vmem:[#allocation2 + $0x80] sm:$0xff] %v4871_v47  ;;  %v2927_v9 = vadd.f32 0.014752088, %v2926_v10  ;;  %v1604_v5 = vsel %vm1603_vm10, %v6111_v21, %v1600_v28  ;;  %v3522_v43 = vadd.f32 1.1283791, %v3521_v53  ;;  %v6216_v50 = vmul.f32 %v6132_v61, %v6132_v61  ;;  %v333_v28 = vpop.f32.mrf.mxu0 }
 0x154   :  { %v4791_v24 = vadd.f32 1.0, %v5065_v40  ;;  %v2281_v16 = vmul.f32 %v2280_v54, %v6134_v49  ;;  %v6219_v38 = vadd.f32 1.0, %v2292_v35  ;;  %v2918_v52 = vadd.f32 0.05243302, %v2917_v59 }
 0x155   :  { %v2928_v62 = vmul.f32 %v2927_v9, %v6172_v8  ;;  %v1938_v31 = vmul.f32 %v1604_v5, %v1170_v22  ;;  %v3543_v58 = vand.u32 2147483647, %v6200_v4  ;;  %v899_v21 = vmul.f32 0.0078125, %v790_v0 }
 0x156   :  { %v4855_v7 = vmul.f32 %v4791_v24, %v2103_v51  ;;  %5165 = vrcp.f32 %v6219_v38  ;;  %v915_v37 = vmul.f32 0.0078125, %v822_v27  ;;  %v2919_v45 = vmul.f32 %v2918_v52, %v6172_v8 }
 0x157   :  { %v5164_v12 = vpop.eup %5163  ;;  %v2929_v49 = vadd.f32 0.112945676, %v2928_v62  ;;  %v2005_v44 = vmul.f32 %v5962_v30, %v1938_v31  ;;  %v6226_v26 = vmul.f32 0.0078125, %v534_v34  ;;  %v6229_v46 = vmul.f32 0.5, %v6079_v14 }
 0x158   :  { %4919 = vst [vmem:[#allocation2] sm:$0xff] %v4855_v7  ;;  %v3523_v53 = vmul.f32 %v3522_v43, %v6091_v39  ;;  %v3535_v6 = vmul.f32 %v5164_v12, %v6200_v4  ;;  %v3545_v0 = vand.u32 2147483648, %v6200_v4  ;;  %v2282_v47 = vadd.f32 1.1283791, %v2281_v16  ;;  %v6249_v39 = vld [vmem:[%s9827_s2] ss:$0 sm:$0xff] }
 0x159   :  { %v2930_v54 = vmul.f32 %v2929_v49, %v6172_v8  ;;  %v6236_v13 = vadd.f32 %v5972_v48, %v2005_v44  ;;  %v963_v10 = vmul.f32 %v6226_v26, %v6226_v26  ;;  %vm6240_vm11 = vcmp.eq.f32.partialorder %v3543_v58, 8.507059e+37 }
 0x15a   :  { %v3536_v40 = vsub.f32 1.0, %v3535_v6  ;;  %v6244_v14 = vmul.f32 0.0078125, %v566_v57  ;;  %v6252_v35 = vadd.f32 %v6249_v39, %v333_v28  ;;  %vm3539_vm12 = vweird.f32 %v6200_v4 }
 0x15b   :  { %v2920_v22 = vadd.f32 0.18741608, %v2919_v45  ;;  %v2931_v24 = vadd.f32 0.4994258, %v2930_v54  ;;  %v6256_v59 = vmul.f32 0.70710677, %v6236_v13  ;;  %vm3540_vm13 = vweird.f32 %v5164_v12 }
 0x15c   :  { %v5166_v9 = vpop.eup %5165  ;;  %v3537_v5 = vmul.f32 %v5164_v12, %v3536_v40  ;;  %v1027_v43 = vsub.f32 %v899_v21, %v963_v10  ;;  %v979_v16 = vmul.f32 %v6244_v14, %v6244_v14  ;;  %517 = vadd.xlane.f32.xlu1 %v6252_v35  ;;  %v3546_v34 = vor.u32 1.1754944e-38, %v3545_v0  ;;  %vm3541_vm14 = vmor %vm3539_vm12, %vm3540_vm13 }
 0x15d   :  { %v2295_v7 = vmul.f32 %v5166_v9, %v6219_v38  ;;  %v2303_v52 = vand.u32 2147483647, %v6219_v38  ;;  %v2932_v62 = vmul.f32 %v2931_v24, %v6172_v8  ;;  %v3551_v27 = vmul.f32 %v6256_v59, %v6256_v59  ;;  %v758_v24 = vpop.xlane.xlu0 %757 }
 0x15e   :  { %v3538_v31 = vadd.f32 %v5164_v12, %v3537_v5  ;;  %v1091_v58 = vmax.f32 %v1027_v43, 0.0  ;;  %v1043_v45 = vsub.f32 %v915_v37, %v979_v16  ;;  %v2305_v49 = vand.u32 2147483648, %v6219_v38 }
 0x15f   :  { %v2296_v21 = vsub.f32 1.0, %v2295_v7  ;;  %v2921_v44 = vmul.f32 %v2920_v22, %v6172_v8  ;;  %v6270_v57 = vadd.f32 1.0, %v2932_v62  ;;  %vm2300_vm15 = vweird.f32 %v5166_v9 }
 0x160   :  { %v3542_v28 = vsel %vm3541_vm14, %v5164_v12, %v3538_v31  ;;  %v6272_v6 = vmin.f32 %v3551_v27, 16.0  ;;  %v6274_v0 = vadd.f32 1e-06, %v1091_v58  ;;  %v1107_v4 = vmax.f32 %v1043_v45, 0.0 }
 0x161   :  { %v3547_v54 = vsel %vm6240_vm11, %v3546_v34, %v3542_v28  ;;  %v2297_v37 = vmul.f32 %v5166_v9, %v2296_v21  ;;  %5167 = vrcp.f32 %v6270_v57  ;;  %v2283_v40 = vmul.f32 %v2282_v47, %v6108_v11  ;;  %v6296_v28 = vpop.xlane.xlu2 %791 }
 0x162   :  { %v3548_v10 = vmul.f32 %v3547_v54, %v3523_v53  ;;  %vm2299_vm0 = vweird.f32 %v6219_v38  ;;  %v3553_v8 = vmul.f32 2.1237322e-06, %v6272_v6  ;;  %vm2304_vm1 = vcmp.eq.f32.partialorder %v2303_v52, 8.507059e+37 }
 0x163   :  { %v2298_v12 = vadd.f32 %v5166_v9, %v2297_v37  ;;  %v3564_v22 = vmul.f32 3.8918573e-05, %v6272_v6  ;;  %5169 = vrsqrt.f32 %v6274_v0  ;;  %vm2301_vm2 = vmor %vm2299_vm0, %vm2300_vm15  ;;  %v2306_v5 = vor.u32 1.1754944e-38, %v2305_v49 }
 0x164   :  { %v5097_v51 = vclamps-f32 %v3548_v10, 1.0  ;;  %v2922_v43 = vadd.f32 1.1283791, %v2921_v44  ;;  %v3554_v16 = vadd.f32 0.00028619796, %v3553_v8  ;;  %v715_v38 = vmul.f32 %v6047_v63, %v6047_v63  ;;  %v6306_v8 = vpop.xlane.xlu1 %503 }
 0x165   :  { %v2302_v53 = vsel %vm2301_vm2, %v5166_v9, %v2298_v12  ;;  %v3565_v34 = vadd.f32 0.001143296, %v3564_v22  ;;  %v6285_v11 = vadd.f32 1e-06, %v1107_v4  ;;  %v883_v62 = vmul.f32 0.0078125, %v758_v24  ;;  %v429_v12 = vpop.f32.mrf.mxu2 }
 0x166   :  { %v4823_v47 = vadd.f32 1.0, %v5097_v51  ;;  %v2307_v7 = vsel %vm2304_vm1, %v2306_v5, %v2302_v53  ;;  %v3555_v52 = vmul.f32 %v3554_v16, %v6272_v6  ;;  %v2104_v27 = vmul.f32 0.5, %v6094_v15  ;;  %805 = vadd.xlane.f32.xlu0 %v715_v38 }
 0x167   :  { %v5168_v31 = vpop.eup %5167  ;;  %v2308_v58 = vmul.f32 %v2307_v7, %v2283_v40  ;;  %v3566_v45 = vmul.f32 %v3565_v34, %v6272_v6  ;;  %5171 = vrsqrt.f32 %v6285_v11  ;;  %v2923_v21 = vmul.f32 %v2922_v43, %v6158_v1 }
 0x168   :  { %v4887_v9 = vmul.f32 %v4823_v47, %v6229_v46  ;;  %v2935_v49 = vmul.f32 %v5168_v31, %v6270_v57  ;;  %v3556_v44 = vadd.f32 0.0036580483, %v3555_v52  ;;  %vm2939_vm3 = vweird.f32 %v6270_v57 }
 0x169   :  { %v6298_v54 = vpop.eup %5169  ;;  %v5066_v37 = vclamps-f32 %v2308_v58, 1.0  ;;  %v3567_v15 = vadd.f32 0.014752088, %v3566_v45  ;;  %v1011_v4 = vsub.f32 %v883_v62, %v6216_v50  ;;  %v2943_v40 = vand.u32 2147483647, %v6270_v57 }
 0x16a   :  { %4951 = vst [vmem:[#allocation2 + $0x100] sm:$0xff] %v4887_v9  ;;  %v2936_v10 = vsub.f32 1.0, %v2935_v49  ;;  %v3557_v46 = vmul.f32 %v3556_v44, %v6272_v6  ;;  %v1446_v1 = vmul.f32 %v6298_v54, %v6274_v0  ;;  %v2945_v24 = vand.u32 2147483648, %v6270_v57  ;;  %v477_v9 = vpop.f32.mrf.mxu3 }
 0x16b   :  { %v4792_v22 = vadd.f32 1.0, %v5066_v37  ;;  %v3568_v51 = vmul.f32 %v3567_v15, %v6272_v6  ;;  %v1075_v5 = vmax.f32 %v1011_v4, 0.0  ;;  %vm2940_vm4 = vweird.f32 %v5168_v31 }
 0x16c   :  { %v2937_v43 = vmul.f32 %v5168_v31, %v2936_v10  ;;  %v3558_v50 = vadd.f32 0.05243302, %v3557_v46  ;;  %v1447_v16 = vmul.f32 %v6298_v54, %v1446_v1  ;;  %v6316_v7 = vadd.f32 %v6249_v39, %v429_v12  ;;  %vm2941_vm5 = vmor %vm2939_vm3, %vm2940_vm4 }
 0x16d   :  { %v6311_v53 = vpop.eup %5171  ;;  %v4856_v34 = vmul.f32 %v4792_v22, %v2104_v27  ;;  %v3569_v38 = vadd.f32 0.112945676, %v3568_v51  ;;  %v6313_v47 = vadd.f32 1e-06, %v1075_v5  ;;  %vm2944_vm6 = vcmp.eq.f32.partialorder %v2943_v40, 8.507059e+37  ;;  %v6333_v22 = vpop.xlane.xlu2 %567 }
 0x16e   :  { %9946 = vst [vmem:[#allocation26_spill] sm:$0xff] %v6316_v7  ;;  %v2938_v52 = vadd.f32 %v5168_v31, %v2937_v43  ;;  %v3559_v62 = vmul.f32 %v3558_v50, %v6272_v6  ;;  %v1448_v58 = vmul.f32 0.5, %v1447_v16  ;;  %v1606_v45 = vmul.f32 %v6311_v53, %v6285_v11  ;;  %581 = vadd.xlane.f32.xlu0 %v6316_v7 }
 0x16f   :  { %4920 = vst [vmem:[#allocation2 + $0x8] sm:$0xff] %v4856_v34  ;;  %v2946_v27 = vor.u32 1.1754944e-38, %v2945_v24  ;;  %v3570_v49 = vmul.f32 %v3569_v38, %v6272_v6  ;;  %5173 = vrsqrt.f32 %v6313_v47  ;;  %vm1452_vm7 = vweird.f32 %v6298_v54 }
 0x170   :  { %v2942_v44 = vsel %vm2941_vm5, %v5168_v31, %v2938_v52  ;;  %v1449_v37 = vsub.f32 1.5, %v1448_v58  ;;  %v1607_v15 = vmul.f32 %v6311_v53, %v1606_v45  ;;  %v3560_v10 = vadd.f32 0.18741608, %v3559_v62  ;;  %v384_v31 = vpop.f32.mrf.mxu1 }
 0x171   :  { %v2947_v4 = vsel %vm2944_vm6, %v2946_v27, %v2942_v44  ;;  %v3571_v46 = vadd.f32 0.4994258, %v3570_v49  ;;  %v6329_v57 = vadd.f32 %v6249_v39, %v477_v9  ;;  %vm1451_vm8 = vweird.f32 %v6274_v0 }
 0x172   :  { %v2948_v40 = vmul.f32 %v2947_v4, %v2923_v21  ;;  %v1450_v1 = vmul.f32 %v6298_v54, %v1449_v37  ;;  %v1608_v12 = vmul.f32 0.5, %v1607_v15  ;;  %v2120_v24 = vmul.f32 0.5, %v6139_v55  ;;  %vm1453_vm9 = vmor %vm1451_vm8, %vm1452_vm7  ;;  %v536_v55 = vpop.xlane.xlu1 %535 }
 0x173   :  { %9947 = vst [vmem:[#allocation27_spill] sm:$0xff] %v6329_v57  ;;  %v3572_v51 = vmul.f32 %v3571_v46, %v6272_v6  ;;  %v1155_v5 = vsub.f32 %v5738_v17, %v6226_v26  ;;  %613 = vadd.xlane.f32.xlu1 %v6329_v57  ;;  %v699_v21 = vmul.f32 %v6252_v35, %v6252_v35  ;;  %vm1612_vm10 = vweird.f32 %v6311_v53 }
 0x174   :  { %v5082_v0 = vclamps-f32 %v2948_v40, 1.0  ;;  %v1454_v43 = vsel %vm1453_vm9, %v6298_v54, %v1450_v1  ;;  %v1609_v50 = vsub.f32 1.5, %v1608_v12  ;;  %v3561_v34 = vmul.f32 %v3560_v10, %v6272_v6 }
 0x175   :  { %v5174_v16 = vpop.eup %5173  ;;  %v6347_v38 = vadd.f32 1.0, %v3572_v51  ;;  %v1923_v17 = vmul.f32 %v1454_v43, %v1155_v5  ;;  %773 = vadd.xlane.f32.xlu2 %v699_v21  ;;  %v6350_v26 = vadd.f32 %v6249_v39, %v384_v31  ;;  %vm1611_vm11 = vweird.f32 %v6285_v11  ;;  %v336_v11 = vpop.f32.mrf.mxu0 }
 0x176   :  { %v4808_v52 = vadd.f32 1.0, %v5082_v0  ;;  %v1610_v62 = vmul.f32 %v6311_v53, %v1609_v50  ;;  %v1286_v54 = vmul.f32 %v5174_v16, %v6313_v47  ;;  %v1171_v58 = vsub.f32 %v5742_v18, %v6244_v14  ;;  %vm1613_vm12 = vmor %vm1611_vm11, %vm1612_vm10  ;;  %v6383_v40 = vpop.xlane.xlu2 %505 }
 0x177   :  { %5175 = vrcp.f32 %v6347_v38  ;;  %v6359_v6 = vmul.f32 0.0078125, %v6306_v8  ;;  %551 = vadd.xlane.f32.xlu0 %v6350_v26  ;;  %v1990_v9 = vmul.f32 %v5962_v30, %v1923_v17  ;;  %v3562_v44 = vadd.f32 1.1283791, %v3561_v34 }
 0x178   :  { %v4872_v45 = vmul.f32 %v4808_v52, %v2120_v24  ;;  %v1614_v27 = vsel %vm1613_vm12, %v6311_v53, %v1610_v62  ;;  %v1287_v49 = vmul.f32 %v5174_v16, %v1286_v54  ;;  %v1139_v15 = vsub.f32 %v5708_v3, %v6132_v61 }
 0x179   :  { %v1939_v37 = vmul.f32 %v1614_v27, %v1171_v58  ;;  %v6367_v18 = vadd.f32 %v5972_v48, %v1990_v9  ;;  %v900_v14 = vmul.f32 0.0078125, %v6296_v28  ;;  %v6373_v10 = vmul.f32 %v6359_v6, %v6359_v6 }
 0x17a   :  { %4936 = vst [vmem:[#allocation2 + $0x88] sm:$0xff] %v4872_v45  ;;  %v1288_v8 = vmul.f32 0.5, %v1287_v49  ;;  %v6375_v53 = vmul.f32 0.0078125, %v536_v55  ;;  %v6378_v46 = vadd.f32 %v6249_v39, %v336_v11  ;;  %vm1292_vm13 = vweird.f32 %v5174_v16  ;;  %v432_v55 = vpop.f32.mrf.mxu2 }
 0x17b   :  { %v2006_v4 = vmul.f32 %v5962_v30, %v1939_v37  ;;  %v6381_v3 = vmul.f32 0.70710677, %v6367_v18  ;;  %v716_v28 = vmul.f32 %v6350_v26, %v6350_v26  ;;  %v3563_v12 = vmul.f32 %v3562_v44, %v6256_v59  ;;  %v760_v59 = vpop.xlane.xlu1 %759 }
 0x17c   :  { %9948 = vst [vmem:[#allocation28_spill] sm:$0xff] %v6378_v46  ;;  %v1289_v61 = vsub.f32 1.5, %v1288_v8  ;;  %vm1291_vm14 = vweird.f32 %v6313_v47  ;;  %v964_v24 = vmul.f32 %v6375_v53, %v6375_v53  ;;  %vm3579_vm15 = vweird.f32 %v6347_v38 }
 0x17d   :  { %v5176_v1 = vpop.eup %5175  ;;  %v6389_v31 = vadd.f32 %v5972_v48, %v2006_v4  ;;  %519 = vadd.xlane.f32.xlu2 %v6378_v46  ;;  %v2951_v5 = vmul.f32 %v6381_v3, %v6381_v3  ;;  %807 = vadd.xlane.f32.xlu1 %v716_v28  ;;  %v3583_v0 = vand.u32 2147483647, %v6347_v38  ;;  %v3585_v43 = vand.u32 2147483648, %v6347_v38  ;;  %vm1293_vm0 = vmor %vm1291_vm14, %vm1292_vm13 }
 0x17e   :  { %v3575_v51 = vmul.f32 %v5176_v1, %v6347_v38  ;;  %v1290_v21 = vmul.f32 %v5174_v16, %v1289_v61  ;;  %v1028_v50 = vsub.f32 %v900_v14, %v964_v24  ;;  %vm3580_vm1 = vweird.f32 %v5176_v1 }
 0x17f   :  { %v6402_v47 = vmul.f32 0.70710677, %v6389_v31  ;;  %v6405_v17 = vmin.f32 %v2951_v5, 16.0  ;;  %v884_v45 = vmul.f32 0.0078125, %v760_v59  ;;  %v6412_v11 = vadd.f32 %v6249_v39, %v432_v55  ;;  %vm3581_vm2 = vmor %vm3579_vm15, %vm3580_vm1 }
 0x180   :  { %v3576_v34 = vsub.f32 1.0, %v3575_v51  ;;  %v1294_v52 = vsel %vm1293_vm0, %v5174_v16, %v1290_v21  ;;  %v1092_v58 = vmax.f32 %v1028_v50, 0.0  ;;  %v3586_v44 = vor.u32 1.1754944e-38, %v3585_v43  ;;  %v6417_v16 = vpop.xlane.xlu0 %599 }
 0x181   :  { %v3591_v62 = vmul.f32 %v6402_v47, %v6402_v47  ;;  %v1907_v54 = vmul.f32 %v1294_v52, %v1139_v15  ;;  %v2953_v27 = vmul.f32 2.1237322e-06, %v6405_v17  ;;  %v2964_v49 = vmul.f32 3.8918573e-05, %v6405_v17 }
 0x182   :  { %v3577_v9 = vmul.f32 %v5176_v1, %v3576_v34  ;;  %v6419_v8 = vadd.f32 1e-06, %v1092_v58  ;;  %v1012_v28 = vsub.f32 %v884_v45, %v6373_v10  ;;  %vm3584_vm3 = vcmp.eq.f32.partialorder %v3583_v0, 8.507059e+37  ;;  %v538_v10 = vpop.xlane.xlu2 %537 }
 0x183   :  { %v6414_v37 = vmin.f32 %v3591_v62, 16.0  ;;  %v1974_v14 = vmul.f32 %v5962_v30, %v1907_v54  ;;  %v2954_v4 = vadd.f32 0.00028619796, %v2953_v27  ;;  %v2965_v61 = vadd.f32 0.001143296, %v2964_v49 }
 0x184   :  { %v3578_v15 = vadd.f32 %v5176_v1, %v3577_v9  ;;  %5177 = vrsqrt.f32 %v6419_v8  ;;  %v2136_v38 = vmul.f32 0.5, %v6236_v13  ;;  %v1076_v54 = vmax.f32 %v1012_v28, 0.0 }
 0x185   :  { %v3593_v24 = vmul.f32 2.1237322e-06, %v6414_v37  ;;  %v3604_v51 = vmul.f32 3.8918573e-05, %v6414_v37  ;;  %v6428_v5 = vadd.f32 %v5972_v48, %v1974_v14  ;;  %v2955_v21 = vmul.f32 %v2954_v4, %v6405_v17  ;;  %583 = vadd.xlane.f32.xlu1 %v6412_v11 }
 0x186   :  { %v3582_v30 = vsel %vm3581_vm2, %v5176_v1, %v3578_v15  ;;  %v2966_v59 = vmul.f32 %v2965_v61, %v6405_v17  ;;  %v6440_v58 = vmul.f32 0.0078125, %v538_v10  ;;  %v6448_v14 = vadd.f32 1e-06, %v1076_v54 }
 0x187   :  { %v3587_v43 = vsel %vm3584_vm3, %v3586_v44, %v3582_v30  ;;  %v3594_v50 = vadd.f32 0.00028619796, %v3593_v24  ;;  %v3605_v55 = vadd.f32 0.001143296, %v3604_v51  ;;  %v2956_v52 = vadd.f32 0.0036580483, %v2955_v21 }
 0x188   :  { %v3588_v34 = vmul.f32 %v3587_v43, %v3563_v12  ;;  %v2967_v48 = vadd.f32 0.014752088, %v2966_v59  ;;  %v6436_v62 = vmul.f32 0.70710677, %v6428_v5  ;;  %v794_v21 = vpop.xlane.xlu0 %793  ;;  %v965_v59 = vmul.f32 %v6440_v58, %v6440_v58 }
 0x189   :  { %v3595_v1 = vmul.f32 %v3594_v50, %v6414_v37  ;;  %v3606_v0 = vmul.f32 %v3605_v55, %v6414_v37  ;;  %v2957_v9 = vmul.f32 %v2956_v52, %v6405_v17  ;;  %5179 = vrsqrt.f32 %v6448_v14 }
 0x18a   :  { %v5098_v45 = vclamps-f32 %v3588_v34, 1.0  ;;  %v2968_v13 = vmul.f32 %v2967_v48, %v6405_v17  ;;  %v2311_v12 = vmul.f32 %v6436_v62, %v6436_v62  ;;  %v6446_v27 = vpop.eup %5177  ;;  %vm1461_vm4 = vweird.f32 %v6419_v8 }
 0x18b   :  { %v3596_v49 = vadd.f32 0.0036580483, %v3595_v1  ;;  %v3607_v44 = vadd.f32 0.014752088, %v3606_v0  ;;  %v2958_v4 = vadd.f32 0.05243302, %v2957_v9  ;;  %v1456_v30 = vmul.f32 %v6446_v27, %v6419_v8 }
 0x18c   :  { %v4824_v15 = vadd.f32 1.0, %v5098_v45  ;;  %v2969_v61 = vadd.f32 0.112945676, %v2968_v13  ;;  %v6450_v28 = vmin.f32 %v2311_v12, 16.0  ;;  %v901_v45 = vmul.f32 0.0078125, %v794_v21 }
 0x18d   :  { %v3597_v24 = vmul.f32 %v3596_v49, %v6414_v37  ;;  %v3608_v51 = vmul.f32 %v3607_v44, %v6414_v37  ;;  %v2959_v43 = vmul.f32 %v2958_v4, %v6405_v17  ;;  %v1457_v1 = vmul.f32 %v6446_v27, %v1456_v30 }
 0x18e   :  { %v4888_v10 = vmul.f32 %v4824_v15, %v2136_v38  ;;  %v2970_v50 = vmul.f32 %v2969_v61, %v6405_v17  ;;  %v2313_v55 = vmul.f32 2.1237322e-06, %v6450_v28  ;;  %v2324_v48 = vmul.f32 3.8918573e-05, %v6450_v28 }
 0x18f   :  { %v3598_v34 = vadd.f32 0.05243302, %v3597_v24  ;;  %v3609_v52 = vadd.f32 0.112945676, %v3608_v51  ;;  %v2960_v0 = vadd.f32 0.18741608, %v2959_v43  ;;  %v1029_v4 = vsub.f32 %v901_v45, %v965_v59 }
 0x190   :  { %4952 = vst [vmem:[#allocation2 + $0x108] sm:$0xff] %v4888_v10  ;;  %v2971_v54 = vadd.f32 0.4994258, %v2970_v50  ;;  %v2314_v13 = vadd.f32 0.00028619796, %v2313_v55  ;;  %v1458_v15 = vmul.f32 0.5, %v1457_v1  ;;  %vm1462_vm5 = vweird.f32 %v6446_v27 }
 0x191   :  { %v3599_v38 = vmul.f32 %v3598_v34, %v6414_v37  ;;  %v3610_v9 = vmul.f32 %v3609_v52, %v6414_v37  ;;  %v2325_v12 = vadd.f32 0.001143296, %v2324_v48  ;;  %v2961_v61 = vmul.f32 %v2960_v0, %v6405_v17  ;;  %vm1463_vm6 = vmor %vm1461_vm4, %vm1462_vm5 }
 0x192   :  { %v2972_v49 = vmul.f32 %v2971_v54, %v6405_v17  ;;  %v2315_v51 = vmul.f32 %v2314_v13, %v6450_v28  ;;  %v1459_v43 = vsub.f32 1.5, %v1458_v15  ;;  %v6475_v50 = vmul.f32 0.0078125, %v6383_v40  ;;  %v6481_v17 = vpop.eup %5179 }
 0x193   :  { %v3611_v24 = vadd.f32 0.4994258, %v3610_v9  ;;  %v2326_v30 = vmul.f32 %v2325_v12, %v6450_v28  ;;  %v3600_v10 = vadd.f32 0.18741608, %v3599_v38  ;;  %v6478_v55 = vmul.f32 0.5, %v6367_v18 }
 0x194   :  { %v6472_v21 = vadd.f32 1.0, %v2972_v49  ;;  %v2316_v59 = vadd.f32 0.0036580483, %v2315_v51  ;;  %v1156_v48 = vsub.f32 %v5762_v25, %v6375_v53  ;;  %v2962_v40 = vadd.f32 1.1283791, %v2961_v61 }
 0x195   :  { %v3612_v34 = vmul.f32 %v3611_v24, %v6414_v37  ;;  %v2327_v52 = vadd.f32 0.014752088, %v2326_v30  ;;  %v1093_v0 = vmax.f32 %v1029_v4, 0.0  ;;  %v3601_v54 = vmul.f32 %v3600_v10, %v6414_v37 }
 0x196   :  { %5181 = vrcp.f32 %v6472_v21  ;;  %v2317_v18 = vmul.f32 %v2316_v59, %v6450_v28  ;;  %v1460_v38 = vmul.f32 %v6446_v27, %v1459_v43  ;;  %v1296_v9 = vmul.f32 %v6481_v17, %v6448_v14  ;;  %v6525_v59 = vld [vmem:[%s9828_s3] ss:$0 sm:$0xff] }
 0x197   :  { %v6488_v1 = vadd.f32 1.0, %v3612_v34  ;;  %v2328_v45 = vmul.f32 %v2327_v52, %v6450_v28  ;;  %v2983_v25 = vand.u32 2147483647, %v6472_v21  ;;  %v6498_v53 = vmul.f32 0.5, %v6389_v31 }
 0x198   :  { %v6503_v8 = vmul.f32 %v6475_v50, %v6475_v50  ;;  %v2985_v37 = vand.u32 2147483648, %v6472_v21  ;;  %v2318_v13 = vadd.f32 0.05243302, %v2317_v18  ;;  %v1464_v12 = vsel %vm1463_vm6, %v6446_v27, %v1460_v38  ;;  %v480_v27 = vpop.f32.mrf.mxu3  ;;  %v6532_v38 = vld [vmem:[%s9829_s4] ss:$0 sm:$0xff] }
 0x199   :  { %5183 = vrcp.f32 %v6488_v1  ;;  %vm1301_vm7 = vweird.f32 %v6448_v14  ;;  %v2963_v31 = vmul.f32 %v2962_v40, %v6381_v3  ;;  %v2329_v15 = vadd.f32 0.112945676, %v2328_v45 }
 0x19a   :  { %v1924_v4 = vmul.f32 %v1464_v12, %v1156_v48  ;;  %v1297_v61 = vmul.f32 %v6481_v17, %v1296_v9  ;;  %vm2979_vm8 = vweird.f32 %v6472_v21  ;;  %v3602_v51 = vadd.f32 1.1283791, %v3601_v54 }
 0x19b   :  { %v2319_v30 = vmul.f32 %v2318_v13, %v6450_v28  ;;  %v6514_v10 = vadd.f32 1e-06, %v1093_v0  ;;  %vm6517_vm9 = vcmp.eq.f32.partialorder %v2983_v25, 8.507059e+37  ;;  %v2330_v3 = vmul.f32 %v2329_v15, %v6450_v28 }
 0x19c   :  { %v5182_v24 = vpop.eup %5181  ;;  %v1991_v52 = vmul.f32 %v6525_v59, %v1924_v4  ;;  %v2986_v48 = vor.u32 1.1754944e-38, %v2985_v37  ;;  %v1298_v18 = vmul.f32 0.5, %v1297_v61  ;;  %v6538_v25 = vadd.f32 %v6249_v39, %v480_v27 }
 0x19d   :  { %v2975_v43 = vmul.f32 %v5182_v24, %v6472_v21  ;;  %v2320_v40 = vadd.f32 0.18741608, %v2319_v30  ;;  %5185 = vrsqrt.f32 %v6514_v10  ;;  %v2331_v45 = vadd.f32 0.4994258, %v2330_v3 }
 0x19e   :  { %v6535_v9 = vadd.f32 %v6532_v38, %v1991_v52  ;;  %9951 = vst [vmem:[#allocation29_spill] sm:$0xff] %v6538_v25  ;;  %v1299_v12 = vsub.f32 1.5, %v1298_v18  ;;  %vm1302_vm10 = vweird.f32 %v6481_v17  ;;  %vm2980_vm11 = vweird.f32 %v5182_v24  ;;  %615 = vadd.xlane.f32.xlu2 %v6538_v25 }
 0x19f   :  { %v5184_v0 = vpop.eup %5183  ;;  %v2976_v54 = vsub.f32 1.0, %v2975_v43  ;;  %v2321_v13 = vmul.f32 %v2320_v40, %v6450_v28  ;;  %v2332_v4 = vmul.f32 %v2331_v45, %v6450_v28  ;;  %v3623_v27 = vand.u32 2147483647, %v6488_v1  ;;  %vm6559_vm12 = vmor %vm1301_vm7, %vm1302_vm10 }
 0x1a0   :  { %v3615_v37 = vmul.f32 %v5184_v0, %v6488_v1  ;;  %v6545_v61 = vmul.f32 0.70710677, %v6535_v9  ;;  %v1300_v43 = vmul.f32 %v6481_v17, %v1299_v12  ;;  %v700_v3 = vmul.f32 %v6378_v46, %v6378_v46  ;;  %vm2981_vm13 = vmor %vm2979_vm8, %vm2980_vm11 }
 0x1a1   :  { %v2977_v15 = vmul.f32 %v5182_v24, %v2976_v54  ;;  %v3625_v40 = vand.u32 2147483648, %v6488_v1  ;;  %v6553_v18 = vadd.f32 1.0, %v2332_v4  ;;  %vm3620_vm14 = vweird.f32 %v5184_v0 }
 0x1a2   :  { %v3616_v30 = vsub.f32 1.0, %v3615_v37  ;;  %v2991_v28 = vmul.f32 %v6545_v61, %v6545_v61  ;;  %v2322_v12 = vadd.f32 1.1283791, %v2321_v13  ;;  %775 = vadd.xlane.f32.xlu0 %v700_v3  ;;  %v3603_v14 = vmul.f32 %v3602_v51, %v6402_v47 }
 0x1a3   :  { %v2978_v52 = vadd.f32 %v5182_v24, %v2977_v15  ;;  %v6563_v45 = vpop.eup %5185  ;;  %v1304_v15 = vsel %vm6559_vm12, %v6481_v17, %v1300_v43  ;;  %vm3619_vm15 = vweird.f32 %v6488_v1  ;;  %5187 = vrcp.f32 %v6553_v18 }
 0x1a4   :  { %v3617_v37 = vmul.f32 %v5184_v0, %v3616_v30  ;;  %vm3624_vm0 = vcmp.eq.f32.partialorder %v3623_v27, 8.507059e+37  ;;  %v6575_v30 = vmin.f32 %v2991_v28, 16.0  ;;  %vm3621_vm1 = vmor %vm3619_vm15, %vm3620_vm14  ;;  %v3626_v44 = vor.u32 1.1754944e-38, %v3625_v40 }
 0x1a5   :  { %v2982_v4 = vsel %vm2981_vm13, %v5182_v24, %v2978_v52  ;;  %v9954_v17 = vsub.f32 %v5781_v32, %v6359_v6  ;;  %v1466_v47 = vmul.f32 %v6563_v45, %v6514_v10  ;;  %v6583_v51 = vmul.f32 %v2322_v12, %v6436_v62 }
 0x1a6   :  { %v2987_v49 = vsel %vm6517_vm9, %v2986_v48, %v2982_v4  ;;  %v3618_v21 = vadd.f32 %v5184_v0, %v3617_v37  ;;  %v2993_v34 = vmul.f32 2.1237322e-06, %v6575_v30  ;;  %v3004_v48 = vmul.f32 3.8918573e-05, %v6575_v30 }
 0x1a7   :  { %v2988_v13 = vmul.f32 %v2987_v49, %v2963_v31  ;;  %v1908_v24 = vmul.f32 %v1304_v15, %v9954_v17  ;;  %vm1471_vm2 = vweird.f32 %v6514_v10  ;;  %v1467_v32 = vmul.f32 %v6563_v45, %v1466_v47  ;;  %v6598_v15 = vpop.xlane.xlu0 %569 }
 0x1a8   :  { %v3622_v1 = vsel %vm3621_vm1, %v5184_v0, %v3618_v21  ;;  %vm2339_vm3 = vweird.f32 %v6553_v18  ;;  %v2994_v43 = vadd.f32 0.00028619796, %v2993_v34  ;;  %v3005_v0 = vadd.f32 0.001143296, %v3004_v48 }
 0x1a9   :  { %v5083_v49 = vclamps-f32 %v2988_v13, 1.0  ;;  %v3627_v31 = vsel %vm3624_vm0, %v3626_v44, %v3622_v1  ;;  %v1975_v27 = vmul.f32 %v6525_v59, %v1908_v24  ;;  %v5188_v3 = vpop.eup %5187  ;;  %v2343_v52 = vand.u32 2147483647, %v6553_v18  ;;  %v339_v1 = vpop.f32.mrf.mxu0 }
 0x1aa   :  { %v3628_v6 = vmul.f32 %v3627_v31, %v3603_v14  ;;  %v1468_v28 = vmul.f32 0.5, %v1467_v32  ;;  %v2335_v44 = vmul.f32 %v5188_v3, %v6553_v18  ;;  %v2345_v37 = vand.u32 2147483648, %v6553_v18 }
 0x1ab   :  { %v4809_v62 = vadd.f32 1.0, %v5083_v49  ;;  %v6593_v40 = vadd.f32 %v6532_v38, %v1975_v27  ;;  %v2995_v12 = vmul.f32 %v2994_v43, %v6575_v30  ;;  %v3006_v14 = vmul.f32 %v3005_v0, %v6575_v30  ;;  %v387_v49 = vpop.f32.mrf.mxu1 }
 0x1ac   :  { %v5099_v54 = vclamps-f32 %v3628_v6, 1.0  ;;  %vm1472_vm4 = vweird.f32 %v6563_v45  ;;  %v2336_v17 = vsub.f32 1.0, %v2335_v44  ;;  %v1469_v47 = vsub.f32 1.5, %v1468_v28  ;;  %v762_v28 = vpop.xlane.xlu2 %761 }
 0x1ad   :  { %v4873_v4 = vmul.f32 %v4809_v62, %v6478_v55  ;;  %v6603_v21 = vmul.f32 0.70710677, %v6593_v40  ;;  %v2996_v24 = vadd.f32 0.0036580483, %v2995_v12  ;;  %vm2340_vm5 = vweird.f32 %v5188_v3  ;;  %vm1473_vm7 = vmor %vm1471_vm2, %vm1472_vm4  ;;  %v6626_v12 = vpop.xlane.xlu1 %601 }
 0x1ae   :  { %v4825_v13 = vadd.f32 1.0, %v5099_v54  ;;  %vm6606_vm6 = vcmp.eq.f32.partialorder %v2343_v52, 8.507059e+37  ;;  %v3007_v48 = vadd.f32 0.014752088, %v3006_v14  ;;  %v2337_v27 = vmul.f32 %v5188_v3, %v2336_v17  ;;  %vm2341_vm8 = vmor %vm2339_vm3, %vm2340_vm5 }
 0x1af   :  { %4937 = vst [vmem:[#allocation2 + $0x90] sm:$0xff] %v4873_v4  ;;  %v2351_v55 = vmul.f32 %v6603_v21, %v6603_v21  ;;  %v2997_v32 = vmul.f32 %v2996_v24, %v6575_v30  ;;  %v1470_v6 = vmul.f32 %v6563_v45, %v1469_v47  ;;  %v2346_v43 = vor.u32 1.1754944e-38, %v2345_v37 }
 0x1b0   :  { %v4889_v31 = vmul.f32 %v4825_v13, %v6498_v53  ;;  %v3008_v0 = vmul.f32 %v3007_v48, %v6575_v30  ;;  %v6623_v52 = vadd.f32 %v6249_v39, %v339_v1  ;;  %v2338_v53 = vadd.f32 %v5188_v3, %v2337_v27 }
 0x1b1   :  { %v6616_v62 = vmin.f32 %v2351_v55, 16.0  ;;  %v2998_v54 = vadd.f32 0.05243302, %v2997_v32  ;;  %v1474_v44 = vsel %vm1473_vm7, %v6563_v45, %v1470_v6  ;;  %v6629_v37 = vadd.f32 %v6249_v39, %v387_v49 }
 0x1b2   :  { %9957 = vst [vmem:[#allocation30_spill] sm:$0xff] %v6623_v52  ;;  %v3009_v10 = vadd.f32 0.112945676, %v3008_v0  ;;  %v9959_v13 = vsub.f32 %v5807_v42, %v6440_v58  ;;  %521 = vadd.xlane.f32.xlu0 %v6623_v52  ;;  %v2342_v45 = vsel %vm2341_vm8, %v5188_v3, %v2338_v53  ;;  %v885_v47 = vmul.f32 0.0078125, %v762_v28 }
 0x1b3   :  { %4953 = vst [vmem:[#allocation2 + $0x110] sm:$0xff] %v4889_v31  ;;  %v2353_v4 = vmul.f32 2.1237322e-06, %v6616_v62  ;;  %v2364_v14 = vmul.f32 3.8918573e-05, %v6616_v62  ;;  %v2999_v24 = vmul.f32 %v2998_v54, %v6575_v30  ;;  %553 = vadd.xlane.f32.xlu1 %v6629_v37  ;;  %v717_v18 = vmul.f32 %v6629_v37, %v6629_v37  ;;  %v540_v31 = vpop.xlane.xlu0 %539 }
 0x1b4   :  { %9958 = vst [vmem:[#allocation31_spill] sm:$0xff] %v6629_v37  ;;  %v1925_v17 = vmul.f32 %v1474_v44, %v9959_v13  ;;  %v2347_v1 = vsel %vm6606_vm6, %v2346_v43, %v2342_v45  ;;  %v3010_v48 = vmul.f32 %v3009_v10, %v6575_v30  ;;  %v1013_v3 = vsub.f32 %v885_v47, %v6503_v8 }
 0x1b5   :  { %v2354_v55 = vadd.f32 0.00028619796, %v2353_v4  ;;  %v2365_v49 = vadd.f32 0.001143296, %v2364_v14  ;;  %v2348_v42 = vmul.f32 %v2347_v1, %v6583_v51  ;;  %809 = vadd.xlane.f32.xlu2 %v717_v18  ;;  %v3000_v34 = vadd.f32 0.18741608, %v2999_v24  ;;  %v796_v1 = vpop.xlane.xlu1 %795 }
 0x1b6   :  { %v1992_v58 = vmul.f32 %v6525_v59, %v1925_v17  ;;  %v3011_v27 = vadd.f32 0.4994258, %v3010_v48  ;;  %v1077_v28 = vmax.f32 %v1013_v3, 0.0  ;;  %v6656_v44 = vmul.f32 0.0078125, %v540_v31 }
 0x1b7   :  { %v2355_v32 = vmul.f32 %v2354_v55, %v6616_v62  ;;  %v2366_v6 = vmul.f32 %v2365_v49, %v6616_v62  ;;  %v5067_v0 = vclamps-f32 %v2348_v42, 1.0  ;;  %v2105_v8 = vmul.f32 0.5, %v6428_v5  ;;  %v483_v49 = vpop.f32.mrf.mxu3  ;;  %v435_v42 = vpop.f32.mrf.mxu2 }
 0x1b8   :  { %v6653_v43 = vadd.f32 %v6532_v38, %v1992_v58  ;;  %v3012_v53 = vmul.f32 %v3011_v27, %v6575_v30  ;;  %v6666_v45 = vadd.f32 1e-06, %v1077_v28  ;;  %v3001_v47 = vmul.f32 %v3000_v34, %v6575_v30 }
 0x1b9   :  { %v2356_v51 = vadd.f32 0.0036580483, %v2355_v32  ;;  %v2367_v54 = vadd.f32 0.014752088, %v2366_v6  ;;  %v4793_v10 = vadd.f32 1.0, %v5067_v0  ;;  %v966_v5 = vmul.f32 %v6656_v44, %v6656_v44 }
 0x1ba   :  { %v6660_v4 = vmul.f32 0.70710677, %v6653_v43  ;;  %v6662_v14 = vadd.f32 1.0, %v3012_v53  ;;  %v902_v3 = vmul.f32 0.0078125, %v796_v1  ;;  %v3002_v30 = vadd.f32 1.1283791, %v3001_v47 }
 0x1bb   :  { %v2357_v13 = vmul.f32 %v2356_v51, %v6616_v62  ;;  %v2368_v17 = vmul.f32 %v2367_v54, %v6616_v62  ;;  %v4857_v24 = vmul.f32 %v4793_v10, %v2105_v8  ;;  %v6681_v0 = vadd.f32 %v6249_v39, %v483_v49 }
 0x1bc   :  { %v3031_v18 = vmul.f32 %v6660_v4, %v6660_v4  ;;  %5189 = vrcp.f32 %v6662_v14  ;;  %v1030_v6 = vsub.f32 %v902_v3, %v966_v5  ;;  %v6684_v34 = vadd.f32 %v6249_v39, %v435_v42 }
 0x1bd   :  { %4921 = vst [vmem:[#allocation2 + $0x10] sm:$0xff] %v4857_v24  ;;  %v2369_v48 = vadd.f32 0.112945676, %v2368_v17  ;;  %5191 = vrsqrt.f32 %v6666_v45  ;;  %v2358_v58 = vadd.f32 0.05243302, %v2357_v13  ;;  %v701_v54 = vmul.f32 %v6623_v52, %v6623_v52  ;;  %617 = vadd.xlane.f32.xlu0 %v6681_v0  ;;  %v6737_v37 = vpop.xlane.xlu1 %571 }
 0x1be   :  { %v6674_v55 = vmin.f32 %v3031_v18, 16.0  ;;  %9960 = vst [vmem:[#allocation32_spill] sm:$0xff] %v6681_v0  ;;  %v6691_v10 = vmul.f32 0.5, %v6535_v9  ;;  %v1094_v24 = vmax.f32 %v1030_v6, 0.0  ;;  %585 = vadd.xlane.f32.xlu2 %v6684_v34  ;;  %v3003_v18 = vmul.f32 %v3002_v30, %v6545_v61 }
 0x1bf   :  { %v2370_v31 = vmul.f32 %v2369_v48, %v6616_v62  ;;  %v2359_v13 = vmul.f32 %v2358_v58, %v6616_v62  ;;  %vm3019_vm9 = vweird.f32 %v6662_v14  ;;  %777 = vadd.xlane.f32.xlu1 %v701_v54  ;;  %v3023_v9 = vand.u32 2147483647, %v6662_v14  ;;  %v508_v58 = vpop.xlane.xlu2 %507 }
 0x1c0   :  { %v3033_v27 = vmul.f32 2.1237322e-06, %v6674_v55  ;;  %v3044_v32 = vmul.f32 3.8918573e-05, %v6674_v55  ;;  %v3025_v61 = vand.u32 2147483648, %v6662_v14  ;;  %vm1311_vm14 = vweird.f32 %v6666_v45 }
 0x1c1   :  { %v2371_v53 = vadd.f32 0.4994258, %v2370_v31  ;;  %v6710_v31 = vadd.f32 1e-06, %v1094_v24  ;;  %vm6716_vm11 = vcmp.eq.f32.partialorder %v3023_v9, 8.507059e+37 }
 0x1c2   :  { %v3034_v51 = vadd.f32 0.00028619796, %v3033_v27  ;;  %v5190_v8 = vpop.eup %5189  ;;  %v3045_v17 = vadd.f32 0.001143296, %v3044_v32  ;;  %v390_v27 = vpop.f32.mrf.mxu1  ;;  %v2360_v32 = vadd.f32 0.18741608, %v2359_v13 }
 0x1c3   :  { %v6696_v47 = vpop.eup %5191  ;;  %v3015_v1 = vmul.f32 %v5190_v8, %v6662_v14  ;;  %v2372_v5 = vmul.f32 %v2371_v53, %v6616_v62  ;;  %vm3020_vm10 = vweird.f32 %v5190_v8  ;;  %v6723_v13 = vadd.f32 %v6249_v39, %v390_v27 }
 0x1c4   :  { %v3035_v48 = vmul.f32 %v3034_v51, %v6674_v55  ;;  %v3046_v49 = vmul.f32 %v3045_v17, %v6674_v55  ;;  %v1306_v42 = vmul.f32 %v6696_v47, %v6666_v45  ;;  %v6714_v17 = vmul.f32 0.0078125, %v508_v58  ;;  %vm3021_vm12 = vmor %vm3019_vm9, %vm3020_vm10 }
 0x1c5   :  { %v3016_v3 = vsub.f32 1.0, %v3015_v1  ;;  %v6708_v30 = vadd.f32 1.0, %v2372_v5  ;;  %9963 = vst [vmem:[#allocation33_spill] sm:$0xff] %v6723_v13  ;;  %v3026_v9 = vor.u32 1.1754944e-38, %v3025_v61  ;;  %vm1312_vm13 = vweird.f32 %v6696_v47 }
 0x1c6   :  { %v3036_v6 = vadd.f32 0.0036580483, %v3035_v48  ;;  %v3047_v53 = vadd.f32 0.014752088, %v3046_v49  ;;  %v1307_v54 = vmul.f32 %v6696_v47, %v1306_v42  ;;  %v764_v48 = vpop.xlane.xlu0 %763  ;;  %v950_v58 = vmul.f32 %v6714_v17, %v6714_v17  ;;  %555 = vadd.xlane.f32.xlu2 %v6723_v13  ;;  %vm1313_vm15 = vmor %vm1311_vm14, %vm1312_vm13 }
 0x1c7   :  { %v3017_v51 = vmul.f32 %v5190_v8, %v3016_v3  ;;  %5193 = vrcp.f32 %v6708_v30  ;;  %v342_v3 = vpop.f32.mrf.mxu0  ;;  %vm2379_vm1 = vweird.f32 %v6708_v30  ;;  %vm1481_vm4 = vweird.f32 %v6710_v31 }
 0x1c8   :  { %v3037_v5 = vmul.f32 %v3036_v6, %v6674_v55  ;;  %v3048_v24 = vmul.f32 %v3047_v53, %v6674_v55  ;;  %v1308_v42 = vmul.f32 0.5, %v1307_v54  ;;  %5195 = vrsqrt.f32 %v6710_v31 }
 0x1c9   :  { %v3018_v49 = vadd.f32 %v5190_v8, %v3017_v51  ;;  %v2361_v6 = vmul.f32 %v2360_v32, %v6616_v62  ;;  %v886_v54 = vmul.f32 0.0078125, %v764_v48  ;;  %v6742_v62 = vld [vmem:[%s9827_s2] ss:$0 sm:$0xff]  ;;  %s5447_s2 = smov 8  }
 0x1ca   :  { %v3038_v28 = vadd.f32 0.05243302, %v3037_v5  ;;  %v3049_v53 = vadd.f32 0.112945676, %v3048_v24  ;;  %v1309_v27 = vsub.f32 1.5, %v1308_v42 }
 0x1cb   :  { %v3022_v39 = vsel %vm3021_vm12, %v5190_v8, %v3018_v49  ;;  %v6745_v8 = vadd.f32 %v6742_v62, %v342_v3  ;;  %v1014_v1 = vsub.f32 %v886_v54, %v950_v58  ;;  %v2385_v58 = vand.u32 2147483648, %v6708_v30 }
 0x1cc   :  { %v3027_v51 = vsel %vm6716_vm11, %v3026_v9, %v3022_v39  ;;  %v3039_v52 = vmul.f32 %v3038_v28, %v6674_v55  ;;  %v3050_v14 = vmul.f32 %v3049_v53, %v6674_v55  ;;  %v1310_v5 = vmul.f32 %v6696_v47, %v1309_v27 }
 0x1cd   :  { %9964 = vst [vmem:[#allocation34_spill] sm:$0xff] %v6745_v8  ;;  %v5194_v61 = vpop.eup %5193  ;;  %v3028_v32 = vmul.f32 %v3027_v51, %v3003_v18  ;;  %v2362_v28 = vadd.f32 1.1283791, %v2361_v6  ;;  %523 = vadd.xlane.f32.xlu1 %v6745_v8  ;;  %v2383_v18 = vand.u32 2147483647, %v6708_v30  ;;  %v1078_v53 = vmax.f32 %v1014_v1, 0.0  ;;  %v6770_v1 = vpop.xlane.xlu2 %603 }
 0x1ce   :  { %v2375_v24 = vmul.f32 %v5194_v61, %v6708_v30  ;;  %v3040_v48 = vadd.f32 0.18741608, %v3039_v52  ;;  %v3051_v49 = vadd.f32 0.4994258, %v3050_v14  ;;  %v6753_v42 = vpop.eup %5195  ;;  %v1314_v9 = vsel %vm1313_vm15, %v6696_v47, %v1310_v5 }
 0x1cf   :  { %v5084_v3 = vclamps-f32 %v3028_v32, 1.0  ;;  %v9965_v52 = vsub.f32 %v5802_v41, %v6475_v50  ;;  %v1476_v51 = vmul.f32 %v6753_v42, %v6710_v31  ;;  %v6765_v14 = vadd.f32 1e-06, %v1078_v53 }
 0x1d0   :  { %v2376_v45 = vsub.f32 1.0, %v2375_v24  ;;  %v3052_v6 = vmul.f32 %v3051_v49, %v6674_v55  ;;  %v3041_v54 = vmul.f32 %v3040_v48, %v6674_v55  ;;  %vm2380_vm0 = vweird.f32 %v5194_v61 }
 0x1d1   :  { %v1909_v39 = vmul.f32 %v1314_v9, %v9965_v52  ;;  %v4810_v27 = vadd.f32 1.0, %v5084_v3  ;;  %v1477_v41 = vmul.f32 %v6753_v42, %v1476_v51  ;;  %5197 = vrsqrt.f32 %v6765_v14  ;;  %vm2381_vm2 = vmor %vm2379_vm1, %vm2380_vm0 }
 0x1d2   :  { %v2377_v32 = vmul.f32 %v5194_v61, %v2376_v45  ;;  %v6767_v47 = vadd.f32 1.0, %v3052_v6  ;;  %v2106_v50 = vmul.f32 0.5, %v6593_v40  ;;  %v2386_v48 = vor.u32 1.1754944e-38, %v2385_v58  ;;  %v542_v45 = vpop.xlane.xlu1 %541 }
 0x1d3   :  { %v1976_v5 = vmul.f32 %v6525_v59, %v1909_v39  ;;  %v4874_v24 = vmul.f32 %v4810_v27, %v6691_v10  ;;  %v3042_v49 = vadd.f32 1.1283791, %v3041_v54  ;;  %v1478_v9 = vmul.f32 0.5, %v1477_v41 }
 0x1d4   :  { %v2378_v55 = vadd.f32 %v5194_v61, %v2377_v32  ;;  %5199 = vrcp.f32 %v6767_v47  ;;  %v2363_v10 = vmul.f32 %v2362_v28, %v6603_v21  ;;  %vm2384_vm3 = vcmp.eq.f32.partialorder %v2383_v18, 8.507059e+37 }
 0x1d5   :  { %4938 = vst [vmem:[#allocation2 + $0x98] sm:$0xff] %v4874_v24  ;;  %v6779_v3 = vadd.f32 %v6532_v38, %v1976_v5  ;;  %v718_v40 = vmul.f32 %v6723_v13, %v6723_v13  ;;  %v1158_v30 = vsub.f32 %v5842_v60, %v6656_v44  ;;  %v1479_v21 = vsub.f32 1.5, %v1478_v9  ;;  %v486_v9 = vpop.f32.mrf.mxu3 }
 0x1d6   :  { %v2382_v53 = vsel %vm2381_vm2, %v5194_v61, %v2378_v55  ;;  %vm1482_vm5 = vweird.f32 %v6753_v42  ;;  %v6796_v28 = vmul.f32 %v3042_v49, %v6660_v4  ;;  %vm3059_vm6 = vweird.f32 %v6767_v47  ;;  %v438_v4 = vpop.f32.mrf.mxu2 }
 0x1d7   :  { %v2387_v6 = vsel %vm2384_vm3, %v2386_v48, %v2382_v53  ;;  %v6790_v39 = vmul.f32 0.70710677, %v6779_v3  ;;  %811 = vadd.xlane.f32.xlu0 %v718_v40  ;;  %v6793_v61 = vpop.eup %5197  ;;  %v3063_v60 = vand.u32 2147483647, %v6767_v47  ;;  %v6800_v44 = vmul.f32 0.0078125, %v542_v45  ;;  %vm1483_vm9 = vmor %vm1481_vm4, %vm1482_vm5 }
 0x1d8   :  { %v2388_v52 = vmul.f32 %v2387_v6, %v2363_v10  ;;  %v1480_v51 = vmul.f32 %v6753_v42, %v1479_v21  ;;  %v1316_v32 = vmul.f32 %v6793_v61, %v6765_v14  ;;  %vm1321_vm7 = vweird.f32 %v6765_v14  ;;  %v798_v10 = vpop.xlane.xlu2 %797 }
 0x1d9   :  { %v2391_v54 = vmul.f32 %v6790_v39, %v6790_v39  ;;  %v3065_v24 = vand.u32 2147483648, %v6767_v47  ;;  %vm1322_vm10 = vweird.f32 %v6793_v61  ;;  %v967_v45 = vmul.f32 %v6800_v44, %v6800_v44 }
 0x1da   :  { %v5200_v18 = vpop.eup %5199  ;;  %v5068_v27 = vclamps-f32 %v2388_v52, 1.0  ;;  %v1484_v48 = vsel %vm1483_vm9, %v6753_v42, %v1480_v51  ;;  %v1317_v49 = vmul.f32 %v6793_v61, %v1316_v32  ;;  %v6822_v6 = vadd.f32 %v6742_v62, %v438_v4  ;;  %vm1323_vm13 = vmor %vm1321_vm7, %vm1322_vm10  ;;  %v766_v14 = vpop.xlane.xlu1 %765 }
 0x1db   :  { %v3055_v5 = vmul.f32 %v5200_v18, %v6767_v47  ;;  %vm3060_vm8 = vweird.f32 %v5200_v18  ;;  %v6815_v55 = vmin.f32 %v2391_v54, 16.0  ;;  %v1926_v40 = vmul.f32 %v1484_v48, %v1158_v30  ;;  %v510_v54 = vpop.xlane.xlu0 %509 }
 0x1dc   :  { %v4794_v41 = vadd.f32 1.0, %v5068_v27  ;;  %9966 = vst [vmem:[#allocation35_spill] sm:$0xff] %v6822_v6  ;;  %v1318_v27 = vmul.f32 0.5, %v1317_v49  ;;  %v6828_v32 = vadd.f32 %v6742_v62, %v486_v9  ;;  %v903_v30 = vmul.f32 0.0078125, %v798_v10  ;;  %vm3061_vm11 = vmor %vm3059_vm6, %vm3060_vm8 }
 0x1dd   :  { %v3056_v53 = vsub.f32 1.0, %v3055_v5  ;;  %v2393_v52 = vmul.f32 2.1237322e-06, %v6815_v55  ;;  %v2404_v21 = vmul.f32 3.8918573e-05, %v6815_v55  ;;  %v1993_v51 = vmul.f32 %v6525_v59, %v1926_v40 }
 0x1de   :  { %v4858_v31 = vmul.f32 %v4794_v41, %v2106_v50  ;;  %9967 = vst [vmem:[#allocation36_spill] sm:$0xff] %v6828_v32  ;;  %v1319_v58 = vsub.f32 1.5, %v1318_v27  ;;  %v702_v50 = vmul.f32 %v6745_v8, %v6745_v8  ;;  %v6836_v49 = vmul.f32 0.0078125, %v510_v54  ;;  %619 = vadd.xlane.f32.xlu1 %v6828_v32 }
 0x1df   :  { %v3057_v42 = vmul.f32 %v5200_v18, %v3056_v53  ;;  %v2394_v5 = vadd.f32 0.00028619796, %v2393_v52  ;;  %v2405_v48 = vadd.f32 0.001143296, %v2404_v21  ;;  %587 = vadd.xlane.f32.xlu0 %v6822_v6  ;;  %v6834_v41 = vadd.f32 %v6532_v38, %v1993_v51 }
 0x1e0   :  { %4922 = vst [vmem:[#allocation2 + $0x18] sm:$0xff] %v4858_v31  ;;  %v1031_v53 = vsub.f32 %v903_v30, %v967_v45  ;;  %v3066_v9 = vor.u32 1.1754944e-38, %v3065_v24  ;;  %v1320_v31 = vmul.f32 %v6793_v61, %v1319_v58  ;;  %779 = vadd.xlane.f32.xlu2 %v702_v50  ;;  %vm3064_vm12 = vcmp.eq.f32.partialorder %v3063_v60, 8.507059e+37  ;;  %v393_v45 = vpop.f32.mrf.mxu1 }
 0x1e1   :  { %v3058_v4 = vadd.f32 %v5200_v18, %v3057_v42  ;;  %v2395_v10 = vmul.f32 %v2394_v5, %v6815_v55  ;;  %v2406_v40 = vmul.f32 %v2405_v48, %v6815_v55  ;;  %v6846_v21 = vmul.f32 0.70710677, %v6834_v41 }
 0x1e2   :  { %v1095_v47 = vmax.f32 %v1031_v53, 0.0  ;;  %v1324_v42 = vsel %vm1323_vm13, %v6793_v61, %v1320_v31  ;;  %v2123_v5 = vmul.f32 0.5, %v6653_v43  ;;  %v6865_v61 = vadd.f32 %v6742_v62, %v393_v45 }
 0x1e3   :  { %v3062_v52 = vsel %vm3061_vm11, %v5200_v18, %v3058_v4  ;;  %v2396_v27 = vadd.f32 0.0036580483, %v2395_v10  ;;  %v2407_v54 = vadd.f32 0.014752088, %v2406_v40  ;;  %v3071_v60 = vmul.f32 %v6846_v21, %v6846_v21 }
 0x1e4   :  { %v3067_v24 = vsel %vm3064_vm12, %v3066_v9, %v3062_v52  ;;  %v9968_v18 = vsub.f32 %v5847_v2, %v6714_v17  ;;  %v6859_v30 = vadd.f32 1e-06, %v1095_v47  ;;  %9969 = vst [vmem:[#allocation37_spill] sm:$0xff] %v6865_v61  ;;  %v951_v9 = vmul.f32 %v6836_v49, %v6836_v49 }
 0x1e5   :  { %v3068_v58 = vmul.f32 %v3067_v24, %v6796_v28  ;;  %v2397_v48 = vmul.f32 %v2396_v27, %v6815_v55  ;;  %v2408_v50 = vmul.f32 %v2407_v54, %v6815_v55  ;;  %v6867_v4 = vmin.f32 %v3071_v60, 16.0 }
 0x1e6   :  { %v1910_v51 = vmul.f32 %v1324_v42, %v9968_v18  ;;  %5201 = vrsqrt.f32 %v6859_v30  ;;  %v887_v43 = vmul.f32 0.0078125, %v766_v14  ;;  %vm1491_vm15 = vweird.f32 %v6859_v30 }
 0x1e7   :  { %v5085_v28 = vclamps-f32 %v3068_v58, 1.0  ;;  %v2398_v2 = vadd.f32 0.05243302, %v2397_v48  ;;  %v2409_v17 = vadd.f32 0.112945676, %v2408_v50  ;;  %557 = vadd.xlane.f32.xlu0 %v6865_v61 }
 0x1e8   :  { %v1977_v53 = vmul.f32 %v6525_v59, %v1910_v51  ;;  %v3073_v40 = vmul.f32 2.1237322e-06, %v6867_v4  ;;  %v3084_v31 = vmul.f32 3.8918573e-05, %v6867_v4  ;;  %v1015_v24 = vsub.f32 %v887_v43, %v951_v9 }
 0x1e9   :  { %v4811_v10 = vadd.f32 1.0, %v5085_v28  ;;  %v2399_v47 = vmul.f32 %v2398_v2, %v6815_v55  ;;  %v2410_v45 = vmul.f32 %v2409_v17, %v6815_v55 }
 0x1ea   :  { %v6877_v52 = vadd.f32 %v6532_v38, %v1977_v53  ;;  %v3074_v54 = vadd.f32 0.00028619796, %v3073_v40  ;;  %v3085_v42 = vadd.f32 0.001143296, %v3084_v31  ;;  %v1079_v48 = vmax.f32 %v1015_v24, 0.0 }
 0x1eb   :  { %v4875_v27 = vmul.f32 %v4811_v10, %v2123_v5  ;;  %v2411_v58 = vadd.f32 0.4994258, %v2410_v45  ;;  %v2400_v50 = vadd.f32 0.18741608, %v2399_v47  ;;  %v345_v45 = vpop.f32.mrf.mxu0  ;;  %v6905_v24 = vmul.f32 0.5, %v6779_v3 }
 0x1ec   :  { %v6882_v60 = vmul.f32 0.70710677, %v6877_v52  ;;  %v6884_v18 = vpop.eup %5201  ;;  %v3075_v51 = vmul.f32 %v3074_v54, %v6867_v4  ;;  %v3086_v14 = vmul.f32 %v3085_v42, %v6867_v4  ;;  %v6893_v9 = vadd.f32 1e-06, %v1079_v48 }
 0x1ed   :  { %4939 = vst [vmem:[#allocation2 + $0xa0] sm:$0xff] %v4875_v27  ;;  %v2412_v28 = vmul.f32 %v2411_v58, %v6815_v55  ;;  %v1486_v53 = vmul.f32 %v6884_v18, %v6859_v30  ;;  %v2401_v27 = vmul.f32 %v2400_v50, %v6815_v55  ;;  %v6911_v48 = vadd.f32 %v6742_v62, %v345_v45  ;;  %v6918_v55 = vpop.xlane.xlu0 %605 }
 0x1ee   :  { %v2431_v5 = vmul.f32 %v6882_v60, %v6882_v60  ;;  %v3076_v2 = vadd.f32 0.0036580483, %v3075_v51  ;;  %v3087_v17 = vadd.f32 0.014752088, %v3086_v14  ;;  %5203 = vrsqrt.f32 %v6893_v9  ;;  %9971 = vst [vmem:[#allocation39_spill] sm:$0xff] %v6918_v55 }
 0x1ef   :  { %v6895_v43 = vadd.f32 1.0, %v2412_v28  ;;  %v1487_v40 = vmul.f32 %v6884_v18, %v1486_v53  ;;  %9970 = vst [vmem:[#allocation38_spill] sm:$0xff] %v6911_v48  ;;  %v1159_v3 = vsub.f32 %v5878_v19, %v6800_v44  ;;  %vm1492_vm14 = vweird.f32 %v6884_v18  ;;  %525 = vadd.xlane.f32.xlu2 %v6911_v48 }
 0x1f0   :  { %v6897_v10 = vmin.f32 %v2431_v5, 16.0  ;;  %v3077_v31 = vmul.f32 %v3076_v2, %v6867_v4  ;;  %v3088_v47 = vmul.f32 %v3087_v17, %v6867_v4  ;;  %v6921_v17 = vpop.xlane.xlu2 %573  ;;  %vm1493_vm0 = vmor %vm1491_vm15, %vm1492_vm14  ;;  %vm1331_vm1 = vweird.f32 %v6893_v9 }
 0x1f1   :  { %5205 = vrcp.f32 %v6895_v43  ;;  %v1488_v42 = vmul.f32 0.5, %v1487_v40  ;;  %9972 = vst [vmem:[#allocation40_spill] sm:$0xff] %v6921_v17  ;;  %v719_v40 = vmul.f32 %v6865_v61, %v6865_v61  ;;  %vm2419_vm3 = vweird.f32 %v6895_v43 }
 0x1f2   :  { %v3089_v54 = vadd.f32 0.112945676, %v3088_v47  ;;  %v3078_v58 = vadd.f32 0.05243302, %v3077_v31  ;;  %v2433_v51 = vmul.f32 2.1237322e-06, %v6897_v10 }
 0x1f3   :  { %v2444_v14 = vmul.f32 3.8918573e-05, %v6897_v10  ;;  %v1489_v53 = vsub.f32 1.5, %v1488_v42  ;;  %v2402_v47 = vadd.f32 1.1283791, %v2401_v27  ;;  %813 = vadd.xlane.f32.xlu1 %v719_v40  ;;  %v2425_v40 = vand.u32 2147483648, %v6895_v43 }
 0x1f4   :  { %v3090_v28 = vmul.f32 %v3089_v54, %v6867_v4  ;;  %v2434_v50 = vadd.f32 0.00028619796, %v2433_v51  ;;  %v6926_v31 = vpop.eup %5203  ;;  %v3079_v54 = vmul.f32 %v3078_v58, %v6867_v4  ;;  %v2423_v27 = vand.u32 2147483647, %v6895_v43 }
 0x1f5   :  { %v2445_v2 = vadd.f32 0.001143296, %v2444_v14  ;;  %v1490_v19 = vmul.f32 %v6884_v18, %v1489_v53  ;;  %v1326_v14 = vmul.f32 %v6926_v31, %v6893_v9  ;;  %v2403_v55 = vmul.f32 %v2402_v47, %v6790_v39  ;;  %v800_v39 = vpop.xlane.xlu0 %799  ;;  %v512_v47 = vpop.xlane.xlu1 %511 }
 0x1f6   :  { %v3091_v45 = vadd.f32 0.4994258, %v3090_v28  ;;  %v2435_v42 = vmul.f32 %v2434_v50, %v6897_v10  ;;  %v3080_v8 = vadd.f32 0.18741608, %v3079_v54  ;;  %vm6951_vm4 = vcmp.eq.f32.partialorder %v2423_v27, 8.507059e+37 }
 0x1f7   :  { %v5206_v44 = vpop.eup %5205  ;;  %v2446_v51 = vmul.f32 %v2445_v2, %v6897_v10  ;;  %v1494_v53 = vsel %vm1493_vm0, %v6884_v18, %v1490_v19  ;;  %v1327_v50 = vmul.f32 %v6926_v31, %v1326_v14  ;;  %v441_v19 = vpop.f32.mrf.mxu2  ;;  %vm1332_vm5 = vweird.f32 %v6926_v31 }
 0x1f8   :  { %v2415_v5 = vmul.f32 %v5206_v44, %v6895_v43  ;;  %v3092_v28 = vmul.f32 %v3091_v45, %v6867_v4  ;;  %v2436_v30 = vadd.f32 0.0036580483, %v2435_v42  ;;  %v1927_v13 = vmul.f32 %v1494_v53, %v1159_v3  ;;  %vm1333_vm7 = vmor %vm1331_vm1, %vm1332_vm5 }
 0x1f9   :  { %v2447_v58 = vadd.f32 0.014752088, %v2446_v51  ;;  %v1328_v17 = vmul.f32 0.5, %v1327_v50  ;;  %vm2420_vm2 = vweird.f32 %v5206_v44 }
 0x1fa   :  { %v2416_v2 = vsub.f32 1.0, %v2415_v5  ;;  %v6944_v61 = vadd.f32 1.0, %v3092_v28  ;;  %v2437_v45 = vmul.f32 %v2436_v30, %v6897_v10  ;;  %v1994_v3 = vmul.f32 %v6525_v59, %v1927_v13  ;;  %vm2421_vm6 = vmor %vm2419_vm3, %vm2420_vm2 }
 0x1fb   :  { %v2448_v46 = vmul.f32 %v2447_v58, %v6897_v10  ;;  %v1329_v14 = vsub.f32 1.5, %v1328_v17  ;;  %v2426_v28 = vor.u32 1.1754944e-38, %v2425_v40  ;;  %v3081_v30 = vmul.f32 %v3080_v8, %v6867_v4  ;;  %v544_v58 = vpop.xlane.xlu2 %543 }
 0x1fc   :  { %v2417_v42 = vmul.f32 %v5206_v44, %v2416_v2  ;;  %5207 = vrcp.f32 %v6944_v61  ;;  %v2438_v5 = vadd.f32 0.05243302, %v2437_v45  ;;  %v6960_v27 = vadd.f32 %v6532_v38, %v1994_v3 }
 0x1fd   :  { %v2449_v51 = vadd.f32 0.112945676, %v2448_v46  ;;  %v1330_v46 = vmul.f32 %v6926_v31, %v1329_v14  ;;  %v6965_v17 = vadd.f32 %v6742_v62, %v441_v19  ;;  %v904_v8 = vmul.f32 0.0078125, %v800_v39 }
 0x1fe   :  { %v2418_v54 = vadd.f32 %v5206_v44, %v2417_v42  ;;  %v2439_v43 = vmul.f32 %v2438_v5, %v6897_v10  ;;  %v6970_v2 = vmul.f32 0.70710677, %v6960_v27  ;;  %v6976_v4 = vmul.f32 0.0078125, %v512_v47 }
 0x1ff   :  { %v2450_v13 = vmul.f32 %v2449_v51, %v6897_v10  ;;  %9975 = vst [vmem:[#allocation41_spill] sm:$0xff] %v6965_v17  ;;  %v1334_v42 = vsel %vm1333_vm7, %v6926_v31, %v1330_v46  ;;  %v6979_v5 = vmul.f32 0.0078125, %v544_v58  ;;  %589 = vadd.xlane.f32.xlu1 %v6965_v17  ;;  %v3082_v18 = vadd.f32 1.1283791, %v3081_v30 }
 0x200   :  { %v2422_v53 = vsel %vm2421_vm6, %v5206_v44, %v2418_v54  ;;  %v2440_v19 = vadd.f32 0.18741608, %v2439_v43  ;;  %v3111_v9 = vmul.f32 %v6970_v2, %v6970_v2  ;;  %v3103_v47 = vand.u32 2147483647, %v6944_v61 }
 0x201   :  { %v2427_v50 = vsel %vm6951_vm4, %v2426_v28, %v2422_v53  ;;  %v2451_v45 = vadd.f32 0.4994258, %v2450_v13  ;;  %v968_v31 = vmul.f32 %v6979_v5, %v6979_v5  ;;  %v3105_v28 = vand.u32 2147483648, %v6944_v61 }
 0x202   :  { %v5208_v44 = vpop.eup %5207  ;;  %v2428_v40 = vmul.f32 %v2427_v50, %v2403_v55  ;;  %v9976_v55 = vsub.f32 %v5881_v20, %v6836_v49  ;;  %v6993_v30 = vmin.f32 %v3111_v9, 16.0  ;;  %v489_v50 = vpop.f32.mrf.mxu3  ;;  %vm3099_vm9 = vweird.f32 %v6944_v61 }
 0x203   :  { %v3095_v3 = vmul.f32 %v5208_v44, %v6944_v61  ;;  %v2452_v51 = vmul.f32 %v2451_v45, %v6897_v10  ;;  %v1032_v13 = vsub.f32 %v904_v8, %v968_v31  ;;  %vm3100_vm8 = vweird.f32 %v5208_v44 }
 0x204   :  { %v5069_v54 = vclamps-f32 %v2428_v40, 1.0  ;;  %v1911_v14 = vmul.f32 %v1334_v42, %v9976_v55  ;;  %v3113_v20 = vmul.f32 2.1237322e-06, %v6993_v30  ;;  %v3124_v49 = vmul.f32 3.8918573e-05, %v6993_v30  ;;  %vm3101_vm10 = vmor %vm3099_vm9, %vm3100_vm8 }
 0x205   :  { %v3096_v39 = vsub.f32 1.0, %v3095_v3  ;;  %v6995_v58 = vadd.f32 1.0, %v2452_v51  ;;  %v3083_v45 = vmul.f32 %v3082_v18, %v6846_v21  ;;  %v2441_v42 = vmul.f32 %v2440_v19, %v6897_v10 }
 0x206   :  { %v4795_v43 = vadd.f32 1.0, %v5069_v54  ;;  %v1978_v53 = vmul.f32 %v6525_v59, %v1911_v14  ;;  %v3114_v59 = vadd.f32 0.00028619796, %v3113_v20  ;;  %v3125_v8 = vadd.f32 0.001143296, %v3124_v49  ;;  %v7027_v20 = vpop.xlane.xlu0 %575 }
 0x207   :  { %v3097_v46 = vmul.f32 %v5208_v44, %v3096_v39  ;;  %5209 = vrcp.f32 %v6995_v58  ;;  %v3106_v9 = vor.u32 1.1754944e-38, %v3105_v28  ;;  %v1096_v51 = vmax.f32 %v1032_v13, 0.0 }
 0x208   :  { %v4859_v40 = vmul.f32 %v4795_v43, %v6905_v24  ;;  %v7006_v54 = vadd.f32 %v6532_v38, %v1978_v53  ;;  %v7009_v24 = vadd.f32 %v6742_v62, %v489_v50  ;;  %vm3104_vm11 = vcmp.eq.f32.partialorder %v3103_v47, 8.507059e+37 }
 0x209   :  { %v3098_v3 = vadd.f32 %v5208_v44, %v3097_v46  ;;  %v3115_v10 = vmul.f32 %v3114_v59, %v6993_v30  ;;  %v3126_v18 = vmul.f32 %v3125_v8, %v6993_v30  ;;  %v2442_v61 = vadd.f32 1.1283791, %v2441_v42  ;;  %v348_v42 = vpop.f32.mrf.mxu0 }
 0x20a   :  { %4923 = vst [vmem:[#allocation2 + $0x20] sm:$0xff] %v4859_v40  ;;  %v7014_v55 = vmul.f32 0.70710677, %v7006_v54  ;;  %v7016_v14 = vadd.f32 1e-06, %v1096_v51  ;;  %621 = vadd.xlane.f32.xlu2 %v7009_v24  ;;  %v2124_v43 = vmul.f32 0.5, %v6834_v41  ;;  %vm2459_vm13 = vweird.f32 %v6995_v58 }
 0x20b   :  { %9977 = vst [vmem:[#allocation42_spill] sm:$0xff] %v7009_v24  ;;  %v3102_v21 = vsel %vm3101_vm10, %v5208_v44, %v3098_v3  ;;  %v3116_v31 = vadd.f32 0.0036580483, %v3115_v10  ;;  %v3127_v39 = vadd.f32 0.014752088, %v3126_v18  ;;  %v703_v44 = vmul.f32 %v6911_v48, %v6911_v48 }
 0x20c   :  { %v3107_v19 = vsel %vm3104_vm11, %v3106_v9, %v3102_v21  ;;  %v2471_v28 = vmul.f32 %v7014_v55, %v7014_v55  ;;  %5211 = vrsqrt.f32 %v7016_v14  ;;  %v2443_v49 = vmul.f32 %v2442_v61, %v6882_v60  ;;  %v396_v61 = vpop.f32.mrf.mxu1 }
 0x20d   :  { %v3108_v38 = vmul.f32 %v3107_v19, %v3083_v45  ;;  %v5210_v47 = vpop.eup %5209  ;;  %v3117_v46 = vmul.f32 %v3116_v31, %v6993_v30  ;;  %781 = vadd.xlane.f32.xlu0 %v703_v44  ;;  %v3128_v50 = vmul.f32 %v3127_v39, %v6993_v30  ;;  %v952_v45 = vmul.f32 %v6976_v4, %v6976_v4 }
 0x20e   :  { %v2455_v13 = vmul.f32 %v5210_v47, %v6995_v58  ;;  %v7031_v40 = vmin.f32 %v2471_v28, 16.0  ;;  %v2463_v59 = vand.u32 2147483647, %v6995_v58  ;;  %v2465_v8 = vand.u32 2147483648, %v6995_v58  ;;  %v7044_v28 = vpop.xlane.xlu1 %607  ;;  %v546_v48 = vpop.xlane.xlu0 %545 }
 0x20f   :  { %v5086_v53 = vclamps-f32 %v3108_v38, 1.0  ;;  %vm2460_vm12 = vweird.f32 %v5210_v47  ;;  %v3129_v9 = vadd.f32 0.112945676, %v3128_v50  ;;  %v3118_v18 = vadd.f32 0.05243302, %v3117_v46 }
 0x210   :  { %v2456_v41 = vsub.f32 1.0, %v2455_v13  ;;  %v2473_v51 = vmul.f32 2.1237322e-06, %v7031_v40  ;;  %v2484_v60 = vmul.f32 3.8918573e-05, %v7031_v40  ;;  %v7040_v19 = vadd.f32 %v6742_v62, %v348_v42  ;;  %vm2461_vm15 = vmor %vm2459_vm13, %vm2460_vm12 }
 0x211   :  { %v4812_v3 = vadd.f32 1.0, %v5086_v53  ;;  %v3130_v31 = vmul.f32 %v3129_v9, %v6993_v30  ;;  %v768_v53 = vpop.xlane.xlu2 %767  ;;  %vm2464_vm14 = vcmp.eq.f32.partialorder %v2463_v59, 8.507059e+37  ;;  %v3119_v9 = vmul.f32 %v3118_v18, %v6993_v30 }
 0x212   :  { %v2457_v10 = vmul.f32 %v5210_v47, %v2456_v41  ;;  %9978 = vst [vmem:[#allocation43_spill] sm:$0xff] %v7040_v19  ;;  %v5212_v38 = vpop.eup %5211  ;;  %v2474_v39 = vadd.f32 0.00028619796, %v2473_v51  ;;  %v2485_v44 = vadd.f32 0.001143296, %v2484_v60  ;;  %v888_v60 = vmul.f32 0.0078125, %v768_v53 }
 0x213   :  { %v4876_v21 = vmul.f32 %v4812_v3, %v2124_v43  ;;  %v2466_v43 = vor.u32 1.1754944e-38, %v2465_v8  ;;  %v1496_v46 = vmul.f32 %v5212_v38, %v7016_v14  ;;  %v3131_v50 = vadd.f32 0.4994258, %v3130_v31 }
 0x214   :  { %v2458_v13 = vadd.f32 %v5210_v47, %v2457_v10  ;;  %v2475_v42 = vmul.f32 %v2474_v39, %v7031_v40  ;;  %v2486_v58 = vmul.f32 %v2485_v44, %v7031_v40  ;;  %v7051_v3 = vadd.f32 %v6742_v62, %v396_v61 }
 0x215   :  { %4940 = vst [vmem:[#allocation2 + $0xa8] sm:$0xff] %v4876_v21  ;;  %v1497_v51 = vmul.f32 %v5212_v38, %v1496_v46  ;;  %527 = vadd.xlane.f32.xlu0 %v7040_v19  ;;  %v3132_v8 = vmul.f32 %v3131_v50, %v6993_v30  ;;  %v1016_v44 = vsub.f32 %v888_v60, %v952_v45  ;;  %vm1502_vm0 = vweird.f32 %v5212_v38 }
 0x216   :  { %9979 = vst [vmem:[#allocation44_spill] sm:$0xff] %v7051_v3  ;;  %v2462_v41 = vsel %vm2461_vm15, %v5210_v47, %v2458_v13  ;;  %v2476_v21 = vadd.f32 0.0036580483, %v2475_v42  ;;  %v2487_v10 = vadd.f32 0.014752088, %v2486_v58  ;;  %559 = vadd.xlane.f32.xlu1 %v7051_v3  ;;  %v720_v53 = vmul.f32 %v7051_v3, %v7051_v3 }
 0x217   :  { %v2467_v59 = vsel %vm2464_vm14, %v2466_v43, %v2462_v41  ;;  %v1498_v39 = vmul.f32 0.5, %v1497_v51  ;;  %v7057_v61 = vadd.f32 1.0, %v3132_v8  ;;  %v1080_v46 = vmax.f32 %v1016_v44, 0.0  ;;  %v802_v8 = vpop.xlane.xlu1 %801 }
 0x218   :  { %v2468_v31 = vmul.f32 %v2467_v59, %v2443_v49  ;;  %v2477_v47 = vmul.f32 %v2476_v21, %v7031_v40  ;;  %v2488_v18 = vmul.f32 %v2487_v10, %v7031_v40  ;;  %v2108_v50 = vmul.f32 0.5, %v6877_v52  ;;  %815 = vadd.xlane.f32.xlu2 %v720_v53  ;;  %v492_v10 = vpop.f32.mrf.mxu3 }
 0x219   :  { %v1499_v43 = vsub.f32 1.5, %v1498_v39  ;;  %v3120_v42 = vadd.f32 0.18741608, %v3119_v9  ;;  %5213 = vrcp.f32 %v7057_v61  ;;  %vm1501_vm1 = vweird.f32 %v7016_v14 }
 0x21a   :  { %v5070_v13 = vclamps-f32 %v2468_v31, 1.0  ;;  %v2478_v45 = vadd.f32 0.05243302, %v2477_v47  ;;  %v2489_v58 = vadd.f32 0.112945676, %v2488_v18  ;;  %v1160_v51 = vsub.f32 %v5897_v29, %v6979_v5  ;;  %vm1503_vm2 = vmor %vm1501_vm1, %vm1502_vm0  ;;  %v444_v31 = vpop.f32.mrf.mxu2  ;;  %v514_v5 = vpop.xlane.xlu2 %513 }
 0x21b   :  { %v1500_v41 = vmul.f32 %v5212_v38, %v1499_v43  ;;  %v7068_v60 = vadd.f32 1e-06, %v1080_v46  ;;  %v7070_v59 = vmul.f32 0.0078125, %v546_v48  ;;  %v3121_v39 = vmul.f32 %v3120_v42, %v6993_v30  ;;  %v7081_v18 = vld [vmem:[%s9828_s3] ss:$0 sm:$0xff] }
 0x21c   :  { %v4796_v49 = vadd.f32 1.0, %v5070_v13  ;;  %v2479_v9 = vmul.f32 %v2478_v45, %v7031_v40  ;;  %v2490_v21 = vmul.f32 %v2489_v58, %v7031_v40  ;;  %v905_v53 = vmul.f32 0.0078125, %v802_v8 }
 0x21d   :  { %v1504_v14 = vsel %vm1503_vm2, %v5212_v38, %v1500_v41  ;;  %5215 = vrsqrt.f32 %v7068_v60  ;;  %v969_v29 = vmul.f32 %v7070_v59, %v7070_v59  ;;  %v7085_v30 = vadd.f32 %v6742_v62, %v492_v10  ;;  %v7098_v41 = vld [vmem:[%s9829_s4] ss:$0 sm:$0xff] }
 0x21e   :  { %v4860_v52 = vmul.f32 %v4796_v49, %v2108_v50  ;;  %v1928_v44 = vmul.f32 %v1504_v14, %v1160_v51  ;;  %v2491_v48 = vadd.f32 0.4994258, %v2490_v21  ;;  %v7088_v13 = vadd.f32 %v6742_v62, %v444_v31  ;;  %v770_v49 = vpop.xlane.xlu0 %769 }
 0x21f   :  { %v5214_v47 = vpop.eup %5213  ;;  %9980 = vst [vmem:[#allocation45_spill] sm:$0xff] %v7085_v30  ;;  %v2480_v46 = vadd.f32 0.18741608, %v2479_v9  ;;  %v7092_v42 = vmul.f32 0.0078125, %v514_v5  ;;  %v3122_v45 = vadd.f32 1.1283791, %v3121_v39  ;;  %v1033_v62 = vsub.f32 %v905_v53, %v969_v29  ;;  %623 = vadd.xlane.f32.xlu0 %v7085_v30 }
 0x220   :  { %4924 = vst [vmem:[#allocation2 + $0x28] sm:$0xff] %v4860_v52  ;;  %v1995_v38 = vmul.f32 %v7081_v18, %v1928_v44  ;;  %v3135_v43 = vmul.f32 %v5214_v47, %v7057_v61  ;;  %v2492_v50 = vmul.f32 %v2491_v48, %v7031_v40  ;;  %v3143_v58 = vand.u32 2147483647, %v7057_v61  ;;  %591 = vadd.xlane.f32.xlu2 %v7088_v13 }
 0x221   :  { %9981 = vst [vmem:[#allocation46_spill] sm:$0xff] %v7088_v13  ;;  %v953_v9 = vmul.f32 %v7092_v42, %v7092_v42  ;;  %v704_v21 = vmul.f32 %v7040_v19, %v7040_v19  ;;  %v3145_v10 = vand.u32 2147483648, %v7057_v61  ;;  %v1097_v39 = vmax.f32 %v1033_v62, 0.0 }
 0x222   :  { %v7101_v51 = vadd.f32 %v7098_v41, %v1995_v38  ;;  %v3136_v8 = vsub.f32 1.0, %v3135_v43  ;;  %v7104_v52 = vadd.f32 1.0, %v2492_v50  ;;  %v889_v44 = vmul.f32 0.0078125, %v770_v49 }
 0x223   :  { %v7111_v14 = vpop.eup %5215  ;;  %vm3140_vm3 = vweird.f32 %v5214_v47  ;;  %v2481_v5 = vmul.f32 %v2480_v46, %v7031_v40  ;;  %783 = vadd.xlane.f32.xlu1 %v704_v21  ;;  %v3123_v48 = vmul.f32 %v3122_v45, %v6970_v2  ;;  %v1144_v38 = vsub.f32 %v5903_v36, %v6976_v4 }
 0x224   :  { %v7115_v31 = vmul.f32 0.70710677, %v7101_v51  ;;  %v3137_v29 = vmul.f32 %v5214_v47, %v3136_v8  ;;  %5217 = vrcp.f32 %v7104_v52  ;;  %v1336_v43 = vmul.f32 %v7111_v14, %v7068_v60 }
 0x225   :  { %vm3139_vm4 = vweird.f32 %v7057_v61  ;;  %v7127_v49 = vadd.f32 1e-06, %v1097_v39  ;;  %v1017_v40 = vsub.f32 %v889_v44, %v953_v9  ;;  %vm3144_vm6 = vcmp.eq.f32.partialorder %v3143_v58, 8.507059e+37 }
 0x226   :  { %v3151_v53 = vmul.f32 %v7115_v31, %v7115_v31  ;;  %v3138_v50 = vadd.f32 %v5214_v47, %v3137_v29  ;;  %vm3141_vm5 = vmor %vm3139_vm4, %vm3140_vm3  ;;  %v3146_v46 = vor.u32 1.1754944e-38, %v3145_v10  ;;  %v1337_v2 = vmul.f32 %v7111_v14, %v1336_v43 }
 0x227   :  { %v2482_v4 = vadd.f32 1.1283791, %v2481_v5  ;;  %5219 = vrsqrt.f32 %v7127_v49  ;;  %v1081_v45 = vmax.f32 %v1017_v40, 0.0  ;;  %v2125_v9 = vmul.f32 0.5, %v6960_v27 }
 0x228   :  { %v7129_v62 = vmin.f32 %v3151_v53, 16.0  ;;  %v3142_v36 = vsel %vm3141_vm5, %v5214_v47, %v3138_v50  ;;  %v1338_v39 = vmul.f32 0.5, %v1337_v2  ;;  %vm1341_vm7 = vweird.f32 %v7068_v60 }
 0x229   :  { %v3147_v8 = vsel %vm3144_vm6, %v3146_v46, %v3142_v36  ;;  %v7137_v10 = vadd.f32 1e-06, %v1081_v45  ;;  %v2503_v44 = vand.u32 2147483647, %v7104_v52  ;;  %vm1342_vm8 = vweird.f32 %v7111_v14 }
 0x22a   :  { %v3153_v21 = vmul.f32 2.1237322e-06, %v7129_v62  ;;  %v3164_v61 = vmul.f32 3.8918573e-05, %v7129_v62  ;;  %v5218_v29 = vpop.eup %5217  ;;  %v3148_v58 = vmul.f32 %v3147_v8, %v3123_v48  ;;  %v1339_v50 = vsub.f32 1.5, %v1338_v39  ;;  %vm1343_vm10 = vmor %vm1341_vm7, %vm1342_vm8 }
 0x22b   :  { %v2495_v47 = vmul.f32 %v5218_v29, %v7104_v52  ;;  %5221 = vrsqrt.f32 %v7137_v10  ;;  %v2483_v40 = vmul.f32 %v2482_v4, %v7014_v55  ;;  %vm2500_vm9 = vweird.f32 %v5218_v29 }
 0x22c   :  { %v3154_v5 = vadd.f32 0.00028619796, %v3153_v21  ;;  %v3165_v53 = vadd.f32 0.001143296, %v3164_v61  ;;  %v5087_v43 = vclamps-f32 %v3148_v58, 1.0  ;;  %v2505_v45 = vand.u32 2147483648, %v7104_v52 }
 0x22d   :  { %v2496_v27 = vsub.f32 1.0, %v2495_v47  ;;  %v5220_v2 = vpop.eup %5219  ;;  %v1340_v8 = vmul.f32 %v7111_v14, %v1339_v50  ;;  %vm2499_vm11 = vweird.f32 %v7104_v52  ;;  %vm7152_vm12 = vcmp.eq.f32.partialorder %v2503_v44, 8.507059e+37 }
 0x22e   :  { %v3155_v48 = vmul.f32 %v3154_v5, %v7129_v62  ;;  %v3166_v46 = vmul.f32 %v3165_v53, %v7129_v62  ;;  %v4813_v36 = vadd.f32 1.0, %v5087_v43  ;;  %v1506_v55 = vmul.f32 %v5220_v2, %v7127_v49  ;;  %vm2501_vm13 = vmor %vm2499_vm11, %vm2500_vm9 }
 0x22f   :  { %v2497_v21 = vmul.f32 %v5218_v29, %v2496_v27  ;;  %v1344_v47 = vsel %vm1343_vm10, %v7111_v14, %v1340_v8  ;;  %v2506_v60 = vor.u32 1.1754944e-38, %v2505_v45  ;;  %v724_v52 = vmul.f32 %v5784_v33, %v5784_v33 }
 0x230   :  { %v3156_v61 = vadd.f32 0.0036580483, %v3155_v48  ;;  %v3167_v39 = vadd.f32 0.014752088, %v3166_v46  ;;  %v4877_v4 = vmul.f32 %v4813_v36, %v2125_v9  ;;  %v1912_v50 = vmul.f32 %v1344_v47, %v1144_v38  ;;  %v9984_v36 = vld [vmem:[#allocation10_spill] sm:$0xff] }
 0x231   :  { %v2498_v5 = vadd.f32 %v5218_v29, %v2497_v21  ;;  %v5222_v27 = vpop.eup %5221  ;;  %v1507_v9 = vmul.f32 %v5220_v2, %v1506_v55  ;;  %v725_v44 = vmul.f32 %v5832_v56, %v5832_v56  ;;  %v726_v8 = vmul.f32 %v9984_v36, %v9984_v36  ;;  %823 = vadd.xlane.f32.xlu0 %v724_v52 }
 0x232   :  { %v3157_v53 = vmul.f32 %v3156_v61, %v7129_v62  ;;  %v3168_v43 = vmul.f32 %v3167_v39, %v7129_v62  ;;  %4941 = vst [vmem:[#allocation2 + $0xb0] sm:$0xff] %v4877_v4  ;;  %v1979_v46 = vmul.f32 %v7081_v18, %v1912_v50  ;;  %v1346_v45 = vmul.f32 %v5222_v27, %v7137_v10 }
 0x233   :  { %v2502_v48 = vsel %vm2501_vm13, %v5218_v29, %v2498_v5  ;;  %v1508_v21 = vmul.f32 0.5, %v1507_v9  ;;  %825 = vadd.xlane.f32.xlu1 %v725_v44  ;;  %827 = vadd.xlane.f32.xlu2 %v726_v8  ;;  %vm1512_vm14 = vweird.f32 %v5220_v2  ;;  %v2109_v5 = vmul.f32 0.5, %v7006_v54  ;;  %v9985_v44 = vld [vmem:[#allocation17_spill] sm:$0xff] }
 0x234   :  { %v3169_v14 = vadd.f32 0.112945676, %v3168_v43  ;;  %v2507_v38 = vsel %vm7152_vm12, %v2506_v60, %v2502_v48  ;;  %v3158_v39 = vadd.f32 0.05243302, %v3157_v53  ;;  %v7172_v29 = vadd.f32 %v7098_v41, %v1979_v46 }
 0x235   :  { %v2508_v61 = vmul.f32 %v2507_v38, %v2483_v40  ;;  %v1509_v4 = vsub.f32 1.5, %v1508_v21  ;;  %v1347_v47 = vmul.f32 %v5222_v27, %v1346_v45  ;;  %vm1511_vm15 = vweird.f32 %v7127_v49 }
 0x236   :  { %v3170_v55 = vmul.f32 %v3169_v14, %v7129_v62  ;;  %v7176_v50 = vmul.f32 0.70710677, %v7172_v29  ;;  %v3159_v9 = vmul.f32 %v3158_v39, %v7129_v62  ;;  %v1161_v48 = vsub.f32 %v9985_v44, %v7070_v59  ;;  %vm1513_vm0 = vmor %vm1511_vm15, %vm1512_vm14 }
 0x237   :  { %v5071_v58 = vclamps-f32 %v2508_v61, 1.0  ;;  %v1510_v60 = vmul.f32 %v5220_v2, %v1509_v4  ;;  %v1348_v40 = vmul.f32 0.5, %v1347_v47  ;;  %vm1352_vm1 = vweird.f32 %v5222_v27 }
 0x238   :  { %v3171_v43 = vadd.f32 0.4994258, %v3170_v55  ;;  %v2511_v54 = vmul.f32 %v7176_v50, %v7176_v50  ;;  %v3160_v61 = vadd.f32 0.18741608, %v3159_v9  ;;  %vm1351_vm2 = vweird.f32 %v7137_v10 }
 0x239   :  { %v4797_v53 = vadd.f32 1.0, %v5071_v58  ;;  %v1514_v14 = vsel %vm1513_vm0, %v5220_v2, %v1510_v60  ;;  %v1349_v46 = vsub.f32 1.5, %v1348_v40  ;;  %vm1353_vm3 = vmor %vm1351_vm2, %vm1352_vm1  ;;  %v9986_v2 = vld [vmem:[#allocation19_spill] sm:$0xff] }
 0x23a   :  { %v3172_v52 = vmul.f32 %v3171_v43, %v7129_v62  ;;  %v1929_v21 = vmul.f32 %v1514_v14, %v1161_v48  ;;  %v7185_v49 = vmin.f32 %v2511_v54, 16.0  ;;  %v1145_v4 = vsub.f32 %v9986_v2, %v7092_v42 }
 0x23b   :  { %v4861_v8 = vmul.f32 %v4797_v53, %v2109_v5  ;;  %v1350_v45 = vmul.f32 %v5222_v27, %v1349_v46  ;;  %v3161_v60 = vmul.f32 %v3160_v61, %v7129_v62 }
 0x23c   :  { %v3173_v38 = vadd.f32 1.0, %v3172_v52  ;;  %v2513_v59 = vmul.f32 2.1237322e-06, %v7185_v49  ;;  %v2524_v39 = vmul.f32 3.8918573e-05, %v7185_v49  ;;  %v1996_v55 = vmul.f32 %v7081_v18, %v1929_v21 }
 0x23d   :  { %4925 = vst [vmem:[#allocation2 + $0x30] sm:$0xff] %v4861_v8  ;;  %v1354_v47 = vsel %vm1353_vm3, %v5222_v27, %v1350_v45  ;;  %v3162_v54 = vadd.f32 1.1283791, %v3161_v60 }
 0x23e   :  { %5223 = vrcp.f32 %v3173_v38  ;;  %v2514_v5 = vadd.f32 0.00028619796, %v2513_v59  ;;  %v2525_v58 = vadd.f32 0.001143296, %v2524_v39  ;;  %v7194_v43 = vadd.f32 %v7098_v41, %v1996_v55 }
 0x23f   :  { %v1913_v40 = vmul.f32 %v1354_v47, %v1145_v4  ;;  %v3183_v21 = vand.u32 2147483647, %v3173_v38  ;;  %v3185_v45 = vand.u32 2147483648, %v3173_v38  ;;  %v3163_v4 = vmul.f32 %v3162_v54, %v7115_v31 }
 0x240   :  { %v2515_v10 = vmul.f32 %v2514_v5, %v7185_v49  ;;  %v2526_v53 = vmul.f32 %v2525_v58, %v7185_v49  ;;  %v7200_v9 = vmul.f32 0.70710677, %v7194_v43  ;;  %vm3179_vm5 = vweird.f32 %v3173_v38 }
 0x241   :  { %v1980_v44 = vmul.f32 %v7081_v18, %v1913_v40  ;;  %vm3184_vm7 = vcmp.eq.f32.partialorder %v3183_v21, 8.507059e+37 }
 0x242   :  { %v2516_v27 = vadd.f32 0.0036580483, %v2515_v10  ;;  %v2527_v48 = vadd.f32 0.014752088, %v2526_v53  ;;  %v3191_v14 = vmul.f32 %v7200_v9, %v7200_v9  ;;  %v9987_v10 = vld [vmem:[#allocation13_spill] sm:$0xff] }
 0x243   :  { %v7206_v62 = vadd.f32 %v7098_v41, %v1980_v44  ;;  %v727_v53 = vmul.f32 %v9987_v10, %v9987_v10  ;;  %v3186_v44 = vor.u32 1.1754944e-38, %v3185_v45 }
 0x244   :  { %v5224_v52 = vpop.eup %5223  ;;  %v2528_v8 = vmul.f32 %v2527_v48, %v7185_v49  ;;  %v7209_v61 = vmin.f32 %v3191_v14, 16.0  ;;  %v2517_v55 = vmul.f32 %v2516_v27, %v7185_v49 }
 0x245   :  { %v3175_v42 = vmul.f32 %v5224_v52, %v3173_v38  ;;  %v7212_v59 = vmul.f32 0.70710677, %v7206_v62  ;;  %vm3180_vm4 = vweird.f32 %v5224_v52  ;;  %829 = vadd.xlane.f32.xlu0 %v727_v53 }
 0x246   :  { %v2529_v2 = vadd.f32 0.112945676, %v2528_v8  ;;  %v3193_v47 = vmul.f32 2.1237322e-06, %v7209_v61  ;;  %v3204_v5 = vmul.f32 3.8918573e-05, %v7209_v61  ;;  %vm3181_vm6 = vmor %vm3179_vm5, %vm3180_vm4 }
 0x247   :  { %v3176_v46 = vsub.f32 1.0, %v3175_v42  ;;  %v2551_v58 = vmul.f32 %v7212_v59, %v7212_v59  ;;  %v2518_v54 = vadd.f32 0.05243302, %v2517_v55 }
 0x248   :  { %v2530_v40 = vmul.f32 %v2529_v2, %v7185_v49  ;;  %v3194_v42 = vadd.f32 0.00028619796, %v3193_v47  ;;  %v3205_v27 = vadd.f32 0.001143296, %v3204_v5 }
 0x249   :  { %v3177_v39 = vmul.f32 %v5224_v52, %v3176_v46  ;;  %v7223_v48 = vmin.f32 %v2551_v58, 16.0  ;;  %v2519_v21 = vmul.f32 %v2518_v54, %v7185_v49  ;;  %v7238_v54 = vpop.xlane.xlu2 %609 }
 0x24a   :  { %v2531_v14 = vadd.f32 0.4994258, %v2530_v40  ;;  %v3195_v8 = vmul.f32 %v3194_v42, %v7209_v61  ;;  %v3206_v38 = vmul.f32 %v3205_v27, %v7209_v61  ;;  %9989 = vst [vmem:[#allocation17_spill] sm:$0xff] %v7238_v54 }
 0x24b   :  { %v3178_v60 = vadd.f32 %v5224_v52, %v3177_v39  ;;  %v2553_v39 = vmul.f32 2.1237322e-06, %v7223_v48  ;;  %v2564_v45 = vmul.f32 3.8918573e-05, %v7223_v48 }
 0x24c   :  { %v2532_v19 = vmul.f32 %v2531_v14, %v7185_v49  ;;  %v3196_v47 = vadd.f32 0.0036580483, %v3195_v8  ;;  %v3207_v5 = vadd.f32 0.014752088, %v3206_v38 }
 0x24d   :  { %v3182_v31 = vsel %vm3181_vm6, %v5224_v52, %v3178_v60  ;;  %v2554_v58 = vadd.f32 0.00028619796, %v2553_v39  ;;  %v2565_v60 = vadd.f32 0.001143296, %v2564_v45 }
 0x24e   :  { %v3187_v46 = vsel %vm3184_vm7, %v3186_v44, %v3182_v31  ;;  %v2533_v55 = vadd.f32 1.0, %v2532_v19  ;;  %v3208_v40 = vmul.f32 %v3207_v5, %v7209_v61  ;;  %v2126_v44 = vmul.f32 0.5, %v7101_v51  ;;  %v7236_v31 = vpop.xlane.xlu1 %577  ;;  %v9990_v19 = vld [vmem:[#allocation15_spill] sm:$0xff] }
 0x24f   :  { %v3188_v2 = vmul.f32 %v3187_v46, %v3163_v4  ;;  %v2555_v53 = vmul.f32 %v2554_v58, %v7223_v48  ;;  %v3197_v4 = vmul.f32 %v3196_v47, %v7209_v61  ;;  %v2566_v27 = vmul.f32 %v2565_v60, %v7223_v48  ;;  %9988 = vst [vmem:[#allocation10_spill] sm:$0xff] %v7236_v31 }
 0x250   :  { %5225 = vrcp.f32 %v2533_v55  ;;  %v2520_v46 = vadd.f32 0.18741608, %v2519_v21  ;;  %v3209_v8 = vadd.f32 0.112945676, %v3208_v40  ;;  %v728_v38 = vmul.f32 %v9990_v19, %v9990_v19 }
 0x251   :  { %v5088_v52 = vclamps-f32 %v3188_v2, 1.0  ;;  %v2556_v39 = vadd.f32 0.0036580483, %v2555_v53  ;;  %v2567_v2 = vadd.f32 0.014752088, %v2566_v27  ;;  %vm2539_vm9 = vweird.f32 %v2533_v55 }
 0x252   :  { %v3210_v51 = vmul.f32 %v3209_v8, %v7209_v61  ;;  %831 = vadd.xlane.f32.xlu1 %v728_v38  ;;  %v3198_v45 = vadd.f32 0.05243302, %v3197_v4  ;;  %v2521_v58 = vmul.f32 %v2520_v46, %v7185_v49  ;;  %v2543_v8 = vand.u32 2147483647, %v2533_v55 }
 0x253   :  { %v4814_v42 = vadd.f32 1.0, %v5088_v52  ;;  %v2568_v47 = vmul.f32 %v2567_v2, %v7223_v48  ;;  %v2557_v60 = vmul.f32 %v2556_v39, %v7223_v48  ;;  %v2545_v4 = vand.u32 2147483648, %v2533_v55 }
 0x254   :  { %v3211_v52 = vadd.f32 0.4994258, %v3210_v51  ;;  %v3199_v53 = vmul.f32 %v3198_v45, %v7209_v61  ;;  %v804_v51 = vpop.xlane.xlu2 %803  ;;  %vm2544_vm11 = vcmp.eq.f32.partialorder %v2543_v8, 8.507059e+37 }
 0x255   :  { %v4878_v14 = vmul.f32 %v4814_v42, %v2126_v44  ;;  %v2569_v40 = vadd.f32 0.112945676, %v2568_v47  ;;  %v2558_v3 = vadd.f32 0.05243302, %v2557_v60 }
 0x256   :  { %v5226_v5 = vpop.eup %5225  ;;  %v3212_v44 = vmul.f32 %v3211_v52, %v7209_v61  ;;  %v548_v46 = vpop.xlane.xlu1 %547  ;;  %v3200_v47 = vadd.f32 0.18741608, %v3199_v53 }
 0x257   :  { %4942 = vst [vmem:[#allocation2 + $0xb8] sm:$0xff] %v4878_v14  ;;  %v2535_v21 = vmul.f32 %v5226_v5, %v2533_v55  ;;  %v2570_v27 = vmul.f32 %v2569_v40, %v7223_v48  ;;  %v2522_v14 = vadd.f32 1.1283791, %v2521_v58  ;;  %vm2540_vm8 = vweird.f32 %v5226_v5  ;;  %v9991_v55 = vld [vmem:[#allocation20_spill] sm:$0xff] }
 0x258   :  { %v3213_v38 = vadd.f32 1.0, %v3212_v44  ;;  %vm2541_vm10 = vmor %vm2539_vm9, %vm2540_vm8  ;;  %v2546_v58 = vor.u32 1.1754944e-38, %v2545_v4  ;;  %v2559_v44 = vmul.f32 %v2558_v3, %v7223_v48  ;;  %v729_v53 = vmul.f32 %v9991_v55, %v9991_v55 }
 0x259   :  { %v2536_v42 = vsub.f32 1.0, %v2535_v21  ;;  %v2571_v49 = vadd.f32 0.4994258, %v2570_v27  ;;  %v2523_v45 = vmul.f32 %v2522_v14, %v7176_v50  ;;  %v7251_v21 = vmul.f32 0.0078125, %v548_v46 }
 0x25a   :  { %5227 = vrcp.f32 %v3213_v38  ;;  %v3201_v50 = vmul.f32 %v3200_v47, %v7209_v61  ;;  %833 = vadd.xlane.f32.xlu2 %v729_v53  ;;  %v2560_v46 = vadd.f32 0.18741608, %v2559_v44  ;;  %v3225_v54 = vand.u32 2147483648, %v3213_v38 }
 0x25b   :  { %v2537_v2 = vmul.f32 %v5226_v5, %v2536_v42  ;;  %v2572_v52 = vmul.f32 %v2571_v49, %v7223_v48  ;;  %v906_v42 = vmul.f32 0.0078125, %v804_v51  ;;  %v2110_v51 = vmul.f32 0.5, %v7172_v29 }
 0x25c   :  { %v2561_v61 = vmul.f32 %v2560_v46, %v7223_v48  ;;  %vm3219_vm13 = vweird.f32 %v3213_v38  ;;  %v3226_v29 = vor.u32 1.1754944e-38, %v3225_v54 }
 0x25d   :  { %v2538_v39 = vadd.f32 %v5226_v5, %v2537_v2  ;;  %v2573_v60 = vadd.f32 1.0, %v2572_v52  ;;  %v970_v2 = vmul.f32 %v7251_v21, %v7251_v21  ;;  %v3202_v52 = vadd.f32 1.1283791, %v3201_v50 }
 0x25f   :  { %v2542_v40 = vsel %vm2541_vm10, %v5226_v5, %v2538_v39  ;;  %5229 = vrcp.f32 %v2573_v60  ;;  %v1034_v8 = vsub.f32 %v906_v42, %v970_v2  ;;  %v3203_v44 = vmul.f32 %v3202_v52, %v7200_v9 }
 0x260   :  { %v2547_v27 = vsel %vm2544_vm11, %v2546_v58, %v2542_v40  ;;  %v5228_v14 = vpop.eup %5227  ;;  %v3223_v40 = vand.u32 2147483647, %v3213_v38  ;;  %v2585_v50 = vand.u32 2147483648, %v2573_v60  ;;  %vm2579_vm1 = vweird.f32 %v2573_v60 }
 0x261   :  { %v2548_v49 = vmul.f32 %v2547_v27, %v2523_v45  ;;  %v3215_v5 = vmul.f32 %v5228_v14, %v3213_v38  ;;  %v1098_v3 = vmax.f32 %v1034_v8, 0.0  ;;  %vm3220_vm12 = vweird.f32 %v5228_v14 }
 0x262   :  { %vm3221_vm14 = vmor %vm3219_vm13, %vm3220_vm12  ;;  %vm3224_vm15 = vcmp.eq.f32.partialorder %v3223_v40, 8.507059e+37  ;;  %v2586_v38 = vor.u32 1.1754944e-38, %v2585_v50 }
 0x263   :  { %v5072_v4 = vclamps-f32 %v2548_v49, 1.0  ;;  %v3216_v58 = vsub.f32 1.0, %v3215_v5  ;;  %v1226_v31 = vadd.f32 1e-06, %v1098_v3  ;;  %v2562_v49 = vadd.f32 1.1283791, %v2561_v61 }
 0x264   :  { %v2583_v5 = vand.u32 2147483647, %v2573_v60 }
 0x265   :  { %v4798_v39 = vadd.f32 1.0, %v5072_v4  ;;  %v5230_v55 = vpop.eup %5229  ;;  %v3217_v27 = vmul.f32 %v5228_v14, %v3216_v58  ;;  %5231 = vrsqrt.f32 %v1226_v31  ;;  %v2563_v9 = vmul.f32 %v2562_v49, %v7212_v59 }
 0x266   :  { %v2575_v47 = vmul.f32 %v5230_v55, %v2573_v60  ;;  %vm2580_vm0 = vweird.f32 %v5230_v55  ;;  %vm2584_vm3 = vcmp.eq.f32.partialorder %v2583_v5, 8.507059e+37  ;;  %v2111_v60 = vmul.f32 0.5, %v7206_v62 }
 0x267   :  { %v4862_v45 = vmul.f32 %v4798_v39, %v2110_v51  ;;  %v3218_v42 = vadd.f32 %v5228_v14, %v3217_v27  ;;  %vm2581_vm2 = vmor %vm2579_vm1, %vm2580_vm0  ;;  %vm1521_vm5 = vweird.f32 %v1226_v31 }
 0x268   :  { %v2576_v2 = vsub.f32 1.0, %v2575_v47 }
 0x269   :  { %4926 = vst [vmem:[#allocation2 + $0x38] sm:$0xff] %v4862_v45  ;;  %v3222_v53 = vsel %vm3221_vm14, %v5228_v14, %v3218_v42  ;;  %v2127_v14 = vmul.f32 0.5, %v7194_v43  ;;  %v9993_v43 = vld [vmem:[#allocation25_spill] sm:$0xff] }
 0x26a   :  { %v3227_v8 = vsel %vm3224_vm15, %v3226_v29, %v3222_v53  ;;  %v2577_v4 = vmul.f32 %v5230_v55, %v2576_v2  ;;  %v730_v53 = vmul.f32 %v9993_v43, %v9993_v43 }
 0x26b   :  { %v3228_v3 = vmul.f32 %v3227_v8, %v3203_v44  ;;  %v5232_v48 = vpop.eup %5231 }
 0x26c   :  { %v2578_v46 = vadd.f32 %v5230_v55, %v2577_v4  ;;  %v1516_v39 = vmul.f32 %v5232_v48, %v1226_v31  ;;  %vm1522_vm4 = vweird.f32 %v5232_v48  ;;  %835 = vadd.xlane.f32.xlu0 %v730_v53  ;;  %v731_v31 = vmul.f32 %v6316_v7, %v6316_v7 }
 0x26d   :  { %v5089_v51 = vclamps-f32 %v3228_v3, 1.0  ;;  %vm1523_vm6 = vmor %vm1521_vm5, %vm1522_vm4 }
 0x26e   :  { %v2582_v54 = vsel %vm2581_vm2, %v5230_v55, %v2578_v46  ;;  %v1517_v40 = vmul.f32 %v5232_v48, %v1516_v39  ;;  %v9992_v55 = vld [vmem:[#allocation22_spill] sm:$0xff]  ;;  %837 = vadd.xlane.f32.xlu1 %v731_v31 }
 0x26f   :  { %v4815_v52 = vadd.f32 1.0, %v5089_v51  ;;  %v2587_v58 = vsel %vm2584_vm3, %v2586_v38, %v2582_v54  ;;  %v1162_v2 = vsub.f32 %v9992_v55, %v7251_v21 }
 0x270   :  { %v2588_v45 = vmul.f32 %v2587_v58, %v2563_v9  ;;  %v1518_v61 = vmul.f32 0.5, %v1517_v40  ;;  %v732_v40 = vmul.f32 %v6412_v11, %v6412_v11 }
 0x271   :  { %v4879_v27 = vmul.f32 %v4815_v52, %v2127_v14  ;;  %v516_v14 = vpop.xlane.xlu0 %515 }
 0x272   :  { %v5073_v47 = vclamps-f32 %v2588_v45, 1.0  ;;  %v1519_v42 = vsub.f32 1.5, %v1518_v61  ;;  %v634_v45 = vmul.f32 0.0078125, %v516_v14  ;;  %839 = vadd.xlane.f32.xlu2 %v732_v40 }
 0x273   :  { %4943 = vst [vmem:[#allocation2 + $0xc0] sm:$0xff] %v4879_v27 }
 0x274   :  { %v4799_v44 = vadd.f32 1.0, %v5073_v47  ;;  %v1520_v29 = vmul.f32 %v5232_v48, %v1519_v42  ;;  %v772_v47 = vpop.xlane.xlu1 %771 }
 0x276   :  { %v4863_v59 = vmul.f32 %v4799_v44, %v2111_v60  ;;  %v1524_v49 = vsel %vm1523_vm6, %v5232_v48, %v1520_v29  ;;  %v890_v60 = vmul.f32 0.0078125, %v772_v47  ;;  %v954_v44 = vmul.f32 %v634_v45, %v634_v45 }
 0x277   :  { %v1930_v50 = vmul.f32 %v1524_v49, %v1162_v2 }
 0x278   :  { %4927 = vst [vmem:[#allocation2 + $0x40] sm:$0xff] %v4863_v59  ;;  %v1018_v55 = vsub.f32 %v890_v60, %v954_v44 }
 0x279   :  { %v1997_v8 = vmul.f32 %v7081_v18, %v1930_v50 }
 0x27a   :  { %v1082_v49 = vmax.f32 %v1018_v55, 0.0 }
 0x27b   :  { %v7271_v4 = vadd.f32 %v7098_v41, %v1997_v8 }
 0x27c   :  { %v1210_v50 = vadd.f32 1e-06, %v1082_v49 }
 0x27d   :  { %v2192_v62 = vmul.f32 0.70710677, %v7271_v4 }
 0x27e   :  { %vm1361_vm12 = vweird.f32 %v1210_v50 }
 0x27f   :  { %v3231_v5 = vmul.f32 %v2192_v62, %v2192_v62 }
 0x281   :  { %v3232_v21 = vmin.f32 %v3231_v5, 16.0 }
 0x283   :  { %v3233_v3 = vmul.f32 2.1237322e-06, %v3232_v21  ;;  %v3244_v46 = vmul.f32 3.8918573e-05, %v3232_v21 }
 0x285   :  { %v3234_v51 = vadd.f32 0.00028619796, %v3233_v3  ;;  %v3245_v48 = vadd.f32 0.001143296, %v3244_v46 }
 0x287   :  { %v3235_v38 = vmul.f32 %v3234_v51, %v3232_v21  ;;  %v3246_v39 = vmul.f32 %v3245_v48, %v3232_v21 }
 0x289   :  { %v3247_v9 = vadd.f32 0.014752088, %v3246_v39  ;;  %v3236_v54 = vadd.f32 0.0036580483, %v3235_v38 }
 0x28b   :  { %v3248_v52 = vmul.f32 %v3247_v9, %v3232_v21  ;;  %v3237_v27 = vmul.f32 %v3236_v54, %v3232_v21 }
 0x28d   :  { %v3249_v58 = vadd.f32 0.112945676, %v3248_v52  ;;  %v3238_v29 = vadd.f32 0.05243302, %v3237_v27  ;;  %v733_v27 = vmul.f32 %v6684_v34, %v6684_v34 }
 0x28f   :  { %v3250_v61 = vmul.f32 %v3249_v58, %v3232_v21  ;;  %v3239_v53 = vmul.f32 %v3238_v29, %v3232_v21  ;;  %841 = vadd.xlane.f32.xlu0 %v733_v27  ;;  %v9994_v29 = vld [vmem:[#allocation23_spill] sm:$0xff] }
 0x291   :  { %v3251_v42 = vadd.f32 0.4994258, %v3250_v61  ;;  %v3240_v8 = vadd.f32 0.18741608, %v3239_v53  ;;  %v2128_v53 = vmul.f32 0.5, %v7271_v4  ;;  %v9995_v4 = vld [vmem:[#allocation5_spill] sm:$0xff] }
 0x293   :  { %v3252_v59 = vmul.f32 %v3251_v42, %v3232_v21  ;;  %v3241_v5 = vmul.f32 %v3240_v8, %v3232_v21 }
 0x295   :  { %v3253_v2 = vadd.f32 1.0, %v3252_v59  ;;  %v3242_v39 = vadd.f32 1.1283791, %v3241_v5  ;;  %v1146_v59 = vsub.f32 %v9994_v29, %v634_v45  ;;  %v7301_v29 = vpop.xlane.xlu2 %579 }
 0x297   :  { %5233 = vrcp.f32 %v3253_v2  ;;  %v3265_v48 = vand.u32 2147483648, %v3253_v2  ;;  %v3263_v54 = vand.u32 2147483647, %v3253_v2  ;;  %vm3259_vm8 = vweird.f32 %v3253_v2 }
 0x298   :  { %5235 = vrsqrt.f32 %v1210_v50  ;;  %v3243_v61 = vmul.f32 %v3242_v39, %v2192_v62  ;;  %v734_v62 = vmul.f32 %v6822_v6, %v6822_v6 }
 0x299   :  { %v3266_v58 = vor.u32 1.1754944e-38, %v3265_v48  ;;  %vm3264_vm10 = vcmp.eq.f32.partialorder %v3263_v54, 8.507059e+37 }
 0x29a   :  { %843 = vadd.xlane.f32.xlu1 %v734_v62 }
 0x29d   :  { %v5234_v31 = vpop.eup %5233 }
 0x29e   :  { %v3255_v3 = vmul.f32 %v5234_v31, %v3253_v2  ;;  %v5236_v46 = vpop.eup %5235  ;;  %vm3260_vm7 = vweird.f32 %v5234_v31 }
 0x29f   :  { %v1356_v38 = vmul.f32 %v5236_v46, %v1210_v50  ;;  %vm3261_vm9 = vmor %vm3259_vm8, %vm3260_vm7  ;;  %vm1362_vm11 = vweird.f32 %v5236_v46 }
 0x2a0   :  { %v3256_v51 = vsub.f32 1.0, %v3255_v3  ;;  %vm1363_vm13 = vmor %vm1361_vm12, %vm1362_vm11 }
 0x2a1   :  { %v1357_v14 = vmul.f32 %v5236_v46, %v1356_v38 }
 0x2a2   :  { %v3257_v9 = vmul.f32 %v5234_v31, %v3256_v51 }
 0x2a3   :  { %v1358_v40 = vmul.f32 0.5, %v1357_v14 }
 0x2a4   :  { %v3258_v52 = vadd.f32 %v5234_v31, %v3257_v9 }
 0x2a5   :  { %v1359_v42 = vsub.f32 1.5, %v1358_v40 }
 0x2a6   :  { %v3262_v21 = vsel %vm3261_vm9, %v5234_v31, %v3258_v52  ;;  %v735_v52 = vmul.f32 %v6965_v17, %v6965_v17 }
 0x2a7   :  { %v3267_v47 = vsel %vm3264_vm10, %v3266_v58, %v3262_v21  ;;  %v1360_v44 = vmul.f32 %v5236_v46, %v1359_v42  ;;  %v9996_v58 = vld [vmem:[#allocation8_spill] sm:$0xff]  ;;  %v7299_v42 = vpop.xlane.xlu0 %611 }
 0x2a8   :  { %v3268_v60 = vmul.f32 %v3267_v47, %v3243_v61  ;;  %v740_v40 = vmul.f32 %v9996_v58, %v9996_v58  ;;  %845 = vadd.xlane.f32.xlu2 %v735_v52 }
 0x2a9   :  { %v1364_v2 = vsel %vm1363_vm13, %v5236_v46, %v1360_v44  ;;  %v737_v46 = vmul.f32 %v9995_v4, %v9995_v4 }
 0x2aa   :  { %v5090_v55 = vclamps-f32 %v3268_v60, 1.0  ;;  %v1914_v8 = vmul.f32 %v1364_v2, %v1146_v59  ;;  %v9997_v59 = vld [vmem:[#allocation6_spill] sm:$0xff]  ;;  %v9998_v2 = vld [vmem:[#allocation12_spill] sm:$0xff] }
 0x2ab   :  { %849 = vadd.xlane.f32.xlu1 %v737_v46  ;;  %v550_v46 = vpop.xlane.xlu2 %549 }
 0x2ac   :  { %v4816_v49 = vadd.f32 1.0, %v5090_v55  ;;  %v1981_v5 = vmul.f32 %v7081_v18, %v1914_v8  ;;  %v738_v55 = vmul.f32 %v9997_v59, %v9997_v59 }
 0x2ae   :  { %v4880_v31 = vmul.f32 %v4816_v49, %v2128_v53  ;;  %v7286_v3 = vadd.f32 %v7098_v41, %v1981_v5  ;;  %v743_v53 = vmul.f32 %v9998_v2, %v9998_v2 }
 0x2b0   :  { %4944 = vst [vmem:[#allocation2 + $0xc8] sm:$0xff] %v4880_v31  ;;  %v7289_v45 = vmul.f32 0.70710677, %v7286_v3  ;;  %851 = vadd.xlane.f32.xlu2 %v738_v55  ;;  %v736_v55 = vmul.f32 %v7088_v13, %v7088_v13 }
 0x2b2   :  { %v2591_v50 = vmul.f32 %v7289_v45, %v7289_v45  ;;  %847 = vadd.xlane.f32.xlu0 %v736_v55 }
 0x2b3   :  { %855 = vadd.xlane.f32.xlu1 %v740_v40 }
 0x2b4   :  { %v2592_v51 = vmin.f32 %v2591_v50, 16.0  ;;  %v806_v50 = vpop.xlane.xlu0 %805 }
 0x2b5   :  { %v907_v52 = vmul.f32 0.0078125, %v806_v50 }
 0x2b6   :  { %v2593_v48 = vmul.f32 2.1237322e-06, %v2592_v51  ;;  %v2604_v38 = vmul.f32 3.8918573e-05, %v2592_v51 }
 0x2b8   :  { %v2594_v39 = vadd.f32 0.00028619796, %v2593_v48  ;;  %v2605_v9 = vadd.f32 0.001143296, %v2604_v38  ;;  %v9999_v48 = vld [vmem:[#allocation9_spill] sm:$0xff] }
 0x2b9   :  { %v741_v38 = vmul.f32 %v9999_v48, %v9999_v48 }
 0x2ba   :  { %v2595_v54 = vmul.f32 %v2594_v39, %v2592_v51  ;;  %v2606_v14 = vmul.f32 %v2605_v9, %v2592_v51  ;;  %v10000_v39 = vld [vmem:[#allocation24_spill] sm:$0xff] }
 0x2bb   :  { %861 = vadd.xlane.f32.xlu1 %v743_v53  ;;  %v746_v9 = vmul.f32 %v10000_v39, %v10000_v39  ;;  %857 = vadd.xlane.f32.xlu2 %v741_v38  ;;  %v10001_v53 = vld [vmem:[#allocation16_spill] sm:$0xff] }
 0x2bc   :  { %v2607_v27 = vadd.f32 0.014752088, %v2606_v14  ;;  %v2596_v61 = vadd.f32 0.0036580483, %v2595_v54  ;;  %v651_v54 = vmul.f32 0.0078125, %v550_v46 }
 0x2be   :  { %v2608_v21 = vmul.f32 %v2607_v27, %v2592_v51  ;;  %v2597_v60 = vmul.f32 %v2596_v61, %v2592_v51  ;;  %v971_v40 = vmul.f32 %v651_v54, %v651_v54 }
 0x2c0   :  { %v2609_v47 = vadd.f32 0.112945676, %v2608_v21  ;;  %v2598_v8 = vadd.f32 0.05243302, %v2597_v60  ;;  %v1035_v61 = vsub.f32 %v907_v52, %v971_v40 }
 0x2c2   :  { %v2610_v44 = vmul.f32 %v2609_v47, %v2592_v51  ;;  %v2599_v5 = vmul.f32 %v2598_v8, %v2592_v51  ;;  %v1099_v60 = vmax.f32 %v1035_v61, 0.0 }
 0x2c3   :  { %867 = vadd.xlane.f32.xlu1 %v746_v9 }
 0x2c4   :  { %v2611_v49 = vadd.f32 0.4994258, %v2610_v44  ;;  %v2600_v14 = vadd.f32 0.18741608, %v2599_v5 }
 0x2c6   :  { %v2612_v62 = vmul.f32 %v2611_v49, %v2592_v51  ;;  %v2601_v21 = vmul.f32 %v2600_v14, %v2592_v51  ;;  %v744_v49 = vmul.f32 %v10001_v53, %v10001_v53  ;;  %v749_v51 = vmul.f32 %v6681_v0, %v6681_v0 }
 0x2c8   :  { %v2613_v31 = vadd.f32 1.0, %v2612_v62  ;;  %v1227_v62 = vadd.f32 1e-06, %v1099_v60  ;;  %v2602_v46 = vadd.f32 1.1283791, %v2601_v21  ;;  %863 = vadd.xlane.f32.xlu2 %v744_v49  ;;  %v10002_v21 = vld [vmem:[#allocation7_spill] sm:$0xff]  ;;  %v747_v60 = vmul.f32 %v6329_v57, %v6329_v57 }
 0x2c9   :  { %v2112_v49 = vmul.f32 0.5, %v7286_v3  ;;  %v750_v3 = vmul.f32 %v6828_v32, %v6828_v32 }
 0x2ca   :  { %5237 = vrcp.f32 %v2613_v31  ;;  %v2625_v8 = vand.u32 2147483648, %v2613_v31  ;;  %v2623_v38 = vand.u32 2147483647, %v2613_v31  ;;  %vm2619_vm15 = vweird.f32 %v2613_v31 }
 0x2cb   :  { %5239 = vrsqrt.f32 %v1227_v62  ;;  %v2603_v14 = vmul.f32 %v2602_v46, %v7289_v45  ;;  %873 = vadd.xlane.f32.xlu1 %v749_v51  ;;  %vm1531_vm3 = vweird.f32 %v1227_v62 }
 0x2cc   :  { %v2626_v9 = vor.u32 1.1754944e-38, %v2625_v8  ;;  %vm2624_vm1 = vcmp.eq.f32.partialorder %v2623_v38, 8.507059e+37  ;;  %v10003_v38 = vld [vmem:[#allocation11_spill] sm:$0xff] }
 0x2d0   :  { %v5238_v27 = vpop.eup %5237  ;;  %869 = vadd.xlane.f32.xlu2 %v747_v60 }
 0x2d1   :  { %v2615_v47 = vmul.f32 %v5238_v27, %v2613_v31  ;;  %vm2620_vm14 = vweird.f32 %v5238_v27 }
 0x2d2   :  { %vm2621_vm0 = vmor %vm2619_vm15, %vm2620_vm14 }
 0x2d3   :  { %v2616_v44 = vsub.f32 1.0, %v2615_v47  ;;  %v739_v47 = vmul.f32 %v10002_v21, %v10002_v21 }
 0x2d5   :  { %v2617_v5 = vmul.f32 %v5238_v27, %v2616_v44  ;;  %v5240_v44 = vpop.eup %5239  ;;  %853 = vadd.xlane.f32.xlu0 %v739_v47  ;;  %v10004_v47 = vld [vmem:[#allocation21_spill] sm:$0xff] }
 0x2d6   :  { %v1526_v55 = vmul.f32 %v5240_v44, %v1227_v62  ;;  %vm1532_vm2 = vweird.f32 %v5240_v44  ;;  %v745_v60 = vmul.f32 %v10004_v47, %v10004_v47 }
 0x2d7   :  { %v2618_v50 = vadd.f32 %v5238_v27, %v2617_v5  ;;  %vm1533_vm4 = vmor %vm1531_vm3, %vm1532_vm2 }
 0x2d8   :  { %v1527_v45 = vmul.f32 %v5240_v44, %v1526_v55  ;;  %875 = vadd.xlane.f32.xlu2 %v750_v3 }
 0x2d9   :  { %v2622_v52 = vsel %vm2621_vm0, %v5238_v27, %v2618_v50  ;;  %v742_v50 = vmul.f32 %v10003_v38, %v10003_v38 }
 0x2da   :  { %v2627_v40 = vsel %vm2624_vm1, %v2626_v9, %v2622_v52  ;;  %v1528_v46 = vmul.f32 0.5, %v1527_v45  ;;  %v1163_v9 = vsub.f32 %v6047_v63, %v651_v54 }
 0x2db   :  { %v2628_v61 = vmul.f32 %v2627_v40, %v2603_v14 }
 0x2dc   :  { %v1529_v5 = vsub.f32 1.5, %v1528_v46 }
 0x2dd   :  { %v5074_v31 = vclamps-f32 %v2628_v61, 1.0  ;;  %859 = vadd.xlane.f32.xlu0 %v742_v50  ;;  %v518_v61 = vpop.xlane.xlu1 %517 }
 0x2de   :  { %v1530_v51 = vmul.f32 %v5240_v44, %v1529_v5  ;;  %v635_v62 = vmul.f32 0.0078125, %v518_v61 }
 0x2df   :  { %v4800_v8 = vadd.f32 1.0, %v5074_v31 }
 0x2e0   :  { %v1534_v14 = vsel %vm1533_vm4, %v5240_v44, %v1530_v51  ;;  %v774_v44 = vpop.xlane.xlu2 %773  ;;  %v955_v55 = vmul.f32 %v635_v62, %v635_v62 }
 0x2e1   :  { %v4864_v27 = vmul.f32 %v4800_v8, %v2112_v49  ;;  %v1931_v52 = vmul.f32 %v1534_v14, %v1163_v9  ;;  %v891_v8 = vmul.f32 0.0078125, %v774_v44 }
 0x2e3   :  { %4928 = vst [vmem:[#allocation2 + $0x48] sm:$0xff] %v4864_v27  ;;  %v1998_v40 = vmul.f32 %v7081_v18, %v1931_v52  ;;  %v748_v18 = vmul.f32 %v6538_v25, %v6538_v25  ;;  %v1019_v46 = vsub.f32 %v891_v8, %v955_v55 }
 0x2e5   :  { %v7332_v31 = vadd.f32 %v7098_v41, %v1998_v40  ;;  %865 = vadd.xlane.f32.xlu0 %v745_v60  ;;  %v1083_v50 = vmax.f32 %v1019_v46, 0.0 }
 0x2e7   :  { %v7335_v63 = vmul.f32 0.70710677, %v7332_v31  ;;  %v1211_v14 = vadd.f32 1e-06, %v1083_v50  ;;  %v752_v50 = vmul.f32 %v7085_v30, %v7085_v30  ;;  %v7368_v30 = vpop.xlane.xlu1 %613 }
 0x2e9   :  { %v3271_v54 = vmul.f32 %v7335_v63, %v7335_v63  ;;  %5241 = vrsqrt.f32 %v1211_v14  ;;  %vm1371_vm6 = vweird.f32 %v1211_v14  ;;  %879 = vadd.xlane.f32.xlu1 %v752_v50 }
 0x2eb   :  { %v3272_v49 = vmin.f32 %v3271_v54, 16.0  ;;  %v751_v54 = vmul.f32 %v7009_v24, %v7009_v24 }
 0x2ed   :  { %v3273_v45 = vmul.f32 2.1237322e-06, %v3272_v49  ;;  %v3284_v27 = vmul.f32 3.8918573e-05, %v3272_v49  ;;  %871 = vadd.xlane.f32.xlu0 %v748_v18 }
 0x2ef   :  { %v3274_v41 = vadd.f32 0.00028619796, %v3273_v45  ;;  %v3285_v5 = vadd.f32 0.001143296, %v3284_v27  ;;  %v5242_v44 = vpop.eup %5241 }
 0x2f0   :  { %v1366_v0 = vmul.f32 %v5242_v44, %v1211_v14  ;;  %vm1372_vm5 = vweird.f32 %v5242_v44  ;;  %v7355_v14 = vld [vmem:[%s9829_s4] ss:$0 sm:$0xff] }
 0x2f1   :  { %v3275_v51 = vmul.f32 %v3274_v41, %v3272_v49  ;;  %v3286_v9 = vmul.f32 %v3285_v5, %v3272_v49  ;;  %vm1373_vm7 = vmor %vm1371_vm6, %vm1372_vm5 }
 0x2f2   :  { %v1367_v18 = vmul.f32 %v5242_v44, %v1366_v0 }
 0x2f3   :  { %v3287_v3 = vadd.f32 0.014752088, %v3286_v9  ;;  %v3276_v52 = vadd.f32 0.0036580483, %v3275_v51  ;;  %v1147_v9 = vsub.f32 %v6252_v35, %v635_v62 }
 0x2f4   :  { %v1368_v27 = vmul.f32 0.5, %v1367_v18 }
 0x2f5   :  { %v3288_v40 = vmul.f32 %v3287_v3, %v3272_v49  ;;  %v3277_v60 = vmul.f32 %v3276_v52, %v3272_v49  ;;  %877 = vadd.xlane.f32.xlu0 %v751_v54 }
 0x2f6   :  { %v1369_v5 = vsub.f32 1.5, %v1368_v27 }
 0x2f7   :  { %v3289_v61 = vadd.f32 0.112945676, %v3288_v40  ;;  %v3278_v8 = vadd.f32 0.05243302, %v3277_v60  ;;  %v7349_v40 = vld [vmem:[%s9828_s3] ss:$0 sm:$0xff] }
 0x2f8   :  { %v1370_v51 = vmul.f32 %v5242_v44, %v1369_v5 }
 0x2f9   :  { %v3290_v32 = vmul.f32 %v3289_v61, %v3272_v49  ;;  %v3279_v41 = vmul.f32 %v3278_v8, %v3272_v49 }
 0x2fb   :  { %v3291_v55 = vadd.f32 0.4994258, %v3290_v32  ;;  %v3280_v3 = vadd.f32 0.18741608, %v3279_v41  ;;  %v1374_v32 = vsel %vm1373_vm7, %v5242_v44, %v1370_v51 }
 0x2fc   :  { %v1915_v52 = vmul.f32 %v1374_v32, %v1147_v9 }
 0x2fd   :  { %v3292_v45 = vmul.f32 %v3291_v55, %v3272_v49  ;;  %v3281_v60 = vmul.f32 %v3280_v3, %v3272_v49 }
 0x2fe   :  { %v1982_v61 = vmul.f32 %v7349_v40, %v1915_v52 }
 0x2ff   :  { %v3293_v46 = vadd.f32 1.0, %v3292_v45  ;;  %v3282_v8 = vadd.f32 1.1283791, %v3281_v60 }
 0x300   :  { %v7358_v35 = vadd.f32 %v7355_v14, %v1982_v61 }
 0x301   :  { %5243 = vrcp.f32 %v3293_v46  ;;  %v3305_v44 = vand.u32 2147483648, %v3293_v46  ;;  %v3303_v45 = vand.u32 2147483647, %v3293_v46  ;;  %vm3299_vm9 = vweird.f32 %v3293_v46 }
 0x302   :  { %v7361_v55 = vmul.f32 0.70710677, %v7358_v35  ;;  %v3283_v50 = vmul.f32 %v3282_v8, %v7335_v63 }
 0x303   :  { %v3306_v41 = vor.u32 1.1754944e-38, %v3305_v44  ;;  %vm3304_vm11 = vcmp.eq.f32.partialorder %v3303_v45, 8.507059e+37  ;;  %v2129_v44 = vmul.f32 0.5, %v7332_v31 }
 0x304   :  { %v2631_v49 = vmul.f32 %v7361_v55, %v7361_v55 }
 0x306   :  { %v2632_v5 = vmin.f32 %v2631_v49, 16.0 }
 0x307   :  { %v5244_v0 = vpop.eup %5243 }
 0x308   :  { %v3295_v54 = vmul.f32 %v5244_v0, %v3293_v46  ;;  %vm3300_vm8 = vweird.f32 %v5244_v0  ;;  %v2633_v3 = vmul.f32 2.1237322e-06, %v2632_v5  ;;  %v2644_v32 = vmul.f32 3.8918573e-05, %v2632_v5 }
 0x309   :  { %vm3301_vm10 = vmor %vm3299_vm9, %vm3300_vm8 }
 0x30a   :  { %v3296_v62 = vsub.f32 1.0, %v3295_v54  ;;  %v2634_v61 = vadd.f32 0.00028619796, %v2633_v3  ;;  %v2645_v60 = vadd.f32 0.001143296, %v2644_v32 }
 0x30c   :  { %v3297_v18 = vmul.f32 %v5244_v0, %v3296_v62  ;;  %v7366_v62 = vpop.xlane.xlu0 %581  ;;  %v2646_v46 = vmul.f32 %v2645_v60, %v2632_v5 }
 0x30d   :  { %v7600_v39 = vmul.f32 0.0078125, %v7366_v62 }
 0x30e   :  { %v3298_v27 = vadd.f32 %v5244_v0, %v3297_v18  ;;  %v2635_v18 = vmul.f32 %v2634_v61, %v2632_v5  ;;  %v2647_v63 = vadd.f32 0.014752088, %v2646_v46 }
 0x30f   :  { %10039 = vst [vmem:[#allocation62_spill] sm:$0xff] %v7600_v39 }
 0x310   :  { %v3302_v51 = vsel %vm3301_vm10, %v5244_v0, %v3298_v27  ;;  %v2636_v24 = vadd.f32 0.0036580483, %v2635_v18  ;;  %v2648_v8 = vmul.f32 %v2647_v63, %v2632_v5 }
 0x311   :  { %v3307_v9 = vsel %vm3304_vm11, %v3306_v41, %v3302_v51  ;;  %v808_v51 = vpop.xlane.xlu1 %807 }
 0x312   :  { %v3308_v52 = vmul.f32 %v3307_v9, %v3283_v50  ;;  %v2637_v45 = vmul.f32 %v2636_v24, %v2632_v5  ;;  %v2649_v27 = vadd.f32 0.112945676, %v2648_v8  ;;  %v908_v31 = vmul.f32 0.0078125, %v808_v51  ;;  %v520_v8 = vpop.xlane.xlu2 %519 }
 0x314   :  { %v5091_v54 = vclamps-f32 %v3308_v52, 1.0  ;;  %v2650_v41 = vmul.f32 %v2649_v27, %v2632_v5  ;;  %v552_v50 = vpop.xlane.xlu0 %551  ;;  %v2638_v9 = vadd.f32 0.05243302, %v2637_v45 }
 0x315   :  { %v7371_v32 = vmul.f32 0.0078125, %v552_v50 }
 0x316   :  { %v4817_v49 = vadd.f32 1.0, %v5091_v54  ;;  %v2651_v3 = vadd.f32 0.4994258, %v2650_v41  ;;  %v2639_v60 = vmul.f32 %v2638_v9, %v2632_v5 }
 0x317   :  { %v972_v61 = vmul.f32 %v7371_v32, %v7371_v32 }
 0x318   :  { %v4881_v0 = vmul.f32 %v4817_v49, %v2129_v44  ;;  %v2652_v52 = vmul.f32 %v2651_v3, %v2632_v5  ;;  %v2640_v44 = vadd.f32 0.18741608, %v2639_v60 }
 0x319   :  { %v1036_v18 = vsub.f32 %v908_v31, %v972_v61 }
 0x31a   :  { %4945 = vst [vmem:[#allocation2 + $0xd0] sm:$0xff] %v4881_v0  ;;  %v2653_v54 = vadd.f32 1.0, %v2652_v52  ;;  %v2641_v63 = vmul.f32 %v2640_v44, %v2632_v5  ;;  %v7375_v52 = vmul.f32 0.0078125, %v520_v8 }
 0x31b   :  { %v1100_v46 = vmax.f32 %v1036_v18, 0.0  ;;  %v7378_v18 = vpop.xlane.xlu1 %583 }
 0x31c   :  { %5245 = vrcp.f32 %v2653_v54  ;;  %v2642_v27 = vadd.f32 1.1283791, %v2641_v63  ;;  %v2665_v41 = vand.u32 2147483648, %v2653_v54  ;;  %v2663_v13 = vand.u32 2147483647, %v2653_v54  ;;  %v776_v5 = vpop.xlane.xlu0 %775 }
 0x31d   :  { %v1228_v24 = vadd.f32 1e-06, %v1100_v46  ;;  %vm2659_vm13 = vweird.f32 %v2653_v54  ;;  %v956_v44 = vmul.f32 %v7375_v52, %v7375_v52  ;;  %v892_v63 = vmul.f32 0.0078125, %v776_v5 }
 0x31e   :  { %v2643_v61 = vmul.f32 %v2642_v27, %v7361_v55  ;;  %v2666_v31 = vor.u32 1.1754944e-38, %v2665_v41  ;;  %vm2664_vm15 = vcmp.eq.f32.partialorder %v2663_v13, 8.507059e+37 }
 0x31f   :  { %5247 = vrsqrt.f32 %v1228_v24  ;;  %v1020_v27 = vsub.f32 %v892_v63, %v956_v44  ;;  %vm1541_vm1 = vweird.f32 %v1228_v24  ;;  %v7402_v63 = vmul.f32 0.0078125, %v6185_v23  ;;  %v10018_v44 = vld [vmem:[#allocation39_spill] sm:$0xff] }
 0x321   :  { %v1084_v17 = vmax.f32 %v1020_v27, 0.0  ;;  %10010 = vst [vmem:[#allocation23_spill] sm:$0xff] %v7402_v63  ;;  %v7427_v27 = vmul.f32 0.0078125, %v6626_v12 }
 0x322   :  { %v5246_v49 = vpop.eup %5245 }
 0x323   :  { %v2655_v0 = vmul.f32 %v5246_v49, %v2653_v54  ;;  %vm2660_vm12 = vweird.f32 %v5246_v49  ;;  %10014 = vst [vmem:[#allocation48_spill] sm:$0xff] %v7427_v27 }
 0x324   :  { %vm2661_vm14 = vmor %vm2659_vm13, %vm2660_vm12 }
 0x325   :  { %v2656_v45 = vsub.f32 1.0, %v2655_v0  ;;  %v5248_v50 = vpop.eup %5247  ;;  %v10005_v0 = vld [vmem:[#allocation14_spill] sm:$0xff] }
 0x326   :  { %v1536_v51 = vmul.f32 %v5248_v50, %v1228_v24  ;;  %vm1542_vm0 = vweird.f32 %v5248_v50  ;;  %v554_v24 = vpop.xlane.xlu1 %553 }
 0x327   :  { %v2657_v3 = vmul.f32 %v5246_v49, %v2656_v45  ;;  %v7383_v45 = vmul.f32 0.0078125, %v10005_v0  ;;  %vm1543_vm2 = vmor %vm1541_vm1, %vm1542_vm0  ;;  %v7405_v0 = vmul.f32 0.0078125, %v6333_v22  ;;  %v7418_v22 = vmul.f32 0.0078125, %v6598_v15 }
 0x328   :  { %v1537_v60 = vmul.f32 %v5248_v50, %v1536_v51 }
 0x329   :  { %v2658_v9 = vadd.f32 %v5246_v49, %v2657_v3  ;;  %10006 = vst [vmem:[#allocation19_spill] sm:$0xff] %v7383_v45  ;;  %v7385_v3 = vpop.xlane.xlu2 %615  ;;  %v7389_v13 = vmul.f32 %v7383_v45, %v7383_v45  ;;  %v7434_v15 = vmul.f32 %v7405_v0, %v7405_v0 }
 0x32a   :  { %v1538_v8 = vmul.f32 0.5, %v1537_v60 }
 0x32b   :  { %v2662_v46 = vsel %vm2661_vm14, %v5246_v49, %v2658_v9  ;;  %10007 = vst [vmem:[#allocation13_spill] sm:$0xff] %v7389_v13  ;;  %v10008_v49 = vld [vmem:[#allocation18_spill] sm:$0xff] }
 0x32c   :  { %v2667_v54 = vsel %vm2664_vm15, %v2666_v31, %v2662_v46  ;;  %v1539_v41 = vsub.f32 1.5, %v1538_v8  ;;  %v7392_v9 = vmul.f32 0.0078125, %v10008_v49  ;;  %v2113_v31 = vmul.f32 0.5, %v7358_v35 }
 0x32d   :  { %v2668_v55 = vmul.f32 %v2667_v54, %v2643_v61  ;;  %v1164_v61 = vsub.f32 %v6350_v26, %v7371_v32  ;;  %v7397_v46 = vadd.f32 1e-06, %v1084_v17  ;;  %v7408_v35 = vmul.f32 0.0078125, %v6417_v16  ;;  %v522_v26 = vpop.xlane.xlu0 %521 }
 0x32e   :  { %10009 = vst [vmem:[#allocation22_spill] sm:$0xff] %v7392_v9  ;;  %v1540_v5 = vmul.f32 %v5248_v50, %v1539_v41  ;;  %v7413_v17 = vmul.f32 %v7392_v9, %v7392_v9  ;;  %v7420_v32 = vmul.f32 0.0078125, %v554_v24  ;;  %v7424_v16 = vmul.f32 %v7402_v63, %v7402_v63  ;;  %v778_v12 = vpop.xlane.xlu1 %777 }
 0x32f   :  { %v5075_v51 = vclamps-f32 %v2668_v55, 1.0  ;;  %10011 = vst [vmem:[#allocation14_spill] sm:$0xff] %v7408_v35  ;;  %5249 = vrsqrt.f32 %v7397_v46  ;;  %v7462_v49 = vmul.f32 %v7427_v27, %v7427_v27  ;;  %v893_v48 = vmul.f32 0.0078125, %v778_v12 }
 0x330   :  { %v1544_v54 = vsel %vm1543_vm2, %v5248_v50, %v1540_v5  ;;  %10012 = vst [vmem:[#allocation18_spill] sm:$0xff] %v7413_v17  ;;  %v7437_v5 = vmul.f32 0.0078125, %v6737_v37  ;;  %v7456_v37 = vmul.f32 %v7418_v22, %v7418_v22  ;;  %vm1381_vm4 = vweird.f32 %v7397_v46 }
 0x331   :  { %v4801_v60 = vadd.f32 1.0, %v5075_v51  ;;  %v1932_v55 = vmul.f32 %v1544_v54, %v1164_v61  ;;  %v810_v50 = vpop.xlane.xlu2 %809  ;;  %10013 = vst [vmem:[#allocation47_spill] sm:$0xff] %v7424_v16  ;;  %v7450_v54 = vmul.f32 0.0078125, %v522_v26 }
 0x332   :  { %v909_v51 = vmul.f32 0.0078125, %v810_v50  ;;  %10016 = vst [vmem:[#allocation50_spill] sm:$0xff] %v7462_v49  ;;  %v7474_v23 = vmul.f32 %v7437_v5, %v7437_v5  ;;  %v7500_v49 = vmul.f32 0.0078125, %v7027_v20 }
 0x333   :  { %v4865_v8 = vmul.f32 %v4801_v60, %v2113_v31  ;;  %v1999_v41 = vmul.f32 %v7349_v40, %v1932_v55  ;;  %v973_v31 = vmul.f32 %v7420_v32, %v7420_v32  ;;  %v7445_v60 = vmul.f32 %v7408_v35, %v7408_v35 }
 0x334   :  { %v957_v27 = vmul.f32 %v7450_v54, %v7450_v54 }
 0x335   :  { %4929 = vst [vmem:[#allocation2 + $0x50] sm:$0xff] %v4865_v8  ;;  %v7448_v61 = vadd.f32 %v7355_v14, %v1999_v41  ;;  %v1037_v55 = vsub.f32 %v909_v51, %v973_v31  ;;  %v5250_v50 = vpop.eup %5249  ;;  %v7467_v41 = vmul.f32 0.0078125, %v6770_v1  ;;  %v7477_v51 = vmul.f32 0.0078125, %v10018_v44  ;;  %v10021_v44 = vld [vmem:[#allocation40_spill] sm:$0xff]  ;;  %v7504_v12 = vpop.xlane.xlu0 %617 }
 0x336   :  { %10015 = vst [vmem:[#allocation49_spill] sm:$0xff] %v7445_v60  ;;  %v1376_v31 = vmul.f32 %v5250_v50, %v7397_v46  ;;  %v7491_v58 = vmul.f32 0.0078125, %v10021_v44  ;;  %v1021_v59 = vsub.f32 %v893_v48, %v957_v27  ;;  %v7522_v27 = vmul.f32 0.0078125, %v7044_v28  ;;  %v10028_v60 = vld [vmem:[#allocation28_spill] sm:$0xff] }
 0x337   :  { %10017 = vst [vmem:[#allocation51_spill] sm:$0xff] %v7467_v41  ;;  %v7470_v24 = vmul.f32 0.70710677, %v7448_v61  ;;  %v1101_v8 = vmax.f32 %v1037_v55, 0.0  ;;  %v7488_v35 = vmul.f32 %v7467_v41, %v7467_v41  ;;  %v7508_v44 = vmul.f32 %v7477_v51, %v7477_v51 }
 0x338   :  { %10019 = vst [vmem:[#allocation39_spill] sm:$0xff] %v7477_v51  ;;  %v1377_v63 = vmul.f32 %v5250_v50, %v1376_v31  ;;  %v7515_v26 = vmul.f32 %v7491_v58, %v7491_v58  ;;  %v1085_v41 = vmax.f32 %v1021_v59, 0.0  ;;  %vm1382_vm3 = vweird.f32 %v5250_v50  ;;  %v10026_v59 = vld [vmem:[#allocation10_spill] sm:$0xff] }
 0x339   :  { %v3311_v1 = vmul.f32 %v7470_v24, %v7470_v24  ;;  %10020 = vst [vmem:[#allocation52_spill] sm:$0xff] %v7488_v35  ;;  %v7493_v55 = vadd.f32 1e-06, %v1101_v8  ;;  %v7495_v21 = vpop.xlane.xlu2 %585  ;;  %v7533_v35 = vmul.f32 0.0078125, %v10026_v59  ;;  %v1148_v45 = vsub.f32 %v10028_v60, %v7375_v52  ;;  %vm1383_vm5 = vmor %vm1381_vm4, %vm1382_vm3 }
 0x33a   :  { %10022 = vst [vmem:[#allocation40_spill] sm:$0xff] %v7500_v49  ;;  %v1378_v31 = vmul.f32 0.5, %v1377_v63  ;;  %v7526_v63 = vmul.f32 %v7500_v49, %v7500_v49  ;;  %v7528_v2 = vadd.f32 1e-06, %v1085_v41 }
 0x33b   :  { %v7502_v9 = vmin.f32 %v3311_v1, 16.0  ;;  %10023 = vst [vmem:[#allocation53_spill] sm:$0xff] %v7504_v12  ;;  %5251 = vrsqrt.f32 %v7493_v55  ;;  %v7556_v16 = vmul.f32 %v7533_v35, %v7533_v35  ;;  %vm1551_vm7 = vweird.f32 %v7493_v55 }
 0x33c   :  { %10024 = vst [vmem:[#allocation54_spill] sm:$0xff] %v7508_v44  ;;  %v1379_v38 = vsub.f32 1.5, %v1378_v31  ;;  %5253 = vrsqrt.f32 %v7528_v2  ;;  %vm1391_vm10 = vweird.f32 %v7528_v2 }
 0x33d   :  { %v3313_v20 = vmul.f32 2.1237322e-06, %v7502_v9  ;;  %v3324_v1 = vmul.f32 3.8918573e-05, %v7502_v9  ;;  %10025 = vst [vmem:[#allocation55_spill] sm:$0xff] %v7522_v27 }
 0x33e   :  { %10027 = vst [vmem:[#allocation10_spill] sm:$0xff] %v7533_v35  ;;  %v1380_v48 = vmul.f32 %v5250_v50, %v1379_v38  ;;  %v7549_v38 = vmul.f32 0.0078125, %v7299_v42 }
 0x33f   :  { %v3314_v8 = vadd.f32 0.00028619796, %v3313_v20  ;;  %v3325_v51 = vadd.f32 0.001143296, %v3324_v1  ;;  %v7543_v20 = vmul.f32 %v7522_v27, %v7522_v27  ;;  %v10030_v1 = vld [vmem:[#allocation17_spill] sm:$0xff]  ;;  %10033 = vst [vmem:[#allocation57_spill] sm:$0xff] %v7556_v16 }
 0x340   :  { %v7546_v59 = vmul.f32 0.0078125, %v10030_v1  ;;  %10032 = vst [vmem:[#allocation56_spill] sm:$0xff] %v7549_v38  ;;  %v1384_v46 = vsel %vm1383_vm5, %v5250_v50, %v1380_v48  ;;  %v7571_v4 = vmul.f32 %v7549_v38, %v7549_v38  ;;  %v524_v38 = vpop.xlane.xlu1 %523 }
 0x341   :  { %v3315_v28 = vmul.f32 %v3314_v8, %v7502_v9  ;;  %v3326_v31 = vmul.f32 %v3325_v51, %v7502_v9  ;;  %v5252_v41 = vpop.eup %5251  ;;  %10029 = vst [vmem:[#allocation28_spill] sm:$0xff] %v7543_v20  ;;  %v1916_v44 = vmul.f32 %v1384_v46, %v1148_v45  ;;  %v556_v60 = vpop.xlane.xlu2 %555  ;;  %v7574_v20 = vmul.f32 0.0078125, %v7301_v29 }
 0x342   :  { %10031 = vst [vmem:[#allocation17_spill] sm:$0xff] %v7546_v59  ;;  %v1546_v52 = vmul.f32 %v5252_v41, %v7493_v55  ;;  %v7562_v42 = vmul.f32 %v7546_v59, %v7546_v59  ;;  %v7576_v27 = vmul.f32 0.0078125, %v556_v60  ;;  %v7578_v53 = vpop.eup %5253  ;;  %vm1552_vm6 = vweird.f32 %v5252_v41 }
 0x343   :  { %v3316_v8 = vadd.f32 0.0036580483, %v3315_v28  ;;  %v3327_v51 = vadd.f32 0.014752088, %v3326_v31  ;;  %v1983_v48 = vmul.f32 %v7349_v40, %v1916_v44  ;;  %v812_v31 = vpop.xlane.xlu0 %811  ;;  %10036 = vst [vmem:[#allocation59_spill] sm:$0xff] %v7571_v4  ;;  %v1386_v59 = vmul.f32 %v7578_v53, %v7528_v2  ;;  %vm1553_vm8 = vmor %vm1551_vm7, %vm1552_vm6 }
 0x344   :  { %10035 = vst [vmem:[#allocation58_spill] sm:$0xff] %v7562_v42  ;;  %v1547_v28 = vmul.f32 %v5252_v41, %v1546_v52  ;;  %v910_v47 = vmul.f32 0.0078125, %v812_v31  ;;  %v974_v29 = vmul.f32 %v7576_v27, %v7576_v27  ;;  %v7591_v60 = vmul.f32 %v7574_v20, %v7574_v20 }
 0x345   :  { %v3317_v50 = vmul.f32 %v3316_v8, %v7502_v9  ;;  %v3328_v45 = vmul.f32 %v3327_v51, %v7502_v9  ;;  %10037 = vst [vmem:[#allocation60_spill] sm:$0xff] %v7574_v20  ;;  %v7581_v44 = vadd.f32 %v7355_v14, %v1983_v48  ;;  %v1387_v46 = vmul.f32 %v7578_v53, %v1386_v59  ;;  %v10040_v59 = vld [vmem:[#allocation31_spill] sm:$0xff] }
 0x346   :  { %v1548_v52 = vmul.f32 0.5, %v1547_v28  ;;  %10038 = vst [vmem:[#allocation61_spill] sm:$0xff] %v7591_v60  ;;  %v1038_v31 = vsub.f32 %v910_v47, %v974_v29  ;;  %v1165_v47 = vsub.f32 %v10040_v59, %v7420_v32  ;;  %v7611_v62 = vmul.f32 0.0078125, %v524_v38 }
 0x347   :  { %v3318_v8 = vadd.f32 0.05243302, %v3317_v50  ;;  %v3329_v51 = vadd.f32 0.112945676, %v3328_v45  ;;  %v7596_v48 = vmul.f32 0.70710677, %v7581_v44  ;;  %vm1392_vm9 = vweird.f32 %v7578_v53 }
 0x348   :  { %v1549_v28 = vsub.f32 1.5, %v1548_v52  ;;  %v1102_v13 = vmax.f32 %v1038_v31, 0.0  ;;  %vm1393_vm11 = vmor %vm1391_vm10, %vm1392_vm9 }
 0x349   :  { %v3319_v50 = vmul.f32 %v3318_v8, %v7502_v9  ;;  %v3330_v45 = vmul.f32 %v3329_v51, %v7502_v9  ;;  %v2671_v17 = vmul.f32 %v7596_v48, %v7596_v48  ;;  %v1388_v51 = vmul.f32 0.5, %v1387_v46 }
 0x34a   :  { %v1550_v8 = vmul.f32 %v5252_v41, %v1549_v28  ;;  %v7614_v28 = vadd.f32 1e-06, %v1102_v13  ;;  %v7627_v13 = vmul.f32 %v7600_v39, %v7600_v39  ;;  %v7681_v39 = vpop.xlane.xlu1 %619 }
 0x34b   :  { %v3320_v4 = vadd.f32 0.18741608, %v3319_v50  ;;  %v3331_v42 = vadd.f32 0.4994258, %v3330_v45  ;;  %v7606_v6 = vmin.f32 %v2671_v17, 16.0  ;;  %v1389_v45 = vsub.f32 1.5, %v1388_v51 }
 0x34c   :  { %v1554_v50 = vsel %vm1553_vm8, %v5252_v41, %v1550_v8  ;;  %5255 = vrsqrt.f32 %v7614_v28  ;;  %10041 = vst [vmem:[#allocation31_spill] sm:$0xff] %v7627_v13  ;;  %vm1561_vm12 = vweird.f32 %v7614_v28 }
 0x34d   :  { %v3332_v52 = vmul.f32 %v3331_v42, %v7502_v9  ;;  %v3321_v29 = vmul.f32 %v3320_v4, %v7502_v9  ;;  %v2673_v46 = vmul.f32 2.1237322e-06, %v7606_v6  ;;  %v1933_v42 = vmul.f32 %v1554_v50, %v1165_v47  ;;  %v780_v4 = vpop.xlane.xlu2 %779  ;;  %10045 = vst [vmem:[#allocation64_spill] sm:$0xff] %v7681_v39 }
 0x34e   :  { %v2684_v32 = vmul.f32 3.8918573e-05, %v7606_v6  ;;  %v1390_v38 = vmul.f32 %v7578_v53, %v1389_v45  ;;  %v7630_v9 = vmul.f32 0.0078125, %v7368_v30  ;;  %v958_v50 = vmul.f32 %v7611_v62, %v7611_v62 }
 0x34f   :  { %v7616_v55 = vadd.f32 1.0, %v3332_v52  ;;  %v3322_v41 = vadd.f32 1.1283791, %v3321_v29  ;;  %v2674_v31 = vadd.f32 0.00028619796, %v2673_v46  ;;  %v2000_v51 = vmul.f32 %v7349_v40, %v1933_v42  ;;  %v10043_v52 = vld [vmem:[#allocation30_spill] sm:$0xff] }
 0x350   :  { %10042 = vst [vmem:[#allocation63_spill] sm:$0xff] %v7630_v9  ;;  %v2685_v8 = vadd.f32 0.001143296, %v2684_v32  ;;  %v1149_v59 = vsub.f32 %v10043_v52, %v7450_v54  ;;  %v1394_v47 = vsel %vm1393_vm11, %v7578_v53, %v1390_v38  ;;  %v894_v30 = vmul.f32 0.0078125, %v780_v4 }
 0x351   :  { %5257 = vrcp.f32 %v7616_v55  ;;  %v2675_v2 = vmul.f32 %v2674_v31, %v7606_v6  ;;  %v7645_v46 = vadd.f32 %v7355_v14, %v2000_v51  ;;  %v7649_v42 = vmul.f32 %v7630_v9, %v7630_v9 }
 0x352   :  { %v2686_v29 = vmul.f32 %v2685_v8, %v7606_v6  ;;  %v7652_v53 = vmul.f32 0.0078125, %v7378_v18  ;;  %v1917_v54 = vmul.f32 %v1394_v47, %v1149_v59  ;;  %v1022_v32 = vsub.f32 %v894_v30, %v958_v50  ;;  %v7654_v38 = vpop.eup %5255 }
 0x353   :  { %10044 = vst [vmem:[#allocation30_spill] sm:$0xff] %v7649_v42  ;;  %v7657_v4 = vmul.f32 0.5, %v7448_v61  ;;  %v3323_v31 = vmul.f32 %v3322_v41, %v7470_v24  ;;  %v2676_v8 = vadd.f32 0.0036580483, %v2675_v2  ;;  %v3345_v45 = vand.u32 2147483648, %v7616_v55  ;;  %v7671_v41 = vpop.xlane.xlu0 %587 }
 0x354   :  { %v2687_v52 = vadd.f32 0.014752088, %v2686_v29  ;;  %v7662_v17 = vmul.f32 0.70710677, %v7645_v46  ;;  %v1984_v18 = vmul.f32 %v7349_v40, %v1917_v54  ;;  %v1556_v59 = vmul.f32 %v7654_v38, %v7614_v28  ;;  %v10049_v28 = vld [vmem:[#allocation33_spill] sm:$0xff] }
 0x355   :  { %v3343_v61 = vand.u32 2147483647, %v7616_v55  ;;  %v2677_v50 = vmul.f32 %v2676_v8, %v7606_v6  ;;  %v1086_v54 = vmax.f32 %v1022_v32, 0.0  ;;  %vm3339_vm13 = vweird.f32 %v7616_v55 }
 0x356   :  { %v2688_v24 = vmul.f32 %v2687_v52, %v7606_v6  ;;  %v3351_v30 = vmul.f32 %v7662_v17, %v7662_v17  ;;  %v7676_v2 = vadd.f32 %v7355_v14, %v1984_v18  ;;  %v1557_v29 = vmul.f32 %v7654_v38, %v1556_v59 }
 0x357   :  { %v5258_v51 = vpop.eup %5257  ;;  %v2678_v12 = vadd.f32 0.05243302, %v2677_v50  ;;  %v3346_v52 = vor.u32 1.1754944e-38, %v3345_v45  ;;  %v7689_v13 = vadd.f32 1e-06, %v1086_v54  ;;  %vm1562_vm15 = vweird.f32 %v7654_v38 }
 0x358   :  { %v3335_v47 = vmul.f32 %v5258_v51, %v7616_v55  ;;  %v2689_v8 = vadd.f32 0.112945676, %v2688_v24  ;;  %v7683_v7 = vmin.f32 %v3351_v30, 16.0  ;;  %v7686_v20 = vmul.f32 0.70710677, %v7676_v2  ;;  %vm7714_vm2 = vmor %vm1561_vm12, %vm1562_vm15 }
 0x359   :  { %v1558_v18 = vmul.f32 0.5, %v1557_v29  ;;  %vm3340_vm14 = vweird.f32 %v5258_v51  ;;  %v2679_v30 = vmul.f32 %v2678_v12, %v7606_v6  ;;  %vm3344_vm1 = vcmp.eq.f32.partialorder %v3343_v61, 8.507059e+37 }
 0x35a   :  { %v3336_v42 = vsub.f32 1.0, %v3335_v47  ;;  %v2690_v59 = vmul.f32 %v2689_v8, %v7606_v6  ;;  %v3353_v32 = vmul.f32 2.1237322e-06, %v7683_v7  ;;  %v3364_v47 = vmul.f32 3.8918573e-05, %v7683_v7  ;;  %vm3341_vm0 = vmor %vm3339_vm13, %vm3340_vm14 }
 0x35b   :  { %v2711_v50 = vmul.f32 %v7686_v20, %v7686_v20  ;;  %v1559_v45 = vsub.f32 1.5, %v1558_v18  ;;  %5259 = vrsqrt.f32 %v7689_v13  ;;  %vm1401_vm8 = vweird.f32 %v7689_v13 }
 0x35c   :  { %v3337_v43 = vmul.f32 %v5258_v51, %v3336_v42  ;;  %v2691_v39 = vadd.f32 0.4994258, %v2690_v59  ;;  %v3354_v42 = vadd.f32 0.00028619796, %v3353_v32  ;;  %v3365_v29 = vadd.f32 0.001143296, %v3364_v47 }
 0x35d   :  { %v7699_v54 = vmin.f32 %v2711_v50, 16.0  ;;  %v1560_v8 = vmul.f32 %v7654_v38, %v1559_v45  ;;  %v2680_v32 = vadd.f32 0.18741608, %v2679_v30  ;;  %v10048_v45 = vld [vmem:[#allocation34_spill] sm:$0xff]  ;;  %v1166_v30 = vsub.f32 %v10049_v28, %v7576_v27 }
 0x35e   :  { %v3338_v24 = vadd.f32 %v5258_v51, %v3337_v43  ;;  %v2692_v1 = vmul.f32 %v2691_v39, %v7606_v6  ;;  %v3355_v12 = vmul.f32 %v3354_v42, %v7683_v7  ;;  %v3366_v18 = vmul.f32 %v3365_v29, %v7683_v7  ;;  %v814_v42 = vpop.xlane.xlu1 %813 }
 0x35f   :  { %v2713_v55 = vmul.f32 2.1237322e-06, %v7699_v54  ;;  %v2724_v50 = vmul.f32 3.8918573e-05, %v7699_v54  ;;  %v7727_v29 = vmul.f32 0.5, %v7581_v44  ;;  %v911_v49 = vmul.f32 0.0078125, %v814_v42 }
 0x360   :  { %v3342_v35 = vsel %vm3341_vm0, %v5258_v51, %v3338_v24  ;;  %v7707_v47 = vadd.f32 1.0, %v2692_v1  ;;  %v3356_v51 = vadd.f32 0.0036580483, %v3355_v12  ;;  %v3367_v61 = vadd.f32 0.014752088, %v3366_v18 }
 0x361   :  { %v3347_v43 = vsel %vm3344_vm1, %v3346_v52, %v3342_v35  ;;  %v558_v35 = vpop.xlane.xlu0 %557  ;;  %v2714_v52 = vadd.f32 0.00028619796, %v2713_v55  ;;  %v2681_v24 = vmul.f32 %v2680_v32, %v7606_v6 }
 0x362   :  { %v3348_v59 = vmul.f32 %v3347_v43, %v3323_v31  ;;  %v1564_v31 = vsel %vm7714_vm2, %v7654_v38, %v1560_v8  ;;  %5261 = vrcp.f32 %v7707_v47  ;;  %v3357_v43 = vmul.f32 %v3356_v51, %v7683_v7  ;;  %v7733_v38 = vpop.eup %5259 }
 0x363   :  { %v3368_v12 = vmul.f32 %v3367_v61, %v7683_v7  ;;  %v7731_v18 = vmul.f32 0.0078125, %v558_v35  ;;  %v2715_v55 = vmul.f32 %v2714_v52, %v7699_v54  ;;  %v1934_v39 = vmul.f32 %v1564_v31, %v1166_v30 }
 0x364   :  { %v5092_v1 = vclamps-f32 %v3348_v59, 1.0  ;;  %v2725_v59 = vadd.f32 0.001143296, %v2724_v50  ;;  %v3358_v27 = vadd.f32 0.05243302, %v3357_v43  ;;  %v7741_v61 = vmul.f32 0.5, %v7645_v46 }
 0x365   :  { %v3369_v28 = vadd.f32 0.112945676, %v3368_v12  ;;  %v2716_v19 = vadd.f32 0.0036580483, %v2715_v55  ;;  %v2001_v35 = vmul.f32 %v7349_v40, %v1934_v39  ;;  %v1396_v6 = vmul.f32 %v7733_v38, %v7689_v13 }
 0x366   :  { %v4818_v8 = vadd.f32 1.0, %v5092_v1  ;;  %v2726_v51 = vmul.f32 %v2725_v59, %v7699_v54  ;;  %v3359_v1 = vmul.f32 %v3358_v27, %v7683_v7  ;;  %v975_v30 = vmul.f32 %v7731_v18, %v7731_v18 }
 0x367   :  { %v3370_v50 = vmul.f32 %v3369_v28, %v7683_v7  ;;  %v2717_v52 = vmul.f32 %v2716_v19, %v7699_v54  ;;  %v7749_v31 = vadd.f32 %v7355_v14, %v2001_v35  ;;  %v2682_v46 = vadd.f32 1.1283791, %v2681_v24 }
 0x368   :  { %v4882_v44 = vmul.f32 %v4818_v8, %v7657_v4  ;;  %v5262_v32 = vpop.eup %5261  ;;  %v2727_v4 = vadd.f32 0.014752088, %v2726_v51  ;;  %v2703_v43 = vand.u32 2147483647, %v7707_v47  ;;  %v2705_v8 = vand.u32 2147483648, %v7707_v47 }
 0x369   :  { %v2695_v42 = vmul.f32 %v5262_v32, %v7707_v47  ;;  %v3371_v12 = vadd.f32 0.4994258, %v3370_v50  ;;  %v2718_v55 = vadd.f32 0.05243302, %v2717_v52  ;;  %v7758_v19 = vmul.f32 0.70710677, %v7749_v31 }
 0x36a   :  { %4946 = vst [vmem:[#allocation2 + $0xd8] sm:$0xff] %v4882_v44  ;;  %v2728_v59 = vmul.f32 %v2727_v4, %v7699_v54  ;;  %v3360_v27 = vadd.f32 0.18741608, %v3359_v1  ;;  %v1397_v44 = vmul.f32 %v7733_v38, %v1396_v6  ;;  %v1039_v50 = vsub.f32 %v911_v49, %v975_v30 }
 0x36b   :  { %v2696_v39 = vsub.f32 1.0, %v2695_v42  ;;  %v3372_v28 = vmul.f32 %v3371_v12, %v7683_v7  ;;  %v2719_v24 = vmul.f32 %v2718_v55, %v7699_v54  ;;  %v3391_v35 = vmul.f32 %v7758_v19, %v7758_v19  ;;  %v526_v55 = vpop.xlane.xlu2 %525 }
 0x36c   :  { %v2729_v51 = vadd.f32 0.112945676, %v2728_v59  ;;  %vm2700_vm3 = vweird.f32 %v5262_v32  ;;  %v1398_v4 = vmul.f32 0.5, %v1397_v44  ;;  %v2683_v16 = vmul.f32 %v2682_v46, %v7596_v48 }
 0x36d   :  { %v2697_v60 = vmul.f32 %v5262_v32, %v2696_v39  ;;  %v7765_v52 = vadd.f32 1.0, %v3372_v28  ;;  %v2720_v42 = vadd.f32 0.18741608, %v2719_v24  ;;  %v7769_v12 = vmin.f32 %v3391_v35, 16.0 }
 0x36e   :  { %v2730_v1 = vmul.f32 %v2729_v51, %v7699_v54  ;;  %vm2699_vm4 = vweird.f32 %v7707_v47  ;;  %vm2704_vm5 = vcmp.eq.f32.partialorder %v2703_v43, 8.507059e+37  ;;  %v2706_v49 = vor.u32 1.1754944e-38, %v2705_v8 }
 0x36f   :  { %v2698_v6 = vadd.f32 %v5262_v32, %v2697_v60  ;;  %5263 = vrcp.f32 %v7765_v52  ;;  %vm2701_vm6 = vmor %vm2699_vm4, %vm2700_vm3  ;;  %v3361_v30 = vmul.f32 %v3360_v27, %v7683_v7  ;;  %v1103_v39 = vmax.f32 %v1039_v50, 0.0 }
 0x370   :  { %v2731_v59 = vadd.f32 0.4994258, %v2730_v1  ;;  %v3393_v48 = vmul.f32 2.1237322e-06, %v7769_v12  ;;  %v3404_v46 = vmul.f32 3.8918573e-05, %v7769_v12  ;;  %v2721_v60 = vmul.f32 %v2720_v42, %v7699_v54 }
 0x371   :  { %v2702_v28 = vsel %vm2701_vm6, %v5262_v32, %v2698_v6  ;;  %v1399_v44 = vsub.f32 1.5, %v1398_v4  ;;  %vm1402_vm7 = vweird.f32 %v7733_v38  ;;  %v7778_v47 = vmul.f32 0.0078125, %v526_v55 }
 0x372   :  { %v2707_v24 = vsel %vm2704_vm5, %v2706_v49, %v2702_v28  ;;  %v2732_v8 = vmul.f32 %v2731_v59, %v7699_v54  ;;  %v3394_v51 = vadd.f32 0.00028619796, %v3393_v48  ;;  %v3405_v7 = vadd.f32 0.001143296, %v3404_v46  ;;  %vm7791_vm9 = vmor %vm1401_vm8, %vm1402_vm7 }
 0x373   :  { %v2708_v43 = vmul.f32 %v2707_v24, %v2683_v16  ;;  %v3362_v27 = vadd.f32 1.1283791, %v3361_v30  ;;  %v1400_v32 = vmul.f32 %v7733_v38, %v1399_v44  ;;  %v7783_v35 = vadd.f32 1e-06, %v1103_v39  ;;  %v782_v44 = vpop.xlane.xlu0 %781  ;;  %v7821_v16 = vpop.xlane.xlu1 %589 }
 0x374   :  { %v7785_v1 = vadd.f32 1.0, %v2732_v8  ;;  %v3395_v42 = vmul.f32 %v3394_v51, %v7769_v12  ;;  %v3406_v6 = vmul.f32 %v3405_v7, %v7769_v12  ;;  %v3383_v13 = vand.u32 2147483647, %v7765_v52 }
 0x375   :  { %v5264_v50 = vpop.eup %5263  ;;  %v5076_v4 = vclamps-f32 %v2708_v43, 1.0  ;;  %v1404_v55 = vsel %vm7791_vm9, %v7733_v38, %v1400_v32  ;;  %5265 = vrsqrt.f32 %v7783_v35  ;;  %v3385_v30 = vand.u32 2147483648, %v7765_v52 }
 0x376   :  { %v3375_v54 = vmul.f32 %v5264_v50, %v7765_v52  ;;  %v2722_v59 = vadd.f32 1.1283791, %v2721_v60  ;;  %5267 = vrcp.f32 %v7785_v1  ;;  %v3363_v39 = vmul.f32 %v3362_v27, %v7662_v17 }
 0x377   :  { %v4802_v49 = vadd.f32 1.0, %v5076_v4  ;;  %v3396_v48 = vadd.f32 0.0036580483, %v3395_v42  ;;  %v3407_v46 = vadd.f32 0.014752088, %v3406_v6  ;;  %vm3379_vm10 = vweird.f32 %v7765_v52 }
 0x378   :  { %v3376_v28 = vsub.f32 1.0, %v3375_v54  ;;  %v10052_v38 = vsub.f32 %v10048_v45, %v7611_v62  ;;  %v959_v8 = vmul.f32 %v7778_v47, %v7778_v47  ;;  %vm3380_vm11 = vweird.f32 %v5264_v50 }
 0x379   :  { %v4866_v24 = vmul.f32 %v4802_v49, %v7727_v29  ;;  %v3397_v51 = vmul.f32 %v3396_v48, %v7769_v12  ;;  %v3408_v17 = vmul.f32 %v3407_v46, %v7769_v12  ;;  %vm7813_vm12 = vcmp.eq.f32.partialorder %v3383_v13, 8.507059e+37  ;;  %vm3381_vm13 = vmor %vm3379_vm10, %vm3380_vm11 }
 0x37a   :  { %v1918_v43 = vmul.f32 %v1404_v55, %v10052_v38  ;;  %v3377_v60 = vmul.f32 %v5264_v50, %v3376_v28  ;;  %v3386_v29 = vor.u32 1.1754944e-38, %v3385_v30  ;;  %v895_v32 = vmul.f32 0.0078125, %v782_v44 }
 0x37b   :  { %4930 = vst [vmem:[#allocation2 + $0x58] sm:$0xff] %v4866_v24  ;;  %v7818_v62 = vpop.eup %5265  ;;  %v2723_v4 = vmul.f32 %v2722_v59, %v7686_v20  ;;  %v3398_v42 = vadd.f32 0.05243302, %v3397_v51  ;;  %v3409_v6 = vadd.f32 0.112945676, %v3408_v17  ;;  %v2745_v13 = vand.u32 2147483648, %v7785_v1 }
 0x37c   :  { %v1985_v27 = vmul.f32 %v7349_v40, %v1918_v43  ;;  %v3378_v45 = vadd.f32 %v5264_v50, %v3377_v60  ;;  %v5268_v54 = vpop.eup %5267  ;;  %v1566_v40 = vmul.f32 %v7818_v62, %v7783_v35  ;;  %v1023_v49 = vsub.f32 %v895_v32, %v959_v8  ;;  %v7851_v32 = vpop.xlane.xlu2 %621 }
 0x37d   :  { %v2735_v20 = vmul.f32 %v5268_v54, %v7785_v1  ;;  %vm2739_vm14 = vweird.f32 %v7785_v1  ;;  %v3399_v59 = vmul.f32 %v3398_v42, %v7769_v12  ;;  %v2743_v28 = vand.u32 2147483647, %v7785_v1 }
 0x37e   :  { %v7828_v55 = vadd.f32 %v7355_v14, %v1985_v27  ;;  %v3382_v30 = vsel %vm3381_vm13, %v5264_v50, %v3378_v45  ;;  %v3410_v48 = vmul.f32 %v3409_v6, %v7769_v12  ;;  %v1567_v50 = vmul.f32 %v7818_v62, %v1566_v40 }
 0x37f   :  { %v3387_v52 = vsel %vm7813_vm12, %v3386_v29, %v3382_v30  ;;  %v2736_v44 = vsub.f32 1.0, %v2735_v20  ;;  %v3400_v24 = vadd.f32 0.18741608, %v3399_v59  ;;  %v2746_v38 = vor.u32 1.1754944e-38, %v2745_v13 }
 0x380   :  { %v7840_v14 = vmul.f32 0.70710677, %v7828_v55  ;;  %v3388_v46 = vmul.f32 %v3387_v52, %v3363_v39  ;;  %v3411_v43 = vadd.f32 0.4994258, %v3410_v48  ;;  %v1087_v60 = vmax.f32 %v1023_v49, 0.0  ;;  %v560_v48 = vpop.xlane.xlu1 %559 }
 0x381   :  { %v2737_v17 = vmul.f32 %v5268_v54, %v2736_v44  ;;  %vm2740_vm15 = vweird.f32 %v5268_v54  ;;  %v1568_v7 = vmul.f32 0.5, %v1567_v50  ;;  %vm1572_vm0 = vweird.f32 %v7818_v62  ;;  %v10056_v50 = vld [vmem:[#allocation37_spill] sm:$0xff] }
 0x382   :  { %v2751_v8 = vmul.f32 %v7840_v14, %v7840_v14  ;;  %v5093_v51 = vclamps-f32 %v3388_v46, 1.0  ;;  %v3412_v29 = vmul.f32 %v3411_v43, %v7769_v12  ;;  %v7849_v39 = vadd.f32 1e-06, %v1087_v60  ;;  %vm2741_vm1 = vmor %vm2739_vm14, %vm2740_vm15 }
 0x383   :  { %v2738_v42 = vadd.f32 %v5268_v54, %v2737_v17  ;;  %v3401_v6 = vmul.f32 %v3400_v24, %v7769_v12  ;;  %v1569_v13 = vsub.f32 1.5, %v1568_v7  ;;  %vm2744_vm2 = vcmp.eq.f32.partialorder %v2743_v28, 8.507059e+37 }
 0x384   :  { %v7846_v27 = vmin.f32 %v2751_v8, 16.0  ;;  %v4819_v45 = vadd.f32 1.0, %v5093_v51  ;;  %v7856_v40 = vadd.f32 1.0, %v3412_v29  ;;  %5269 = vrsqrt.f32 %v7849_v39  ;;  %v528_v51 = vpop.xlane.xlu0 %527  ;;  %v10057_v29 = vld [vmem:[#allocation38_spill] sm:$0xff] }
 0x385   :  { %v2742_v59 = vsel %vm2741_vm1, %v5268_v54, %v2738_v42  ;;  %v1570_v52 = vmul.f32 %v7818_v62, %v1569_v13  ;;  %vm1571_vm3 = vweird.f32 %v7783_v35  ;;  %v7869_v46 = vmul.f32 %v7652_v53, %v7652_v53 }
 0x386   :  { %v2753_v49 = vmul.f32 2.1237322e-06, %v7846_v27  ;;  %v2764_v30 = vmul.f32 3.8918573e-05, %v7846_v27  ;;  %v4883_v20 = vmul.f32 %v4819_v45, %v7741_v61  ;;  %v2747_v1 = vsel %vm2744_vm2, %v2746_v38, %v2742_v59  ;;  %vm1573_vm4 = vmor %vm1571_vm3, %vm1572_vm0 }
 0x387   :  { %5271 = vrcp.f32 %v7856_v40  ;;  %v2748_v44 = vmul.f32 %v2747_v1, %v2723_v4  ;;  %v7874_v28 = vmul.f32 0.0078125, %v7385_v3  ;;  %v3402_v24 = vadd.f32 1.1283791, %v3401_v6 }
 0x388   :  { %4947 = vst [vmem:[#allocation2 + $0xe0] sm:$0xff] %v4883_v20  ;;  %v2754_v61 = vadd.f32 0.00028619796, %v2753_v49  ;;  %v2765_v54 = vadd.f32 0.001143296, %v2764_v30  ;;  %v1167_v38 = vsub.f32 %v10056_v50, %v7731_v18  ;;  %v1574_v35 = vsel %vm1573_vm4, %v7818_v62, %v1570_v52  ;;  %v816_v52 = vpop.xlane.xlu2 %815 }
 0x389   :  { %10055 = vst [vmem:[#allocation34_spill] sm:$0xff] %v7874_v28  ;;  %v5077_v43 = vclamps-f32 %v2748_v44, 1.0  ;;  %v3423_v8 = vand.u32 2147483647, %v7856_v40  ;;  %v2115_v7 = vmul.f32 0.5, %v7676_v2  ;;  %v1151_v45 = vsub.f32 %v10057_v29, %v7778_v47 }
 0x38a   :  { %v2755_v60 = vmul.f32 %v2754_v61, %v7846_v27  ;;  %v2766_v4 = vmul.f32 %v2765_v54, %v7846_v27  ;;  %v7882_v17 = vpop.eup %5269  ;;  %v1935_v3 = vmul.f32 %v1574_v35, %v1167_v38  ;;  %v7887_v42 = vmul.f32 0.0078125, %v560_v48  ;;  %v7897_v2 = vld [vmem:[%s9828_s3] ss:$0 sm:$0xff] }
 0x38b   :  { %v4803_v18 = vadd.f32 1.0, %v5077_v43  ;;  %v1406_v13 = vmul.f32 %v7882_v17, %v7849_v39  ;;  %v3403_v30 = vmul.f32 %v3402_v24, %v7758_v19  ;;  %vm3419_vm5 = vweird.f32 %v7856_v40  ;;  %v7911_v54 = vld [vmem:[%s9829_s4] ss:$0 sm:$0xff] }
 0x38c   :  { %v2756_v62 = vadd.f32 0.0036580483, %v2755_v60  ;;  %v2767_v6 = vadd.f32 0.014752088, %v2766_v4  ;;  %v3425_v20 = vand.u32 2147483648, %v7856_v40  ;;  %v2002_v59 = vmul.f32 %v7897_v2, %v1935_v3  ;;  %v784_v4 = vpop.xlane.xlu1 %783  ;;  %v7931_v12 = vpop.xlane.xlu0 %623 }
 0x38d   :  { %v5272_v49 = vpop.eup %5271  ;;  %v4867_v48 = vmul.f32 %v4803_v18, %v2115_v7  ;;  %vm7901_vm6 = vcmp.eq.f32.partialorder %v3423_v8, 8.507059e+37  ;;  %vm1411_vm7 = vweird.f32 %v7849_v39  ;;  %v1407_v50 = vmul.f32 %v7882_v17, %v1406_v13 }
 0x38e   :  { %v3415_v1 = vmul.f32 %v5272_v49, %v7856_v40  ;;  %v2757_v19 = vmul.f32 %v2756_v62, %v7846_v27  ;;  %v2768_v61 = vmul.f32 %v2767_v6, %v7846_v27  ;;  %v7914_v24 = vadd.f32 %v7911_v54, %v2002_v59 }
 0x38f   :  { %v976_v38 = vmul.f32 %v7887_v42, %v7887_v42  ;;  %4931 = vst [vmem:[#allocation2 + $0x60] sm:$0xff] %v4867_v48  ;;  %v7919_v8 = vmul.f32 0.0078125, %v528_v51  ;;  %v912_v60 = vmul.f32 0.0078125, %v816_v52  ;;  %v1408_v18 = vmul.f32 0.5, %v1407_v50 }
 0x390   :  { %v3416_v35 = vsub.f32 1.0, %v3415_v1  ;;  %v2758_v43 = vadd.f32 0.05243302, %v2757_v19  ;;  %v2769_v7 = vadd.f32 0.112945676, %v2768_v61  ;;  %vm1412_vm8 = vweird.f32 %v7882_v17 }
 0x391   :  { %v7922_v3 = vmul.f32 0.70710677, %v7914_v24  ;;  %vm3420_vm9 = vweird.f32 %v5272_v49  ;;  %v1040_v13 = vsub.f32 %v912_v60, %v976_v38  ;;  %v1409_v48 = vsub.f32 1.5, %v1408_v18  ;;  %vm1413_vm11 = vmor %vm1411_vm7, %vm1412_vm8 }
 0x392   :  { %v3417_v62 = vmul.f32 %v5272_v49, %v3416_v35  ;;  %v2759_v6 = vmul.f32 %v2758_v43, %v7846_v27  ;;  %v2770_v59 = vmul.f32 %v2769_v7, %v7846_v27  ;;  %v896_v52 = vmul.f32 0.0078125, %v784_v4  ;;  %vm3421_vm10 = vmor %vm3419_vm5, %vm3420_vm9 }
 0x393   :  { %v3431_v51 = vmul.f32 %v7922_v3, %v7922_v3  ;;  %v960_v61 = vmul.f32 %v7919_v8, %v7919_v8  ;;  %v1104_v50 = vmax.f32 %v1040_v13, 0.0  ;;  %v3426_v35 = vor.u32 1.1754944e-38, %v3425_v20 }
 0x394   :  { %v3418_v1 = vadd.f32 %v5272_v49, %v3417_v62  ;;  %v2760_v19 = vadd.f32 0.18741608, %v2759_v6  ;;  %v2771_v38 = vadd.f32 0.4994258, %v2770_v59  ;;  %v1410_v60 = vmul.f32 %v7882_v17, %v1409_v48 }
 0x395   :  { %v7935_v43 = vmin.f32 %v3431_v51, 16.0  ;;  %v7939_v18 = vadd.f32 1e-06, %v1104_v50  ;;  %v1024_v62 = vsub.f32 %v896_v52, %v960_v61  ;;  %v2116_v57 = vmul.f32 0.5, %v7828_v55 }
 0x396   :  { %v3422_v7 = vsel %vm3421_vm10, %v5272_v49, %v3418_v1  ;;  %v2761_v4 = vmul.f32 %v2760_v19, %v7846_v27  ;;  %v2772_v13 = vmul.f32 %v2771_v38, %v7846_v27  ;;  %v7951_v49 = vmul.f32 0.0078125, %v7495_v21  ;;  %v826_v38 = vpop.xlane.xlu1 %825 }
 0x397   :  { %v3427_v6 = vsel %vm7901_vm6, %v3426_v35, %v3422_v7  ;;  %v3433_v40 = vmul.f32 2.1237322e-06, %v7935_v43  ;;  %v3444_v20 = vmul.f32 3.8918573e-05, %v7935_v43  ;;  %v1414_v51 = vsel %vm1413_vm11, %v7882_v17, %v1410_v60 }
 0x398   :  { %v3428_v59 = vmul.f32 %v3427_v6, %v3403_v30  ;;  %5273 = vrsqrt.f32 %v7939_v18  ;;  %v7955_v44 = vadd.f32 1.0, %v2772_v13  ;;  %v1919_v52 = vmul.f32 %v1414_v51, %v1151_v45 }
 0x399   :  { %v3434_v27 = vadd.f32 0.00028619796, %v3433_v40  ;;  %v3445_v48 = vadd.f32 0.001143296, %v3444_v20  ;;  %v1088_v30 = vmax.f32 %v1024_v62, 0.0  ;;  %v7966_v17 = vmul.f32 %v7874_v28, %v7874_v28  ;;  %v824_v40 = vpop.xlane.xlu0 %823 }
 0x39a   :  { %v5094_v1 = vclamps-f32 %v3428_v59, 1.0  ;;  %v2132_v19 = vmul.f32 0.5, %v7749_v31  ;;  %v2762_v61 = vadd.f32 1.1283791, %v2761_v4  ;;  %5275 = vrcp.f32 %v7955_v44  ;;  %v10060_v59 = vld [vmem:[#allocation44_spill] sm:$0xff] }
 0x39b   :  { %v3435_v47 = vmul.f32 %v3434_v27, %v7935_v43  ;;  %v3446_v29 = vmul.f32 %v3445_v48, %v7935_v43  ;;  %v1986_v45 = vmul.f32 %v7897_v2, %v1919_v52  ;;  %v7975_v35 = vmul.f32 %v7951_v49, %v7951_v49 }
 0x39c   :  { %v4820_v50 = vadd.f32 1.0, %v5094_v1  ;;  %v7980_v60 = vmul.f32 0.0078125, %v7671_v41  ;;  %v7982_v31 = vadd.f32 1e-06, %v1088_v30  ;;  %v2783_v20 = vand.u32 2147483647, %v7955_v44 }
 0x39d   :  { %v3436_v62 = vadd.f32 0.0036580483, %v3435_v47  ;;  %v3447_v6 = vadd.f32 0.014752088, %v3446_v29  ;;  %v7985_v13 = vadd.f32 %v7911_v54, %v1986_v45  ;;  %v1168_v51 = vsub.f32 %v10060_v59, %v7887_v42 }
 0x39e   :  { %v5274_v7 = vpop.eup %5273  ;;  %v4884_v4 = vmul.f32 %v4820_v50, %v2132_v19  ;;  %5277 = vrsqrt.f32 %v7982_v31  ;;  %v2763_v41 = vmul.f32 %v2762_v61, %v7840_v14  ;;  %vm2779_vm12 = vweird.f32 %v7955_v44 }
 0x39f   :  { %v1576_v27 = vmul.f32 %v5274_v7, %v7939_v18  ;;  %v3437_v48 = vmul.f32 %v3436_v62, %v7935_v43  ;;  %v3448_v52 = vmul.f32 %v3447_v6, %v7935_v43  ;;  %v7996_v1 = vmul.f32 0.70710677, %v7985_v13 }
 0x3a0   :  { %4948 = vst [vmem:[#allocation2 + $0xe8] sm:$0xff] %v4884_v4  ;;  %v5276_v30 = vpop.eup %5275  ;;  %vm1581_vm13 = vweird.f32 %v7939_v18  ;;  %v916_v42 = vmul.f32 0.0078125, %v824_v40  ;;  %v2785_v47 = vand.u32 2147483648, %v7955_v44  ;;  %vm8002_vm14 = vcmp.eq.f32.partialorder %v2783_v20, 8.507059e+37 }
 0x3a1   :  { %v1577_v19 = vmul.f32 %v5274_v7, %v1576_v27  ;;  %v2775_v50 = vmul.f32 %v5276_v30, %v7955_v44  ;;  %v3438_v29 = vadd.f32 0.05243302, %v3437_v48  ;;  %v3449_v14 = vadd.f32 0.112945676, %v3448_v52  ;;  %v8011_v27 = vpop.xlane.xlu2 %591 }
 0x3a2   :  { %v2791_v45 = vmul.f32 %v7996_v1, %v7996_v1  ;;  %v1044_v62 = vsub.f32 %v916_v42, %v7434_v15  ;;  %vm1582_vm15 = vweird.f32 %v5274_v7  ;;  %vm2780_vm0 = vweird.f32 %v5276_v30 }
 0x3a3   :  { %v1578_v4 = vmul.f32 0.5, %v1577_v19  ;;  %v2776_v6 = vsub.f32 1.0, %v2775_v50  ;;  %v3439_v59 = vmul.f32 %v3438_v29, %v7935_v43  ;;  %v3450_v40 = vmul.f32 %v3449_v14, %v7935_v43  ;;  %vm1583_vm1 = vmor %vm1581_vm13, %vm1582_vm15 }
 0x3a4   :  { %v8013_v48 = vpop.eup %5277  ;;  %v8015_v20 = vmin.f32 %v2791_v45, 16.0  ;;  %v1108_v21 = vmax.f32 %v1044_v62, 0.0  ;;  %v2786_v42 = vor.u32 1.1754944e-38, %v2785_v47  ;;  %vm2781_vm2 = vmor %vm2779_vm12, %vm2780_vm0  ;;  %vm1421_vm4 = vweird.f32 %v7982_v31 }
 0x3a5   :  { %v1579_v52 = vsub.f32 1.5, %v1578_v4  ;;  %v2777_v39 = vmul.f32 %v5276_v30, %v2776_v6  ;;  %v3440_v19 = vadd.f32 0.18741608, %v3439_v59  ;;  %v3451_v28 = vadd.f32 0.4994258, %v3450_v40 }
 0x3a6   :  { %v1416_v15 = vmul.f32 %v8013_v48, %v7982_v31  ;;  %v2793_v50 = vmul.f32 2.1237322e-06, %v8015_v20  ;;  %v2804_v29 = vmul.f32 3.8918573e-05, %v8015_v20  ;;  %v917_v4 = vmul.f32 0.0078125, %v826_v38 }
 0x3a7   :  { %v1580_v14 = vmul.f32 %v5274_v7, %v1579_v52  ;;  %v2778_v25 = vadd.f32 %v5276_v30, %v2777_v39  ;;  %v3452_v9 = vmul.f32 %v3451_v28, %v7935_v43  ;;  %v3441_v47 = vmul.f32 %v3440_v19, %v7935_v43 }
 0x3a8   :  { %v1417_v45 = vmul.f32 %v8013_v48, %v1416_v15  ;;  %v2794_v62 = vadd.f32 0.00028619796, %v2793_v50  ;;  %v2805_v6 = vadd.f32 0.001143296, %v2804_v29  ;;  %v8032_v52 = vadd.f32 1e-06, %v1108_v21 }
 0x3a9   :  { %v1584_v59 = vsel %vm1583_vm1, %v5274_v7, %v1580_v14  ;;  %v2782_v40 = vsel %vm2781_vm2, %v5276_v30, %v2778_v25  ;;  %v8030_v39 = vadd.f32 1.0, %v3452_v9  ;;  %v1045_v25 = vsub.f32 %v917_v4, %v7456_v37  ;;  %v828_v19 = vpop.xlane.xlu2 %827 }
 0x3aa   :  { %v1936_v28 = vmul.f32 %v1584_v59, %v1168_v51  ;;  %v2787_v18 = vsel %vm8002_vm14, %v2786_v42, %v2782_v40  ;;  %v2795_v38 = vmul.f32 %v2794_v62, %v8015_v20  ;;  %v2806_v15 = vmul.f32 %v2805_v6, %v8015_v20 }
 0x3ab   :  { %v1418_v44 = vmul.f32 0.5, %v1417_v45  ;;  %v2788_v43 = vmul.f32 %v2787_v18, %v2763_v41  ;;  %5279 = vrcp.f32 %v8030_v39  ;;  %v3442_v9 = vadd.f32 1.1283791, %v3441_v47  ;;  %v10063_v41 = vld [vmem:[#allocation43_spill] sm:$0xff] }
 0x3ac   :  { %v2796_v7 = vadd.f32 0.0036580483, %v2795_v38  ;;  %v2003_v21 = vmul.f32 %v7897_v2, %v1936_v28  ;;  %vm1422_vm3 = vweird.f32 %v8013_v48  ;;  %v2807_v30 = vadd.f32 0.014752088, %v2806_v15 }
 0x3ad   :  { %v5078_v51 = vclamps-f32 %v2788_v43, 1.0  ;;  %v1419_v61 = vsub.f32 1.5, %v1418_v44  ;;  %5281 = vrsqrt.f32 %v8032_v52  ;;  %v8045_v42 = vmul.f32 0.5, %v7914_v24  ;;  %vm8061_vm5 = vmor %vm1421_vm4, %vm1422_vm3 }
 0x3ae   :  { %v2797_v55 = vmul.f32 %v2796_v7, %v8015_v20  ;;  %v1152_v37 = vsub.f32 %v10063_v41, %v7919_v8  ;;  %v8051_v50 = vadd.f32 %v7911_v54, %v2003_v21  ;;  %v2808_v14 = vmul.f32 %v2807_v30, %v8015_v20 }
 0x3af   :  { %v4804_v29 = vadd.f32 1.0, %v5078_v51  ;;  %v1420_v45 = vmul.f32 %v8013_v48, %v1419_v61  ;;  %v1109_v8 = vmax.f32 %v1045_v25, 0.0  ;;  %v918_v62 = vmul.f32 0.0078125, %v828_v19 }
 0x3b0   :  { %v2798_v4 = vadd.f32 0.05243302, %v2797_v55  ;;  %v8057_v47 = vmul.f32 0.70710677, %v8051_v50  ;;  %v3443_v40 = vmul.f32 %v3442_v9, %v7922_v3  ;;  %v2809_v28 = vadd.f32 0.112945676, %v2808_v14 }
 0x3b1   :  { %v5280_v6 = vpop.eup %5279  ;;  %v4868_v59 = vmul.f32 %v4804_v29, %v2116_v57  ;;  %v1424_v31 = vsel %vm8061_vm5, %v8013_v48, %v1420_v45  ;;  %vm3459_vm6 = vweird.f32 %v8030_v39  ;;  %v3463_v57 = vand.u32 2147483647, %v8030_v39 }
 0x3b2   :  { %v3455_v18 = vmul.f32 %v5280_v6, %v8030_v39  ;;  %v2799_v38 = vmul.f32 %v2798_v4, %v8015_v20  ;;  %v3471_v15 = vmul.f32 %v8057_v47, %v8057_v47  ;;  %v2810_v3 = vmul.f32 %v2809_v28, %v8015_v20 }
 0x3b3   :  { %v8074_v44 = vpop.eup %5281  ;;  %4932 = vst [vmem:[#allocation2 + $0x68] sm:$0xff] %v4868_v59  ;;  %v1920_v43 = vmul.f32 %v1424_v31, %v1152_v37  ;;  %v8078_v25 = vadd.f32 1e-06, %v1109_v8  ;;  %v3465_v51 = vand.u32 2147483648, %v8030_v39  ;;  %vm3460_vm7 = vweird.f32 %v5280_v6 }
 0x3b4   :  { %v3456_v48 = vsub.f32 1.0, %v3455_v18  ;;  %v2800_v9 = vadd.f32 0.18741608, %v2799_v38  ;;  %v8080_v7 = vmin.f32 %v3471_v15, 16.0  ;;  %v1616_v21 = vmul.f32 %v8074_v44, %v8032_v52  ;;  %vm3461_vm8 = vmor %vm3459_vm6, %vm3460_vm7 }
 0x3b5   :  { %v2811_v30 = vadd.f32 0.4994258, %v2810_v3  ;;  %v1987_v61 = vmul.f32 %v7897_v2, %v1920_v43  ;;  %5283 = vrsqrt.f32 %v8078_v25  ;;  %v1046_v59 = vsub.f32 %v918_v62, %v7474_v23 }
 0x3b6   :  { %v3457_v19 = vmul.f32 %v5280_v6, %v3456_v48  ;;  %v3473_v55 = vmul.f32 2.1237322e-06, %v8080_v7  ;;  %v3484_v41 = vmul.f32 3.8918573e-05, %v8080_v7  ;;  %v2801_v37 = vmul.f32 %v2800_v9, %v8015_v20 }
 0x3b7   :  { %v2812_v29 = vmul.f32 %v2811_v30, %v8015_v20  ;;  %v8092_v14 = vadd.f32 %v7911_v54, %v1987_v61  ;;  %v1617_v45 = vmul.f32 %v8074_v44, %v1616_v21  ;;  %v3466_v28 = vor.u32 1.1754944e-38, %v3465_v51 }
 0x3b8   :  { %v3458_v4 = vadd.f32 %v5280_v6, %v3457_v19  ;;  %v3474_v24 = vadd.f32 0.00028619796, %v3473_v55  ;;  %v3485_v8 = vadd.f32 0.001143296, %v3484_v41  ;;  %vm3464_vm9 = vcmp.eq.f32.partialorder %v3463_v57, 8.507059e+37 }
 0x3b9   :  { %v8098_v31 = vadd.f32 1.0, %v2812_v29  ;;  %v8101_v18 = vmul.f32 0.70710677, %v8092_v14  ;;  %v1618_v20 = vmul.f32 0.5, %v1617_v45  ;;  %v2802_v23 = vadd.f32 1.1283791, %v2801_v37 }
 0x3ba   :  { %v3462_v38 = vsel %vm3461_vm8, %v5280_v6, %v3458_v4  ;;  %v3475_v15 = vmul.f32 %v3474_v24, %v8080_v7  ;;  %v3486_v3 = vmul.f32 %v3485_v8, %v8080_v7  ;;  %vm1621_vm10 = vweird.f32 %v8032_v52 }
 0x3bb   :  { %v8105_v43 = vpop.eup %5283  ;;  %v3467_v48 = vsel %vm3464_vm9, %v3466_v28, %v3462_v38  ;;  %5285 = vrcp.f32 %v8098_v31  ;;  %v1110_v21 = vmax.f32 %v1046_v59, 0.0  ;;  %v2831_v6 = vmul.f32 %v8101_v18, %v8101_v18 }
 0x3bc   :  { %v3468_v39 = vmul.f32 %v3467_v48, %v3443_v40  ;;  %v3476_v62 = vadd.f32 0.0036580483, %v3475_v15  ;;  %v3487_v9 = vadd.f32 0.014752088, %v3486_v3  ;;  %v1619_v57 = vsub.f32 1.5, %v1618_v20 }
 0x3bd   :  { %vm1622_vm11 = vweird.f32 %v8074_v44  ;;  %v1626_v51 = vmul.f32 %v8105_v43, %v8078_v25  ;;  %v2823_v61 = vand.u32 2147483647, %v8098_v31  ;;  %vm1631_vm12 = vweird.f32 %v8078_v25 }
 0x3be   :  { %v5095_v30 = vclamps-f32 %v3468_v39, 1.0  ;;  %v3477_v19 = vmul.f32 %v3476_v62, %v8080_v7  ;;  %v3488_v55 = vmul.f32 %v3487_v9, %v8080_v7  ;;  %v2803_v40 = vmul.f32 %v2802_v23, %v7996_v1  ;;  %vm1623_vm14 = vmor %vm1621_vm10, %vm1622_vm11 }
 0x3bf   :  { %v8119_v41 = vmin.f32 %v2831_v6, 16.0  ;;  %v1620_v37 = vmul.f32 %v8074_v44, %v1619_v57  ;;  %v1627_v29 = vmul.f32 %v8105_v43, %v1626_v51  ;;  %vm2819_vm13 = vweird.f32 %v8098_v31 }
 0x3c0   :  { %v4821_v45 = vadd.f32 1.0, %v5095_v30  ;;  %v2825_v4 = vand.u32 2147483648, %v8098_v31  ;;  %v3478_v24 = vadd.f32 0.05243302, %v3477_v19  ;;  %v3489_v8 = vadd.f32 0.112945676, %v3488_v55 }
 0x3c1   :  { %v5286_v59 = vpop.eup %5285  ;;  %v2833_v1 = vmul.f32 2.1237322e-06, %v8119_v41  ;;  %v2844_v28 = vmul.f32 3.8918573e-05, %v8119_v41  ;;  %v1624_v20 = vsel %vm1623_vm14, %v8074_v44, %v1620_v37  ;;  %v1628_v38 = vmul.f32 0.5, %v1627_v29 }
 0x3c2   :  { %v4885_v15 = vmul.f32 %v4821_v45, %v8045_v42  ;;  %v2815_v3 = vmul.f32 %v5286_v59, %v8098_v31  ;;  %vm8134_vm15 = vcmp.eq.f32.partialorder %v2823_v61, 8.507059e+37  ;;  %v3479_v23 = vmul.f32 %v3478_v24, %v8080_v7 }
 0x3c3   :  { %v3490_v52 = vmul.f32 %v3489_v8, %v8080_v7  ;;  %v2834_v39 = vadd.f32 0.00028619796, %v2833_v1  ;;  %v2845_v62 = vadd.f32 0.001143296, %v2844_v28  ;;  %v10068_v9 = vsub.f32 %v5784_v33, %v7405_v0  ;;  %v830_v8 = vpop.xlane.xlu0 %829 }
 0x3c4   :  { %4949 = vst [vmem:[#allocation2 + $0xf0] sm:$0xff] %v4885_v15  ;;  %v2816_v44 = vsub.f32 1.0, %v2815_v3  ;;  %v3480_v57 = vadd.f32 0.18741608, %v3479_v23  ;;  %v1629_v42 = vsub.f32 1.5, %v1628_v38  ;;  %vm1632_vm0 = vweird.f32 %v8105_v43 }
 0x3c5   :  { %v1940_v6 = vmul.f32 %v1624_v20, %v10068_v9  ;;  %v3491_v51 = vadd.f32 0.4994258, %v3490_v52  ;;  %v2835_v30 = vmul.f32 %v2834_v39, %v8119_v41  ;;  %v2846_v61 = vmul.f32 %v2845_v62, %v8119_v41  ;;  %vm1633_vm2 = vmor %vm1631_vm12, %vm1632_vm0 }
 0x3c6   :  { %v2817_v55 = vmul.f32 %v5286_v59, %v2816_v44  ;;  %vm2820_vm1 = vweird.f32 %v5286_v59  ;;  %v1630_v37 = vmul.f32 %v8105_v43, %v1629_v42  ;;  %v8148_v29 = vadd.f32 1e-06, %v1110_v21 }
 0x3c7   :  { %v2007_v19 = vmul.f32 %v7897_v2, %v1940_v6  ;;  %v3492_v33 = vmul.f32 %v3491_v51, %v8080_v7  ;;  %v2836_v0 = vadd.f32 0.0036580483, %v2835_v30  ;;  %v2847_v45 = vadd.f32 0.014752088, %v2846_v61  ;;  %vm2821_vm3 = vmor %vm2819_vm13, %vm2820_vm1 }
 0x3c8   :  { %v2818_v1 = vadd.f32 %v5286_v59, %v2817_v55  ;;  %v3481_v28 = vmul.f32 %v3480_v57, %v8080_v7  ;;  %v1634_v20 = vsel %vm1633_vm2, %v8105_v43, %v1630_v37  ;;  %5287 = vrsqrt.f32 %v8148_v29 }
 0x3c9   :  { %v8152_v24 = vadd.f32 %v7911_v54, %v2007_v19  ;;  %v2826_v21 = vor.u32 1.1754944e-38, %v2825_v4  ;;  %v8161_v38 = vadd.f32 1.0, %v3492_v33  ;;  %v2837_v15 = vmul.f32 %v2836_v0, %v8119_v41 }
 0x3ca   :  { %v2848_v3 = vmul.f32 %v2847_v45, %v8119_v41  ;;  %v2822_v25 = vsel %vm2821_vm3, %v5286_v59, %v2818_v1  ;;  %v10069_v7 = vsub.f32 %v5832_v56, %v7418_v22  ;;  %v919_v52 = vmul.f32 0.0078125, %v830_v8 }
 0x3cb   :  { %v8166_v23 = vmul.f32 0.70710677, %v8152_v24  ;;  %v2827_v31 = vsel %vm8134_vm15, %v2826_v21, %v2822_v25  ;;  %v8174_v4 = vmul.f32 0.0078125, %v7821_v16  ;;  %5289 = vrcp.f32 %v8161_v38 }
 0x3cc   :  { %v1941_v43 = vmul.f32 %v1634_v20, %v10069_v7  ;;  %v8178_v39 = vmul.f32 0.0078125, %v8011_v27  ;;  %v2828_v59 = vmul.f32 %v2827_v31, %v2803_v40  ;;  %v3482_v62 = vadd.f32 1.1283791, %v3481_v28 }
 0x3cd   :  { %v2838_v9 = vadd.f32 0.05243302, %v2837_v15  ;;  %v2849_v6 = vadd.f32 0.112945676, %v2848_v3  ;;  %v2117_v44 = vmul.f32 0.5, %v7985_v13  ;;  %v8182_v56 = vmul.f32 0.5, %v8051_v50 }
 0x3ce   :  { %v3631_v22 = vmul.f32 %v8166_v23, %v8166_v23  ;;  %v2008_v16 = vmul.f32 %v7897_v2, %v1941_v43  ;;  %v8187_v48 = vpop.eup %5287  ;;  %v5079_v57 = vclamps-f32 %v2828_v59, 1.0  ;;  %v1047_v42 = vsub.f32 %v919_v52, %v7515_v26 }
 0x3cf   :  { %v2839_v27 = vmul.f32 %v2838_v9, %v8119_v41  ;;  %v2850_v40 = vmul.f32 %v2849_v6, %v8119_v41  ;;  %v8193_v51 = vmul.f32 0.5, %v8092_v14  ;;  %v1636_v30 = vmul.f32 %v8187_v48, %v8148_v29 }
 0x3d0   :  { %v8195_v13 = vmin.f32 %v3631_v22, 16.0  ;;  %v8198_v50 = vadd.f32 %v7911_v54, %v2008_v16  ;;  %v4805_v61 = vadd.f32 1.0, %v5079_v57  ;;  %v3483_v19 = vmul.f32 %v3482_v62, %v8057_v47 }
 0x3d1   :  { %v2840_v55 = vadd.f32 0.18741608, %v2839_v27  ;;  %v2851_v37 = vadd.f32 0.4994258, %v2850_v40  ;;  %v5290_v33 = vpop.eup %5289  ;;  %vm3499_vm4 = vweird.f32 %v8161_v38  ;;  %v1637_v0 = vmul.f32 %v8187_v48, %v1636_v30  ;;  %v832_v40 = vpop.xlane.xlu1 %831 }
 0x3d2   :  { %v3633_v26 = vmul.f32 2.1237322e-06, %v8195_v13  ;;  %v3644_v14 = vmul.f32 3.8918573e-05, %v8195_v13  ;;  %v4869_v45 = vmul.f32 %v4805_v61, %v2117_v44  ;;  %v3495_v8 = vmul.f32 %v5290_v33, %v8161_v38 }
 0x3d3   :  { %v3503_v1 = vand.u32 2147483647, %v8161_v38  ;;  %v1111_v28 = vmax.f32 %v1047_v42, 0.0  ;;  %v2852_v20 = vmul.f32 %v2851_v37, %v8119_v41  ;;  %v8211_v15 = vmul.f32 0.70710677, %v8198_v50 }
 0x3d4   :  { %v3634_v47 = vadd.f32 0.00028619796, %v3633_v26  ;;  %v3645_v21 = vadd.f32 0.001143296, %v3644_v14  ;;  %4933 = vst [vmem:[#allocation2 + $0x70] sm:$0xff] %v4869_v45  ;;  %v3496_v3 = vsub.f32 1.0, %v3495_v8  ;;  %v2841_v7 = vmul.f32 %v2840_v55, %v8119_v41 }
 0x3d5   :  { %v3505_v25 = vand.u32 2147483648, %v8161_v38  ;;  %v1638_v43 = vmul.f32 0.5, %v1637_v0  ;;  %v8215_v52 = vadd.f32 1.0, %v2852_v20  ;;  %v3671_v62 = vmul.f32 %v8211_v15, %v8211_v15 }
 0x3d6   :  { %v3635_v31 = vmul.f32 %v3634_v47, %v8195_v13  ;;  %v3646_v59 = vmul.f32 %v3645_v21, %v8195_v13  ;;  %v3497_v9 = vmul.f32 %v5290_v33, %v3496_v3  ;;  %vm3500_vm5 = vweird.f32 %v5290_v33 }
 0x3d7   :  { %v1639_v6 = vsub.f32 1.5, %v1638_v43  ;;  %v8221_v44 = vadd.f32 1e-06, %v1111_v28  ;;  %vm8223_vm6 = vcmp.eq.f32.partialorder %v3503_v1, 8.507059e+37  ;;  %5291 = vrcp.f32 %v8215_v52  ;;  %vm3501_vm9 = vmor %vm3499_vm4, %vm3500_vm5 }
 0x3d8   :  { %vm1641_vm7 = vweird.f32 %v8148_v29  ;;  %vm1642_vm8 = vweird.f32 %v8187_v48  ;;  %v3498_v41 = vadd.f32 %v5290_v33, %v3497_v9  ;;  %v3636_v16 = vadd.f32 0.0036580483, %v3635_v31 }
 0x3d9   :  { %v3647_v57 = vadd.f32 0.014752088, %v3646_v59  ;;  %v8230_v27 = vmin.f32 %v3671_v62, 16.0  ;;  %v3506_v42 = vor.u32 1.1754944e-38, %v3505_v25  ;;  %v2842_v30 = vadd.f32 1.1283791, %v2841_v7  ;;  %vm1643_vm10 = vmor %vm1641_vm7, %vm1642_vm8 }
 0x3da   :  { %v1640_v61 = vmul.f32 %v8187_v48, %v1639_v6  ;;  %5293 = vrsqrt.f32 %v8221_v44  ;;  %v3502_v55 = vsel %vm3501_vm9, %v5290_v33, %v3498_v41  ;;  %v3637_v37 = vmul.f32 %v3636_v16, %v8195_v13 }
 0x3db   :  { %v3648_v26 = vmul.f32 %v3647_v57, %v8195_v13  ;;  %v3673_v14 = vmul.f32 2.1237322e-06, %v8230_v27  ;;  %v3507_v38 = vsel %vm8223_vm6, %v3506_v42, %v3502_v55  ;;  %v3684_v0 = vmul.f32 3.8918573e-05, %v8230_v27 }
 0x3dc   :  { %v1644_v45 = vsel %vm1643_vm10, %v8187_v48, %v1640_v61  ;;  %v920_v8 = vmul.f32 0.0078125, %v832_v40  ;;  %v3508_v33 = vmul.f32 %v3507_v38, %v3483_v19  ;;  %v3638_v1 = vadd.f32 0.05243302, %v3637_v37 }
 0x3dd   :  { %v3649_v28 = vadd.f32 0.112945676, %v3648_v26  ;;  %v3674_v20 = vadd.f32 0.00028619796, %v3673_v14  ;;  %v5292_v47 = vpop.eup %5291  ;;  %v2843_v21 = vmul.f32 %v2842_v30, %v8101_v18  ;;  %vm2859_vm11 = vweird.f32 %v8215_v52 }
 0x3de   :  { %v3685_v3 = vadd.f32 0.001143296, %v3684_v0  ;;  %v10072_v29 = vsub.f32 %v9984_v36, %v7437_v5  ;;  %v5096_v7 = vclamps-f32 %v3508_v33, 1.0  ;;  %v2855_v43 = vmul.f32 %v5292_v47, %v8215_v52 }
 0x3df   :  { %v2863_v48 = vand.u32 2147483647, %v8215_v52  ;;  %v2865_v19 = vand.u32 2147483648, %v8215_v52  ;;  %v3650_v59 = vmul.f32 %v3649_v28, %v8195_v13  ;;  %v3675_v62 = vmul.f32 %v3674_v20, %v8230_v27  ;;  %v834_v52 = vpop.xlane.xlu2 %833 }
 0x3e0   :  { %v1942_v25 = vmul.f32 %v1644_v45, %v10072_v29  ;;  %v5294_v31 = vpop.eup %5293  ;;  %v3686_v18 = vmul.f32 %v3685_v3, %v8230_v27  ;;  %v4822_v6 = vadd.f32 1.0, %v5096_v7  ;;  %v2856_v22 = vsub.f32 1.0, %v2855_v43 }
 0x3e1   :  { %v3639_v36 = vmul.f32 %v3638_v1, %v8195_v13  ;;  %v1646_v5 = vmul.f32 %v5294_v31, %v8221_v44  ;;  %v3651_v41 = vadd.f32 0.4994258, %v3650_v59  ;;  %v3676_v16 = vadd.f32 0.0036580483, %v3675_v62 }
 0x3e2   :  { %v2009_v9 = vmul.f32 %v7897_v2, %v1942_v25  ;;  %v3687_v57 = vadd.f32 0.014752088, %v3686_v18  ;;  %v4886_v42 = vmul.f32 %v4822_v6, %v8182_v56  ;;  %v2857_v30 = vmul.f32 %v5292_v47, %v2856_v22 }
 0x3e3   :  { %vm2860_vm12 = vweird.f32 %v5292_v47  ;;  %v1647_v61 = vmul.f32 %v5294_v31, %v1646_v5  ;;  %v2866_v55 = vor.u32 1.1754944e-38, %v2865_v19  ;;  %v3652_v37 = vmul.f32 %v3651_v41, %v8195_v13 }
 0x3e4   :  { %v8262_v40 = vadd.f32 %v7911_v54, %v2009_v9  ;;  %v3677_v26 = vmul.f32 %v3676_v16, %v8230_v27  ;;  %v3688_v14 = vmul.f32 %v3687_v57, %v8230_v27  ;;  %4950 = vst [vmem:[#allocation2 + $0xf8] sm:$0xff] %v4886_v42  ;;  %v2858_v38 = vadd.f32 %v5292_v47, %v2857_v30  ;;  %vm2861_vm13 = vmor %vm2859_vm11, %vm2860_vm12 }
 0x3e5   :  { %v3640_v0 = vadd.f32 0.18741608, %v3639_v36  ;;  %v1648_v33 = vmul.f32 0.5, %v1647_v61  ;;  %v8273_v56 = vadd.f32 1.0, %v3652_v37  ;;  %v1048_v20 = vsub.f32 %v920_v8, %v7526_v63  ;;  %v836_v37 = vpop.xlane.xlu0 %835 }
 0x3e6   :  { %v8269_v45 = vmul.f32 0.70710677, %v8262_v40  ;;  %v3678_v1 = vadd.f32 0.05243302, %v3677_v26  ;;  %v3689_v28 = vadd.f32 0.112945676, %v3688_v14  ;;  %v2862_v3 = vsel %vm2861_vm13, %v5292_v47, %v2858_v38 }
 0x3e7   :  { %vm2864_vm14 = vcmp.eq.f32.partialorder %v2863_v48, 8.507059e+37  ;;  %v1649_v25 = vsub.f32 1.5, %v1648_v33  ;;  %v8279_v43 = vmul.f32 0.5, %v8152_v24  ;;  %5295 = vrcp.f32 %v8273_v56 }
 0x3e8   :  { %v3711_v29 = vmul.f32 %v8269_v45, %v8269_v45  ;;  %v2867_v7 = vsel %vm2864_vm14, %v2866_v55, %v2862_v3  ;;  %vm1652_vm15 = vweird.f32 %v5294_v31  ;;  %v3679_v59 = vmul.f32 %v3678_v1, %v8230_v27 }
 0x3e9   :  { %v2868_v19 = vmul.f32 %v2867_v7, %v2843_v21  ;;  %v3690_v62 = vmul.f32 %v3689_v28, %v8230_v27  ;;  %vm1651_vm0 = vweird.f32 %v8221_v44  ;;  %v3641_v63 = vmul.f32 %v3640_v0, %v8195_v13  ;;  %v10074_v28 = vld [vmem:[#allocation57_spill] sm:$0xff] }
 0x3ea   :  { %v8286_v8 = vmin.f32 %v3711_v29, 16.0  ;;  %v1650_v47 = vmul.f32 %v5294_v31, %v1649_v25  ;;  %v1112_v48 = vmax.f32 %v1048_v20, 0.0  ;;  %v3680_v24 = vadd.f32 0.18741608, %v3679_v59  ;;  %vm1653_vm1 = vmor %vm1651_vm0, %vm1652_vm15 }
 0x3eb   :  { %v5080_v18 = vclamps-f32 %v2868_v19, 1.0  ;;  %v3691_v9 = vadd.f32 0.4994258, %v3690_v62  ;;  %v921_v6 = vmul.f32 0.0078125, %v834_v52  ;;  %v10073_v16 = vsub.f32 %v9987_v10, %v7491_v58 }
 0x3ec   :  { %v3713_v22 = vmul.f32 2.1237322e-06, %v8286_v8  ;;  %v3724_v21 = vmul.f32 3.8918573e-05, %v8286_v8  ;;  %v1654_v36 = vsel %vm1653_vm1, %v5294_v31, %v1650_v47  ;;  %v8290_v5 = vadd.f32 1e-06, %v1112_v48 }
 0x3ed   :  { %v4806_v41 = vadd.f32 1.0, %v5080_v18  ;;  %v3681_v44 = vmul.f32 %v3680_v24, %v8230_v27  ;;  %v3692_v13 = vmul.f32 %v3691_v9, %v8230_v27  ;;  %v1943_v57 = vmul.f32 %v1654_v36, %v10073_v16  ;;  %v5296_v42 = vpop.eup %5295 }
 0x3ee   :  { %v3642_v30 = vadd.f32 1.1283791, %v3641_v63  ;;  %v3714_v61 = vadd.f32 0.00028619796, %v3713_v22  ;;  %v3725_v55 = vadd.f32 0.001143296, %v3724_v21  ;;  %5297 = vrsqrt.f32 %v8290_v5 }
 0x3ef   :  { %v4870_v31 = vmul.f32 %v4806_v41, %v8193_v51  ;;  %v3655_v26 = vmul.f32 %v5296_v42, %v8273_v56  ;;  %v3663_v14 = vand.u32 2147483647, %v8273_v56  ;;  %v3665_v38 = vand.u32 2147483648, %v8273_v56 }
 0x3f0   :  { %v8302_v27 = vadd.f32 1.0, %v3692_v13  ;;  %v3715_v10 = vmul.f32 %v3714_v61, %v8286_v8  ;;  %v3726_v58 = vmul.f32 %v3725_v55, %v8286_v8  ;;  %v2010_v0 = vmul.f32 %v7897_v2, %v1943_v57 }
 0x3f1   :  { %4934 = vst [vmem:[#allocation2 + $0x78] sm:$0xff] %v4870_v31  ;;  %v3656_v33 = vsub.f32 1.0, %v3655_v26  ;;  %v3682_v1 = vadd.f32 1.1283791, %v3681_v44  ;;  %v1049_v20 = vsub.f32 %v921_v6, %v10074_v28  ;;  %v922_v51 = vmul.f32 0.0078125, %v836_v37 }
 0x3f2   :  { %v3643_v3 = vmul.f32 %v3642_v30, %v8166_v23  ;;  %vm3659_vm2 = vweird.f32 %v8273_v56  ;;  %vm3660_vm3 = vweird.f32 %v5296_v42  ;;  %5299 = vrcp.f32 %v8302_v27  ;;  %v10077_v23 = vld [vmem:[#allocation61_spill] sm:$0xff] }
 0x3f3   :  { %v3657_v29 = vmul.f32 %v5296_v42, %v3656_v33  ;;  %v3716_v25 = vadd.f32 0.0036580483, %v3715_v10  ;;  %v3727_v7 = vadd.f32 0.014752088, %v3726_v58  ;;  %v8312_v52 = vadd.f32 %v7911_v54, %v2010_v0  ;;  %vm3661_vm5 = vmor %vm3659_vm2, %vm3660_vm3 }
 0x3f4   :  { %v8314_v2 = vpop.eup %5297  ;;  %vm8316_vm4 = vcmp.eq.f32.partialorder %v3663_v14, 8.507059e+37  ;;  %v3666_v59 = vor.u32 1.1754944e-38, %v3665_v38  ;;  %v1113_v62 = vmax.f32 %v1049_v20, 0.0  ;;  %v1050_v63 = vsub.f32 %v922_v51, %v10077_v23 }
 0x3f5   :  { %v3658_v47 = vadd.f32 %v5296_v42, %v3657_v29  ;;  %v8322_v48 = vmul.f32 %v3682_v1, %v8211_v15  ;;  %v3717_v18 = vmul.f32 %v3716_v25, %v8286_v8  ;;  %v3728_v24 = vmul.f32 %v3727_v7, %v8286_v8 }
 0x3f6   :  { %v3703_v54 = vand.u32 2147483647, %v8302_v27  ;;  %v8331_v9 = vmul.f32 0.70710677, %v8312_v52  ;;  %v1656_v6 = vmul.f32 %v8314_v2, %v8290_v5  ;;  %vm1661_vm6 = vweird.f32 %v8290_v5 }
 0x3f7   :  { %v8336_v15 = vadd.f32 1e-06, %v1113_v62  ;;  %v3662_v22 = vsel %vm3661_vm5, %v5296_v42, %v3658_v47  ;;  %vm3699_vm7 = vweird.f32 %v8302_v27  ;;  %v3718_v21 = vadd.f32 0.05243302, %v3717_v18 }
 0x3f8   :  { %v3729_v36 = vadd.f32 0.112945676, %v3728_v24  ;;  %v1114_v41 = vmax.f32 %v1050_v63, 0.0  ;;  %v5300_v56 = vpop.eup %5299  ;;  %v3667_v44 = vsel %vm8316_vm4, %v3666_v59, %v3662_v22  ;;  %v3751_v13 = vmul.f32 %v8331_v9, %v8331_v9 }
 0x3f9   :  { %v1657_v16 = vmul.f32 %v8314_v2, %v1656_v6  ;;  %5301 = vrsqrt.f32 %v8336_v15  ;;  %v3668_v57 = vmul.f32 %v3667_v44, %v3643_v3  ;;  %v3695_v30 = vmul.f32 %v5300_v56, %v8302_v27 }
 0x3fa   :  { %v3705_v42 = vand.u32 2147483648, %v8302_v27  ;;  %v3719_v61 = vmul.f32 %v3718_v21, %v8286_v8  ;;  %v3730_v55 = vmul.f32 %v3729_v36, %v8286_v8  ;;  %v8349_v37 = vmin.f32 %v3751_v13, 16.0  ;;  %v10080_v13 = vld [vmem:[#allocation15_spill] sm:$0xff] }
 0x3fb   :  { %v1658_v31 = vmul.f32 0.5, %v1657_v16  ;;  %vm1662_vm8 = vweird.f32 %v8314_v2  ;;  %v5100_v26 = vclamps-f32 %v3668_v57, 1.0  ;;  %v3696_v14 = vsub.f32 1.0, %v3695_v30  ;;  %v10081_v16 = vld [vmem:[#allocation40_spill] sm:$0xff] }
 0x3fc   :  { %v3720_v38 = vadd.f32 0.18741608, %v3719_v61  ;;  %v8352_v10 = vadd.f32 1e-06, %v1114_v41  ;;  %vm3700_vm9 = vweird.f32 %v5300_v56  ;;  %v3731_v58 = vadd.f32 0.4994258, %v3730_v55  ;;  %vm8367_vm10 = vmor %vm1661_vm6, %vm1662_vm8 }
 0x3fd   :  { %v3753_v0 = vmul.f32 2.1237322e-06, %v8349_v37  ;;  %v3764_v33 = vmul.f32 3.8918573e-05, %v8349_v37  ;;  %v4826_v1 = vadd.f32 1.0, %v5100_v26  ;;  %v3697_v28 = vmul.f32 %v5300_v56, %v3696_v14  ;;  %vm3701_vm11 = vmor %vm3699_vm7, %vm3700_vm9 }
 0x3fe   :  { %v3721_v20 = vmul.f32 %v3720_v38, %v8286_v8  ;;  %v1659_v51 = vsub.f32 1.5, %v1658_v31  ;;  %v3732_v29 = vmul.f32 %v3731_v58, %v8286_v8  ;;  %5303 = vrsqrt.f32 %v8352_v10  ;;  %v838_v58 = vpop.xlane.xlu1 %837 }
 0x3ff   :  { %v8357_v3 = vpop.eup %5301  ;;  %v3754_v25 = vadd.f32 0.00028619796, %v3753_v0  ;;  %v3765_v7 = vadd.f32 0.001143296, %v3764_v33  ;;  %v4890_v19 = vmul.f32 %v4826_v1, %v8279_v43  ;;  %v3698_v59 = vadd.f32 %v5300_v56, %v3697_v28 }
 0x400   :  { %v3706_v62 = vor.u32 1.1754944e-38, %v3705_v42  ;;  %v1660_v23 = vmul.f32 %v8314_v2, %v1659_v51  ;;  %v8374_v8 = vadd.f32 1.0, %v3732_v29  ;;  %v1666_v18 = vmul.f32 %v8357_v3, %v8336_v15 }
 0x401   :  { %v3755_v43 = vmul.f32 %v3754_v25, %v8349_v37  ;;  %v3766_v47 = vmul.f32 %v3765_v7, %v8349_v37  ;;  %4954 = vst [vmem:[#allocation2 + $0x118] sm:$0xff] %v4890_v19  ;;  %v3702_v24 = vsel %vm3701_vm11, %v5300_v56, %v3698_v59  ;;  %vm3704_vm12 = vcmp.eq.f32.partialorder %v3703_v54, 8.507059e+37 }
 0x402   :  { %v3722_v5 = vadd.f32 1.1283791, %v3721_v20  ;;  %v1664_v6 = vsel %vm8367_vm10, %v8314_v2, %v1660_v23  ;;  %v8385_v27 = vmul.f32 %v7980_v60, %v7980_v60  ;;  %v8389_v22 = vmul.f32 %v8174_v4, %v8174_v4  ;;  %v8424_v20 = vld [vmem:[%s9829_s4] ss:$0 sm:$0xff]  ;;  %v840_v23 = vpop.xlane.xlu2 %839 }
 0x403   :  { %v3707_v21 = vsel %vm3704_vm12, %v3706_v62, %v3702_v24  ;;  %5305 = vrcp.f32 %v8374_v8  ;;  %v8394_v36 = vmul.f32 %v8178_v39, %v8178_v39  ;;  %v3756_v41 = vadd.f32 0.0036580483, %v3755_v43 }
 0x404   :  { %v3708_v54 = vmul.f32 %v3707_v21, %v8322_v48  ;;  %v3767_v56 = vadd.f32 0.014752088, %v3766_v47  ;;  %v8397_v2 = vpop.eup %5303  ;;  %v2139_v44 = vmul.f32 0.5, %v8198_v50  ;;  %v10082_v57 = vsub.f32 %v10080_v13, %v10081_v16  ;;  %v8413_v50 = vld [vmem:[%s9828_s3] ss:$0 sm:$0xff]  ;;  %v10084_v13 = vld [vmem:[#allocation10_spill] sm:$0xff] }
 0x405   :  { %v1667_v42 = vmul.f32 %v8357_v3, %v1666_v18  ;;  %vm1671_vm13 = vweird.f32 %v8336_v15  ;;  %v8406_v55 = vmul.f32 %v3722_v5, %v8269_v45  ;;  %v3757_v48 = vmul.f32 %v3756_v41, %v8349_v37 }
 0x406   :  { %v1944_v30 = vmul.f32 %v1664_v6, %v10082_v57  ;;  %v5101_v61 = vclamps-f32 %v3708_v54, 1.0  ;;  %v3768_v31 = vmul.f32 %v3767_v56, %v8349_v37  ;;  %vm1672_vm14 = vweird.f32 %v8357_v3 }
 0x407   :  { %v1668_v14 = vmul.f32 0.5, %v1667_v42  ;;  %v1676_v38 = vmul.f32 %v8397_v2, %v8352_v10  ;;  %vm3739_vm15 = vweird.f32 %v8374_v8  ;;  %v3758_v0 = vadd.f32 0.05243302, %v3757_v48  ;;  %vm1673_vm0 = vmor %vm1671_vm13, %vm1672_vm14  ;;  %v10086_v48 = vld [vmem:[#allocation31_spill] sm:$0xff] }
 0x408   :  { %v2011_v26 = vmul.f32 %v8413_v50, %v1944_v30  ;;  %v4827_v45 = vadd.f32 1.0, %v5101_v61  ;;  %v3769_v33 = vadd.f32 0.112945676, %v3768_v31  ;;  %v3743_v28 = vand.u32 2147483647, %v8374_v8 }
 0x409   :  { %v5306_v1 = vpop.eup %5305  ;;  %v1669_v29 = vsub.f32 1.5, %v1668_v14  ;;  %v1677_v25 = vmul.f32 %v8397_v2, %v1676_v38  ;;  %v3745_v59 = vand.u32 2147483648, %v8374_v8  ;;  %v923_v62 = vmul.f32 0.0078125, %v838_v58 }
 0x40a   :  { %v2078_v51 = vadd.f32 %v8424_v20, %v2011_v26  ;;  %v4891_v7 = vmul.f32 %v4827_v45, %v2139_v44  ;;  %v3735_v19 = vmul.f32 %v5306_v1, %v8374_v8  ;;  %v3759_v63 = vmul.f32 %v3758_v0, %v8349_v37  ;;  %v10083_v44 = vld [vmem:[#allocation20_spill] sm:$0xff] }
 0x40b   :  { %v3770_v43 = vmul.f32 %v3769_v33, %v8349_v37  ;;  %v1670_v18 = vmul.f32 %v8357_v3, %v1669_v29  ;;  %v1678_v5 = vmul.f32 0.5, %v1677_v25  ;;  %vm1681_vm1 = vweird.f32 %v8352_v10 }
 0x40c   :  { %v8432_v47 = vmul.f32 0.70710677, %v2078_v51  ;;  %4955 = vst [vmem:[#allocation2 + $0x120] sm:$0xff] %v4891_v7  ;;  %v3736_v24 = vsub.f32 1.0, %v3735_v19  ;;  %vm1682_vm2 = vweird.f32 %v8397_v2  ;;  %v924_v41 = vmul.f32 0.0078125, %v840_v23 }
 0x40d   :  { %v3771_v6 = vadd.f32 0.4994258, %v3770_v43  ;;  %v1674_v54 = vsel %vm1673_vm0, %v8357_v3, %v1670_v18  ;;  %vm3740_vm3 = vweird.f32 %v5306_v1  ;;  %v10085_v16 = vsub.f32 %v10083_v44, %v10084_v13  ;;  %vm8457_vm5 = vmor %vm1681_vm1, %vm1682_vm2  ;;  %v10090_v18 = vld [vmem:[#allocation60_spill] sm:$0xff] }
 0x40e   :  { %v3791_v21 = vmul.f32 %v8432_v47, %v8432_v47  ;;  %v3737_v56 = vmul.f32 %v5306_v1, %v3736_v24  ;;  %v1679_v15 = vsub.f32 1.5, %v1678_v5  ;;  %v3760_v30 = vadd.f32 0.18741608, %v3759_v63  ;;  %vm3741_vm6 = vmor %vm3739_vm15, %vm3740_vm3  ;;  %v842_v5 = vpop.xlane.xlu0 %841 }
 0x40f   :  { %v1945_v57 = vmul.f32 %v1674_v54, %v10085_v16  ;;  %v3772_v42 = vmul.f32 %v3771_v6, %v8349_v37  ;;  %v1051_v31 = vsub.f32 %v923_v62, %v10086_v48  ;;  %vm3744_vm4 = vcmp.eq.f32.partialorder %v3743_v28, 8.507059e+37 }
 0x410   :  { %v8448_v61 = vmin.f32 %v3791_v21, 16.0  ;;  %v3738_v26 = vadd.f32 %v5306_v1, %v3737_v56  ;;  %v1680_v3 = vmul.f32 %v8397_v2, %v1679_v15  ;;  %v3746_v58 = vor.u32 1.1754944e-38, %v3745_v59 }
 0x411   :  { %v2012_v14 = vmul.f32 %v8413_v50, %v1945_v57  ;;  %v8463_v45 = vadd.f32 1.0, %v3772_v42  ;;  %v1052_v25 = vsub.f32 %v924_v41, %v7869_v46  ;;  %v3761_v8 = vmul.f32 %v3760_v30, %v8349_v37  ;;  %v10089_v46 = vld [vmem:[#allocation25_spill] sm:$0xff] }
 0x412   :  { %v3793_v0 = vmul.f32 2.1237322e-06, %v8448_v61  ;;  %v3804_v33 = vmul.f32 3.8918573e-05, %v8448_v61  ;;  %v3742_v28 = vsel %vm3741_vm6, %v5306_v1, %v3738_v26  ;;  %v1684_v10 = vsel %vm8457_vm5, %v8397_v2, %v1680_v3 }
 0x413   :  { %v8468_v29 = vadd.f32 %v8424_v20, %v2012_v14  ;;  %v3747_v7 = vsel %vm3744_vm4, %v3746_v58, %v3742_v28  ;;  %5307 = vrcp.f32 %v8463_v45  ;;  %v1115_v19 = vmax.f32 %v1051_v31, 0.0 }
 0x414   :  { %v2140_v59 = vmul.f32 0.5, %v8262_v40  ;;  %v3748_v62 = vmul.f32 %v3747_v7, %v8406_v55  ;;  %v3794_v1 = vadd.f32 0.00028619796, %v3793_v0  ;;  %v3805_v23 = vadd.f32 0.001143296, %v3804_v33 }
 0x415   :  { %v8479_v63 = vmul.f32 0.5, %v8312_v52  ;;  %v8481_v43 = vmul.f32 0.5, %v2078_v51  ;;  %v8484_v2 = vmul.f32 0.70710677, %v8468_v29  ;;  %v10091_v37 = vsub.f32 %v10089_v46, %v10090_v18 }
 0x416   :  { %v5102_v6 = vclamps-f32 %v3748_v62, 1.0  ;;  %v3795_v40 = vmul.f32 %v3794_v1, %v8448_v61  ;;  %v3806_v55 = vmul.f32 %v3805_v23, %v8448_v61  ;;  %v1116_v21 = vmax.f32 %v1052_v25, 0.0 }
 0x417   :  { %v1946_v24 = vmul.f32 %v1684_v10, %v10091_v37  ;;  %v3762_v54 = vadd.f32 1.1283791, %v3761_v8  ;;  %v3831_v52 = vmul.f32 %v8484_v2, %v8484_v2  ;;  %v8494_v41 = vadd.f32 1e-06, %v1115_v19 }
 0x418   :  { %v4828_v56 = vadd.f32 1.0, %v5102_v6  ;;  %v3796_v44 = vadd.f32 0.0036580483, %v3795_v40  ;;  %v3807_v13 = vadd.f32 0.014752088, %v3806_v55  ;;  %v8496_v16 = vmul.f32 0.0078125, %v842_v5 }
 0x419   :  { %v2013_v51 = vmul.f32 %v8413_v50, %v1946_v24  ;;  %v5308_v57 = vpop.eup %5307  ;;  %v3783_v15 = vand.u32 2147483647, %v8463_v45  ;;  %v8499_v30 = vmin.f32 %v3831_v52, 16.0  ;;  %5309 = vrsqrt.f32 %v8494_v41 }
 0x41a   :  { %v4892_v48 = vmul.f32 %v4828_v56, %v2140_v59  ;;  %v3775_v31 = vmul.f32 %v5308_v57, %v8463_v45  ;;  %v3785_v26 = vand.u32 2147483648, %v8463_v45  ;;  %v3797_v14 = vmul.f32 %v3796_v44, %v8448_v61 }
 0x41b   :  { %v2080_v42 = vadd.f32 %v8424_v20, %v2013_v51  ;;  %v3808_v3 = vmul.f32 %v3807_v13, %v8448_v61  ;;  %v3833_v38 = vmul.f32 2.1237322e-06, %v8499_v30  ;;  %v3844_v58 = vmul.f32 3.8918573e-05, %v8499_v30 }
 0x41c   :  { %v8509_v0 = vadd.f32 1e-06, %v1116_v21  ;;  %4956 = vst [vmem:[#allocation2 + $0x128] sm:$0xff] %v4892_v48  ;;  %v3763_v33 = vmul.f32 %v3762_v54, %v8331_v9  ;;  %v3776_v28 = vsub.f32 1.0, %v3775_v31  ;;  %v3798_v10 = vadd.f32 0.05243302, %v3797_v14 }
 0x41d   :  { %v8512_v25 = vmul.f32 0.70710677, %v2080_v42  ;;  %vm3779_vm7 = vweird.f32 %v8463_v45  ;;  %v3809_v7 = vadd.f32 0.112945676, %v3808_v3  ;;  %v3834_v8 = vadd.f32 0.00028619796, %v3833_v38 }
 0x41e   :  { %v3845_v19 = vadd.f32 0.001143296, %v3844_v58  ;;  %v3777_v59 = vmul.f32 %v5308_v57, %v3776_v28  ;;  %vm3780_vm8 = vweird.f32 %v5308_v57  ;;  %v3799_v62 = vmul.f32 %v3798_v10, %v8448_v61 }
 0x41f   :  { %v3871_v1 = vmul.f32 %v8512_v25, %v8512_v25  ;;  %v8518_v23 = vpop.eup %5309  ;;  %vm8520_vm9 = vcmp.eq.f32.partialorder %v3783_v15, 8.507059e+37  ;;  %v3810_v46 = vmul.f32 %v3809_v7, %v8448_v61  ;;  %v3835_v18 = vmul.f32 %v3834_v8, %v8499_v30  ;;  %vm3781_vm10 = vmor %vm3779_vm7, %vm3780_vm8 }
 0x420   :  { %v3846_v37 = vmul.f32 %v3845_v19, %v8499_v30  ;;  %v3778_v24 = vadd.f32 %v5308_v57, %v3777_v59  ;;  %v3786_v5 = vor.u32 1.1754944e-38, %v3785_v26  ;;  %5311 = vrsqrt.f32 %v8509_v0  ;;  %v844_v59 = vpop.xlane.xlu1 %843 }
 0x421   :  { %v8527_v6 = vmin.f32 %v3871_v1, 16.0  ;;  %v3811_v40 = vadd.f32 0.4994258, %v3810_v46  ;;  %v3836_v55 = vadd.f32 0.0036580483, %v3835_v18  ;;  %v1686_v54 = vmul.f32 %v8518_v23, %v8494_v41 }
 0x422   :  { %v3847_v21 = vadd.f32 0.014752088, %v3846_v37  ;;  %v3782_v52 = vsel %vm3781_vm10, %v5308_v57, %v3778_v24  ;;  %v3800_v51 = vadd.f32 0.18741608, %v3799_v62  ;;  %v1053_v57 = vsub.f32 %v8496_v16, %v7975_v35 }
 0x423   :  { %v3873_v56 = vmul.f32 2.1237322e-06, %v8527_v6  ;;  %v3884_v44 = vmul.f32 3.8918573e-05, %v8527_v6  ;;  %v3787_v13 = vsel %vm8520_vm9, %v3786_v5, %v3782_v52  ;;  %v3812_v15 = vmul.f32 %v3811_v40, %v8448_v61 }
 0x424   :  { %v3837_v45 = vmul.f32 %v3836_v55, %v8499_v30  ;;  %v3848_v48 = vmul.f32 %v3847_v21, %v8499_v30  ;;  %v3788_v31 = vmul.f32 %v3787_v13, %v3763_v33  ;;  %v1687_v28 = vmul.f32 %v8518_v23, %v1686_v54 }
 0x425   :  { %v3874_v26 = vadd.f32 0.00028619796, %v3873_v56  ;;  %v3885_v14 = vadd.f32 0.001143296, %v3884_v44  ;;  %v8543_v3 = vadd.f32 1.0, %v3812_v15  ;;  %v8549_v8 = vmul.f32 0.5, %v8468_v29 }
 0x426   :  { %v3838_v38 = vadd.f32 0.05243302, %v3837_v45  ;;  %v3849_v58 = vadd.f32 0.112945676, %v3848_v48  ;;  %v8546_v10 = vpop.eup %5311  ;;  %v5103_v7 = vclamps-f32 %v3788_v31, 1.0  ;;  %v3801_v62 = vmul.f32 %v3800_v51, %v8448_v61 }
 0x427   :  { %v3875_v19 = vmul.f32 %v3874_v26, %v8527_v6  ;;  %v3886_v33 = vmul.f32 %v3885_v14, %v8527_v6  ;;  %5313 = vrcp.f32 %v8543_v3  ;;  %v8555_v35 = vmul.f32 0.5, %v2080_v42 }
 0x428   :  { %vm1691_vm11 = vweird.f32 %v8494_v41  ;;  %v4829_v16 = vadd.f32 1.0, %v5103_v7  ;;  %v3839_v1 = vmul.f32 %v3838_v38, %v8499_v30  ;;  %v3850_v9 = vmul.f32 %v3849_v58, %v8499_v30 }
 0x429   :  { %v3876_v29 = vadd.f32 0.0036580483, %v3875_v19  ;;  %v3887_v46 = vadd.f32 0.014752088, %v3886_v33  ;;  %v1688_v18 = vmul.f32 0.5, %v1687_v28  ;;  %v1117_v37 = vmax.f32 %v1053_v57, 0.0 }
 0x42a   :  { %v8560_v24 = vmul.f32 0.0078125, %v844_v59  ;;  %v4893_v5 = vmul.f32 %v4829_v16, %v8479_v63  ;;  %v3840_v61 = vadd.f32 0.18741608, %v3839_v1  ;;  %v3851_v40 = vadd.f32 0.4994258, %v3850_v9  ;;  %v10094_v33 = vld [vmem:[#allocation26_spill] sm:$0xff] }
 0x42b   :  { %v3877_v42 = vmul.f32 %v3876_v29, %v8527_v6  ;;  %v3888_v55 = vmul.f32 %v3887_v46, %v8527_v6  ;;  %v1689_v21 = vsub.f32 1.5, %v1688_v18  ;;  %vm1692_vm12 = vweird.f32 %v8518_v23  ;;  %v10095_v59 = vld [vmem:[#allocation62_spill] sm:$0xff] }
 0x42c   :  { %v1696_v54 = vmul.f32 %v8546_v10, %v8509_v0  ;;  %4957 = vst [vmem:[#allocation2 + $0x130] sm:$0xff] %v4893_v5  ;;  %v3802_v52 = vadd.f32 1.1283791, %v3801_v62  ;;  %vm3819_vm13 = vweird.f32 %v8543_v3  ;;  %v3852_v51 = vmul.f32 %v3851_v40, %v8499_v30  ;;  %vm1693_vm15 = vmor %vm1691_vm11, %vm1692_vm12 }
 0x42d   :  { %v3878_v56 = vadd.f32 0.05243302, %v3877_v42  ;;  %v5314_v63 = vpop.eup %5313  ;;  %v3841_v44 = vmul.f32 %v3840_v61, %v8499_v30  ;;  %v3889_v13 = vadd.f32 0.112945676, %v3888_v55  ;;  %v1690_v15 = vmul.f32 %v8518_v23, %v1689_v21 }
 0x42e   :  { %v1697_v45 = vmul.f32 %v8546_v10, %v1696_v54  ;;  %vm1701_vm14 = vweird.f32 %v8509_v0  ;;  %v3815_v48 = vmul.f32 %v5314_v63, %v8543_v3  ;;  %v3823_v31 = vand.u32 2147483647, %v8543_v3 }
 0x42f   :  { %v8576_v26 = vadd.f32 1.0, %v3852_v51  ;;  %v8582_v14 = vadd.f32 1e-06, %v1117_v37  ;;  %v3879_v30 = vmul.f32 %v3878_v56, %v8527_v6  ;;  %v3890_v57 = vmul.f32 %v3889_v13, %v8527_v6 }
 0x430   :  { %v1694_v38 = vsel %vm1693_vm15, %v8518_v23, %v1690_v15  ;;  %v1698_v58 = vmul.f32 0.5, %v1697_v45  ;;  %v3816_v28 = vsub.f32 1.0, %v3815_v48  ;;  %v3825_v7 = vand.u32 2147483648, %v8543_v3  ;;  %v846_v3 = vpop.xlane.xlu2 %845 }
 0x431   :  { %5315 = vrcp.f32 %v8576_v26  ;;  %vm1702_vm0 = vweird.f32 %v8546_v10  ;;  %vm3820_vm1 = vweird.f32 %v5314_v63  ;;  %v3842_v19 = vadd.f32 1.1283791, %v3841_v44 }
 0x432   :  { %v3880_v41 = vadd.f32 0.18741608, %v3879_v30  ;;  %v10096_v62 = vsub.f32 %v10094_v33, %v10095_v59  ;;  %v3817_v1 = vmul.f32 %v5314_v63, %v3816_v28  ;;  %v3891_v9 = vadd.f32 0.4994258, %v3890_v57  ;;  %vm3821_vm2 = vmor %vm3819_vm13, %vm3820_vm1 }
 0x433   :  { %v1699_v29 = vsub.f32 1.5, %v1698_v58  ;;  %5317 = vrsqrt.f32 %v8582_v14  ;;  %v3863_v23 = vand.u32 2147483647, %v8576_v26  ;;  %v1054_v37 = vsub.f32 %v8560_v24, %v8385_v27  ;;  %vm8617_vm5 = vmor %vm1701_vm14, %vm1702_vm0 }
 0x434   :  { %v1947_v16 = vmul.f32 %v1694_v38, %v10096_v62  ;;  %v3881_v46 = vmul.f32 %v3880_v41, %v8527_v6  ;;  %v3818_v5 = vadd.f32 %v5314_v63, %v3817_v1  ;;  %v3865_v61 = vand.u32 2147483648, %v8576_v26 }
 0x435   :  { %v3892_v40 = vmul.f32 %v3891_v9, %v8527_v6  ;;  %v1700_v42 = vmul.f32 %v8546_v10, %v1699_v29  ;;  %v3803_v55 = vmul.f32 %v3802_v52, %v8432_v47  ;;  %vm3824_vm3 = vcmp.eq.f32.partialorder %v3823_v31, 8.507059e+37  ;;  %v848_v52 = vpop.xlane.xlu0 %847 }
 0x436   :  { %v2014_v18 = vmul.f32 %v8413_v50, %v1947_v16  ;;  %v3826_v21 = vor.u32 1.1754944e-38, %v3825_v7  ;;  %v3822_v27 = vsel %vm3821_vm2, %v5314_v63, %v3818_v5  ;;  %v3843_v24 = vmul.f32 %v3842_v19, %v8484_v2 }
 0x437   :  { %v5316_v51 = vpop.eup %5315  ;;  %vm3859_vm4 = vweird.f32 %v8576_v26  ;;  %v8611_v6 = vadd.f32 1.0, %v3892_v40  ;;  %vm8622_vm6 = vcmp.eq.f32.partialorder %v3863_v23, 8.507059e+37  ;;  %v3882_v2 = vadd.f32 1.1283791, %v3881_v46 }
 0x438   :  { %v8607_v54 = vadd.f32 %v8424_v20, %v2014_v18  ;;  %v3827_v56 = vsel %vm3824_vm3, %v3826_v21, %v3822_v27  ;;  %v3855_v44 = vmul.f32 %v5316_v51, %v8576_v26  ;;  %v1704_v13 = vsel %vm8617_vm5, %v8546_v10, %v1700_v42 }
 0x439   :  { %v8629_v15 = vpop.eup %5317  ;;  %v3828_v0 = vmul.f32 %v3827_v56, %v3803_v55  ;;  %v3866_v45 = vor.u32 1.1754944e-38, %v3865_v61  ;;  %5319 = vrcp.f32 %v8611_v6  ;;  %v1118_v48 = vmax.f32 %v1054_v37, 0.0 }
 0x43a   :  { %v3856_v31 = vsub.f32 1.0, %v3855_v44  ;;  %v8633_v30 = vmul.f32 0.70710677, %v8607_v54  ;;  %v927_v57 = vmul.f32 0.0078125, %v846_v3  ;;  %v8635_v38 = vmul.f32 0.0078125, %v848_v52 }
 0x43b   :  { %v5104_v58 = vclamps-f32 %v3828_v0, 1.0  ;;  %vm3860_vm7 = vweird.f32 %v5316_v51  ;;  %v10101_v28 = vsub.f32 %v6412_v11, %v7652_v53  ;;  %v1706_v7 = vmul.f32 %v8629_v15, %v8582_v14 }
 0x43c   :  { %v3857_v19 = vmul.f32 %v5316_v51, %v3856_v31  ;;  %v8643_v41 = vmul.f32 %v3882_v2, %v8512_v25  ;;  %v3903_v33 = vand.u32 2147483647, %v8611_v6  ;;  %v3911_v59 = vmul.f32 %v8633_v30, %v8633_v30  ;;  %vm3861_vm10 = vmor %vm3859_vm4, %vm3860_vm7 }
 0x43d   :  { %v1948_v10 = vmul.f32 %v1704_v13, %v10101_v28  ;;  %vm1711_vm8 = vweird.f32 %v8582_v14  ;;  %v4830_v62 = vadd.f32 1.0, %v5104_v58  ;;  %v1707_v11 = vmul.f32 %v8629_v15, %v1706_v7 }
 0x43e   :  { %v8651_v53 = vadd.f32 1e-06, %v1118_v48  ;;  %v3858_v1 = vadd.f32 %v5316_v51, %v3857_v19  ;;  %vm3899_vm9 = vweird.f32 %v8611_v6  ;;  %v3905_v25 = vand.u32 2147483648, %v8611_v6 }
 0x43f   :  { %v2015_v16 = vmul.f32 %v8413_v50, %v1948_v10  ;;  %v8655_v9 = vmin.f32 %v3911_v59, 16.0  ;;  %v1055_v29 = vsub.f32 %v927_v57, %v8389_v22  ;;  %v5320_v23 = vpop.eup %5319  ;;  %v4894_v46 = vmul.f32 %v4830_v62, %v8481_v43 }
 0x440   :  { %v1708_v37 = vmul.f32 0.5, %v1707_v11  ;;  %5321 = vrsqrt.f32 %v8651_v53  ;;  %v3862_v5 = vsel %vm3861_vm10, %v5316_v51, %v3858_v1  ;;  %v3895_v61 = vmul.f32 %v5320_v23, %v8611_v6 }
 0x441   :  { %v8663_v18 = vadd.f32 %v8424_v20, %v2015_v16  ;;  %vm8667_vm11 = vcmp.eq.f32.partialorder %v3903_v33, 8.507059e+37  ;;  %v3913_v22 = vmul.f32 2.1237322e-06, %v8655_v9  ;;  %4958 = vst [vmem:[#allocation2 + $0x138] sm:$0xff] %v4894_v46  ;;  %v3867_v43 = vsel %vm8622_vm6, %v3866_v45, %v3862_v5 }
 0x442   :  { %v3924_v26 = vmul.f32 3.8918573e-05, %v8655_v9  ;;  %vm1712_vm12 = vweird.f32 %v8629_v15  ;;  %v3868_v55 = vmul.f32 %v3867_v43, %v3843_v24  ;;  %v3896_v21 = vsub.f32 1.0, %v3895_v61 }
 0x443   :  { %v8676_v42 = vmul.f32 0.70710677, %v8663_v18  ;;  %v3914_v51 = vadd.f32 0.00028619796, %v3913_v22  ;;  %v1709_v27 = vsub.f32 1.5, %v1708_v37  ;;  %vm3900_vm13 = vweird.f32 %v5320_v23  ;;  %vm1713_vm14 = vmor %vm1711_vm8, %vm1712_vm12 }
 0x444   :  { %v3925_v47 = vadd.f32 0.001143296, %v3924_v26  ;;  %v1119_v52 = vmax.f32 %v1055_v29, 0.0  ;;  %v5105_v56 = vclamps-f32 %v3868_v55, 1.0  ;;  %v3897_v44 = vmul.f32 %v5320_v23, %v3896_v21  ;;  %vm3901_vm15 = vmor %vm3899_vm9, %vm3900_vm13 }
 0x445   :  { %v3951_v3 = vmul.f32 %v8676_v42, %v8676_v42  ;;  %v3915_v63 = vmul.f32 %v3914_v51, %v8655_v9  ;;  %v1710_v2 = vmul.f32 %v8629_v15, %v1709_v27  ;;  %v3906_v0 = vor.u32 1.1754944e-38, %v3905_v25 }
 0x446   :  { %v8683_v13 = vpop.eup %5321  ;;  %v3926_v24 = vmul.f32 %v3925_v47, %v8655_v9  ;;  %v8692_v48 = vadd.f32 1e-06, %v1119_v52  ;;  %v4831_v31 = vadd.f32 1.0, %v5105_v56  ;;  %v3898_v57 = vadd.f32 %v5320_v23, %v3897_v44 }
 0x447   :  { %v8686_v45 = vmin.f32 %v3951_v3, 16.0  ;;  %v3916_v58 = vadd.f32 0.0036580483, %v3915_v63  ;;  %v1714_v28 = vsel %vm1713_vm14, %v8629_v15, %v1710_v2  ;;  %v10104_v14 = vsub.f32 %v6684_v34, %v7951_v49 }
 0x448   :  { %v3927_v10 = vadd.f32 0.014752088, %v3926_v24  ;;  %v4895_v59 = vmul.f32 %v4831_v31, %v8549_v8  ;;  %v3902_v62 = vsel %vm3901_vm15, %v5320_v23, %v3898_v57  ;;  %v1716_v15 = vmul.f32 %v8683_v13, %v8651_v53  ;;  %v10105_v31 = vld [vmem:[#allocation53_spill] sm:$0xff] }
 0x449   :  { %v3953_v7 = vmul.f32 2.1237322e-06, %v8686_v45  ;;  %v3964_v19 = vmul.f32 3.8918573e-05, %v8686_v45  ;;  %v1949_v33 = vmul.f32 %v1714_v28, %v10104_v14  ;;  %v3917_v16 = vmul.f32 %v3916_v58, %v8655_v9  ;;  %v10106_v58 = vld [vmem:[#allocation35_spill] sm:$0xff] }
 0x44a   :  { %v3907_v6 = vsel %vm8667_vm11, %v3906_v0, %v3902_v62  ;;  %v3928_v11 = vmul.f32 %v3927_v10, %v8655_v9  ;;  %4959 = vst [vmem:[#allocation2 + $0x140] sm:$0xff] %v4895_v59  ;;  %v1717_v8 = vmul.f32 %v8683_v13, %v1716_v15  ;;  %v1056_v5 = vsub.f32 %v8635_v38, %v8394_v36  ;;  %v10107_v59 = vld [vmem:[#allocation64_spill] sm:$0xff]  ;;  %v10108_v15 = vld [vmem:[#allocation41_spill] sm:$0xff] }
 0x44b   :  { %v3954_v1 = vadd.f32 0.00028619796, %v3953_v7  ;;  %v3965_v25 = vadd.f32 0.001143296, %v3964_v19  ;;  %v3908_v29 = vmul.f32 %v3907_v6, %v8643_v41  ;;  %v3918_v34 = vadd.f32 0.05243302, %v3917_v16 }
 0x44c   :  { %v2016_v49 = vmul.f32 %v8413_v50, %v1949_v33  ;;  %v3929_v23 = vadd.f32 0.112945676, %v3928_v11  ;;  %v1718_v41 = vmul.f32 0.5, %v1717_v8  ;;  %vm1722_vm0 = vweird.f32 %v8683_v13  ;;  %v10109_v11 = vld [vmem:[#allocation46_spill] sm:$0xff] }
 0x44d   :  { %v3955_v46 = vmul.f32 %v3954_v1, %v8686_v45  ;;  %v3966_v37 = vmul.f32 %v3965_v25, %v8686_v45  ;;  %v5106_v61 = vclamps-f32 %v3908_v29, 1.0  ;;  %v3919_v40 = vmul.f32 %v3918_v34, %v8655_v9 }
 0x44e   :  { %v8719_v22 = vadd.f32 %v8424_v20, %v2016_v49  ;;  %v3930_v43 = vmul.f32 %v3929_v23, %v8655_v9  ;;  %5323 = vrsqrt.f32 %v8692_v48  ;;  %v1719_v3 = vsub.f32 1.5, %v1718_v41 }
 0x44f   :  { %v3956_v26 = vadd.f32 0.0036580483, %v3955_v46  ;;  %v3967_v55 = vadd.f32 0.014752088, %v3966_v37  ;;  %v4832_v21 = vadd.f32 1.0, %v5106_v61  ;;  %vm1721_vm1 = vweird.f32 %v8651_v53 }
 0x450   :  { %v3920_v51 = vadd.f32 0.18741608, %v3919_v40  ;;  %v8724_v27 = vmul.f32 0.70710677, %v8719_v22  ;;  %v3931_v36 = vadd.f32 0.4994258, %v3930_v43  ;;  %v1720_v24 = vmul.f32 %v8683_v13, %v1719_v3  ;;  %vm1723_vm2 = vmor %vm1721_vm1, %vm1722_vm0 }
 0x451   :  { %v3957_v38 = vmul.f32 %v3956_v26, %v8686_v45  ;;  %v3968_v47 = vmul.f32 %v3967_v55, %v8686_v45  ;;  %v4896_v52 = vmul.f32 %v4832_v21, %v8555_v35  ;;  %v1120_v44 = vmax.f32 %v1056_v5, 0.0 }
 0x452   :  { %v3991_v56 = vmul.f32 %v8724_v27, %v8724_v27  ;;  %v3932_v63 = vmul.f32 %v3931_v36, %v8655_v9  ;;  %v8736_v57 = vmul.f32 0.0078125, %v10105_v31  ;;  %v1182_v28 = vsub.f32 %v10106_v58, %v7980_v60  ;;  %v850_v58 = vpop.xlane.xlu1 %849 }
 0x453   :  { %v3958_v2 = vadd.f32 0.05243302, %v3957_v38  ;;  %v3969_v0 = vadd.f32 0.112945676, %v3968_v47  ;;  %4960 = vst [vmem:[#allocation2 + $0x148] sm:$0xff] %v4896_v52  ;;  %v3921_v35 = vmul.f32 %v3920_v51, %v8655_v9  ;;  %v1724_v14 = vsel %vm1723_vm2, %v8683_v13, %v1720_v24 }
 0x454   :  { %v8741_v10 = vmin.f32 %v3991_v56, 16.0  ;;  %v8745_v53 = vadd.f32 1.0, %v3932_v63  ;;  %v8750_v33 = vpop.eup %5323  ;;  %v8753_v60 = vmul.f32 0.0078125, %v10107_v59  ;;  %v1950_v16 = vmul.f32 %v1724_v14, %v1182_v28 }
 0x455   :  { %v3959_v7 = vmul.f32 %v3958_v2, %v8686_v45  ;;  %v3970_v19 = vmul.f32 %v3969_v0, %v8686_v45  ;;  %v1183_v6 = vsub.f32 %v10108_v15, %v8174_v4  ;;  %v1184_v1 = vsub.f32 %v10109_v11, %v8178_v39 }
 0x456   :  { %v3993_v9 = vmul.f32 2.1237322e-06, %v8741_v10  ;;  %v4004_v62 = vmul.f32 3.8918573e-05, %v8741_v10  ;;  %5325 = vrcp.f32 %v8745_v53  ;;  %v8762_v25 = vadd.f32 1e-06, %v1120_v44 }
 0x457   :  { %v3960_v13 = vadd.f32 0.18741608, %v3959_v7  ;;  %v3971_v29 = vadd.f32 0.4994258, %v3970_v19  ;;  %v2017_v49 = vmul.f32 %v8413_v50, %v1950_v16  ;;  %v8766_v8 = vmul.f32 0.5, %v8607_v54 }
 0x458   :  { %v3994_v34 = vadd.f32 0.00028619796, %v3993_v9  ;;  %v3922_v23 = vadd.f32 1.1283791, %v3921_v35  ;;  %v4005_v46 = vadd.f32 0.001143296, %v4004_v62  ;;  %v1726_v37 = vmul.f32 %v8750_v33, %v8692_v48 }
 0x459   :  { %v3961_v5 = vmul.f32 %v3960_v13, %v8686_v45  ;;  %v3972_v61 = vmul.f32 %v3971_v29, %v8686_v45  ;;  %v8774_v41 = vadd.f32 %v8424_v20, %v2017_v49  ;;  %v3943_v43 = vand.u32 2147483647, %v8745_v53 }
 0x45a   :  { %v3995_v40 = vmul.f32 %v3994_v34, %v8741_v10  ;;  %v3945_v26 = vand.u32 2147483648, %v8745_v53  ;;  %v4006_v54 = vmul.f32 %v4005_v46, %v8741_v10  ;;  %v1727_v55 = vmul.f32 %v8750_v33, %v1726_v37 }
 0x45b   :  { %v3962_v21 = vadd.f32 1.1283791, %v3961_v5  ;;  %v8780_v51 = vadd.f32 1.0, %v3972_v61  ;;  %5327 = vrsqrt.f32 %v8762_v25  ;;  %v8784_v38 = vmul.f32 0.5, %v8663_v18 }
 0x45c   :  { %v3996_v36 = vadd.f32 0.0036580483, %v3995_v40  ;;  %v5326_v45 = vpop.eup %5325  ;;  %v4007_v47 = vadd.f32 0.014752088, %v4006_v54  ;;  %v8787_v3 = vmul.f32 0.70710677, %v8774_v41  ;;  %v3923_v56 = vmul.f32 %v3922_v23, %v8633_v30 }
 0x45d   :  { %v1728_v52 = vmul.f32 0.5, %v1727_v55  ;;  %v3935_v44 = vmul.f32 %v5326_v45, %v8745_v53  ;;  %5329 = vrcp.f32 %v8780_v51  ;;  %vm1731_vm3 = vweird.f32 %v8692_v48 }
 0x45e   :  { %vm3939_vm4 = vweird.f32 %v8745_v53  ;;  %vm8794_vm5 = vcmp.eq.f32.partialorder %v3943_v43, 8.507059e+37  ;;  %v3946_v18 = vor.u32 1.1754944e-38, %v3945_v26  ;;  %v3997_v2 = vmul.f32 %v3996_v36, %v8741_v10 }
 0x45f   :  { %v3936_v0 = vsub.f32 1.0, %v3935_v44  ;;  %v4008_v24 = vmul.f32 %v4007_v47, %v8741_v10  ;;  %v4031_v30 = vmul.f32 %v8787_v3, %v8787_v3  ;;  %v1729_v31 = vsub.f32 1.5, %v1728_v52 }
 0x460   :  { %vm3940_vm6 = vweird.f32 %v5326_v45  ;;  %v3963_v28 = vmul.f32 %v3962_v21, %v8676_v42  ;;  %v3998_v35 = vadd.f32 0.05243302, %v3997_v2  ;;  %vm1732_vm7 = vweird.f32 %v8750_v33 }
 0x461   :  { %v8804_v7 = vpop.eup %5327  ;;  %v3937_v19 = vmul.f32 %v5326_v45, %v3936_v0  ;;  %v4009_v14 = vadd.f32 0.112945676, %v4008_v24  ;;  %v8806_v59 = vmin.f32 %v4031_v30, 16.0  ;;  %v1730_v9 = vmul.f32 %v8750_v33, %v1729_v31  ;;  %vm1733_vm9 = vmor %vm1731_vm3, %vm1732_vm7 }
 0x462   :  { %vm3979_vm8 = vweird.f32 %v8780_v51  ;;  %v3983_v62 = vand.u32 2147483647, %v8780_v51  ;;  %v3985_v16 = vand.u32 2147483648, %v8780_v51  ;;  %v929_v13 = vmul.f32 0.0078125, %v850_v58  ;;  %vm3941_vm10 = vmor %vm3939_vm4, %vm3940_vm6 }
 0x463   :  { %v5330_v29 = vpop.eup %5329  ;;  %v3938_v42 = vadd.f32 %v5326_v45, %v3937_v19  ;;  %v4010_v34 = vmul.f32 %v4009_v14, %v8741_v10  ;;  %v4033_v49 = vmul.f32 2.1237322e-06, %v8806_v59  ;;  %v4044_v23 = vmul.f32 3.8918573e-05, %v8806_v59 }
 0x464   :  { %v3975_v46 = vmul.f32 %v5330_v29, %v8780_v51  ;;  %v3999_v37 = vmul.f32 %v3998_v35, %v8741_v10  ;;  %v1734_v5 = vsel %vm1733_vm9, %v8750_v33, %v1730_v9  ;;  %v1736_v61 = vmul.f32 %v8804_v7, %v8762_v25 }
 0x465   :  { %v3942_v40 = vsel %vm3941_vm10, %v5326_v45, %v3938_v42  ;;  %v4011_v43 = vadd.f32 0.4994258, %v4010_v34  ;;  %v4034_v26 = vadd.f32 0.00028619796, %v4033_v49  ;;  %v4045_v54 = vadd.f32 0.001143296, %v4044_v23 }
 0x466   :  { %v3947_v48 = vsel %vm8794_vm5, %v3946_v18, %v3942_v40  ;;  %v3976_v55 = vsub.f32 1.0, %v3975_v46  ;;  %vm3980_vm11 = vweird.f32 %v5330_v29  ;;  %v1951_v53 = vmul.f32 %v1734_v5, %v1183_v6  ;;  %v10112_v6 = vld [vmem:[#allocation13_spill] sm:$0xff] }
 0x467   :  { %v3948_v21 = vmul.f32 %v3947_v48, %v3923_v56  ;;  %v4012_v36 = vmul.f32 %v4011_v43, %v8741_v10  ;;  %v4035_v33 = vmul.f32 %v4034_v26, %v8806_v59  ;;  %v4046_v47 = vmul.f32 %v4045_v54, %v8806_v59  ;;  %vm3981_vm13 = vmor %vm3979_vm8, %vm3980_vm11 }
 0x468   :  { %v3977_v45 = vmul.f32 %v5330_v29, %v3976_v55  ;;  %v4000_v52 = vadd.f32 0.18741608, %v3999_v37  ;;  %v2018_v44 = vmul.f32 %v8413_v50, %v1951_v53  ;;  %v1737_v63 = vmul.f32 %v8804_v7, %v1736_v61  ;;  %v10113_v53 = vld [vmem:[#allocation18_spill] sm:$0xff] }
 0x469   :  { %v5107_v18 = vclamps-f32 %v3948_v21, 1.0  ;;  %v8837_v2 = vadd.f32 1.0, %v4012_v36  ;;  %v4036_v0 = vadd.f32 0.0036580483, %v4035_v33  ;;  %v4047_v24 = vadd.f32 0.014752088, %v4046_v47 }
 0x46a   :  { %v3978_v4 = vadd.f32 %v5330_v29, %v3977_v45  ;;  %vm3984_vm12 = vcmp.eq.f32.partialorder %v3983_v62, 8.507059e+37  ;;  %v3986_v15 = vor.u32 1.1754944e-38, %v3985_v16  ;;  %v1057_v56 = vsub.f32 %v929_v13, %v10112_v6  ;;  %v852_v62 = vpop.xlane.xlu2 %851 }
 0x46b   :  { %v4833_v30 = vadd.f32 1.0, %v5107_v18  ;;  %5331 = vrcp.f32 %v8837_v2  ;;  %v8845_v31 = vadd.f32 %v8424_v20, %v2018_v44  ;;  %v1738_v58 = vmul.f32 0.5, %v1737_v63 }
 0x46c   :  { %v3982_v35 = vsel %vm3981_vm13, %v5330_v29, %v3978_v4  ;;  %v4001_v19 = vmul.f32 %v4000_v52, %v8741_v10  ;;  %v4037_v14 = vmul.f32 %v4036_v0, %v8806_v59  ;;  %v4048_v9 = vmul.f32 %v4047_v24, %v8806_v59 }
 0x46d   :  { %v4897_v16 = vmul.f32 %v4833_v30, %v8766_v8  ;;  %v3987_v13 = vsel %vm3984_vm12, %v3986_v15, %v3982_v35  ;;  %v8852_v51 = vmul.f32 0.5, %v8719_v22  ;;  %vm1741_vm14 = vweird.f32 %v8762_v25  ;;  %v854_v25 = vpop.xlane.xlu0 %853 }
 0x46e   :  { %v3988_v42 = vmul.f32 %v3987_v13, %v3963_v28  ;;  %v4038_v34 = vadd.f32 0.05243302, %v4037_v14  ;;  %v4049_v49 = vadd.f32 0.112945676, %v4048_v9  ;;  %vm1742_vm15 = vweird.f32 %v8804_v7 }
 0x46f   :  { %4961 = vst [vmem:[#allocation2 + $0x150] sm:$0xff] %v4897_v16  ;;  %v8857_v10 = vmul.f32 0.70710677, %v8845_v31  ;;  %v1739_v29 = vsub.f32 1.5, %v1738_v58  ;;  %v1121_v23 = vmax.f32 %v1057_v56, 0.0  ;;  %v930_v46 = vmul.f32 0.0078125, %v852_v62  ;;  %vm1743_vm0 = vmor %vm1741_vm14, %vm1742_vm15 }
 0x470   :  { %v5108_v37 = vclamps-f32 %v3988_v42, 1.0  ;;  %v4002_v8 = vadd.f32 1.1283791, %v4001_v19  ;;  %v4039_v5 = vmul.f32 %v4038_v34, %v8806_v59  ;;  %v4050_v22 = vmul.f32 %v4049_v49, %v8806_v59  ;;  %v10114_v16 = vld [vmem:[#allocation47_spill] sm:$0xff] }
 0x471   :  { %v5332_v61 = vpop.eup %5331  ;;  %v4023_v28 = vand.u32 2147483647, %v8837_v2  ;;  %v4071_v40 = vmul.f32 %v8857_v10, %v8857_v10  ;;  %v1740_v43 = vmul.f32 %v8804_v7, %v1739_v29  ;;  %v8865_v26 = vadd.f32 1e-06, %v1121_v23 }
 0x472   :  { %v4834_v54 = vadd.f32 1.0, %v5108_v37  ;;  %v4015_v48 = vmul.f32 %v5332_v61, %v8837_v2  ;;  %v4040_v55 = vadd.f32 0.18741608, %v4039_v5  ;;  %v1058_v21 = vsub.f32 %v930_v46, %v10113_v53 }
 0x473   :  { %v4051_v36 = vadd.f32 0.4994258, %v4050_v22  ;;  %v8873_v33 = vmin.f32 %v4071_v40, 16.0  ;;  %v1744_v47 = vsel %vm1743_vm0, %v8804_v7, %v1740_v43  ;;  %5333 = vrsqrt.f32 %v8865_v26 }
 0x474   :  { %v4898_v45 = vmul.f32 %v4834_v54, %v8784_v38  ;;  %v4016_v52 = vsub.f32 1.0, %v4015_v48  ;;  %v4025_v44 = vand.u32 2147483648, %v8837_v2  ;;  %v1952_v63 = vmul.f32 %v1744_v47, %v1184_v1 }
 0x475   :  { %v4041_v18 = vmul.f32 %v4040_v55, %v8806_v59  ;;  %v4052_v0 = vmul.f32 %v4051_v36, %v8806_v59  ;;  %v4073_v24 = vmul.f32 2.1237322e-06, %v8873_v33  ;;  %v4084_v7 = vmul.f32 3.8918573e-05, %v8873_v33 }
 0x476   :  { %4962 = vst [vmem:[#allocation2 + $0x158] sm:$0xff] %v4898_v45  ;;  %v4017_v4 = vmul.f32 %v5332_v61, %v4016_v52  ;;  %vm4020_vm1 = vweird.f32 %v5332_v61  ;;  %v2019_v38 = vmul.f32 %v8413_v50, %v1952_v63  ;;  %v1122_v15 = vmax.f32 %v1058_v21, 0.0  ;;  %v856_v63 = vpop.xlane.xlu1 %855 }
 0x477   :  { %v8887_v6 = vadd.f32 1.0, %v4052_v0  ;;  %v4074_v56 = vadd.f32 0.00028619796, %v4073_v24  ;;  %v4085_v39 = vadd.f32 0.001143296, %v4084_v7  ;;  %v931_v11 = vmul.f32 0.0078125, %v854_v25 }
 0x478   :  { %v4003_v1 = vmul.f32 %v4002_v8, %v8724_v27  ;;  %v4018_v30 = vadd.f32 %v5332_v61, %v4017_v4  ;;  %vm4019_vm2 = vweird.f32 %v8837_v2  ;;  %v8892_v59 = vadd.f32 %v8424_v20, %v2019_v38 }
 0x479   :  { %v8894_v58 = vpop.eup %5333  ;;  %vm4021_vm3 = vmor %vm4019_vm2, %vm4020_vm1  ;;  %v4026_v35 = vor.u32 1.1754944e-38, %v4025_v44  ;;  %v4042_v19 = vadd.f32 1.1283791, %v4041_v18  ;;  %5335 = vrcp.f32 %v8887_v6  ;;  %v8897_v50 = vadd.f32 1e-06, %v1122_v15 }
 0x47a   :  { %v4022_v14 = vsel %vm4021_vm3, %v5332_v61, %v4018_v30  ;;  %vm4024_vm4 = vcmp.eq.f32.partialorder %v4023_v28, 8.507059e+37  ;;  %v4075_v9 = vmul.f32 %v4074_v56, %v8873_v33  ;;  %v4086_v27 = vmul.f32 %v4085_v39, %v8873_v33 }
 0x47b   :  { %v4027_v62 = vsel %vm4024_vm4, %v4026_v35, %v4022_v14  ;;  %v4065_v2 = vand.u32 2147483648, %v8887_v6  ;;  %v8903_v20 = vmul.f32 0.70710677, %v8892_v59  ;;  %v1059_v13 = vsub.f32 %v931_v11, %v10114_v16 }
 0x47c   :  { %v4028_v42 = vmul.f32 %v4027_v62, %v4003_v1  ;;  %v4076_v34 = vadd.f32 0.0036580483, %v4075_v9  ;;  %v4087_v49 = vadd.f32 0.014752088, %v4086_v27  ;;  %v1746_v29 = vmul.f32 %v8894_v58, %v8865_v26 }
 0x47d   :  { %v4043_v23 = vmul.f32 %v4042_v19, %v8787_v3  ;;  %v4111_v46 = vmul.f32 %v8903_v20, %v8903_v20  ;;  %vm1751_vm5 = vweird.f32 %v8865_v26  ;;  %5337 = vrsqrt.f32 %v8897_v50 }
 0x47e   :  { %v5109_v37 = vclamps-f32 %v4028_v42, 1.0  ;;  %vm4059_vm6 = vweird.f32 %v8887_v6  ;;  %v4077_v8 = vmul.f32 %v4076_v34, %v8873_v33  ;;  %v4088_v5 = vmul.f32 %v4087_v49, %v8873_v33 }
 0x47f   :  { %v1747_v22 = vmul.f32 %v8894_v58, %v1746_v29  ;;  %v5336_v61 = vpop.eup %5335  ;;  %v4063_v28 = vand.u32 2147483647, %v8887_v6  ;;  %v4066_v3 = vor.u32 1.1754944e-38, %v4065_v2  ;;  %v8918_v40 = vmin.f32 %v4111_v46, 16.0  ;;  %v10117_v46 = vld [vmem:[#allocation5_spill] sm:$0xff] }
 0x480   :  { %v1123_v43 = vmax.f32 %v1059_v13, 0.0  ;;  %v4835_v54 = vadd.f32 1.0, %v5109_v37  ;;  %v4055_v48 = vmul.f32 %v5336_v61, %v8887_v6  ;;  %v4078_v55 = vadd.f32 0.05243302, %v4077_v8  ;;  %v10118_v37 = vld [vmem:[#allocation19_spill] sm:$0xff] }
 0x481   :  { %vm1752_vm7 = vweird.f32 %v8894_v58  ;;  %vm4060_vm8 = vweird.f32 %v5336_v61  ;;  %v4089_v53 = vadd.f32 0.112945676, %v4088_v5  ;;  %v4113_v21 = vmul.f32 2.1237322e-06, %v8918_v40 }
 0x482   :  { %v4124_v36 = vmul.f32 3.8918573e-05, %v8918_v40  ;;  %v4899_v47 = vmul.f32 %v4835_v54, %v8852_v51  ;;  %v4056_v45 = vsub.f32 1.0, %v4055_v48  ;;  %v4079_v52 = vmul.f32 %v4078_v55, %v8873_v33  ;;  %vm8941_vm9 = vmor %vm1751_vm5, %vm1752_vm7 }
 0x483   :  { %v1748_v44 = vmul.f32 0.5, %v1747_v22  ;;  %v8926_v25 = vpop.eup %5337  ;;  %v4090_v18 = vmul.f32 %v4089_v53, %v8873_v33  ;;  %v4114_v0 = vadd.f32 0.00028619796, %v4113_v21  ;;  %v8929_v7 = vadd.f32 1e-06, %v1123_v43  ;;  %vm4061_vm10 = vmor %vm4059_vm6, %vm4060_vm8 }
 0x484   :  { %v4125_v24 = vadd.f32 0.001143296, %v4124_v36  ;;  %4963 = vst [vmem:[#allocation2 + $0x160] sm:$0xff] %v4899_v47  ;;  %v4057_v4 = vmul.f32 %v5336_v61, %v4056_v45  ;;  %v4080_v38 = vadd.f32 0.18741608, %v4079_v52  ;;  %v1756_v51 = vmul.f32 %v8926_v25, %v8897_v50 }
 0x485   :  { %v1749_v15 = vsub.f32 1.5, %v1748_v44  ;;  %v4091_v56 = vadd.f32 0.4994258, %v4090_v18  ;;  %v4115_v39 = vmul.f32 %v4114_v0, %v8918_v40  ;;  %v932_v1 = vmul.f32 0.0078125, %v856_v63  ;;  %v8985_v44 = vld [vmem:[%s9829_s4] ss:$0 sm:$0xff] }
 0x486   :  { %v4126_v11 = vmul.f32 %v4125_v24, %v8918_v40  ;;  %v4058_v30 = vadd.f32 %v5336_v61, %v4057_v4  ;;  %v4081_v35 = vmul.f32 %v4080_v38, %v8873_v33  ;;  %v1757_v9 = vmul.f32 %v8926_v25, %v1756_v51 }
 0x487   :  { %v1750_v19 = vmul.f32 %v8894_v58, %v1749_v15  ;;  %v4092_v27 = vmul.f32 %v4091_v56, %v8873_v33  ;;  %v4116_v62 = vadd.f32 0.0036580483, %v4115_v39  ;;  %5339 = vrsqrt.f32 %v8929_v7  ;;  %v10121_v39 = vld [vmem:[#allocation6_spill] sm:$0xff] }
 0x488   :  { %v4127_v2 = vadd.f32 0.014752088, %v4126_v11  ;;  %v4062_v16 = vsel %vm4061_vm10, %v5336_v61, %v4058_v30  ;;  %vm4064_vm11 = vcmp.eq.f32.partialorder %v4063_v28, 8.507059e+37  ;;  %v1758_v13 = vmul.f32 0.5, %v1757_v9  ;;  %v858_v61 = vpop.xlane.xlu2 %857  ;;  %v10122_v11 = vld [vmem:[#allocation22_spill] sm:$0xff] }
 0x489   :  { %v1754_v26 = vsel %vm8941_vm9, %v8894_v58, %v1750_v19  ;;  %v4067_v42 = vsel %vm4064_vm11, %v4066_v3, %v4062_v16  ;;  %v8954_v34 = vadd.f32 1.0, %v4092_v27  ;;  %v4117_v49 = vmul.f32 %v4116_v62, %v8918_v40  ;;  %v10120_v58 = vld [vmem:[#allocation49_spill] sm:$0xff] }
 0x48a   :  { %v4128_v6 = vmul.f32 %v4127_v2, %v8918_v40  ;;  %v2148_v33 = vmul.f32 0.5, %v8774_v41  ;;  %v4068_v29 = vmul.f32 %v4067_v42, %v4043_v23  ;;  %v10119_v8 = vsub.f32 %v10117_v46, %v10118_v37  ;;  %v8968_v41 = vld [vmem:[%s9828_s3] ss:$0 sm:$0xff] }
 0x48b   :  { %v1759_v22 = vsub.f32 1.5, %v1758_v13  ;;  %v4082_v28 = vadd.f32 1.1283791, %v4081_v35  ;;  %5341 = vrcp.f32 %v8954_v34  ;;  %vm1762_vm12 = vweird.f32 %v8926_v25 }
 0x48c   :  { %v1953_v5 = vmul.f32 %v1754_v26, %v10119_v8  ;;  %v1060_v3 = vsub.f32 %v932_v1, %v10120_v58  ;;  %v5110_v43 = vclamps-f32 %v4068_v29, 1.0  ;;  %v4118_v54 = vadd.f32 0.05243302, %v4117_v49 }
 0x48d   :  { %v4129_v48 = vadd.f32 0.112945676, %v4128_v6  ;;  %v8971_v55 = vpop.eup %5339  ;;  %v8974_v53 = vmul.f32 0.5, %v8845_v31  ;;  %v1760_v21 = vmul.f32 %v8926_v25, %v1759_v22  ;;  %vm1761_vm13 = vweird.f32 %v8897_v50 }
 0x48e   :  { %v2020_v23 = vmul.f32 %v8968_v41, %v1953_v5  ;;  %v8978_v36 = vmul.f32 0.0078125, %v858_v61  ;;  %v4836_v47 = vadd.f32 1.0, %v5110_v43  ;;  %v4119_v45 = vmul.f32 %v4118_v54, %v8918_v40  ;;  %vm1763_vm14 = vmor %vm1761_vm13, %vm1762_vm12  ;;  %v10126_v43 = vld [vmem:[#allocation50_spill] sm:$0xff] }
 0x48f   :  { %v4130_v52 = vmul.f32 %v4129_v48, %v8918_v40  ;;  %v4083_v31 = vmul.f32 %v4082_v28, %v8857_v10  ;;  %v1764_v50 = vsel %vm1763_vm14, %v8926_v25, %v1760_v21  ;;  %v1766_v18 = vmul.f32 %v8971_v55, %v8929_v7 }
 0x490   :  { %v8988_v63 = vadd.f32 %v8985_v44, %v2020_v23  ;;  %v1124_v0 = vmax.f32 %v1060_v3, 0.0  ;;  %v4900_v24 = vmul.f32 %v4836_v47, %v2148_v33  ;;  %v4103_v4 = vand.u32 2147483647, %v8954_v34 }
 0x491   :  { %v4120_v38 = vadd.f32 0.18741608, %v4119_v45  ;;  %v4131_v15 = vadd.f32 0.4994258, %v4130_v52  ;;  %v5342_v51 = vpop.eup %5341  ;;  %v10123_v1 = vsub.f32 %v10121_v39, %v10122_v11  ;;  %v1767_v10 = vmul.f32 %v8971_v55, %v1766_v18  ;;  %v10127_v45 = vld [vmem:[#allocation7_spill] sm:$0xff] }
 0x492   :  { %v8998_v56 = vmul.f32 0.70710677, %v8988_v63  ;;  %v9004_v25 = vadd.f32 1e-06, %v1124_v0  ;;  %4964 = vst [vmem:[#allocation2 + $0x168] sm:$0xff] %v4900_v24  ;;  %v4095_v35 = vmul.f32 %v5342_v51, %v8954_v34  ;;  %v4105_v19 = vand.u32 2147483648, %v8954_v34 }
 0x493   :  { %v1954_v30 = vmul.f32 %v1764_v50, %v10123_v1  ;;  %v4121_v14 = vmul.f32 %v4120_v38, %v8918_v40  ;;  %v4132_v9 = vmul.f32 %v4131_v15, %v8918_v40  ;;  %v1768_v2 = vmul.f32 0.5, %v1767_v10  ;;  %v10128_v52 = vld [vmem:[#allocation23_spill] sm:$0xff] }
 0x494   :  { %v4151_v27 = vmul.f32 %v8998_v56, %v8998_v56  ;;  %5343 = vrsqrt.f32 %v9004_v25  ;;  %v4096_v16 = vsub.f32 1.0, %v4095_v35  ;;  %vm4099_vm15 = vweird.f32 %v8954_v34 }
 0x495   :  { %v2021_v62 = vmul.f32 %v8968_v41, %v1954_v30  ;;  %v9015_v26 = vadd.f32 1.0, %v4132_v9  ;;  %vm1772_vm0 = vweird.f32 %v8971_v55  ;;  %v4122_v13 = vadd.f32 1.1283791, %v4121_v14 }
 0x496   :  { %v9018_v42 = vmin.f32 %v4151_v27, 16.0  ;;  %v1769_v49 = vsub.f32 1.5, %v1768_v2  ;;  %v4097_v6 = vmul.f32 %v5342_v51, %v4096_v16  ;;  %vm4100_vm1 = vweird.f32 %v5342_v51 }
 0x497   :  { %v9021_v40 = vadd.f32 %v8985_v44, %v2021_v62  ;;  %vm9023_vm2 = vcmp.eq.f32.partialorder %v4103_v4, 8.507059e+37  ;;  %5345 = vrcp.f32 %v9015_v26  ;;  %v4106_v29 = vor.u32 1.1754944e-38, %v4105_v19  ;;  %vm4101_vm5 = vmor %vm4099_vm15, %vm4100_vm1 }
 0x498   :  { %v4145_v46 = vand.u32 2147483648, %v9015_v26  ;;  %v4153_v37 = vmul.f32 2.1237322e-06, %v9018_v42  ;;  %vm1771_vm3 = vweird.f32 %v8929_v7  ;;  %v4098_v8 = vadd.f32 %v5342_v51, %v4097_v6 }
 0x499   :  { %v4164_v5 = vmul.f32 3.8918573e-05, %v9018_v42  ;;  %v9033_v22 = vmul.f32 0.70710677, %v9021_v40  ;;  %v1770_v61 = vmul.f32 %v8971_v55, %v1769_v49  ;;  %vm1773_vm4 = vmor %vm1771_vm3, %vm1772_vm0  ;;  %v9043_v58 = vmul.f32 %v4122_v13, %v8903_v20 }
 0x49a   :  { %v9038_v28 = vpop.eup %5343  ;;  %v4143_v7 = vand.u32 2147483647, %v9015_v26  ;;  %v4154_v3 = vadd.f32 0.00028619796, %v4153_v37  ;;  %v1061_v54 = vsub.f32 %v8978_v36, %v10126_v43  ;;  %v4102_v48 = vsel %vm4101_vm5, %v5342_v51, %v4098_v8 }
 0x49b   :  { %v4165_v23 = vadd.f32 0.001143296, %v4164_v5  ;;  %v4191_v21 = vmul.f32 %v9033_v22, %v9033_v22  ;;  %v1774_v47 = vsel %vm1773_vm4, %v8971_v55, %v1770_v61  ;;  %v4107_v34 = vsel %vm9023_vm2, %v4106_v29, %v4102_v48 }
 0x49c   :  { %vm4139_vm6 = vweird.f32 %v9015_v26  ;;  %v4155_v20 = vmul.f32 %v4154_v3, %v9018_v42  ;;  %v10129_v50 = vsub.f32 %v10127_v45, %v10128_v52  ;;  %v1776_v36 = vmul.f32 %v9038_v28, %v9004_v25 }
 0x49d   :  { %v5346_v0 = vpop.eup %5345  ;;  %v4108_v24 = vmul.f32 %v4107_v34, %v4083_v31  ;;  %v4146_v4 = vor.u32 1.1754944e-38, %v4145_v46  ;;  %v4166_v38 = vmul.f32 %v4165_v23, %v9018_v42  ;;  %v9061_v55 = vmin.f32 %v4191_v21, 16.0 }
 0x49e   :  { %v1955_v18 = vmul.f32 %v1774_v47, %v10129_v50  ;;  %v4135_v15 = vmul.f32 %v5346_v0, %v9015_v26  ;;  %vm9064_vm7 = vcmp.eq.f32.partialorder %v4143_v7, 8.507059e+37  ;;  %v4156_v39 = vadd.f32 0.0036580483, %v4155_v20 }
 0x49f   :  { %vm1781_vm8 = vweird.f32 %v9004_v25  ;;  %vm1782_vm9 = vweird.f32 %v9038_v28  ;;  %v5111_v1 = vclamps-f32 %v4108_v24, 1.0  ;;  %v4167_v31 = vadd.f32 0.014752088, %v4166_v38 }
 0x4a0   :  { %v2022_v11 = vmul.f32 %v8968_v41, %v1955_v18  ;;  %v4193_v30 = vmul.f32 2.1237322e-06, %v9061_v55  ;;  %v1777_v10 = vmul.f32 %v9038_v28, %v1776_v36  ;;  %v4136_v35 = vsub.f32 1.0, %v4135_v15  ;;  %vm1783_vm12 = vmor %vm1781_vm8, %vm1782_vm9 }
 0x4a1   :  { %v4157_v19 = vmul.f32 %v4156_v39, %v9018_v42  ;;  %v4204_v14 = vmul.f32 3.8918573e-05, %v9061_v55  ;;  %v4837_v27 = vadd.f32 1.0, %v5111_v1  ;;  %v4168_v62 = vmul.f32 %v4167_v31, %v9018_v42  ;;  %v10132_v39 = vld [vmem:[#allocation8_spill] sm:$0xff] }
 0x4a2   :  { %v9076_v9 = vadd.f32 %v8985_v44, %v2022_v11  ;;  %v4194_v2 = vadd.f32 0.00028619796, %v4193_v30  ;;  %v1778_v16 = vmul.f32 0.5, %v1777_v10  ;;  %v4137_v13 = vmul.f32 %v5346_v0, %v4136_v35  ;;  %v10133_v11 = vld [vmem:[#allocation14_spill] sm:$0xff] }
 0x4a3   :  { %vm4140_vm10 = vweird.f32 %v5346_v0  ;;  %v4158_v49 = vadd.f32 0.05243302, %v4157_v19  ;;  %v4205_v6 = vadd.f32 0.001143296, %v4204_v14  ;;  %v4901_v33 = vmul.f32 %v4837_v27, %v8974_v53  ;;  %v10135_v27 = vld [vmem:[#allocation32_spill] sm:$0xff] }
 0x4a4   :  { %v4169_v29 = vadd.f32 0.112945676, %v4168_v62  ;;  %v4195_v46 = vmul.f32 %v4194_v2, %v9061_v55  ;;  %v9082_v37 = vmul.f32 0.70710677, %v9076_v9  ;;  %v4138_v8 = vadd.f32 %v5346_v0, %v4137_v13  ;;  %vm4141_vm11 = vmor %vm4139_vm6, %vm4140_vm10 }
 0x4a5   :  { %v4159_v5 = vmul.f32 %v4158_v49, %v9018_v42  ;;  %v4206_v61 = vmul.f32 %v4205_v6, %v9061_v55  ;;  %v1779_v7 = vsub.f32 1.5, %v1778_v16  ;;  %4965 = vst [vmem:[#allocation2 + $0x170] sm:$0xff] %v4901_v33  ;;  %v1125_v48 = vmax.f32 %v1061_v54, 0.0 }
 0x4a6   :  { %v4170_v3 = vmul.f32 %v4169_v29, %v9018_v42  ;;  %v4196_v43 = vadd.f32 0.0036580483, %v4195_v46  ;;  %v4231_v53 = vmul.f32 %v9082_v37, %v9082_v37  ;;  %v4142_v23 = vsel %vm4141_vm11, %v5346_v0, %v4138_v8 }
 0x4a7   :  { %v4160_v21 = vadd.f32 0.18741608, %v4159_v5  ;;  %v4207_v47 = vadd.f32 0.014752088, %v4206_v61  ;;  %v1780_v34 = vmul.f32 %v9038_v28, %v1779_v7  ;;  %v4147_v20 = vsel %vm9064_vm7, %v4146_v4, %v4142_v23 }
 0x4a8   :  { %v4171_v45 = vadd.f32 0.4994258, %v4170_v3  ;;  %v4197_v52 = vmul.f32 %v4196_v43, %v9061_v55  ;;  %v9095_v26 = vmin.f32 %v4231_v53, 16.0  ;;  %v4148_v54 = vmul.f32 %v4147_v20, %v9043_v58  ;;  %v860_v3 = vpop.xlane.xlu0 %859  ;;  %v862_v20 = vpop.xlane.xlu1 %861 }
 0x4a9   :  { %v4161_v50 = vmul.f32 %v4160_v21, %v9018_v42  ;;  %v4208_v18 = vmul.f32 %v4207_v47, %v9061_v55  ;;  %v1784_v36 = vsel %vm1783_vm12, %v9038_v28, %v1780_v34  ;;  %v2150_v15 = vmul.f32 0.5, %v8892_v59 }
 0x4aa   :  { %v4172_v0 = vmul.f32 %v4171_v45, %v9018_v42  ;;  %v4198_v24 = vadd.f32 0.05243302, %v4197_v52  ;;  %v4233_v4 = vmul.f32 2.1237322e-06, %v9095_v26  ;;  %v4244_v38 = vmul.f32 3.8918573e-05, %v9095_v26  ;;  %v864_v45 = vpop.xlane.xlu2 %863 }
 0x4ab   :  { %v5112_v51 = vclamps-f32 %v4148_v54, 1.0  ;;  %v4209_v25 = vadd.f32 0.112945676, %v4208_v18  ;;  %v10134_v58 = vsub.f32 %v10132_v39, %v10133_v11  ;;  %v9117_v14 = vadd.f32 1e-06, %v1125_v48 }
 0x4ac   :  { %v9112_v31 = vadd.f32 1.0, %v4172_v0  ;;  %v4199_v30 = vmul.f32 %v4198_v24, %v9061_v55  ;;  %v4234_v28 = vadd.f32 0.00028619796, %v4233_v4  ;;  %v4245_v10 = vadd.f32 0.001143296, %v4244_v38 }
 0x4ad   :  { %v1956_v1 = vmul.f32 %v1784_v36, %v10134_v58  ;;  %v4838_v42 = vadd.f32 1.0, %v5112_v51  ;;  %v4210_v35 = vmul.f32 %v4209_v25, %v9061_v55  ;;  %v9121_v59 = vmul.f32 %v8736_v57, %v8736_v57 }
 0x4ae   :  { %v1197_v62 = vsub.f32 %v10135_v27, %v8736_v57  ;;  %v4162_v2 = vadd.f32 1.1283791, %v4161_v50  ;;  %5347 = vrcp.f32 %v9112_v31  ;;  %v4200_v13 = vadd.f32 0.18741608, %v4199_v30 }
 0x4af   :  { %v2023_v19 = vmul.f32 %v8968_v41, %v1956_v1  ;;  %v4902_v16 = vmul.f32 %v4838_v42, %v2150_v15  ;;  %v4211_v49 = vadd.f32 0.4994258, %v4210_v35  ;;  %v4235_v6 = vmul.f32 %v4234_v28, %v9095_v26  ;;  %v10138_v1 = vld [vmem:[#allocation52_spill] sm:$0xff] }
 0x4b0   :  { %v9129_v33 = vmul.f32 %v8753_v60, %v8753_v60  ;;  %v4183_v29 = vand.u32 2147483647, %v9112_v31  ;;  %v4246_v46 = vmul.f32 %v4245_v10, %v9095_v26  ;;  %v4201_v5 = vmul.f32 %v4200_v13, %v9061_v55 }
 0x4b1   :  { %v9134_v8 = vadd.f32 %v8985_v44, %v2023_v19  ;;  %4966 = vst [vmem:[#allocation2 + $0x178] sm:$0xff] %v4902_v16  ;;  %v4212_v61 = vmul.f32 %v4211_v49, %v9061_v55  ;;  %v4236_v7 = vadd.f32 0.0036580483, %v4235_v6  ;;  %5349 = vrsqrt.f32 %v9117_v14 }
 0x4b2   :  { %v9140_v43 = vmul.f32 0.0078125, %v7851_v32  ;;  %v4185_v53 = vand.u32 2147483648, %v9112_v31  ;;  %v4247_v48 = vadd.f32 0.014752088, %v4246_v46  ;;  %v9147_v21 = vmul.f32 0.5, %v8988_v63  ;;  %v868_v63 = vpop.xlane.xlu1 %867 }
 0x4b3   :  { %v9144_v23 = vmul.f32 0.70710677, %v9134_v8  ;;  %v4163_v47 = vmul.f32 %v4162_v2, %v8998_v56  ;;  %v9150_v34 = vadd.f32 1.0, %v4212_v61  ;;  %v4237_v55 = vmul.f32 %v4236_v7, %v9095_v26 }
 0x4b4   :  { %v5348_v52 = vpop.eup %5347  ;;  %v4202_v32 = vadd.f32 1.1283791, %v4201_v5  ;;  %v4248_v54 = vmul.f32 %v4247_v48, %v9095_v26  ;;  %v934_v18 = vmul.f32 0.0078125, %v860_v3  ;;  %vm4179_vm13 = vweird.f32 %v9112_v31 }
 0x4b5   :  { %v4271_v50 = vmul.f32 %v9144_v23, %v9144_v23  ;;  %v4175_v36 = vmul.f32 %v5348_v52, %v9112_v31  ;;  %vm9158_vm14 = vcmp.eq.f32.partialorder %v4183_v29, 8.507059e+37  ;;  %5351 = vrcp.f32 %v9150_v34 }
 0x4b6   :  { %v4186_v56 = vor.u32 1.1754944e-38, %v4185_v53  ;;  %v4238_v0 = vadd.f32 0.05243302, %v4237_v55  ;;  %v9163_v24 = vmul.f32 0.0078125, %v862_v20  ;;  %v9165_v4 = vmul.f32 0.0078125, %v864_v45 }
 0x4b7   :  { %v9167_v38 = vpop.eup %5349  ;;  %v4176_v15 = vsub.f32 1.0, %v4175_v36  ;;  %vm4180_vm15 = vweird.f32 %v5348_v52  ;;  %v4249_v51 = vadd.f32 0.112945676, %v4248_v54  ;;  %v9169_v25 = vmin.f32 %v4271_v50, 16.0 }
 0x4b8   :  { %v4203_v39 = vmul.f32 %v4202_v32, %v9033_v22  ;;  %v4239_v11 = vmul.f32 %v4238_v0, %v9095_v26  ;;  %v1786_v58 = vmul.f32 %v9167_v38, %v9117_v14  ;;  %v1062_v30 = vsub.f32 %v934_v18, %v10138_v1  ;;  %vm4181_vm1 = vmor %vm4179_vm13, %vm4180_vm15 }
 0x4b9   :  { %v4177_v28 = vmul.f32 %v5348_v52, %v4176_v15  ;;  %v4250_v10 = vmul.f32 %v4249_v51, %v9095_v26  ;;  %v4273_v42 = vmul.f32 2.1237322e-06, %v9169_v25  ;;  %v4284_v35 = vmul.f32 3.8918573e-05, %v9169_v25 }
 0x4ba   :  { %vm1791_vm0 = vweird.f32 %v9117_v14  ;;  %v4223_v19 = vand.u32 2147483647, %v9150_v34  ;;  %v4225_v22 = vand.u32 2147483648, %v9150_v34  ;;  %v4240_v2 = vadd.f32 0.18741608, %v4239_v11 }
 0x4bb   :  { %v1787_v16 = vmul.f32 %v9167_v38, %v1786_v58  ;;  %v5352_v13 = vpop.eup %5351  ;;  %v4178_v49 = vadd.f32 %v5348_v52, %v4177_v28  ;;  %v4251_v6 = vadd.f32 0.4994258, %v4250_v10  ;;  %v4274_v29 = vadd.f32 0.00028619796, %v4273_v42 }
 0x4bc   :  { %v4285_v46 = vadd.f32 0.001143296, %v4284_v35  ;;  %v4215_v5 = vmul.f32 %v5352_v13, %v9150_v34  ;;  %vm1792_vm2 = vweird.f32 %v9167_v38  ;;  %v1126_v7 = vmax.f32 %v1062_v30, 0.0 }
 0x4bd   :  { %v1788_v61 = vmul.f32 0.5, %v1787_v16  ;;  %v4182_v3 = vsel %vm4181_vm1, %v5348_v52, %v4178_v49  ;;  %v4252_v53 = vmul.f32 %v4251_v6, %v9095_v26  ;;  %v4275_v48 = vmul.f32 %v4274_v29, %v9169_v25  ;;  %vm1793_vm6 = vmor %vm1791_vm0, %vm1792_vm2  ;;  %v10144_v29 = vld [vmem:[#allocation54_spill] sm:$0xff] }
 0x4be   :  { %v4286_v55 = vmul.f32 %v4285_v46, %v9169_v25  ;;  %v4187_v20 = vsel %vm9158_vm14, %v4186_v56, %v4182_v3  ;;  %v4216_v45 = vsub.f32 1.0, %v4215_v5  ;;  %v4241_v31 = vmul.f32 %v4240_v2, %v9095_v26  ;;  %v10142_v2 = vld [vmem:[#allocation48_spill] sm:$0xff] }
 0x4bf   :  { %v1789_v32 = vsub.f32 1.5, %v1788_v61  ;;  %v4188_v54 = vmul.f32 %v4187_v20, %v4163_v47  ;;  %v9194_v50 = vadd.f32 1.0, %v4252_v53  ;;  %v4276_v18 = vadd.f32 0.0036580483, %v4275_v48  ;;  %v10145_v3 = vld [vmem:[#allocation28_spill] sm:$0xff] }
 0x4c0   :  { %v4287_v36 = vadd.f32 0.014752088, %v4286_v55  ;;  %v4217_v0 = vmul.f32 %v5352_v13, %v4216_v45  ;;  %vm4220_vm3 = vweird.f32 %v5352_v13  ;;  %v9197_v15 = vadd.f32 1e-06, %v1126_v7 }
 0x4c1   :  { %v1790_v52 = vmul.f32 %v9167_v38, %v1789_v32  ;;  %v5113_v51 = vclamps-f32 %v4188_v54, 1.0  ;;  %vm4219_vm4 = vweird.f32 %v9150_v34  ;;  %vm9200_vm5 = vcmp.eq.f32.partialorder %v4223_v19, 8.507059e+37 }
 0x4c2   :  { %5353 = vrcp.f32 %v9194_v50  ;;  %v4218_v26 = vadd.f32 %v5352_v13, %v4217_v0  ;;  %v4226_v47 = vor.u32 1.1754944e-38, %v4225_v22  ;;  %v4277_v56 = vmul.f32 %v4276_v18, %v9169_v25  ;;  %vm4221_vm7 = vmor %vm4219_vm4, %vm4220_vm3  ;;  %v10141_v22 = vld [vmem:[#allocation9_spill] sm:$0xff] }
 0x4c3   :  { %v4288_v11 = vmul.f32 %v4287_v36, %v9169_v25  ;;  %v4839_v58 = vadd.f32 1.0, %v5113_v51  ;;  %v4242_v34 = vadd.f32 1.1283791, %v4241_v31  ;;  %v1794_v1 = vsel %vm1793_vm6, %v9167_v38, %v1790_v52 }
 0x4c4   :  { %5355 = vrsqrt.f32 %v9197_v15  ;;  %v4222_v30 = vsel %vm4221_vm7, %v5352_v13, %v4218_v26  ;;  %v4263_v28 = vand.u32 2147483647, %v9194_v50  ;;  %v4278_v10 = vadd.f32 0.05243302, %v4277_v56 }
 0x4c5   :  { %v4289_v42 = vadd.f32 0.112945676, %v4288_v11  ;;  %v4903_v35 = vmul.f32 %v4839_v58, %v9147_v21  ;;  %v4227_v19 = vsel %vm9200_vm5, %v4226_v47, %v4222_v30  ;;  %v4265_v14 = vand.u32 2147483648, %v9194_v50 }
 0x4c6   :  { %v10143_v16 = vsub.f32 %v10141_v22, %v10142_v2  ;;  %v4228_v6 = vmul.f32 %v4227_v19, %v4203_v39  ;;  %v4279_v38 = vmul.f32 %v4278_v10, %v9169_v25  ;;  %v1063_v46 = vsub.f32 %v9163_v24, %v10144_v29  ;;  %v866_v24 = vpop.xlane.xlu0 %865 }
 0x4c7   :  { %v4290_v13 = vmul.f32 %v4289_v42, %v9169_v25  ;;  %4967 = vst [vmem:[#allocation2 + $0x180] sm:$0xff] %v4903_v35  ;;  %v2152_v21 = vmul.f32 0.5, %v9021_v40  ;;  %v4243_v61 = vmul.f32 %v4242_v34, %v9082_v37  ;;  %v1064_v53 = vsub.f32 %v9165_v4, %v10145_v3  ;;  %v10148_v42 = vld [vmem:[#allocation58_spill] sm:$0xff] }
 0x4c8   :  { %v1957_v49 = vmul.f32 %v1794_v1, %v10143_v16  ;;  %v5354_v5 = vpop.eup %5353  ;;  %v5114_v48 = vclamps-f32 %v4228_v6, 1.0  ;;  %vm4259_vm8 = vweird.f32 %v9194_v50  ;;  %vm9232_vm9 = vcmp.eq.f32.partialorder %v4263_v28, 8.507059e+37 }
 0x4c9   :  { %v4255_v39 = vmul.f32 %v5354_v5, %v9194_v50  ;;  %v4280_v45 = vadd.f32 0.18741608, %v4279_v38  ;;  %v4291_v40 = vadd.f32 0.4994258, %v4290_v13  ;;  %v1127_v31 = vmax.f32 %v1063_v46, 0.0 }
 0x4ca   :  { %v2024_v7 = vmul.f32 %v8968_v41, %v1957_v49  ;;  %v5356_v20 = vpop.eup %5355  ;;  %v4840_v32 = vadd.f32 1.0, %v5114_v48  ;;  %v4266_v4 = vor.u32 1.1754944e-38, %v4265_v14  ;;  %v1128_v52 = vmax.f32 %v1064_v53, 0.0 }
 0x4cb   :  { %v4256_v54 = vsub.f32 1.0, %v4255_v39  ;;  %v1796_v18 = vmul.f32 %v5356_v20, %v9197_v15  ;;  %v4292_v36 = vmul.f32 %v4291_v40, %v9169_v25  ;;  %v937_v51 = vmul.f32 0.0078125, %v866_v24  ;;  %v10150_v24 = vld [vmem:[#allocation11_spill] sm:$0xff] }
 0x4cc   :  { %v9237_v37 = vadd.f32 %v8985_v44, %v2024_v7  ;;  %v4904_v26 = vmul.f32 %v4840_v32, %v2152_v21  ;;  %vm4260_vm10 = vweird.f32 %v5354_v5  ;;  %v4281_v11 = vmul.f32 %v4280_v45, %v9169_v25  ;;  %v10149_v21 = vld [vmem:[#allocation59_spill] sm:$0xff] }
 0x4cd   :  { %v4257_v47 = vmul.f32 %v5354_v5, %v4256_v54  ;;  %v1797_v56 = vmul.f32 %v5356_v20, %v1796_v18  ;;  %v9245_v58 = vadd.f32 1.0, %v4292_v36  ;;  %v9249_v1 = vadd.f32 1e-06, %v1127_v31  ;;  %vm4261_vm12 = vmor %vm4259_vm8, %vm4260_vm10 }
 0x4ce   :  { %v9242_v0 = vmul.f32 0.70710677, %v9237_v37  ;;  %4968 = vst [vmem:[#allocation2 + $0x188] sm:$0xff] %v4904_v26  ;;  %vm1801_vm11 = vweird.f32 %v9197_v15  ;;  %v938_v10 = vmul.f32 0.0078125, %v868_v63  ;;  %vm1802_vm13 = vweird.f32 %v5356_v20 }
 0x4cf   :  { %v4258_v30 = vadd.f32 %v5354_v5, %v4257_v47  ;;  %v1798_v28 = vmul.f32 0.5, %v1797_v56  ;;  %5357 = vrcp.f32 %v9245_v58  ;;  %v9255_v25 = vadd.f32 1e-06, %v1128_v52  ;;  %vm1803_vm14 = vmor %vm1801_vm11, %vm1802_vm13 }
 0x4d0   :  { %v4311_v34 = vmul.f32 %v9242_v0, %v9242_v0  ;;  %v1065_v35 = vsub.f32 %v937_v51, %v10148_v42  ;;  %5359 = vrsqrt.f32 %v9249_v1  ;;  %v4282_v16 = vadd.f32 1.1283791, %v4281_v11 }
 0x4d1   :  { %v4262_v19 = vsel %vm4261_vm12, %v5354_v5, %v4258_v30  ;;  %v1799_v22 = vsub.f32 1.5, %v1798_v28  ;;  %v4303_v50 = vand.u32 2147483647, %v9245_v58  ;;  %v4305_v49 = vand.u32 2147483648, %v9245_v58 }
 0x4d2   :  { %v9258_v14 = vmin.f32 %v4311_v34, 16.0  ;;  %v4267_v2 = vsel %vm9232_vm9, %v4266_v4, %v4262_v19  ;;  %v2153_v46 = vmul.f32 0.5, %v9076_v9  ;;  %5361 = vrsqrt.f32 %v9255_v25  ;;  %v10151_v9 = vld [vmem:[#allocation51_spill] sm:$0xff]  ;;  %v10155_v4 = vld [vmem:[#allocation12_spill] sm:$0xff] }
 0x4d3   :  { %v4268_v6 = vmul.f32 %v4267_v2, %v4243_v61  ;;  %v1800_v29 = vmul.f32 %v5356_v20, %v1799_v22  ;;  %v1129_v5 = vmax.f32 %v1065_v35, 0.0  ;;  %v1066_v7 = vsub.f32 %v938_v10, %v10149_v21 }
 0x4d4   :  { %v4313_v38 = vmul.f32 2.1237322e-06, %v9258_v14  ;;  %v4324_v13 = vmul.f32 3.8918573e-05, %v9258_v14  ;;  %v4283_v55 = vmul.f32 %v4282_v16, %v9144_v23  ;;  %vm4299_vm15 = vweird.f32 %v9245_v58 }
 0x4d5   :  { %v5115_v3 = vclamps-f32 %v4268_v6, 1.0  ;;  %v1804_v61 = vsel %vm1803_vm14, %v5356_v20, %v1800_v29  ;;  %v5358_v39 = vpop.eup %5357  ;;  %v10152_v45 = vsub.f32 %v10150_v24, %v10151_v9  ;;  %v9278_v15 = vadd.f32 1e-06, %v1129_v5 }
 0x4d6   :  { %v4314_v53 = vadd.f32 0.00028619796, %v4313_v38  ;;  %v4325_v48 = vadd.f32 0.001143296, %v4324_v13  ;;  %v5360_v31 = vpop.eup %5359  ;;  %v4295_v54 = vmul.f32 %v5358_v39, %v9245_v58  ;;  %vm9281_vm0 = vcmp.eq.f32.partialorder %v4303_v50, 8.507059e+37 }
 0x4d7   :  { %v1958_v40 = vmul.f32 %v1804_v61, %v10152_v45  ;;  %v4841_v32 = vadd.f32 1.0, %v5115_v3  ;;  %v4306_v20 = vor.u32 1.1754944e-38, %v4305_v49  ;;  %v1806_v52 = vmul.f32 %v5360_v31, %v9249_v1 }
 0x4d8   :  { %v4315_v18 = vmul.f32 %v4314_v53, %v9258_v14  ;;  %v4326_v23 = vmul.f32 %v4325_v48, %v9258_v14  ;;  %v1130_v51 = vmax.f32 %v1066_v7, 0.0  ;;  %v4296_v26 = vsub.f32 1.0, %v4295_v54  ;;  %v5362_v56 = vpop.eup %5361 }
 0x4d9   :  { %v2025_v36 = vmul.f32 %v8968_v41, %v1958_v40  ;;  %v4905_v63 = vmul.f32 %v4841_v32, %v2153_v46  ;;  %5363 = vrsqrt.f32 %v9278_v15  ;;  %v1807_v30 = vmul.f32 %v5360_v31, %v1806_v52 }
 0x4da   :  { %v4316_v47 = vadd.f32 0.0036580483, %v4315_v18  ;;  %v4327_v11 = vadd.f32 0.014752088, %v4326_v23  ;;  %vm1811_vm1 = vweird.f32 %v9249_v1  ;;  %v4297_v28 = vmul.f32 %v5358_v39, %v4296_v26 }
 0x4db   :  { %v9291_v34 = vadd.f32 %v8985_v44, %v2025_v36  ;;  %4969 = vst [vmem:[#allocation2 + $0x190] sm:$0xff] %v4905_v63  ;;  %vm4300_vm2 = vweird.f32 %v5358_v39  ;;  %v1816_v42 = vmul.f32 %v5362_v56, %v9255_v25  ;;  %v1808_v22 = vmul.f32 0.5, %v1807_v30 }
 0x4dc   :  { %v4317_v10 = vmul.f32 %v4316_v47, %v9258_v14  ;;  %v4328_v35 = vmul.f32 %v4327_v11, %v9258_v14  ;;  %vm1821_vm3 = vweird.f32 %v9255_v25  ;;  %v4298_v2 = vadd.f32 %v5358_v39, %v4297_v28  ;;  %vm4301_vm4 = vmor %vm4299_vm15, %vm4300_vm2 }
 0x4dd   :  { %v9298_v19 = vmul.f32 0.70710677, %v9291_v34  ;;  %v1817_v50 = vmul.f32 %v5362_v56, %v1816_v42  ;;  %v9301_v49 = vadd.f32 1e-06, %v1130_v51  ;;  %v1809_v13 = vsub.f32 1.5, %v1808_v22  ;;  %v10159_v42 = vld [vmem:[#allocation55_spill] sm:$0xff] }
 0x4de   :  { %v4318_v16 = vadd.f32 0.05243302, %v4317_v10  ;;  %v4329_v6 = vadd.f32 0.112945676, %v4328_v35  ;;  %vm1812_vm5 = vweird.f32 %v5360_v31  ;;  %v4302_v46 = vsel %vm4301_vm4, %v5358_v39, %v4298_v2  ;;  %v10158_v10 = vld [vmem:[#allocation16_spill] sm:$0xff] }
 0x4df   :  { %v4351_v38 = vmul.f32 %v9298_v19, %v9298_v19  ;;  %v9307_v29 = vpop.eup %5363  ;;  %v1818_v21 = vmul.f32 0.5, %v1817_v50  ;;  %vm1822_vm6 = vweird.f32 %v5362_v56  ;;  %v4307_v7 = vsel %vm9281_vm0, %v4306_v20, %v4302_v46  ;;  %vm1813_vm7 = vmor %vm1811_vm1, %vm1812_vm5  ;;  %v10156_v20 = vld [vmem:[#allocation39_spill] sm:$0xff]  ;;  %v10161_v2 = vld [vmem:[#allocation36_spill] sm:$0xff] }
 0x4e0   :  { %v4319_v5 = vmul.f32 %v4318_v16, %v9258_v14  ;;  %v4330_v3 = vmul.f32 %v4329_v6, %v9258_v14  ;;  %v1810_v53 = vmul.f32 %v5360_v31, %v1809_v13  ;;  %v4308_v48 = vmul.f32 %v4307_v7, %v4283_v55  ;;  %vm1823_vm8 = vmor %vm1821_vm3, %vm1822_vm6  ;;  %v870_v6 = vpop.xlane.xlu2 %869 }
 0x4e1   :  { %v9313_v58 = vmin.f32 %v4351_v38, 16.0  ;;  %v1819_v61 = vsub.f32 1.5, %v1818_v21  ;;  %v1826_v39 = vmul.f32 %v9307_v29, %v9278_v15  ;;  %5365 = vrsqrt.f32 %v9301_v49 }
 0x4e2   :  { %v4331_v24 = vadd.f32 0.4994258, %v4330_v3  ;;  %v1814_v40 = vsel %vm1813_vm7, %v5360_v31, %v1810_v53  ;;  %v5116_v32 = vclamps-f32 %v4308_v48, 1.0  ;;  %v4320_v54 = vadd.f32 0.18741608, %v4319_v5 }
 0x4e3   :  { %v4353_v9 = vmul.f32 2.1237322e-06, %v9313_v58  ;;  %v4364_v45 = vmul.f32 3.8918573e-05, %v9313_v58  ;;  %v10157_v55 = vsub.f32 %v10155_v4, %v10156_v20  ;;  %v1820_v1 = vmul.f32 %v5362_v56, %v1819_v61 }
 0x4e4   :  { %v4332_v23 = vmul.f32 %v4331_v24, %v9258_v14  ;;  %v1827_v51 = vmul.f32 %v9307_v29, %v1826_v39  ;;  %v2154_v63 = vmul.f32 0.5, %v9134_v8  ;;  %v4842_v31 = vadd.f32 1.0, %v5116_v32 }
 0x4e5   :  { %v1959_v18 = vmul.f32 %v1814_v40, %v10157_v55  ;;  %v4354_v36 = vadd.f32 0.00028619796, %v4353_v9  ;;  %v4365_v52 = vadd.f32 0.001143296, %v4364_v45  ;;  %v1824_v47 = vsel %vm1823_vm8, %v5362_v56, %v1820_v1 }
 0x4e6   :  { %v9332_v11 = vadd.f32 1.0, %v4332_v23  ;;  %v10160_v35 = vsub.f32 %v10158_v10, %v10159_v42  ;;  %v1198_v16 = vsub.f32 %v10161_v2, %v8753_v60  ;;  %v4906_v8 = vmul.f32 %v4842_v31, %v2154_v63 }
 0x4e7   :  { %v2026_v26 = vmul.f32 %v8968_v41, %v1959_v18  ;;  %v4355_v30 = vmul.f32 %v4354_v36, %v9313_v58  ;;  %v4366_v28 = vmul.f32 %v4365_v52, %v9313_v58  ;;  %v9339_v25 = vpop.eup %5365  ;;  %v1828_v56 = vmul.f32 0.5, %v1827_v51 }
 0x4e8   :  { %v1960_v22 = vmul.f32 %v1824_v47, %v10160_v35  ;;  %v9348_v38 = vmul.f32 %v9140_v43, %v9140_v43  ;;  %v9351_v13 = vmul.f32 0.0078125, %v7931_v12  ;;  %v4321_v46 = vmul.f32 %v4320_v54, %v9258_v14  ;;  %4970 = vst [vmem:[#allocation2 + $0x198] sm:$0xff] %v4906_v8  ;;  %v10163_v47 = vld [vmem:[#allocation17_spill] sm:$0xff] }
 0x4e9   :  { %v9344_v50 = vadd.f32 %v8985_v44, %v2026_v26  ;;  %5367 = vrcp.f32 %v9332_v11  ;;  %v9356_v5 = vmul.f32 0.5, %v9237_v37  ;;  %v4356_v21 = vadd.f32 0.0036580483, %v4355_v30  ;;  %v10162_v26 = vld [vmem:[#allocation21_spill] sm:$0xff] }
 0x4ea   :  { %v4367_v7 = vadd.f32 0.014752088, %v4366_v28  ;;  %v2027_v3 = vmul.f32 %v8968_v41, %v1960_v22  ;;  %v1829_v48 = vsub.f32 1.5, %v1828_v56  ;;  %vm1831_vm9 = vweird.f32 %v9278_v15 }
 0x4eb   :  { %v9360_v53 = vmul.f32 0.70710677, %v9344_v50  ;;  %v9363_v12 = vmul.f32 0.0078125, %v870_v6  ;;  %v4357_v14 = vmul.f32 %v4356_v21, %v9313_v58  ;;  %vm1832_vm10 = vweird.f32 %v9307_v29 }
 0x4ec   :  { %v4368_v61 = vmul.f32 %v4367_v7, %v9313_v58  ;;  %v9368_v39 = vadd.f32 %v8985_v44, %v2027_v3  ;;  %v4322_v37 = vadd.f32 1.1283791, %v4321_v46  ;;  %v1830_v9 = vmul.f32 %v9307_v29, %v1829_v48  ;;  %vm1833_vm12 = vmor %vm1831_vm9, %vm1832_vm10 }
 0x4ed   :  { %v4391_v24 = vmul.f32 %v9360_v53, %v9360_v53  ;;  %v1836_v15 = vmul.f32 %v9339_v25, %v9301_v49  ;;  %vm4339_vm11 = vweird.f32 %v9332_v11  ;;  %v4345_v45 = vand.u32 2147483648, %v9332_v11 }
 0x4ee   :  { %v4358_v40 = vadd.f32 0.05243302, %v4357_v14  ;;  %v4369_v32 = vadd.f32 0.112945676, %v4368_v61  ;;  %v9381_v20 = vmul.f32 0.70710677, %v9368_v39  ;;  %v1834_v55 = vsel %vm1833_vm12, %v9307_v29, %v1830_v9 }
 0x4ef   :  { %v5368_v54 = vpop.eup %5367  ;;  %v9378_v4 = vmin.f32 %v4391_v24, 16.0  ;;  %v1837_v18 = vmul.f32 %v9339_v25, %v1836_v15  ;;  %v4343_v23 = vand.u32 2147483647, %v9332_v11  ;;  %v10164_v29 = vsub.f32 %v10162_v26, %v10163_v47 }
 0x4f0   :  { %v4335_v1 = vmul.f32 %v5368_v54, %v9332_v11  ;;  %v4359_v36 = vmul.f32 %v4358_v40, %v9313_v58  ;;  %v4370_v52 = vmul.f32 %v4369_v32, %v9313_v58  ;;  %v4431_v31 = vmul.f32 %v9381_v20, %v9381_v20 }
 0x4f1   :  { %v4393_v51 = vmul.f32 2.1237322e-06, %v9378_v4  ;;  %v4404_v63 = vmul.f32 3.8918573e-05, %v9378_v4  ;;  %v1961_v30 = vmul.f32 %v1834_v55, %v10164_v29  ;;  %v1838_v35 = vmul.f32 0.5, %v1837_v18  ;;  %v10165_v55 = vld [vmem:[#allocation30_spill] sm:$0xff] }
 0x4f2   :  { %v4336_v28 = vsub.f32 1.0, %v4335_v1  ;;  %v4360_v10 = vadd.f32 0.18741608, %v4359_v36  ;;  %v4371_v42 = vadd.f32 0.4994258, %v4370_v52  ;;  %v4346_v22 = vor.u32 1.1754944e-38, %v4345_v45 }
 0x4f3   :  { %v4394_v8 = vadd.f32 0.00028619796, %v4393_v51  ;;  %v4405_v56 = vadd.f32 0.001143296, %v4404_v63  ;;  %v9396_v6 = vmin.f32 %v4431_v31, 16.0  ;;  %vm4340_vm13 = vweird.f32 %v5368_v54 }
 0x4f4   :  { %v4337_v46 = vmul.f32 %v5368_v54, %v4336_v28  ;;  %v4372_v21 = vmul.f32 %v4371_v42, %v9313_v58  ;;  %v2028_v7 = vmul.f32 %v8968_v41, %v1961_v30  ;;  %v4361_v3 = vmul.f32 %v4360_v10, %v9313_v58  ;;  %vm4341_vm14 = vmor %vm4339_vm11, %vm4340_vm13 }
 0x4f5   :  { %v4395_v48 = vmul.f32 %v4394_v8, %v9378_v4  ;;  %v4406_v14 = vmul.f32 %v4405_v56, %v9378_v4  ;;  %v4433_v61 = vmul.f32 2.1237322e-06, %v9396_v6  ;;  %v4444_v15 = vmul.f32 3.8918573e-05, %v9396_v6 }
 0x4f6   :  { %v4338_v24 = vadd.f32 %v5368_v54, %v4337_v46  ;;  %v9404_v9 = vadd.f32 1.0, %v4372_v21  ;;  %v1839_v45 = vsub.f32 1.5, %v1838_v35  ;;  %v1067_v58 = vsub.f32 %v9363_v12, %v10165_v55 }
 0x4f7   :  { %v4396_v40 = vadd.f32 0.0036580483, %v4395_v48  ;;  %v4407_v32 = vadd.f32 0.014752088, %v4406_v14  ;;  %v4434_v41 = vadd.f32 0.00028619796, %v4433_v61  ;;  %v4323_v18 = vmul.f32 %v4322_v37, %v9242_v0 }
 0x4f8   :  { %v4342_v1 = vsel %vm4341_vm14, %v5368_v54, %v4338_v24  ;;  %vm4344_vm15 = vcmp.eq.f32.partialorder %v4343_v23, 8.507059e+37  ;;  %5369 = vrcp.f32 %v9404_v9  ;;  %v4362_v52 = vadd.f32 1.1283791, %v4361_v3 }
 0x4f9   :  { %v4347_v36 = vsel %vm4344_vm15, %v4346_v22, %v4342_v1  ;;  %v4397_v51 = vmul.f32 %v4396_v40, %v9378_v4  ;;  %v9415_v63 = vadd.f32 %v8985_v44, %v2028_v7  ;;  %v4408_v31 = vmul.f32 %v4407_v32, %v9378_v4  ;;  %v10169_v1 = vld [vmem:[#allocation56_spill] sm:$0xff] }
 0x4fa   :  { %v4348_v11 = vmul.f32 %v4347_v36, %v4323_v18  ;;  %v4435_v26 = vmul.f32 %v4434_v41, %v9396_v6  ;;  %v4445_v47 = vadd.f32 0.001143296, %v4444_v15  ;;  %v1840_v0 = vmul.f32 %v9339_v25, %v1839_v45  ;;  %v10168_v18 = vld [vmem:[#allocation24_spill] sm:$0xff] }
 0x4fb   :  { %v4398_v12 = vadd.f32 0.05243302, %v4397_v51  ;;  %vm1841_vm0 = vweird.f32 %v9301_v49  ;;  %vm1842_vm1 = vweird.f32 %v9339_v25  ;;  %v4409_v54 = vadd.f32 0.112945676, %v4408_v31 }
 0x4fc   :  { %v5117_v37 = vclamps-f32 %v4348_v11, 1.0  ;;  %v4436_v23 = vadd.f32 0.0036580483, %v4435_v26  ;;  %v4446_v29 = vmul.f32 %v4445_v47, %v9396_v6  ;;  %v4363_v44 = vmul.f32 %v4362_v52, %v9298_v19  ;;  %vm9433_vm2 = vmor %vm1841_vm0, %vm1842_vm1 }
 0x4fd   :  { %v4383_v30 = vand.u32 2147483647, %v9404_v9  ;;  %v4399_v28 = vmul.f32 %v4398_v12, %v9378_v4  ;;  %v9427_v10 = vmul.f32 0.70710677, %v9415_v63  ;;  %v4410_v22 = vmul.f32 %v4409_v54, %v9378_v4  ;;  %v9464_v54 = vld [vmem:[%s9828_s3] ss:$0 sm:$0xff] }
 0x4fe   :  { %v5370_v42 = vpop.eup %5369  ;;  %v4843_v35 = vadd.f32 1.0, %v5117_v37  ;;  %v4437_v8 = vmul.f32 %v4436_v23, %v9396_v6  ;;  %v4447_v56 = vadd.f32 0.014752088, %v4446_v29  ;;  %v4385_v21 = vand.u32 2147483648, %v9404_v9 }
 0x4ff   :  { %v4375_v19 = vmul.f32 %v5370_v42, %v9404_v9  ;;  %v4471_v7 = vmul.f32 %v9427_v10, %v9427_v10  ;;  %v1844_v3 = vsel %vm9433_vm2, %v9339_v25, %v1840_v0  ;;  %v4411_v14 = vadd.f32 0.4994258, %v4410_v22 }
 0x500   :  { %v4907_v48 = vmul.f32 %v4843_v35, %v9356_v5  ;;  %v4438_v61 = vadd.f32 0.05243302, %v4437_v8  ;;  %v4448_v49 = vmul.f32 %v4447_v56, %v9396_v6  ;;  %v4400_v15 = vadd.f32 0.18741608, %v4399_v28 }
 0x501   :  { %v4376_v24 = vsub.f32 1.0, %v4375_v19  ;;  %v9446_v45 = vmin.f32 %v4471_v7, 16.0  ;;  %v1131_v40 = vmax.f32 %v1067_v58, 0.0  ;;  %v4412_v32 = vmul.f32 %v4411_v14, %v9378_v4 }
 0x502   :  { %4971 = vst [vmem:[#allocation2 + $0x1a0] sm:$0xff] %v4907_v48  ;;  %v4439_v41 = vmul.f32 %v4438_v61, %v9396_v6  ;;  %v4449_v55 = vadd.f32 0.112945676, %v4448_v49  ;;  %v10170_v25 = vsub.f32 %v10168_v18, %v10169_v1  ;;  %vm4380_vm3 = vweird.f32 %v5370_v42  ;;  %v9481_v48 = vld [vmem:[%s9829_s4] ss:$0 sm:$0xff]  ;;  %s5445_s4 = smov [#allocation2]  }
 0x503   :  { %v4377_v5 = vmul.f32 %v5370_v42, %v4376_v24  ;;  %v4473_v52 = vmul.f32 2.1237322e-06, %v9446_v45  ;;  %v4484_v51 = vmul.f32 3.8918573e-05, %v9446_v45  ;;  %vm4379_vm4 = vweird.f32 %v9404_v9  ;;  %s4987_s7 = sshll.u32 %s5445_s4, 4  ;;  %s4988_s7 = int_to_ptr.vmem [resolvable:$true] %s4987_s7 }
 0x504   :  { %v1962_v36 = vmul.f32 %v1844_v3, %v10170_v25  ;;  %v4386_v11 = vor.u32 1.1754944e-38, %v4385_v21  ;;  %v9456_v58 = vadd.f32 1.0, %v4412_v32  ;;  %v4450_v31 = vmul.f32 %v4449_v55, %v9396_v6  ;;  %vm4381_vm5 = vmor %vm4379_vm4, %vm4380_vm3  ;;  %v872_v3 = vpop.xlane.xlu0 %871 }
 0x505   :  { %v4378_v26 = vadd.f32 %v5370_v42, %v4377_v5  ;;  %v4401_v47 = vmul.f32 %v4400_v15, %v9378_v4  ;;  %v4474_v12 = vadd.f32 0.00028619796, %v4473_v52  ;;  %v4485_v0 = vadd.f32 0.001143296, %v4484_v51 }
 0x506   :  { %5371 = vrcp.f32 %v9456_v58  ;;  %v4440_v37 = vadd.f32 0.18741608, %v4439_v41  ;;  %v2029_v9 = vmul.f32 %v9464_v54, %v1962_v36  ;;  %v9467_v23 = vadd.f32 1e-06, %v1131_v40 }
 0x507   :  { %v4382_v29 = vsel %vm4381_vm5, %v5370_v42, %v4378_v26  ;;  %vm4384_vm6 = vcmp.eq.f32.partialorder %v4383_v30, 8.507059e+37  ;;  %v4451_v28 = vadd.f32 0.4994258, %v4450_v31  ;;  %v4475_v4 = vmul.f32 %v4474_v12, %v9446_v45 }
 0x508   :  { %v9472_v35 = vmul.f32 %v9351_v13, %v9351_v13  ;;  %v2156_v22 = vmul.f32 0.5, %v9291_v34  ;;  %v4387_v8 = vsel %vm4384_vm6, %v4386_v11, %v4382_v29  ;;  %v4486_v56 = vmul.f32 %v4485_v0, %v9446_v45 }
 0x509   :  { %v4388_v46 = vmul.f32 %v4387_v8, %v4363_v44  ;;  %v4402_v19 = vadd.f32 1.1283791, %v4401_v47  ;;  %v4452_v21 = vmul.f32 %v4451_v28, %v9396_v6  ;;  %v4476_v7 = vadd.f32 0.0036580483, %v4475_v4 }
 0x50a   :  { %v4441_v30 = vmul.f32 %v4440_v37, %v9396_v6  ;;  %v4487_v42 = vadd.f32 0.014752088, %v4486_v56  ;;  %v9484_v14 = vadd.f32 %v9481_v48, %v2029_v9  ;;  %5373 = vrsqrt.f32 %v9467_v23 }
 0x50b   :  { %v5118_v34 = vclamps-f32 %v4388_v46, 1.0  ;;  %v4423_v44 = vand.u32 2147483647, %v9456_v58  ;;  %v9488_v61 = vadd.f32 1.0, %v4452_v21  ;;  %v4477_v49 = vmul.f32 %v4476_v7, %v9446_v45 }
 0x50c   :  { %v5372_v24 = vpop.eup %5371  ;;  %v4425_v6 = vand.u32 2147483648, %v9456_v58  ;;  %v4488_v15 = vmul.f32 %v4487_v42, %v9446_v45  ;;  %v9494_v40 = vmul.f32 0.70710677, %v9484_v14  ;;  %v940_v32 = vmul.f32 0.0078125, %v872_v3 }
 0x50d   :  { %v4844_v41 = vadd.f32 1.0, %v5118_v34  ;;  %v9497_v55 = vmul.f32 0.5, %v9344_v50  ;;  %v4415_v18 = vmul.f32 %v5372_v24, %v9456_v58  ;;  %5375 = vrcp.f32 %v9488_v61 }
 0x50e   :  { %v4403_v1 = vmul.f32 %v4402_v19, %v9360_v53  ;;  %vm4419_vm7 = vweird.f32 %v9456_v58  ;;  %v4442_v25 = vadd.f32 1.1283791, %v4441_v30  ;;  %v4478_v36 = vadd.f32 0.05243302, %v4477_v49 }
 0x50f   :  { %v4908_v5 = vmul.f32 %v4844_v41, %v2156_v22  ;;  %v4416_v52 = vsub.f32 1.0, %v4415_v18  ;;  %v4489_v51 = vadd.f32 0.112945676, %v4488_v15  ;;  %v4511_v11 = vmul.f32 %v9494_v40, %v9494_v40  ;;  %v874_v18 = vpop.xlane.xlu1 %873 }
 0x510   :  { %v9505_v31 = vpop.eup %5373  ;;  %vm4420_vm8 = vweird.f32 %v5372_v24  ;;  %vm9507_vm9 = vcmp.eq.f32.partialorder %v4423_v44, 8.507059e+37  ;;  %v4426_v26 = vor.u32 1.1754944e-38, %v4425_v6  ;;  %v1068_v53 = vsub.f32 %v940_v32, %v7966_v17 }
 0x511   :  { %4972 = vst [vmem:[#allocation2 + $0x1a8] sm:$0xff] %v4908_v5  ;;  %v4417_v47 = vmul.f32 %v5372_v24, %v4416_v52  ;;  %v4490_v12 = vmul.f32 %v4489_v51, %v9446_v45  ;;  %v9513_v0 = vmin.f32 %v4511_v11, 16.0  ;;  %v1846_v37 = vmul.f32 %v9505_v31, %v9467_v23  ;;  %vm4421_vm12 = vmor %vm4419_vm7, %vm4420_vm8 }
 0x512   :  { %v4443_v9 = vmul.f32 %v4442_v25, %v9381_v20  ;;  %vm4459_vm10 = vweird.f32 %v9488_v61  ;;  %v4463_v29 = vand.u32 2147483647, %v9488_v61  ;;  %v4479_v28 = vmul.f32 %v4478_v36, %v9446_v45 }
 0x513   :  { %v5376_v4 = vpop.eup %5375  ;;  %v4418_v22 = vadd.f32 %v5372_v24, %v4417_v47  ;;  %v4491_v17 = vadd.f32 0.4994258, %v4490_v12  ;;  %v4513_v8 = vmul.f32 2.1237322e-06, %v9513_v0  ;;  %v4524_v56 = vmul.f32 3.8918573e-05, %v9513_v0 }
 0x514   :  { %vm1851_vm11 = vweird.f32 %v9467_v23  ;;  %v4455_v20 = vmul.f32 %v5376_v4, %v9488_v61  ;;  %v4465_v46 = vand.u32 2147483648, %v9488_v61  ;;  %v1847_v19 = vmul.f32 %v9505_v31, %v1846_v37 }
 0x515   :  { %v1132_v21 = vmax.f32 %v1068_v53, 0.0  ;;  %v4422_v7 = vsel %vm4421_vm12, %v5372_v24, %v4418_v22  ;;  %v4492_v3 = vmul.f32 %v4491_v17, %v9446_v45  ;;  %v4514_v30 = vadd.f32 0.00028619796, %v4513_v8  ;;  %v876_v22 = vpop.xlane.xlu2 %875 }
 0x516   :  { %v4525_v42 = vadd.f32 0.001143296, %v4524_v56  ;;  %v4427_v34 = vsel %vm9507_vm9, %v4426_v26, %v4422_v7  ;;  %v4456_v44 = vsub.f32 1.0, %v4455_v20  ;;  %v4480_v49 = vadd.f32 0.18741608, %v4479_v28  ;;  %v878_v7 = vpop.xlane.xlu0 %877 }
 0x517   :  { %v1848_v6 = vmul.f32 0.5, %v1847_v19  ;;  %v4428_v58 = vmul.f32 %v4427_v34, %v4403_v1  ;;  %v9533_v15 = vadd.f32 1.0, %v4492_v3  ;;  %v4515_v32 = vmul.f32 %v4514_v30, %v9513_v0 }
 0x518   :  { %v4526_v41 = vmul.f32 %v4525_v42, %v9513_v0  ;;  %v4457_v25 = vmul.f32 %v5376_v4, %v4456_v44  ;;  %vm4460_vm13 = vweird.f32 %v5376_v4  ;;  %v9537_v36 = vadd.f32 1e-06, %v1132_v21 }
 0x519   :  { %v1849_v24 = vsub.f32 1.5, %v1848_v6  ;;  %v5119_v5 = vclamps-f32 %v4428_v58, 1.0  ;;  %v4466_v52 = vor.u32 1.1754944e-38, %v4465_v46  ;;  %5377 = vrcp.f32 %v9533_v15  ;;  %vm4461_vm15 = vmor %vm4459_vm10, %vm4460_vm13 }
 0x51a   :  { %vm1852_vm14 = vweird.f32 %v9505_v31  ;;  %v4458_v51 = vadd.f32 %v5376_v4, %v4457_v25  ;;  %v4516_v1 = vadd.f32 0.0036580483, %v4515_v32  ;;  %v4527_v11 = vadd.f32 0.014752088, %v4526_v41 }
 0x51b   :  { %v941_v50 = vmul.f32 0.0078125, %v874_v18  ;;  %v4845_v26 = vadd.f32 1.0, %v5119_v5  ;;  %v4481_v53 = vmul.f32 %v4480_v49, %v9446_v45  ;;  %v1850_v47 = vmul.f32 %v9505_v31, %v1849_v24  ;;  %vm1853_vm1 = vmor %vm1851_vm11, %vm1852_vm14 }
 0x51c   :  { %5379 = vrsqrt.f32 %v9537_v36  ;;  %v4462_v12 = vsel %vm4461_vm15, %v5376_v4, %v4458_v51  ;;  %vm4464_vm0 = vcmp.eq.f32.partialorder %v4463_v29, 8.507059e+37  ;;  %v4517_v37 = vmul.f32 %v4516_v1, %v9513_v0  ;;  %v10173_v4 = vld [vmem:[#allocation27_spill] sm:$0xff] }
 0x51d   :  { %v4528_v28 = vmul.f32 %v4527_v11, %v9513_v0  ;;  %v4909_v17 = vmul.f32 %v4845_v26, %v9497_v55  ;;  %v2158_v61 = vmul.f32 0.5, %v9368_v39  ;;  %v4467_v8 = vsel %vm4464_vm0, %v4466_v52, %v4462_v12  ;;  %v10174_v29 = vld [vmem:[#allocation63_spill] sm:$0xff] }
 0x51e   :  { %v1854_v45 = vsel %vm1853_vm1, %v9505_v31, %v1850_v47  ;;  %v4468_v56 = vmul.f32 %v4467_v8, %v4443_v9  ;;  %v4518_v20 = vadd.f32 0.05243302, %v4517_v37  ;;  %v10175_v19 = vsub.f32 %v10173_v4, %v10174_v29 }
 0x51f   :  { %v4529_v46 = vadd.f32 0.112945676, %v4528_v28  ;;  %v5378_v3 = vpop.eup %5377  ;;  %4973 = vst [vmem:[#allocation2 + $0x1b0] sm:$0xff] %v4909_v17  ;;  %v4482_v23 = vadd.f32 1.1283791, %v4481_v53  ;;  %v1069_v55 = vsub.f32 %v941_v50, %v9121_v59  ;;  %v942_v42 = vmul.f32 0.0078125, %v876_v22  ;;  %v880_v28 = vpop.xlane.xlu1 %879 }
 0x520   :  { %v1963_v21 = vmul.f32 %v1854_v45, %v10175_v19  ;;  %v4503_v30 = vand.u32 2147483647, %v9533_v15  ;;  %v5120_v39 = vclamps-f32 %v4468_v56, 1.0  ;;  %v4495_v34 = vmul.f32 %v5378_v3, %v9533_v15 }
 0x521   :  { %v4505_v31 = vand.u32 2147483648, %v9533_v15  ;;  %v4519_v9 = vmul.f32 %v4518_v20, %v9513_v0  ;;  %v4530_v49 = vmul.f32 %v4529_v46, %v9513_v0  ;;  %v1133_v58 = vmax.f32 %v1069_v55, 0.0 }
 0x522   :  { %v9561_v44 = vpop.eup %5379  ;;  %v2030_v6 = vmul.f32 %v9464_v54, %v1963_v21  ;;  %v943_v32 = vmul.f32 0.0078125, %v878_v7  ;;  %v4846_v41 = vadd.f32 1.0, %v5120_v39  ;;  %v4496_v18 = vsub.f32 1.0, %v4495_v34 }
 0x523   :  { %v4520_v25 = vadd.f32 0.18741608, %v4519_v9  ;;  %v1856_v59 = vmul.f32 %v9561_v44, %v9537_v36  ;;  %v4531_v24 = vadd.f32 0.4994258, %v4530_v49  ;;  %v9570_v52 = vadd.f32 1e-06, %v1133_v58 }
 0x524   :  { %v9568_v5 = vadd.f32 %v9481_v48, %v2030_v6  ;;  %v1070_v51 = vsub.f32 %v942_v42, %v9129_v33  ;;  %v4910_v1 = vmul.f32 %v4846_v41, %v2158_v61  ;;  %v4497_v11 = vmul.f32 %v5378_v3, %v4496_v18  ;;  %v10177_v9 = vld [vmem:[#allocation34_spill] sm:$0xff] }
 0x525   :  { %vm4500_vm2 = vweird.f32 %v5378_v3  ;;  %v1857_v50 = vmul.f32 %v9561_v44, %v1856_v59  ;;  %vm4499_vm3 = vweird.f32 %v9533_v15  ;;  %v4532_v26 = vmul.f32 %v4531_v24, %v9513_v0 }
 0x526   :  { %v9577_v53 = vmul.f32 0.70710677, %v9568_v5  ;;  %5381 = vrsqrt.f32 %v9570_v52  ;;  %4974 = vst [vmem:[#allocation2 + $0x1b8] sm:$0xff] %v4910_v1  ;;  %v4498_v47 = vadd.f32 %v5378_v3, %v4497_v11  ;;  %v4506_v12 = vor.u32 1.1754944e-38, %v4505_v31  ;;  %vm4501_vm4 = vmor %vm4499_vm3, %vm4500_vm2  ;;  %v10176_v31 = vld [vmem:[#allocation29_spill] sm:$0xff] }
 0x527   :  { %v4521_v37 = vmul.f32 %v4520_v25, %v9513_v0  ;;  %v1858_v33 = vmul.f32 0.5, %v1857_v50  ;;  %v9581_v22 = vadd.f32 1.0, %v4532_v26  ;;  %v1134_v17 = vmax.f32 %v1070_v51, 0.0 }
 0x528   :  { %v4551_v15 = vmul.f32 %v9577_v53, %v9577_v53  ;;  %v1071_v61 = vsub.f32 %v943_v32, %v9348_v38  ;;  %v4483_v8 = vmul.f32 %v4482_v23, %v9427_v10  ;;  %v4502_v45 = vsel %vm4501_vm4, %v5378_v3, %v4498_v47 }
 0x529   :  { %vm4504_vm5 = vcmp.eq.f32.partialorder %v4503_v30, 8.507059e+37  ;;  %v1859_v56 = vsub.f32 1.5, %v1858_v33  ;;  %5383 = vrcp.f32 %v9581_v22  ;;  %vm1862_vm6 = vweird.f32 %v9561_v44 }
 0x52a   :  { %v4507_v20 = vsel %vm4504_vm5, %v4506_v12, %v4502_v45  ;;  %v944_v0 = vmul.f32 0.0078125, %v880_v28  ;;  %v2159_v46 = vmul.f32 0.5, %v9415_v63  ;;  %v9590_v29 = vmin.f32 %v4551_v15, 16.0 }
 0x52b   :  { %v4508_v4 = vmul.f32 %v4507_v20, %v4483_v8  ;;  %v1860_v19 = vmul.f32 %v9561_v44, %v1859_v56  ;;  %v4522_v38 = vadd.f32 1.1283791, %v4521_v37  ;;  %vm1861_vm7 = vweird.f32 %v9537_v36 }
 0x52c   :  { %v9593_v21 = vpop.eup %5381  ;;  %v9596_v10 = vadd.f32 1e-06, %v1134_v17  ;;  %v1135_v7 = vmax.f32 %v1071_v61, 0.0  ;;  %v9599_v23 = vmul.f32 0.5, %v9484_v14  ;;  %v4553_v30 = vmul.f32 2.1237322e-06, %v9590_v29  ;;  %vm1863_vm8 = vmor %vm1861_vm7, %vm1862_vm6 }
 0x52d   :  { %v5121_v3 = vclamps-f32 %v4508_v4, 1.0  ;;  %v4564_v63 = vmul.f32 3.8918573e-05, %v9590_v29  ;;  %v1864_v55 = vsel %vm1863_vm8, %v9561_v44, %v1860_v19  ;;  %v1866_v42 = vmul.f32 %v9593_v21, %v9570_v52 }
 0x52e   :  { %vm1871_vm9 = vweird.f32 %v9570_v52  ;;  %5385 = vrsqrt.f32 %v9596_v10  ;;  %v1072_v36 = vsub.f32 %v944_v0, %v9472_v35  ;;  %v4554_v39 = vadd.f32 0.00028619796, %v4553_v30 }
 0x52f   :  { %v4847_v14 = vadd.f32 1.0, %v5121_v3  ;;  %v4565_v34 = vadd.f32 0.001143296, %v4564_v63  ;;  %v10178_v49 = vsub.f32 %v10176_v31, %v10177_v9  ;;  %v5384_v58 = vpop.eup %5383  ;;  %v4523_v32 = vmul.f32 %v4522_v38, %v9494_v40 }
 0x530   :  { %vm4539_vm10 = vweird.f32 %v9581_v22  ;;  %v1867_v44 = vmul.f32 %v9593_v21, %v1866_v42  ;;  %v9617_v41 = vadd.f32 1e-06, %v1135_v7  ;;  %v4535_v25 = vmul.f32 %v5384_v58, %v9581_v22 }
 0x531   :  { %v1964_v6 = vmul.f32 %v1864_v55, %v10178_v49  ;;  %v4911_v18 = vmul.f32 %v4847_v14, %v2159_v46  ;;  %v4543_v35 = vand.u32 2147483647, %v9581_v22  ;;  %v4555_v59 = vmul.f32 %v4554_v39, %v9590_v29 }
 0x532   :  { %v4566_v24 = vmul.f32 %v4565_v34, %v9590_v29  ;;  %v1868_v1 = vmul.f32 0.5, %v1867_v44  ;;  %5387 = vrsqrt.f32 %v9617_v41  ;;  %v4536_v40 = vsub.f32 1.0, %v4535_v25 }
 0x533   :  { %v2031_v51 = vmul.f32 %v9464_v54, %v1964_v6  ;;  %4975 = vst [vmem:[#allocation2 + $0x1c0] sm:$0xff] %v4911_v18  ;;  %v4545_v11 = vand.u32 2147483648, %v9581_v22  ;;  %v4556_v50 = vadd.f32 0.0036580483, %v4555_v59  ;;  %v1136_v26 = vmax.f32 %v1072_v36, 0.0 }
 0x534   :  { %v5386_v47 = vpop.eup %5385  ;;  %v4567_v12 = vadd.f32 0.014752088, %v4566_v24  ;;  %v1869_v33 = vsub.f32 1.5, %v1868_v1  ;;  %vm1872_vm11 = vweird.f32 %v9593_v21  ;;  %v4537_v28 = vmul.f32 %v5384_v58, %v4536_v40 }
 0x535   :  { %v9627_v37 = vadd.f32 %v9481_v48, %v2031_v51  ;;  %vm4540_vm12 = vweird.f32 %v5384_v58  ;;  %v4557_v15 = vmul.f32 %v4556_v50, %v9590_v29  ;;  %v1876_v17 = vmul.f32 %v5386_v47, %v9596_v10  ;;  %vm1873_vm14 = vmor %vm1871_vm9, %vm1872_vm11 }
 0x536   :  { %vm9632_vm13 = vcmp.eq.f32.partialorder %v4543_v35, 8.507059e+37  ;;  %v4568_v8 = vmul.f32 %v4567_v12, %v9590_v29  ;;  %v1870_v56 = vmul.f32 %v9593_v21, %v1869_v33  ;;  %v4538_v20 = vadd.f32 %v5384_v58, %v4537_v28  ;;  %vm4541_vm15 = vmor %vm4539_vm10, %vm4540_vm12 }
 0x537   :  { %v9638_v45 = vmul.f32 0.70710677, %v9627_v37  ;;  %v4546_v0 = vor.u32 1.1754944e-38, %v4545_v11  ;;  %v4558_v46 = vadd.f32 0.05243302, %v4557_v15  ;;  %v1877_v4 = vmul.f32 %v5386_v47, %v1876_v17 }
 0x538   :  { %v9643_v19 = vpop.eup %5387  ;;  %v4569_v38 = vadd.f32 0.112945676, %v4568_v8  ;;  %v1874_v3 = vsel %vm1873_vm14, %v9593_v21, %v1870_v56  ;;  %v9650_v30 = vadd.f32 1e-06, %v1136_v26  ;;  %v4542_v63 = vsel %vm4541_vm15, %v5384_v58, %v4538_v20 }
 0x539   :  { %v4591_v7 = vmul.f32 %v9638_v45, %v9638_v45  ;;  %v1965_v52 = vmul.f32 %v1874_v3, %v1197_v62  ;;  %v1878_v55 = vmul.f32 0.5, %v1877_v4  ;;  %vm1882_vm0 = vweird.f32 %v5386_v47 }
 0x53a   :  { %v4547_v42 = vsel %vm9632_vm13, %v4546_v0, %v4542_v63  ;;  %v4570_v22 = vmul.f32 %v4569_v38, %v9590_v29  ;;  %v1886_v14 = vmul.f32 %v9643_v19, %v9617_v41  ;;  %v4559_v39 = vmul.f32 %v4558_v46, %v9590_v29 }
 0x53b   :  { %v9658_v36 = vmin.f32 %v4591_v7, 16.0  ;;  %v4548_v21 = vmul.f32 %v4547_v42, %v4523_v32  ;;  %v2032_v34 = vmul.f32 %v9464_v54, %v1965_v52  ;;  %v1879_v31 = vsub.f32 1.5, %v1878_v55 }
 0x53c   :  { %v4571_v57 = vadd.f32 0.4994258, %v4570_v22  ;;  %v1887_v9 = vmul.f32 %v9643_v19, %v1886_v14  ;;  %vm1881_vm1 = vweird.f32 %v9596_v10  ;;  %5389 = vrsqrt.f32 %v9650_v30 }
 0x53d   :  { %v4593_v27 = vmul.f32 2.1237322e-06, %v9658_v36  ;;  %v4604_v62 = vmul.f32 3.8918573e-05, %v9658_v36  ;;  %v5122_v49 = vclamps-f32 %v4548_v21, 1.0  ;;  %v9668_v6 = vadd.f32 %v9481_v48, %v2032_v34  ;;  %vm1883_vm2 = vmor %vm1881_vm1, %vm1882_vm0 }
 0x53e   :  { %v1880_v58 = vmul.f32 %v5386_v47, %v1879_v31  ;;  %v4572_v32 = vmul.f32 %v4571_v57, %v9590_v29  ;;  %v4560_v35 = vadd.f32 0.18741608, %v4559_v39  ;;  %v1888_v24 = vmul.f32 0.5, %v1887_v9 }
 0x53f   :  { %v4594_v44 = vadd.f32 0.00028619796, %v4593_v27  ;;  %v4605_v18 = vadd.f32 0.001143296, %v4604_v62  ;;  %v4848_v25 = vadd.f32 1.0, %v5122_v49  ;;  %vm1892_vm3 = vweird.f32 %v9643_v19 }
 0x540   :  { %v9674_v59 = vmul.f32 0.70710677, %v9668_v6  ;;  %v9677_v51 = vadd.f32 1.0, %v4572_v32  ;;  %v1884_v40 = vsel %vm1883_vm2, %v5386_v47, %v1880_v58  ;;  %v1889_v47 = vsub.f32 1.5, %v1888_v24 }
 0x541   :  { %v4595_v1 = vmul.f32 %v4594_v44, %v9658_v36  ;;  %v4606_v10 = vmul.f32 %v4605_v18, %v9658_v36  ;;  %v4912_v11 = vmul.f32 %v4848_v25, %v9599_v23  ;;  %v1966_v26 = vmul.f32 %v1884_v40, %v1198_v16 }
 0x542   :  { %v4631_v50 = vmul.f32 %v9674_v59, %v9674_v59  ;;  %5391 = vrcp.f32 %v9677_v51  ;;  %v9691_v17 = vpop.eup %5389  ;;  %v4561_v23 = vmul.f32 %v4560_v35, %v9590_v29  ;;  %v1890_v56 = vmul.f32 %v9643_v19, %v1889_v47  ;;  %v10181_v29 = vld [vmem:[#allocation42_spill] sm:$0xff] }
 0x543   :  { %4976 = vst [vmem:[#allocation2 + $0x1c8] sm:$0xff] %v4912_v11  ;;  %v4596_v12 = vadd.f32 0.0036580483, %v4595_v1  ;;  %v4607_v33 = vadd.f32 0.014752088, %v4606_v10  ;;  %v2033_v15 = vmul.f32 %v9464_v54, %v1966_v26  ;;  %vm1891_vm4 = vweird.f32 %v9617_v41 }
 0x544   :  { %v9688_v28 = vmin.f32 %v4631_v50, 16.0  ;;  %v1199_v20 = vsub.f32 %v10181_v29, %v9140_v43  ;;  %vm1893_vm5 = vmor %vm1891_vm4, %vm1892_vm3  ;;  %v4562_v38 = vadd.f32 1.1283791, %v4561_v23  ;;  %v1896_v41 = vmul.f32 %v9691_v17, %v9650_v30 }
 0x545   :  { %v4597_v61 = vmul.f32 %v4596_v12, %v9658_v36  ;;  %v4608_v60 = vmul.f32 %v4607_v33, %v9658_v36  ;;  %v9700_v8 = vadd.f32 %v9481_v48, %v2033_v15  ;;  %v1894_v63 = vsel %vm1893_vm5, %v9643_v19, %v1890_v56 }
 0x546   :  { %v4633_v2 = vmul.f32 2.1237322e-06, %v9688_v28  ;;  %v4644_v16 = vmul.f32 3.8918573e-05, %v9688_v28  ;;  %v1967_v21 = vmul.f32 %v1894_v63, %v1199_v20  ;;  %v4583_v34 = vand.u32 2147483647, %v9677_v51 }
 0x547   :  { %v4609_v0 = vadd.f32 0.112945676, %v4608_v60  ;;  %v9707_v3 = vmul.f32 0.70710677, %v9700_v8  ;;  %v4598_v55 = vadd.f32 0.05243302, %v4597_v61  ;;  %v1897_v32 = vmul.f32 %v9691_v17, %v1896_v41 }
 0x548   :  { %v4634_v46 = vadd.f32 0.00028619796, %v4633_v2  ;;  %v5392_v4 = vpop.eup %5391  ;;  %v4645_v7 = vadd.f32 0.001143296, %v4644_v16  ;;  %v4585_v19 = vand.u32 2147483648, %v9677_v51  ;;  %v2034_v35 = vmul.f32 %v9464_v54, %v1967_v21  ;;  %v10182_v16 = vld [vmem:[#allocation45_spill] sm:$0xff] }
 0x549   :  { %v4575_v52 = vmul.f32 %v5392_v4, %v9677_v51  ;;  %v4610_v42 = vmul.f32 %v4609_v0, %v9658_v36  ;;  %v4671_v14 = vmul.f32 %v9707_v3, %v9707_v3  ;;  %vm4580_vm6 = vweird.f32 %v5392_v4 }
 0x54a   :  { %v4635_v43 = vmul.f32 %v4634_v46, %v9688_v28  ;;  %v4646_v22 = vmul.f32 %v4645_v7, %v9688_v28  ;;  %v4599_v49 = vmul.f32 %v4598_v55, %v9658_v36  ;;  %vm4579_vm7 = vweird.f32 %v9677_v51 }
 0x54b   :  { %v4576_v39 = vsub.f32 1.0, %v4575_v52  ;;  %v4611_v31 = vadd.f32 0.4994258, %v4610_v42  ;;  %v9720_v62 = vmin.f32 %v4671_v14, 16.0  ;;  %v4563_v40 = vmul.f32 %v4562_v38, %v9577_v53  ;;  %vm4581_vm8 = vmor %vm4579_vm7, %vm4580_vm6 }
 0x54c   :  { %v4636_v57 = vadd.f32 0.0036580483, %v4635_v43  ;;  %v4647_v27 = vadd.f32 0.014752088, %v4646_v22  ;;  %v4586_v11 = vor.u32 1.1754944e-38, %v4585_v19  ;;  %vm4584_vm9 = vcmp.eq.f32.partialorder %v4583_v34, 8.507059e+37 }
 0x54d   :  { %v4577_v9 = vmul.f32 %v5392_v4, %v4576_v39  ;;  %v4612_v58 = vmul.f32 %v4611_v31, %v9658_v36  ;;  %v4673_v25 = vmul.f32 2.1237322e-06, %v9720_v62  ;;  %v4684_v10 = vmul.f32 3.8918573e-05, %v9720_v62 }
 0x54e   :  { %v4637_v44 = vmul.f32 %v4636_v57, %v9688_v28  ;;  %v4648_v18 = vmul.f32 %v4647_v27, %v9688_v28  ;;  %v4600_v33 = vadd.f32 0.18741608, %v4599_v49  ;;  %v9737_v51 = vadd.f32 %v9481_v48, %v2034_v35 }
 0x54f   :  { %v4578_v24 = vadd.f32 %v5392_v4, %v4577_v9  ;;  %v9730_v1 = vadd.f32 1.0, %v4612_v58  ;;  %v4674_v26 = vadd.f32 0.00028619796, %v4673_v25  ;;  %v1898_v47 = vmul.f32 0.5, %v1897_v32 }
 0x550   :  { %v4649_v50 = vadd.f32 0.112945676, %v4648_v18  ;;  %v4638_v23 = vadd.f32 0.05243302, %v4637_v44  ;;  %v4685_v2 = vadd.f32 0.001143296, %v4684_v10  ;;  %v1200_v56 = vsub.f32 %v10182_v16, %v9351_v13 }
 0x551   :  { %v4582_v12 = vsel %vm4581_vm8, %v5392_v4, %v4578_v24  ;;  %5393 = vrcp.f32 %v9730_v1  ;;  %v4675_v53 = vmul.f32 %v4674_v26, %v9720_v62  ;;  %v4601_v20 = vmul.f32 %v4600_v33, %v9658_v36 }
 0x552   :  { %v4587_v15 = vsel %vm4584_vm9, %v4586_v11, %v4582_v12  ;;  %v4650_v60 = vmul.f32 %v4649_v50, %v9688_v28  ;;  %v4686_v46 = vmul.f32 %v4685_v2, %v9720_v62  ;;  %v2161_v4 = vmul.f32 0.5, %v9568_v5 }
 0x553   :  { %v4588_v61 = vmul.f32 %v4587_v15, %v4563_v40  ;;  %v4639_v38 = vmul.f32 %v4638_v23, %v9688_v28  ;;  %v9748_v7 = vmul.f32 0.70710677, %v9737_v51  ;;  %v1899_v63 = vsub.f32 1.5, %v1898_v47 }
 0x554   :  { %v4651_v0 = vadd.f32 0.4994258, %v4650_v60  ;;  %v4676_v41 = vadd.f32 0.0036580483, %v4675_v53  ;;  %v4687_v13 = vadd.f32 0.014752088, %v4686_v46  ;;  %vm1901_vm10 = vweird.f32 %v9650_v30 }
 0x555   :  { %v5123_v29 = vclamps-f32 %v4588_v61, 1.0  ;;  %v4711_v36 = vmul.f32 %v9748_v7, %v9748_v7  ;;  %vm1902_vm11 = vweird.f32 %v9691_v17  ;;  %v4602_v22 = vadd.f32 1.1283791, %v4601_v20 }
 0x556   :  { %v4652_v42 = vmul.f32 %v4651_v0, %v9688_v28  ;;  %v4688_v21 = vmul.f32 %v4687_v13, %v9720_v62  ;;  %v4623_v34 = vand.u32 2147483647, %v9730_v1  ;;  %v1900_v31 = vmul.f32 %v9691_v17, %v1899_v63  ;;  %vm1903_vm13 = vmor %vm1901_vm10, %vm1902_vm11 }
 0x557   :  { %v5394_v52 = vpop.eup %5393  ;;  %v4849_v55 = vadd.f32 1.0, %v5123_v29  ;;  %v9760_v19 = vmin.f32 %v4711_v36, 16.0  ;;  %v4625_v57 = vand.u32 2147483648, %v9730_v1  ;;  %v4640_v27 = vadd.f32 0.18741608, %v4639_v38 }
 0x558   :  { %v4615_v43 = vmul.f32 %v5394_v52, %v9730_v1  ;;  %v9756_v14 = vadd.f32 1.0, %v4652_v42  ;;  %v4677_v9 = vmul.f32 %v4676_v41, %v9720_v62  ;;  %vm4620_vm12 = vweird.f32 %v5394_v52 }
 0x559   :  { %v4913_v5 = vmul.f32 %v4849_v55, %v2161_v4  ;;  %v4689_v58 = vadd.f32 0.112945676, %v4688_v21  ;;  %v4713_v32 = vmul.f32 2.1237322e-06, %v9760_v19  ;;  %v4603_v44 = vmul.f32 %v4602_v22, %v9638_v45 }
 0x55a   :  { %v4616_v39 = vsub.f32 1.0, %v4615_v43  ;;  %5395 = vrcp.f32 %v9756_v14  ;;  %vm4619_vm14 = vweird.f32 %v9730_v1  ;;  %v4724_v18 = vmul.f32 3.8918573e-05, %v9760_v19 }
 0x55b   :  { %4977 = vst [vmem:[#allocation2 + $0x1d0] sm:$0xff] %v4913_v5  ;;  %v1904_v25 = vsel %vm1903_vm13, %v9691_v17, %v1900_v31  ;;  %vm4624_vm15 = vcmp.eq.f32.partialorder %v4623_v34, 8.507059e+37  ;;  %v4690_v24 = vmul.f32 %v4689_v58, %v9720_v62  ;;  %v4714_v10 = vadd.f32 0.00028619796, %v4713_v32  ;;  %vm4621_vm0 = vmor %vm4619_vm14, %vm4620_vm12 }
 0x55c   :  { %v4617_v49 = vmul.f32 %v5394_v52, %v4616_v39  ;;  %v4626_v40 = vor.u32 1.1754944e-38, %v4625_v57  ;;  %v4678_v11 = vadd.f32 0.05243302, %v4677_v9  ;;  %v4725_v50 = vadd.f32 0.001143296, %v4724_v18 }
 0x55d   :  { %v1968_v26 = vmul.f32 %v1904_v25, %v1200_v56  ;;  %v4641_v12 = vmul.f32 %v4640_v27, %v9688_v28  ;;  %v4691_v45 = vadd.f32 0.4994258, %v4690_v24  ;;  %v4715_v1 = vmul.f32 %v4714_v10, %v9760_v19 }
 0x55e   :  { %v4618_v35 = vadd.f32 %v5394_v52, %v4617_v49  ;;  %v4726_v17 = vmul.f32 %v4725_v50, %v9760_v19  ;;  %v2162_v47 = vmul.f32 0.5, %v9627_v37  ;;  %v4679_v53 = vmul.f32 %v4678_v11, %v9720_v62 }
 0x55f   :  { %v2035_v23 = vmul.f32 %v9464_v54, %v1968_v26  ;;  %v4692_v2 = vmul.f32 %v4691_v45, %v9720_v62  ;;  %v4642_v29 = vadd.f32 1.1283791, %v4641_v12  ;;  %v4716_v0 = vadd.f32 0.0036580483, %v4715_v1 }
 0x560   :  { %v4622_v30 = vsel %vm4621_vm0, %v5394_v52, %v4618_v35  ;;  %v5396_v33 = vpop.eup %5395  ;;  %v4727_v16 = vadd.f32 0.014752088, %v4726_v17  ;;  %v4663_v46 = vand.u32 2147483647, %v9756_v14  ;;  %v4665_v54 = vand.u32 2147483648, %v9756_v14 }
 0x561   :  { %v4627_v15 = vsel %vm4624_vm15, %v4626_v40, %v4622_v30  ;;  %v4655_v60 = vmul.f32 %v5396_v33, %v9756_v14  ;;  %v9785_v28 = vadd.f32 %v9481_v48, %v2035_v23  ;;  %v4693_v37 = vadd.f32 1.0, %v4692_v2 }
 0x562   :  { %v4628_v61 = vmul.f32 %v4627_v15, %v4603_v44  ;;  %v4728_v4 = vmul.f32 %v4727_v16, %v9760_v19  ;;  %vm4660_vm1 = vweird.f32 %v5396_v33  ;;  %vm4659_vm2 = vweird.f32 %v9756_v14 }
 0x563   :  { %v4656_v20 = vsub.f32 1.0, %v4655_v60  ;;  %v9791_v52 = vmul.f32 0.70710677, %v9785_v28  ;;  %v4680_v48 = vadd.f32 0.18741608, %v4679_v53  ;;  %5397 = vrcp.f32 %v4693_v37  ;;  %vm4661_vm3 = vmor %vm4659_vm2, %vm4660_vm1 }
 0x564   :  { %v5124_v56 = vclamps-f32 %v4628_v61, 1.0  ;;  %v4717_v41 = vmul.f32 %v4716_v0, %v9760_v19  ;;  %v4729_v13 = vadd.f32 0.112945676, %v4728_v4  ;;  %v4666_v43 = vor.u32 1.1754944e-38, %v4665_v54 }
 0x565   :  { %v4657_v63 = vmul.f32 %v5396_v33, %v4656_v20  ;;  %v4751_v36 = vmul.f32 %v9791_v52, %v9791_v52  ;;  %v4643_v5 = vmul.f32 %v4642_v29, %v9674_v59  ;;  %vm4664_vm4 = vcmp.eq.f32.partialorder %v4663_v46, 8.507059e+37 }
 0x566   :  { %v4850_v38 = vadd.f32 1.0, %v5124_v56  ;;  %v4730_v21 = vmul.f32 %v4729_v13, %v9760_v19  ;;  %v4681_v31 = vmul.f32 %v4680_v48, %v9720_v62  ;;  %v4718_v57 = vadd.f32 0.05243302, %v4717_v41 }
 0x567   :  { %v4658_v42 = vadd.f32 %v5396_v33, %v4657_v63  ;;  %v9799_v39 = vmin.f32 %v4751_v36, 16.0  ;;  %v2163_v59 = vmul.f32 0.5, %v9668_v6  ;;  %v4703_v11 = vand.u32 2147483647, %v4693_v37 }
 0x568   :  { %v4914_v55 = vmul.f32 %v4850_v38, %v2162_v47  ;;  %v4731_v27 = vadd.f32 0.4994258, %v4730_v21  ;;  %v4682_v10 = vadd.f32 1.1283791, %v4681_v31  ;;  %v4719_v62 = vmul.f32 %v4718_v57, %v9760_v19 }
 0x569   :  { %v4662_v22 = vsel %vm4661_vm3, %v5396_v33, %v4658_v42  ;;  %v5398_v9 = vpop.eup %5397  ;;  %v4753_v49 = vmul.f32 2.1237322e-06, %v9799_v39  ;;  %v4764_v58 = vmul.f32 3.8918573e-05, %v9799_v39  ;;  %v4705_v50 = vand.u32 2147483648, %v4693_v37 }
 0x56a   :  { %4978 = vst [vmem:[#allocation2 + $0x1d8] sm:$0xff] %v4914_v55  ;;  %v4667_v14 = vsel %vm4664_vm4, %v4666_v43, %v4662_v22  ;;  %v4695_v44 = vmul.f32 %v5398_v9, %v4693_v37  ;;  %v4732_v18 = vmul.f32 %v4731_v27, %v9760_v19  ;;  %vm4700_vm5 = vweird.f32 %v5398_v9 }
 0x56b   :  { %v4668_v34 = vmul.f32 %v4667_v14, %v4643_v5  ;;  %v4754_v25 = vadd.f32 0.00028619796, %v4753_v49  ;;  %v4765_v35 = vadd.f32 0.001143296, %v4764_v58  ;;  %vm4699_vm6 = vweird.f32 %v4693_v37 }
 0x56c   :  { %v4696_v40 = vsub.f32 1.0, %v4695_v44  ;;  %v4733_v26 = vadd.f32 1.0, %v4732_v18  ;;  %v4720_v33 = vadd.f32 0.18741608, %v4719_v62  ;;  %v4683_v17 = vmul.f32 %v4682_v10, %v9707_v3  ;;  %vm4701_vm7 = vmor %vm4699_vm6, %vm4700_vm5 }
 0x56d   :  { %v5125_v32 = vclamps-f32 %v4668_v34, 1.0  ;;  %v4766_v30 = vmul.f32 %v4765_v35, %v9799_v39  ;;  %v4755_v1 = vmul.f32 %v4754_v25, %v9799_v39  ;;  %v4706_v23 = vor.u32 1.1754944e-38, %v4705_v50 }
 0x56e   :  { %v4697_v45 = vmul.f32 %v5398_v9, %v4696_v40  ;;  %5399 = vrcp.f32 %v4733_v26  ;;  %vm4704_vm8 = vcmp.eq.f32.partialorder %v4703_v11, 8.507059e+37  ;;  %v4721_v16 = vmul.f32 %v4720_v33, %v9760_v19 }
 0x56f   :  { %v4851_v24 = vadd.f32 1.0, %v5125_v32  ;;  %v4767_v15 = vadd.f32 0.014752088, %v4766_v30  ;;  %v4756_v61 = vadd.f32 0.0036580483, %v4755_v1  ;;  %v2164_v3 = vmul.f32 0.5, %v9700_v8 }
 0x570   :  { %v4698_v6 = vadd.f32 %v5398_v9, %v4697_v45  ;;  %v4722_v4 = vadd.f32 1.1283791, %v4721_v16  ;;  %v4743_v63 = vand.u32 2147483647, %v4733_v26  ;;  %v4745_v48 = vand.u32 2147483648, %v4733_v26 }
 0x571   :  { %v4915_v12 = vmul.f32 %v4851_v24, %v2163_v59  ;;  %v4768_v60 = vmul.f32 %v4767_v15, %v9799_v39  ;;  %v4757_v46 = vmul.f32 %v4756_v61, %v9799_v39  ;;  %vm4739_vm10 = vweird.f32 %v4733_v26 }
 0x572   :  { %v4702_v47 = vsel %vm4701_vm7, %v5398_v9, %v4698_v6  ;;  %v4746_v36 = vor.u32 1.1754944e-38, %v4745_v48  ;;  %v4723_v8 = vmul.f32 %v4722_v4, %v9748_v7  ;;  %vm4744_vm12 = vcmp.eq.f32.partialorder %v4743_v63, 8.507059e+37 }
 0x573   :  { %4979 = vst [vmem:[#allocation2 + $0x1e0] sm:$0xff] %v4915_v12  ;;  %v4707_v53 = vsel %vm4704_vm8, %v4706_v23, %v4702_v47  ;;  %v4769_v56 = vadd.f32 0.112945676, %v4768_v60  ;;  %v4758_v19 = vadd.f32 0.05243302, %v4757_v46  ;;  %v2165_v27 = vmul.f32 0.5, %v9737_v51 }
 0x574   :  { %v4708_v2 = vmul.f32 %v4707_v53, %v4683_v17  ;;  %v5400_v29 = vpop.eup %5399 }
 0x575   :  { %v4735_v0 = vmul.f32 %v5400_v29, %v4733_v26  ;;  %v4770_v54 = vmul.f32 %v4769_v56, %v9799_v39  ;;  %vm4740_vm9 = vweird.f32 %v5400_v29  ;;  %v4759_v21 = vmul.f32 %v4758_v19, %v9799_v39 }
 0x576   :  { %v5126_v20 = vclamps-f32 %v4708_v2, 1.0  ;;  %vm4741_vm11 = vmor %vm4739_vm10, %vm4740_vm9 }
 0x577   :  { %v4736_v38 = vsub.f32 1.0, %v4735_v0  ;;  %v4771_v55 = vadd.f32 0.4994258, %v4770_v54  ;;  %v4760_v57 = vadd.f32 0.18741608, %v4759_v21 }
 0x578   :  { %v4852_v37 = vadd.f32 1.0, %v5126_v20 }
 0x579   :  { %v4737_v41 = vmul.f32 %v5400_v29, %v4736_v38  ;;  %v4772_v13 = vmul.f32 %v4771_v55, %v9799_v39  ;;  %v4761_v32 = vmul.f32 %v4760_v57, %v9799_v39  ;;  %v2166_v39 = vmul.f32 0.5, %v9785_v28 }
 0x57a   :  { %v4916_v42 = vmul.f32 %v4852_v37, %v2164_v3 }
 0x57b   :  { %v4738_v43 = vadd.f32 %v5400_v29, %v4737_v41  ;;  %v4773_v5 = vadd.f32 1.0, %v4772_v13  ;;  %v4762_v18 = vadd.f32 1.1283791, %v4761_v32 }
 0x57c   :  { %4980 = vst [vmem:[#allocation2 + $0x1e8] sm:$0xff] %v4916_v42 }
 0x57d   :  { %v4742_v22 = vsel %vm4741_vm11, %v5400_v29, %v4738_v43  ;;  %5401 = vrcp.f32 %v4773_v5  ;;  %v4785_v7 = vand.u32 2147483648, %v4773_v5  ;;  %v4783_v35 = vand.u32 2147483647, %v4773_v5 }
 0x57e   :  { %v4747_v14 = vsel %vm4744_vm12, %v4746_v36, %v4742_v22  ;;  %vm4779_vm14 = vweird.f32 %v4773_v5  ;;  %v4763_v40 = vmul.f32 %v4762_v18, %v9791_v52 }
 0x57f   :  { %v4748_v34 = vmul.f32 %v4747_v14, %v4723_v8  ;;  %v4786_v10 = vor.u32 1.1754944e-38, %v4785_v7  ;;  %vm4784_vm0 = vcmp.eq.f32.partialorder %v4783_v35, 8.507059e+37 }
 0x581   :  { %v5127_v31 = vclamps-f32 %v4748_v34, 1.0 }
 0x583   :  { %v4853_v9 = vadd.f32 1.0, %v5127_v31  ;;  %v5402_v49 = vpop.eup %5401 }
 0x584   :  { %v4775_v44 = vmul.f32 %v5402_v49, %v4773_v5  ;;  %vm4780_vm13 = vweird.f32 %v5402_v49 }
 0x585   :  { %v4917_v58 = vmul.f32 %v4853_v9, %v2165_v27  ;;  %vm4781_vm15 = vmor %vm4779_vm14, %vm4780_vm13 }
 0x586   :  { %v4776_v59 = vsub.f32 1.0, %v4775_v44 }
 0x587   :  { %4981 = vst [vmem:[#allocation2 + $0x1f0] sm:$0xff] %v4917_v58 }
 0x588   :  { %v4777_v25 = vmul.f32 %v5402_v49, %v4776_v59 }
 0x58a   :  { %v4778_v24 = vadd.f32 %v5402_v49, %v4777_v25 }
 0x58c   :  { %v4782_v51 = vsel %vm4781_vm15, %v5402_v49, %v4778_v24 }
 0x58d   :  { %v4787_v62 = vsel %vm4784_vm0, %v4786_v10, %v4782_v51 }
 0x58e   :  { %v4788_v11 = vmul.f32 %v4787_v62, %v4763_v40 }
 0x590   :  { %v5128_v50 = vclamps-f32 %v4788_v11, 1.0 }
 0x592   :  { %v4854_v26 = vadd.f32 1.0, %v5128_v50 }
 0x594   :  { %v4918_v30 = vmul.f32 %v4854_v26, %v2166_v39 }
 0x596   :  { %4982 = vst [vmem:[#allocation2 + $0x1f8] sm:$0xff] %v4918_v30 }
 0x597   :  { %4995 = dma.vmem_to_hbm [thread:$0]  %s4988_s7, 8192, %s4990_s9, [#allocation3], %s5446_s10, %s5446_s10, %s5447_s2  }
 0x598   :  { %5443 = dma.done.wait [#allocation3], 8192  }
 0x599   :  { %5444 = vsyncadd [#allocation3], 4294959104 }
 0x59a   :  { %5000 = vsyncpa [#allocation3], 1 }

</bundles_post_ra>
